<compile_context>
chip_gen: v7x
topology: tpu7x:2x2x1
jax: 0.10.0
libtpu: 0.0.40
codegen_flags: <defaults>
</compile_context>

<pallas_src>
import jax
import jax.numpy as jnp
from jax.experimental import pallas as pl
from jax.experimental.pallas import tpu as pltpu

ENC_DIMS = [64, 128, 256, 512, 1024]   # Linear+ReLU x3, Linear
DEC_DIMS = [1024, 512, 256, 128, 64]   # Linear+ReLU x3, Linear+Sigmoid


def _cdiv(a, b):
    return -(-a // b)


def _round_up(x, m):
    return ((x + m - 1) // m) * m


def dae_kernel(x_ref,
               ew0, eb0, ew1, eb1, ew2, eb2, ew3, eb3,
               dw0, db0, dw1, db1, dw2, db2, dw3, db3,
               z_ref, out_ref):
    """Fused forward for one batch tile: encoder then decoder.
    bf16 MXU inputs, f32 accumulation, bias add + activations in f32."""

    def linear(h_bf16, w_ref, b_ref):
        acc = jnp.dot(h_bf16, w_ref[...], preferred_element_type=jnp.float32)
        return acc + b_ref[...]

    h = x_ref[...]                                              # already bf16

    # ----- encoder -----
    h = jnp.maximum(linear(h, ew0, eb0), 0.0).astype(jnp.bfloat16)
    h = jnp.maximum(linear(h, ew1, eb1), 0.0).astype(jnp.bfloat16)
    h = jnp.maximum(linear(h, ew2, eb2), 0.0).astype(jnp.bfloat16)
    z_bf16 = linear(h, ew3, eb3).astype(jnp.bfloat16)           # f32 acc -> bf16 once
    z_ref[...] = z_bf16

    # ----- decoder -----
    h = jnp.maximum(linear(z_bf16, dw0, db0), 0.0).astype(jnp.bfloat16)
    h = jnp.maximum(linear(h, dw1, db1), 0.0).astype(jnp.bfloat16)
    h = jnp.maximum(linear(h, dw2, db2), 0.0).astype(jnp.bfloat16)
    logits = linear(h, dw3, db3)                                # f32
    out_ref[...] = jax.nn.sigmoid(logits).astype(out_ref.dtype)


def init_params(key):
    """PyTorch-style Linear init U(-1/sqrt(fan_in), 1/sqrt(fan_in)).
    Weights stored bf16 (in, out) layout; biases f32 (1, out)."""
    params = []
    for dims in (ENC_DIMS, DEC_DIMS):
        layers = []
        for fan_in, fan_out in zip(dims[:-1], dims[1:]):
            key, kw, kb = jax.random.split(key, 3)
            bound = 1.0 / (fan_in ** 0.5)
            w = jax.random.uniform(kw, (fan_in, fan_out), jnp.float32, -bound, bound)
            b = jax.random.uniform(kb, (1, fan_out), jnp.float32, -bound, bound)
            layers.append((w.astype(jnp.bfloat16), b))
        params.append(layers)
    return params


def dae_forward(x, params, tm=1024, vmem_limit_bytes=48 << 20):
    """Batch-tiled fused forward.  Returns (z, out): (B,1024) bf16, (B,64) f32."""
    B, d_in = x.shape
    enc, dec = params

    x = x.astype(jnp.bfloat16)                       # halve input DMA

    # Tile the batch: few, large tiles; minimal padding; >=2 tiles for v7x
    # megacore whenever the batch is big enough to split usefully.
    n_tiles = _cdiv(B, tm)
    if n_tiles == 1 and B > 8:
        n_tiles = 2
    TM = _round_up(_cdiv(B, n_tiles), 8)
    padded_B = n_tiles * TM
    if padded_B != B:
        x = jnp.pad(x, ((0, padded_B - B), (0, 0)))

    flat_args = [x] + [a for (w, b) in enc + dec for a in (w, b)]

    def const_spec(arr, single_buffer):
        nd = arr.ndim
        idx = lambda i, _nd=nd: (0,) * _nd           # same block every step
        if single_buffer:
            return pl.BlockSpec(arr.shape, idx, pipeline_mode=pl.Buffered(1))
        return pl.BlockSpec(arr.shape, idx)

    def build_call(single_buffer):
        in_specs = [pl.BlockSpec((TM, d_in), lambda i: (i, 0))]
        in_specs += [const_spec(a, single_buffer) for a in flat_args[1:]]
        out_specs = (pl.BlockSpec((TM, ENC_DIMS[-1]), lambda i: (i, 0)),
                     pl.BlockSpec((TM, DEC_DIMS[-1]), lambda i: (i, 0)))
        out_shape = (jax.ShapeDtypeStruct((padded_B, ENC_DIMS[-1]), jnp.bfloat16),
                     jax.ShapeDtypeStruct((padded_B, DEC_DIMS[-1]), jnp.float32))
        return pl.pallas_call(
            dae_kernel,
            grid=(n_tiles,),
            in_specs=in_specs,
            out_specs=out_specs,
            out_shape=out_shape,
            compiler_params=pltpu.CompilerParams(
                dimension_semantics=("parallel",),   # shard batch tiles over TCs
                vmem_limit_bytes=vmem_limit_bytes,
            ),
        )

    try:
        z, out = build_call(single_buffer=True)(*flat_args)
    except Exception:
        # Fallback for JAX builds that reject Buffered(1) on pallas_call specs.
        z, out = build_call(single_buffer=False)(*flat_args)
    return z[:B], out[:B]


def dae_reference(x, params):
    """Pure-JAX reference with matching numerics (bf16 MXU inputs, f32 acc)."""
    enc, dec = params

    def run(h, layers):
        for i, (w, b) in enumerate(layers):
            h = jnp.dot(h.astype(jnp.bfloat16), w,
                        preferred_element_type=jnp.float32) + b
            if i < len(layers) - 1:
                h = jnp.maximum(h, 0.0)
        return h

    z = run(x, enc).astype(jnp.bfloat16)
    logits = run(z, dec)
    return z, jax.nn.sigmoid(logits)


def _check(x, params):
    z, out = dae_forward(x, params)
    jax.block_until_ready((z, out))
    z_ref, out_ref = dae_reference(x, params)
    B = x.shape[0]
    assert z.shape == (B, 1024) and out.shape == (B, 64)
    assert jnp.allclose(z.astype(jnp.float32), z_ref.astype(jnp.float32),
                        atol=2e-2, rtol=2e-2)
    assert jnp.allclose(out, out_ref, atol=5e-3, rtol=5e-3)
    assert bool(jnp.all((out >= 0.0) & (out <= 1.0)))


if __name__ == "__main__":
    key = jax.random.PRNGKey(0)
    key, kx1, kx2 = jax.random.split(key, 3)
    params = init_params(key)

    # Small demo batch (single tile).
    _check(jax.random.normal(kx1, (8, 64), dtype=jnp.float32), params)
    # Medium batch: exercises padding + the 2-tile (megacore) path.
    _check(jax.random.normal(kx2, (200, 64), dtype=jnp.float32), params)

    print("KERNEL_OK")
</pallas_src>

<mosaic_0001>
module attributes {stable_mosaic.version = 11 : i64} {
  func.func @dae_kernel(%arg0: i32, %arg1: memref<8x64xbf16, #tpu.memory_space<vmem>>, %arg2: memref<64x128xbf16, #tpu.memory_space<vmem>>, %arg3: memref<1x128xf32, #tpu.memory_space<vmem>>, %arg4: memref<128x256xbf16, #tpu.memory_space<vmem>>, %arg5: memref<1x256xf32, #tpu.memory_space<vmem>>, %arg6: memref<256x512xbf16, #tpu.memory_space<vmem>>, %arg7: memref<1x512xf32, #tpu.memory_space<vmem>>, %arg8: memref<512x1024xbf16, #tpu.memory_space<vmem>>, %arg9: memref<1x1024xf32, #tpu.memory_space<vmem>>, %arg10: memref<1024x512xbf16, #tpu.memory_space<vmem>>, %arg11: memref<1x512xf32, #tpu.memory_space<vmem>>, %arg12: memref<512x256xbf16, #tpu.memory_space<vmem>>, %arg13: memref<1x256xf32, #tpu.memory_space<vmem>>, %arg14: memref<256x128xbf16, #tpu.memory_space<vmem>>, %arg15: memref<1x128xf32, #tpu.memory_space<vmem>>, %arg16: memref<128x64xbf16, #tpu.memory_space<vmem>>, %arg17: memref<1x64xf32, #tpu.memory_space<vmem>>, %arg18: memref<8x1024xbf16, #tpu.memory_space<vmem>>, %arg19: memref<8x64xf32, #tpu.memory_space<vmem>>) attributes {dimension_semantics = [#tpu.dimension_semantics<parallel>], iteration_bounds = array<i64: 1>, scalar_prefetch = 0 : i64, scratch_operands = 0 : i64, tpu.core_type = #tpu.core_type<tc>, window_params = [{transform_indices = @transform_0, window_bounds = array<i64: 8, 64>}, {pipeline_mode = #tpu.pipeline_mode<synchronous>, transform_indices = @transform_1, window_bounds = array<i64: 64, 128>}, {pipeline_mode = #tpu.pipeline_mode<synchronous>, transform_indices = @transform_2, window_bounds = array<i64: 1, 128>}, {pipeline_mode = #tpu.pipeline_mode<synchronous>, transform_indices = @transform_3, window_bounds = array<i64: 128, 256>}, {pipeline_mode = #tpu.pipeline_mode<synchronous>, transform_indices = @transform_4, window_bounds = array<i64: 1, 256>}, {pipeline_mode = #tpu.pipeline_mode<synchronous>, transform_indices = @transform_5, window_bounds = array<i64: 256, 512>}, {pipeline_mode = #tpu.pipeline_mode<synchronous>, transform_indices = @transform_6, window_bounds = array<i64: 1, 512>}, {pipeline_mode = #tpu.pipeline_mode<synchronous>, transform_indices = @transform_7, window_bounds = array<i64: 512, 1024>}, {pipeline_mode = #tpu.pipeline_mode<synchronous>, transform_indices = @transform_8, window_bounds = array<i64: 1, 1024>}, {pipeline_mode = #tpu.pipeline_mode<synchronous>, transform_indices = @transform_9, window_bounds = array<i64: 1024, 512>}, {pipeline_mode = #tpu.pipeline_mode<synchronous>, transform_indices = @transform_10, window_bounds = array<i64: 1, 512>}, {pipeline_mode = #tpu.pipeline_mode<synchronous>, transform_indices = @transform_11, window_bounds = array<i64: 512, 256>}, {pipeline_mode = #tpu.pipeline_mode<synchronous>, transform_indices = @transform_12, window_bounds = array<i64: 1, 256>}, {pipeline_mode = #tpu.pipeline_mode<synchronous>, transform_indices = @transform_13, window_bounds = array<i64: 256, 128>}, {pipeline_mode = #tpu.pipeline_mode<synchronous>, transform_indices = @transform_14, window_bounds = array<i64: 1, 128>}, {pipeline_mode = #tpu.pipeline_mode<synchronous>, transform_indices = @transform_15, window_bounds = array<i64: 128, 64>}, {pipeline_mode = #tpu.pipeline_mode<synchronous>, transform_indices = @transform_16, window_bounds = array<i64: 1, 64>}, {transform_indices = @transform_17, window_bounds = array<i64: 8, 1024>}, {transform_indices = @transform_18, window_bounds = array<i64: 8, 64>}]} {
    %c0 = arith.constant 0 : index
    %c0_0 = arith.constant 0 : index
    %0 = vector.load %arg1[%c0, %c0_0] : memref<8x64xbf16, #tpu.memory_space<vmem>>, vector<8x64xbf16>
    %c0_1 = arith.constant 0 : index
    %c0_2 = arith.constant 0 : index
    %1 = vector.load %arg2[%c0_1, %c0_2] : memref<64x128xbf16, #tpu.memory_space<vmem>>, vector<64x128xbf16>
    %cst = arith.constant dense<0.000000e+00> : vector<8x128xf32>
    %2 = tpu.matmul %0, %1, %cst {dimension_numbers = #tpu.dot_dimension_numbers<[1], [0], [0], [1], [0, 0, 1, 1], [], []>} : vector<8x64xbf16>, vector<64x128xbf16>, vector<8x128xf32> -> vector<8x128xf32>
    %c0_3 = arith.constant 0 : index
    %c0_4 = arith.constant 0 : index
    %3 = vector.load %arg3[%c0_3, %c0_4] : memref<1x128xf32, #tpu.memory_space<vmem>>, vector<1x128xf32>
    %4 = vector.broadcast %3 : vector<1x128xf32> to vector<8x128xf32>
    %5 = arith.addf %2, %4 : vector<8x128xf32>
    %cst_5 = arith.constant 0.000000e+00 : f32
    %6 = vector.broadcast %cst_5 : f32 to vector<8x128xf32>
    %7 = arith.maximumf %5, %6 : vector<8x128xf32>
    %8 = arith.truncf %7 : vector<8x128xf32> to vector<8x128xbf16>
    %c0_6 = arith.constant 0 : index
    %c0_7 = arith.constant 0 : index
    %9 = vector.load %arg4[%c0_6, %c0_7] : memref<128x256xbf16, #tpu.memory_space<vmem>>, vector<128x256xbf16>
    %cst_8 = arith.constant dense<0.000000e+00> : vector<8x256xf32>
    %10 = tpu.matmul %8, %9, %cst_8 {dimension_numbers = #tpu.dot_dimension_numbers<[1], [0], [0], [1], [0, 0, 1, 1], [], []>} : vector<8x128xbf16>, vector<128x256xbf16>, vector<8x256xf32> -> vector<8x256xf32>
    %c0_9 = arith.constant 0 : index
    %c0_10 = arith.constant 0 : index
    %11 = vector.load %arg5[%c0_9, %c0_10] : memref<1x256xf32, #tpu.memory_space<vmem>>, vector<1x256xf32>
    %12 = vector.broadcast %11 : vector<1x256xf32> to vector<8x256xf32>
    %13 = arith.addf %10, %12 : vector<8x256xf32>
    %cst_11 = arith.constant 0.000000e+00 : f32
    %14 = vector.broadcast %cst_11 : f32 to vector<8x256xf32>
    %15 = arith.maximumf %13, %14 : vector<8x256xf32>
    %16 = arith.truncf %15 : vector<8x256xf32> to vector<8x256xbf16>
    %c0_12 = arith.constant 0 : index
    %c0_13 = arith.constant 0 : index
    %17 = vector.load %arg6[%c0_12, %c0_13] : memref<256x512xbf16, #tpu.memory_space<vmem>>, vector<256x512xbf16>
    %cst_14 = arith.constant dense<0.000000e+00> : vector<8x512xf32>
    %18 = tpu.matmul %16, %17, %cst_14 {dimension_numbers = #tpu.dot_dimension_numbers<[1], [0], [0], [1], [0, 0, 1, 1], [], []>} : vector<8x256xbf16>, vector<256x512xbf16>, vector<8x512xf32> -> vector<8x512xf32>
    %c0_15 = arith.constant 0 : index
    %c0_16 = arith.constant 0 : index
    %19 = vector.load %arg7[%c0_15, %c0_16] : memref<1x512xf32, #tpu.memory_space<vmem>>, vector<1x512xf32>
    %20 = vector.broadcast %19 : vector<1x512xf32> to vector<8x512xf32>
    %21 = arith.addf %18, %20 : vector<8x512xf32>
    %cst_17 = arith.constant 0.000000e+00 : f32
    %22 = vector.broadcast %cst_17 : f32 to vector<8x512xf32>
    %23 = arith.maximumf %21, %22 : vector<8x512xf32>
    %24 = arith.truncf %23 : vector<8x512xf32> to vector<8x512xbf16>
    %c0_18 = arith.constant 0 : index
    %c0_19 = arith.constant 0 : index
    %25 = vector.load %arg8[%c0_18, %c0_19] : memref<512x1024xbf16, #tpu.memory_space<vmem>>, vector<512x1024xbf16>
    %cst_20 = arith.constant dense<0.000000e+00> : vector<8x1024xf32>
    %26 = tpu.matmul %24, %25, %cst_20 {dimension_numbers = #tpu.dot_dimension_numbers<[1], [0], [0], [1], [0, 0, 1, 1], [], []>} : vector<8x512xbf16>, vector<512x1024xbf16>, vector<8x1024xf32> -> vector<8x1024xf32>
    %c0_21 = arith.constant 0 : index
    %c0_22 = arith.constant 0 : index
    %27 = vector.load %arg9[%c0_21, %c0_22] : memref<1x1024xf32, #tpu.memory_space<vmem>>, vector<1x1024xf32>
    %28 = vector.broadcast %27 : vector<1x1024xf32> to vector<8x1024xf32>
    %29 = arith.addf %26, %28 : vector<8x1024xf32>
    %30 = arith.truncf %29 : vector<8x1024xf32> to vector<8x1024xbf16>
    %c0_23 = arith.constant 0 : index
    %c0_24 = arith.constant 0 : index
    %31 = vector.load %arg18[%c0_23, %c0_24] : memref<8x1024xbf16, #tpu.memory_space<vmem>>, vector<8x1024xbf16>
    tpu.vector_store %arg18[%c0_23, %c0_24], %30 {strides = array<i32>} : memref<8x1024xbf16, #tpu.memory_space<vmem>>, vector<8x1024xbf16>,
    %c0_25 = arith.constant 0 : index
    %c0_26 = arith.constant 0 : index
    %32 = vector.load %arg10[%c0_25, %c0_26] : memref<1024x512xbf16, #tpu.memory_space<vmem>>, vector<1024x512xbf16>
    %cst_27 = arith.constant dense<0.000000e+00> : vector<8x512xf32>
    %33 = tpu.matmul %30, %32, %cst_27 {dimension_numbers = #tpu.dot_dimension_numbers<[1], [0], [0], [1], [0, 0, 1, 1], [], []>} : vector<8x1024xbf16>, vector<1024x512xbf16>, vector<8x512xf32> -> vector<8x512xf32>
    %c0_28 = arith.constant 0 : index
    %c0_29 = arith.constant 0 : index
    %34 = vector.load %arg11[%c0_28, %c0_29] : memref<1x512xf32, #tpu.memory_space<vmem>>, vector<1x512xf32>
    %35 = vector.broadcast %34 : vector<1x512xf32> to vector<8x512xf32>
    %36 = arith.addf %33, %35 : vector<8x512xf32>
    %cst_30 = arith.constant 0.000000e+00 : f32
    %37 = vector.broadcast %cst_30 : f32 to vector<8x512xf32>
    %38 = arith.maximumf %36, %37 : vector<8x512xf32>
    %39 = arith.truncf %38 : vector<8x512xf32> to vector<8x512xbf16>
    %c0_31 = arith.constant 0 : index
    %c0_32 = arith.constant 0 : index
    %40 = vector.load %arg12[%c0_31, %c0_32] : memref<512x256xbf16, #tpu.memory_space<vmem>>, vector<512x256xbf16>
    %cst_33 = arith.constant dense<0.000000e+00> : vector<8x256xf32>
    %41 = tpu.matmul %39, %40, %cst_33 {dimension_numbers = #tpu.dot_dimension_numbers<[1], [0], [0], [1], [0, 0, 1, 1], [], []>} : vector<8x512xbf16>, vector<512x256xbf16>, vector<8x256xf32> -> vector<8x256xf32>
    %c0_34 = arith.constant 0 : index
    %c0_35 = arith.constant 0 : index
    %42 = vector.load %arg13[%c0_34, %c0_35] : memref<1x256xf32, #tpu.memory_space<vmem>>, vector<1x256xf32>
    %43 = vector.broadcast %42 : vector<1x256xf32> to vector<8x256xf32>
    %44 = arith.addf %41, %43 : vector<8x256xf32>
    %cst_36 = arith.constant 0.000000e+00 : f32
    %45 = vector.broadcast %cst_36 : f32 to vector<8x256xf32>
    %46 = arith.maximumf %44, %45 : vector<8x256xf32>
    %47 = arith.truncf %46 : vector<8x256xf32> to vector<8x256xbf16>
    %c0_37 = arith.constant 0 : index
    %c0_38 = arith.constant 0 : index
    %48 = vector.load %arg14[%c0_37, %c0_38] : memref<256x128xbf16, #tpu.memory_space<vmem>>, vector<256x128xbf16>
    %cst_39 = arith.constant dense<0.000000e+00> : vector<8x128xf32>
    %49 = tpu.matmul %47, %48, %cst_39 {dimension_numbers = #tpu.dot_dimension_numbers<[1], [0], [0], [1], [0, 0, 1, 1], [], []>} : vector<8x256xbf16>, vector<256x128xbf16>, vector<8x128xf32> -> vector<8x128xf32>
    %c0_40 = arith.constant 0 : index
    %c0_41 = arith.constant 0 : index
    %50 = vector.load %arg15[%c0_40, %c0_41] : memref<1x128xf32, #tpu.memory_space<vmem>>, vector<1x128xf32>
    %51 = vector.broadcast %50 : vector<1x128xf32> to vector<8x128xf32>
    %52 = arith.addf %49, %51 : vector<8x128xf32>
    %cst_42 = arith.constant 0.000000e+00 : f32
    %53 = vector.broadcast %cst_42 : f32 to vector<8x128xf32>
    %54 = arith.maximumf %52, %53 : vector<8x128xf32>
    %55 = arith.truncf %54 : vector<8x128xf32> to vector<8x128xbf16>
    %c0_43 = arith.constant 0 : index
    %c0_44 = arith.constant 0 : index
    %56 = vector.load %arg16[%c0_43, %c0_44] : memref<128x64xbf16, #tpu.memory_space<vmem>>, vector<128x64xbf16>
    %cst_45 = arith.constant dense<0.000000e+00> : vector<8x64xf32>
    %57 = tpu.matmul %55, %56, %cst_45 {dimension_numbers = #tpu.dot_dimension_numbers<[1], [0], [0], [1], [0, 0, 1, 1], [], []>} : vector<8x128xbf16>, vector<128x64xbf16>, vector<8x64xf32> -> vector<8x64xf32>
    %c0_46 = arith.constant 0 : index
    %c0_47 = arith.constant 0 : index
    %58 = vector.load %arg17[%c0_46, %c0_47] : memref<1x64xf32, #tpu.memory_space<vmem>>, vector<1x64xf32>
    %59 = vector.broadcast %58 : vector<1x64xf32> to vector<8x64xf32>
    %60 = arith.addf %57, %59 : vector<8x64xf32>
    %61 = arith.negf %60 : vector<8x64xf32>
    %62 = math.exp %61 : vector<8x64xf32>
    %cst_48 = arith.constant 1.000000e+00 : f32
    %63 = vector.broadcast %cst_48 : f32 to vector<8x64xf32>
    %64 = arith.addf %63, %62 : vector<8x64xf32>
    %65 = arith.divf %63, %64 : vector<8x64xf32>
    %c0_49 = arith.constant 0 : index
    %c0_50 = arith.constant 0 : index
    %66 = vector.load %arg19[%c0_49, %c0_50] : memref<8x64xf32, #tpu.memory_space<vmem>>, vector<8x64xf32>
    tpu.vector_store %arg19[%c0_49, %c0_50], %65 {strides = array<i32>} : memref<8x64xf32, #tpu.memory_space<vmem>>, vector<8x64xf32>,
    return
  }
  func.func @transform_0(%arg0: i32) -> (i32, i32) {
    %c0_i32 = arith.constant 0 : i32
    %c0_i32_0 = arith.constant 0 : i32
    return %arg0, %c0_i32 : i32, i32
  }
  func.func @transform_1(%arg0: i32) -> (i32, i32) {
    %c0_i32 = arith.constant 0 : i32
    %c0_i32_0 = arith.constant 0 : i32
    %c0_i32_1 = arith.constant 0 : i32
    return %c0_i32, %c0_i32_0 : i32, i32
  }
  func.func @transform_2(%arg0: i32) -> (i32, i32) {
    %c0_i32 = arith.constant 0 : i32
    %c0_i32_0 = arith.constant 0 : i32
    %c0_i32_1 = arith.constant 0 : i32
    return %c0_i32, %c0_i32_0 : i32, i32
  }
  func.func @transform_3(%arg0: i32) -> (i32, i32) {
    %c0_i32 = arith.constant 0 : i32
    %c0_i32_0 = arith.constant 0 : i32
    %c0_i32_1 = arith.constant 0 : i32
    return %c0_i32, %c0_i32_0 : i32, i32
  }
  func.func @transform_4(%arg0: i32) -> (i32, i32) {
    %c0_i32 = arith.constant 0 : i32
    %c0_i32_0 = arith.constant 0 : i32
    %c0_i32_1 = arith.constant 0 : i32
    return %c0_i32, %c0_i32_0 : i32, i32
  }
  func.func @transform_5(%arg0: i32) -> (i32, i32) {
    %c0_i32 = arith.constant 0 : i32
    %c0_i32_0 = arith.constant 0 : i32
    %c0_i32_1 = arith.constant 0 : i32
    return %c0_i32, %c0_i32_0 : i32, i32
  }
  func.func @transform_6(%arg0: i32) -> (i32, i32) {
    %c0_i32 = arith.constant 0 : i32
    %c0_i32_0 = arith.constant 0 : i32
    %c0_i32_1 = arith.constant 0 : i32
    return %c0_i32, %c0_i32_0 : i32, i32
  }
  func.func @transform_7(%arg0: i32) -> (i32, i32) {
    %c0_i32 = arith.constant 0 : i32
    %c0_i32_0 = arith.constant 0 : i32
    %c0_i32_1 = arith.constant 0 : i32
    return %c0_i32, %c0_i32_0 : i32, i32
  }
  func.func @transform_8(%arg0: i32) -> (i32, i32) {
    %c0_i32 = arith.constant 0 : i32
    %c0_i32_0 = arith.constant 0 : i32
    %c0_i32_1 = arith.constant 0 : i32
    return %c0_i32, %c0_i32_0 : i32, i32
  }
  func.func @transform_9(%arg0: i32) -> (i32, i32) {
    %c0_i32 = arith.constant 0 : i32
    %c0_i32_0 = arith.constant 0 : i32
    %c0_i32_1 = arith.constant 0 : i32
    return %c0_i32, %c0_i32_0 : i32, i32
  }
  func.func @transform_10(%arg0: i32) -> (i32, i32) {
    %c0_i32 = arith.constant 0 : i32
    %c0_i32_0 = arith.constant 0 : i32
    %c0_i32_1 = arith.constant 0 : i32
    return %c0_i32, %c0_i32_0 : i32, i32
  }
  func.func @transform_11(%arg0: i32) -> (i32, i32) {
    %c0_i32 = arith.constant 0 : i32
    %c0_i32_0 = arith.constant 0 : i32
    %c0_i32_1 = arith.constant 0 : i32
    return %c0_i32, %c0_i32_0 : i32, i32
  }
  func.func @transform_12(%arg0: i32) -> (i32, i32) {
    %c0_i32 = arith.constant 0 : i32
    %c0_i32_0 = arith.constant 0 : i32
    %c0_i32_1 = arith.constant 0 : i32
    return %c0_i32, %c0_i32_0 : i32, i32
  }
  func.func @transform_13(%arg0: i32) -> (i32, i32) {
    %c0_i32 = arith.constant 0 : i32
    %c0_i32_0 = arith.constant 0 : i32
    %c0_i32_1 = arith.constant 0 : i32
    return %c0_i32, %c0_i32_0 : i32, i32
  }
  func.func @transform_14(%arg0: i32) -> (i32, i32) {
    %c0_i32 = arith.constant 0 : i32
    %c0_i32_0 = arith.constant 0 : i32
    %c0_i32_1 = arith.constant 0 : i32
    return %c0_i32, %c0_i32_0 : i32, i32
  }
  func.func @transform_15(%arg0: i32) -> (i32, i32) {
    %c0_i32 = arith.constant 0 : i32
    %c0_i32_0 = arith.constant 0 : i32
    %c0_i32_1 = arith.constant 0 : i32
    return %c0_i32, %c0_i32_0 : i32, i32
  }
  func.func @transform_16(%arg0: i32) -> (i32, i32) {
    %c0_i32 = arith.constant 0 : i32
    %c0_i32_0 = arith.constant 0 : i32
    %c0_i32_1 = arith.constant 0 : i32
    return %c0_i32, %c0_i32_0 : i32, i32
  }
  func.func @transform_17(%arg0: i32) -> (i32, i32) {
    %c0_i32 = arith.constant 0 : i32
    %c0_i32_0 = arith.constant 0 : i32
    return %arg0, %c0_i32 : i32, i32
  }
  func.func @transform_18(%arg0: i32) -> (i32, i32) {
    %c0_i32 = arith.constant 0 : i32
    %c0_i32_0 = arith.constant 0 : i32
    return %arg0, %c0_i32 : i32, i32
  }
}

module attributes {stable_mosaic.version = 11 : i64} {
  func.func @dae_kernel(%arg0: i32, %arg1: memref<8x64xbf16, #tpu.memory_space<vmem>>, %arg2: memref<64x128xbf16, #tpu.memory_space<vmem>>, %arg3: memref<1x128xf32, #tpu.memory_space<vmem>>, %arg4: memref<128x256xbf16, #tpu.memory_space<vmem>>, %arg5: memref<1x256xf32, #tpu.memory_space<vmem>>, %arg6: memref<256x512xbf16, #tpu.memory_space<vmem>>, %arg7: memref<1x512xf32, #tpu.memory_space<vmem>>, %arg8: memref<512x1024xbf16, #tpu.memory_space<vmem>>, %arg9: memref<1x1024xf32, #tpu.memory_space<vmem>>, %arg10: memref<1024x512xbf16, #tpu.memory_space<vmem>>, %arg11: memref<1x512xf32, #tpu.memory_space<vmem>>, %arg12: memref<512x256xbf16, #tpu.memory_space<vmem>>, %arg13: memref<1x256xf32, #tpu.memory_space<vmem>>, %arg14: memref<256x128xbf16, #tpu.memory_space<vmem>>, %arg15: memref<1x128xf32, #tpu.memory_space<vmem>>, %arg16: memref<128x64xbf16, #tpu.memory_space<vmem>>, %arg17: memref<1x64xf32, #tpu.memory_space<vmem>>, %arg18: memref<8x1024xbf16, #tpu.memory_space<vmem>>, %arg19: memref<8x64xf32, #tpu.memory_space<vmem>>) attributes {dimension_semantics = [#tpu.dimension_semantics<parallel>], iteration_bounds = array<i64: 1>, scalar_prefetch = 0 : i64, scratch_operands = 0 : i64, tpu.core_type = #tpu.core_type<tc>, window_params = [{transform_indices = @transform_0, window_bounds = array<i64: 8, 64>}, {pipeline_mode = #tpu.pipeline_mode<synchronous>, transform_indices = @transform_1, window_bounds = array<i64: 64, 128>}, {pipeline_mode = #tpu.pipeline_mode<synchronous>, transform_indices = @transform_2, window_bounds = array<i64: 1, 128>}, {pipeline_mode = #tpu.pipeline_mode<synchronous>, transform_indices = @transform_3, window_bounds = array<i64: 128, 256>}, {pipeline_mode = #tpu.pipeline_mode<synchronous>, transform_indices = @transform_4, window_bounds = array<i64: 1, 256>}, {pipeline_mode = #tpu.pipeline_mode<synchronous>, transform_indices = @transform_5, window_bounds = array<i64: 256, 512>}, {pipeline_mode = #tpu.pipeline_mode<synchronous>, transform_indices = @transform_6, window_bounds = array<i64: 1, 512>}, {pipeline_mode = #tpu.pipeline_mode<synchronous>, transform_indices = @transform_7, window_bounds = array<i64: 512, 1024>}, {pipeline_mode = #tpu.pipeline_mode<synchronous>, transform_indices = @transform_8, window_bounds = array<i64: 1, 1024>}, {pipeline_mode = #tpu.pipeline_mode<synchronous>, transform_indices = @transform_9, window_bounds = array<i64: 1024, 512>}, {pipeline_mode = #tpu.pipeline_mode<synchronous>, transform_indices = @transform_10, window_bounds = array<i64: 1, 512>}, {pipeline_mode = #tpu.pipeline_mode<synchronous>, transform_indices = @transform_11, window_bounds = array<i64: 512, 256>}, {pipeline_mode = #tpu.pipeline_mode<synchronous>, transform_indices = @transform_12, window_bounds = array<i64: 1, 256>}, {pipeline_mode = #tpu.pipeline_mode<synchronous>, transform_indices = @transform_13, window_bounds = array<i64: 256, 128>}, {pipeline_mode = #tpu.pipeline_mode<synchronous>, transform_indices = @transform_14, window_bounds = array<i64: 1, 128>}, {pipeline_mode = #tpu.pipeline_mode<synchronous>, transform_indices = @transform_15, window_bounds = array<i64: 128, 64>}, {pipeline_mode = #tpu.pipeline_mode<synchronous>, transform_indices = @transform_16, window_bounds = array<i64: 1, 64>}, {transform_indices = @transform_17, window_bounds = array<i64: 8, 1024>}, {transform_indices = @transform_18, window_bounds = array<i64: 8, 64>}]} {
    %c0 = arith.constant 0 : index
    %c0_0 = arith.constant 0 : index
    %0 = vector.load %arg1[%c0, %c0_0] : memref<8x64xbf16, #tpu.memory_space<vmem>>, vector<8x64xbf16>
    %c0_1 = arith.constant 0 : index
    %c0_2 = arith.constant 0 : index
    %1 = vector.load %arg2[%c0_1, %c0_2] : memref<64x128xbf16, #tpu.memory_space<vmem>>, vector<64x128xbf16>
    %cst = arith.constant dense<0.000000e+00> : vector<8x128xf32>
    %2 = tpu.matmul %0, %1, %cst {dimension_numbers = #tpu.dot_dimension_numbers<[1], [0], [0], [1], [0, 0, 1, 1], [], []>} : vector<8x64xbf16>, vector<64x128xbf16>, vector<8x128xf32> -> vector<8x128xf32>
    %c0_3 = arith.constant 0 : index
    %c0_4 = arith.constant 0 : index
    %3 = vector.load %arg3[%c0_3, %c0_4] : memref<1x128xf32, #tpu.memory_space<vmem>>, vector<1x128xf32>
    %4 = vector.broadcast %3 : vector<1x128xf32> to vector<8x128xf32>
    %5 = arith.addf %2, %4 : vector<8x128xf32>
    %cst_5 = arith.constant 0.000000e+00 : f32
    %6 = vector.broadcast %cst_5 : f32 to vector<8x128xf32>
    %7 = arith.maximumf %5, %6 : vector<8x128xf32>
    %8 = arith.truncf %7 : vector<8x128xf32> to vector<8x128xbf16>
    %c0_6 = arith.constant 0 : index
    %c0_7 = arith.constant 0 : index
    %9 = vector.load %arg4[%c0_6, %c0_7] : memref<128x256xbf16, #tpu.memory_space<vmem>>, vector<128x256xbf16>
    %cst_8 = arith.constant dense<0.000000e+00> : vector<8x256xf32>
    %10 = tpu.matmul %8, %9, %cst_8 {dimension_numbers = #tpu.dot_dimension_numbers<[1], [0], [0], [1], [0, 0, 1, 1], [], []>} : vector<8x128xbf16>, vector<128x256xbf16>, vector<8x256xf32> -> vector<8x256xf32>
    %c0_9 = arith.constant 0 : index
    %c0_10 = arith.constant 0 : index
    %11 = vector.load %arg5[%c0_9, %c0_10] : memref<1x256xf32, #tpu.memory_space<vmem>>, vector<1x256xf32>
    %12 = vector.broadcast %11 : vector<1x256xf32> to vector<8x256xf32>
    %13 = arith.addf %10, %12 : vector<8x256xf32>
    %cst_11 = arith.constant 0.000000e+00 : f32
    %14 = vector.broadcast %cst_11 : f32 to vector<8x256xf32>
    %15 = arith.maximumf %13, %14 : vector<8x256xf32>
    %16 = arith.truncf %15 : vector<8x256xf32> to vector<8x256xbf16>
    %c0_12 = arith.constant 0 : index
    %c0_13 = arith.constant 0 : index
    %17 = vector.load %arg6[%c0_12, %c0_13] : memref<256x512xbf16, #tpu.memory_space<vmem>>, vector<256x512xbf16>
    %cst_14 = arith.constant dense<0.000000e+00> : vector<8x512xf32>
    %18 = tpu.matmul %16, %17, %cst_14 {dimension_numbers = #tpu.dot_dimension_numbers<[1], [0], [0], [1], [0, 0, 1, 1], [], []>} : vector<8x256xbf16>, vector<256x512xbf16>, vector<8x512xf32> -> vector<8x512xf32>
    %c0_15 = arith.constant 0 : index
    %c0_16 = arith.constant 0 : index
    %19 = vector.load %arg7[%c0_15, %c0_16] : memref<1x512xf32, #tpu.memory_space<vmem>>, vector<1x512xf32>
    %20 = vector.broadcast %19 : vector<1x512xf32> to vector<8x512xf32>
    %21 = arith.addf %18, %20 : vector<8x512xf32>
    %cst_17 = arith.constant 0.000000e+00 : f32
    %22 = vector.broadcast %cst_17 : f32 to vector<8x512xf32>
    %23 = arith.maximumf %21, %22 : vector<8x512xf32>
    %24 = arith.truncf %23 : vector<8x512xf32> to vector<8x512xbf16>
    %c0_18 = arith.constant 0 : index
    %c0_19 = arith.constant 0 : index
    %25 = vector.load %arg8[%c0_18, %c0_19] : memref<512x1024xbf16, #tpu.memory_space<vmem>>, vector<512x1024xbf16>
    %cst_20 = arith.constant dense<0.000000e+00> : vector<8x1024xf32>
    %26 = tpu.matmul %24, %25, %cst_20 {dimension_numbers = #tpu.dot_dimension_numbers<[1], [0], [0], [1], [0, 0, 1, 1], [], []>} : vector<8x512xbf16>, vector<512x1024xbf16>, vector<8x1024xf32> -> vector<8x1024xf32>
    %c0_21 = arith.constant 0 : index
    %c0_22 = arith.constant 0 : index
    %27 = vector.load %arg9[%c0_21, %c0_22] : memref<1x1024xf32, #tpu.memory_space<vmem>>, vector<1x1024xf32>
    %28 = vector.broadcast %27 : vector<1x1024xf32> to vector<8x1024xf32>
    %29 = arith.addf %26, %28 : vector<8x1024xf32>
    %30 = arith.truncf %29 : vector<8x1024xf32> to vector<8x1024xbf16>
    %c0_23 = arith.constant 0 : index
    %c0_24 = arith.constant 0 : index
    %31 = vector.load %arg18[%c0_23, %c0_24] : memref<8x1024xbf16, #tpu.memory_space<vmem>>, vector<8x1024xbf16>
    tpu.vector_store %arg18[%c0_23, %c0_24], %30 {strides = array<i32>} : memref<8x1024xbf16, #tpu.memory_space<vmem>>, vector<8x1024xbf16>,
    %c0_25 = arith.constant 0 : index
    %c0_26 = arith.constant 0 : index
    %32 = vector.load %arg10[%c0_25, %c0_26] : memref<1024x512xbf16, #tpu.memory_space<vmem>>, vector<1024x512xbf16>
    %cst_27 = arith.constant dense<0.000000e+00> : vector<8x512xf32>
    %33 = tpu.matmul %30, %32, %cst_27 {dimension_numbers = #tpu.dot_dimension_numbers<[1], [0], [0], [1], [0, 0, 1, 1], [], []>} : vector<8x1024xbf16>, vector<1024x512xbf16>, vector<8x512xf32> -> vector<8x512xf32>
    %c0_28 = arith.constant 0 : index
    %c0_29 = arith.constant 0 : index
    %34 = vector.load %arg11[%c0_28, %c0_29] : memref<1x512xf32, #tpu.memory_space<vmem>>, vector<1x512xf32>
    %35 = vector.broadcast %34 : vector<1x512xf32> to vector<8x512xf32>
    %36 = arith.addf %33, %35 : vector<8x512xf32>
    %cst_30 = arith.constant 0.000000e+00 : f32
    %37 = vector.broadcast %cst_30 : f32 to vector<8x512xf32>
    %38 = arith.maximumf %36, %37 : vector<8x512xf32>
    %39 = arith.truncf %38 : vector<8x512xf32> to vector<8x512xbf16>
    %c0_31 = arith.constant 0 : index
    %c0_32 = arith.constant 0 : index
    %40 = vector.load %arg12[%c0_31, %c0_32] : memref<512x256xbf16, #tpu.memory_space<vmem>>, vector<512x256xbf16>
    %cst_33 = arith.constant dense<0.000000e+00> : vector<8x256xf32>
    %41 = tpu.matmul %39, %40, %cst_33 {dimension_numbers = #tpu.dot_dimension_numbers<[1], [0], [0], [1], [0, 0, 1, 1], [], []>} : vector<8x512xbf16>, vector<512x256xbf16>, vector<8x256xf32> -> vector<8x256xf32>
    %c0_34 = arith.constant 0 : index
    %c0_35 = arith.constant 0 : index
    %42 = vector.load %arg13[%c0_34, %c0_35] : memref<1x256xf32, #tpu.memory_space<vmem>>, vector<1x256xf32>
    %43 = vector.broadcast %42 : vector<1x256xf32> to vector<8x256xf32>
    %44 = arith.addf %41, %43 : vector<8x256xf32>
    %cst_36 = arith.constant 0.000000e+00 : f32
    %45 = vector.broadcast %cst_36 : f32 to vector<8x256xf32>
    %46 = arith.maximumf %44, %45 : vector<8x256xf32>
    %47 = arith.truncf %46 : vector<8x256xf32> to vector<8x256xbf16>
    %c0_37 = arith.constant 0 : index
    %c0_38 = arith.constant 0 : index
    %48 = vector.load %arg14[%c0_37, %c0_38] : memref<256x128xbf16, #tpu.memory_space<vmem>>, vector<256x128xbf16>
    %cst_39 = arith.constant dense<0.000000e+00> : vector<8x128xf32>
    %49 = tpu.matmul %47, %48, %cst_39 {dimension_numbers = #tpu.dot_dimension_numbers<[1], [0], [0], [1], [0, 0, 1, 1], [], []>} : vector<8x256xbf16>, vector<256x128xbf16>, vector<8x128xf32> -> vector<8x128xf32>
    %c0_40 = arith.constant 0 : index
    %c0_41 = arith.constant 0 : index
    %50 = vector.load %arg15[%c0_40, %c0_41] : memref<1x128xf32, #tpu.memory_space<vmem>>, vector<1x128xf32>
    %51 = vector.broadcast %50 : vector<1x128xf32> to vector<8x128xf32>
    %52 = arith.addf %49, %51 : vector<8x128xf32>
    %cst_42 = arith.constant 0.000000e+00 : f32
    %53 = vector.broadcast %cst_42 : f32 to vector<8x128xf32>
    %54 = arith.maximumf %52, %53 : vector<8x128xf32>
    %55 = arith.truncf %54 : vector<8x128xf32> to vector<8x128xbf16>
    %c0_43 = arith.constant 0 : index
    %c0_44 = arith.constant 0 : index
    %56 = vector.load %arg16[%c0_43, %c0_44] : memref<128x64xbf16, #tpu.memory_space<vmem>>, vector<128x64xbf16>
    %cst_45 = arith.constant dense<0.000000e+00> : vector<8x64xf32>
    %57 = tpu.matmul %55, %56, %cst_45 {dimension_numbers = #tpu.dot_dimension_numbers<[1], [0], [0], [1], [0, 0, 1, 1], [], []>} : vector<8x128xbf16>, vector<128x64xbf16>, vector<8x64xf32> -> vector<8x64xf32>
    %c0_46 = arith.constant 0 : index
    %c0_47 = arith.constant 0 : index
    %58 = vector.load %arg17[%c0_46, %c0_47] : memref<1x64xf32, #tpu.memory_space<vmem>>, vector<1x64xf32>
    %59 = vector.broadcast %58 : vector<1x64xf32> to vector<8x64xf32>
    %60 = arith.addf %57, %59 : vector<8x64xf32>
    %61 = arith.negf %60 : vector<8x64xf32>
    %62 = math.exp %61 : vector<8x64xf32>
    %cst_48 = arith.constant 1.000000e+00 : f32
    %63 = vector.broadcast %cst_48 : f32 to vector<8x64xf32>
    %64 = arith.addf %63, %62 : vector<8x64xf32>
    %65 = arith.divf %63, %64 : vector<8x64xf32>
    %c0_49 = arith.constant 0 : index
    %c0_50 = arith.constant 0 : index
    %66 = vector.load %arg19[%c0_49, %c0_50] : memref<8x64xf32, #tpu.memory_space<vmem>>, vector<8x64xf32>
    tpu.vector_store %arg19[%c0_49, %c0_50], %65 {strides = array<i32>} : memref<8x64xf32, #tpu.memory_space<vmem>>, vector<8x64xf32>,
    return
  }
  func.func @transform_0(%arg0: i32) -> (i32, i32) {
    %c0_i32 = arith.constant 0 : i32
    %c0_i32_0 = arith.constant 0 : i32
    return %arg0, %c0_i32 : i32, i32
  }
  func.func @transform_1(%arg0: i32) -> (i32, i32) {
    %c0_i32 = arith.constant 0 : i32
    %c0_i32_0 = arith.constant 0 : i32
    %c0_i32_1 = arith.constant 0 : i32
    return %c0_i32, %c0_i32_0 : i32, i32
  }
  func.func @transform_2(%arg0: i32) -> (i32, i32) {
    %c0_i32 = arith.constant 0 : i32
    %c0_i32_0 = arith.constant 0 : i32
    %c0_i32_1 = arith.constant 0 : i32
    return %c0_i32, %c0_i32_0 : i32, i32
  }
  func.func @transform_3(%arg0: i32) -> (i32, i32) {
    %c0_i32 = arith.constant 0 : i32
    %c0_i32_0 = arith.constant 0 : i32
    %c0_i32_1 = arith.constant 0 : i32
    return %c0_i32, %c0_i32_0 : i32, i32
  }
  func.func @transform_4(%arg0: i32) -> (i32, i32) {
    %c0_i32 = arith.constant 0 : i32
    %c0_i32_0 = arith.constant 0 : i32
    %c0_i32_1 = arith.constant 0 : i32
    return %c0_i32, %c0_i32_0 : i32, i32
  }
  func.func @transform_5(%arg0: i32) -> (i32, i32) {
    %c0_i32 = arith.constant 0 : i32
    %c0_i32_0 = arith.constant 0 : i32
    %c0_i32_1 = arith.constant 0 : i32
    return %c0_i32, %c0_i32_0 : i32, i32
  }
  func.func @transform_6(%arg0: i32) -> (i32, i32) {
    %c0_i32 = arith.constant 0 : i32
    %c0_i32_0 = arith.constant 0 : i32
    %c0_i32_1 = arith.constant 0 : i32
    return %c0_i32, %c0_i32_0 : i32, i32
  }
  func.func @transform_7(%arg0: i32) -> (i32, i32) {
    %c0_i32 = arith.constant 0 : i32
    %c0_i32_0 = arith.constant 0 : i32
    %c0_i32_1 = arith.constant 0 : i32
    return %c0_i32, %c0_i32_0 : i32, i32
  }
  func.func @transform_8(%arg0: i32) -> (i32, i32) {
    %c0_i32 = arith.constant 0 : i32
    %c0_i32_0 = arith.constant 0 : i32
    %c0_i32_1 = arith.constant 0 : i32
    return %c0_i32, %c0_i32_0 : i32, i32
  }
  func.func @transform_9(%arg0: i32) -> (i32, i32) {
    %c0_i32 = arith.constant 0 : i32
    %c0_i32_0 = arith.constant 0 : i32
    %c0_i32_1 = arith.constant 0 : i32
    return %c0_i32, %c0_i32_0 : i32, i32
  }
  func.func @transform_10(%arg0: i32) -> (i32, i32) {
    %c0_i32 = arith.constant 0 : i32
    %c0_i32_0 = arith.constant 0 : i32
    %c0_i32_1 = arith.constant 0 : i32
    return %c0_i32, %c0_i32_0 : i32, i32
  }
  func.func @transform_11(%arg0: i32) -> (i32, i32) {
    %c0_i32 = arith.constant 0 : i32
    %c0_i32_0 = arith.constant 0 : i32
    %c0_i32_1 = arith.constant 0 : i32
    return %c0_i32, %c0_i32_0 : i32, i32
  }
  func.func @transform_12(%arg0: i32) -> (i32, i32) {
    %c0_i32 = arith.constant 0 : i32
    %c0_i32_0 = arith.constant 0 : i32
    %c0_i32_1 = arith.constant 0 : i32
    return %c0_i32, %c0_i32_0 : i32, i32
  }
  func.func @transform_13(%arg0: i32) -> (i32, i32) {
    %c0_i32 = arith.constant 0 : i32
    %c0_i32_0 = arith.constant 0 : i32
    %c0_i32_1 = arith.constant 0 : i32
    return %c0_i32, %c0_i32_0 : i32, i32
  }
  func.func @transform_14(%arg0: i32) -> (i32, i32) {
    %c0_i32 = arith.constant 0 : i32
    %c0_i32_0 = arith.constant 0 : i32
    %c0_i32_1 = arith.constant 0 : i32
    return %c0_i32, %c0_i32_0 : i32, i32
  }
  func.func @transform_15(%arg0: i32) -> (i32, i32) {
    %c0_i32 = arith.constant 0 : i32
    %c0_i32_0 = arith.constant 0 : i32
    %c0_i32_1 = arith.constant 0 : i32
    return %c0_i32, %c0_i32_0 : i32, i32
  }
  func.func @transform_16(%arg0: i32) -> (i32, i32) {
    %c0_i32 = arith.constant 0 : i32
    %c0_i32_0 = arith.constant 0 : i32
    %c0_i32_1 = arith.constant 0 : i32
    return %c0_i32, %c0_i32_0 : i32, i32
  }
  func.func @transform_17(%arg0: i32) -> (i32, i32) {
    %c0_i32 = arith.constant 0 : i32
    %c0_i32_0 = arith.constant 0 : i32
    return %arg0, %c0_i32 : i32, i32
  }
  func.func @transform_18(%arg0: i32) -> (i32, i32) {
    %c0_i32 = arith.constant 0 : i32
    %c0_i32_0 = arith.constant 0 : i32
    return %arg0, %c0_i32 : i32, i32
  }
}

</mosaic_0001>

<bundles_post_ra>
// kernel: tpu_custom_call.1
= control target key start
LH: loop header
LB: loop body
LE: loop exit
PB: predicated region body
PF: predicated region fallthrough
CT: control target
= control target key end

     0   :  { %s7757_s0 = inlined_call_operand.vmem [shape: bf16[8,64], index: 0, kind: input, shape index: {}]   ;;  %s7758_s1 = inlined_call_operand.hbm [shape: bf16[64,128], index: 1, kind: input, shape index: {}]   ;;  %s7759_s2 = inlined_call_operand.vmem [shape: f32[1,128], index: 2, kind: input, shape index: {}]   ;;  %s7760_s3 = inlined_call_operand.hbm [shape: bf16[128,256], index: 3, kind: input, shape index: {}]   ;;  %s7761_s4 = inlined_call_operand.hbm [shape: f32[1,256], index: 4, kind: input, shape index: {}]   ;;  %s7762_s5 = inlined_call_operand.hbm [shape: bf16[256,512], index: 5, kind: input, shape index: {}]   ;;  %s7763_s6 = inlined_call_operand.vmem [shape: f32[1,512], index: 6, kind: input, shape index: {}]   ;;  %s7764_s7 = inlined_call_operand.hbm [shape: bf16[512,1024], index: 7, kind: input, shape index: {}]   ;;  %s7765_s8 = inlined_call_operand.vmem [shape: f32[1,1024], index: 8, kind: input, shape index: {}]   ;;  %s7766_s9 = inlined_call_operand.hbm [shape: bf16[1024,512], index: 9, kind: input, shape index: {}]   ;;  %s7767_s10 = inlined_call_operand.hbm [shape: f32[1,512], index: 10, kind: input, shape index: {}]   ;;  %s7768_s11 = inlined_call_operand.hbm [shape: bf16[512,256], index: 11, kind: input, shape index: {}]   ;;  %s7769_s12 = inlined_call_operand.hbm [shape: f32[1,256], index: 12, kind: input, shape index: {}]   ;;  %s7770_s13 = inlined_call_operand.vmem [shape: bf16[256,128], index: 13, kind: input, shape index: {}]   ;;  %s7771_s14 = inlined_call_operand.vmem [shape: f32[1,128], index: 14, kind: input, shape index: {}]   ;;  %s7772_s15 = inlined_call_operand.vmem [shape: bf16[128,64], index: 15, kind: input, shape index: {}]   ;;  %s7773_s16 = inlined_call_operand.vmem [shape: f32[1,64], index: 16, kind: input, shape index: {}]   ;;  %s7774_s17 = inlined_call_operand.hbm [shape: bf16[8,1024], index: 17, kind: output, shape index: {0}]   ;;  %s7775_s18 = inlined_call_operand.hbm [shape: f32[8,64], index: 18, kind: output, shape index: {1}]  }
   0x1   :  { %7779 = sst [smem:[#allocation27_spill]] %s7757_s0 }
   0x2   :  { %7780 = sst [smem:[#allocation28_spill]] %s7758_s1 }
   0x3   :  { %7781 = sst [smem:[#allocation29_spill]] %s7759_s2 }
   0x4   :  { %24 = vsyncpa [#allocation3], 0 }
   0x5   :  { %25 = vsyncpa [#allocation6], 0 }
   0x6   :  { %26 = vsyncpa [#allocation9], 0 }
   0x7   :  { %27 = vsyncpa [#allocation12], 0 }
   0x8   :  { %28 = vsyncpa [#allocation15], 0 }
   0x9   :  { %29 = vsyncpa [#allocation4], 0 }
   0xa   :  { %30 = vsyncpa [#allocation19], 0  ;;  %s7291_s27 = smov [#allocation5]   ;;  %s7035_s0 = scalar_lea.hbm %s7760_s3, 2048 }
   0xb   :  { %s52_s28 = sshll.u32 %s7291_s27, 4  ;;  %p7036_p0 = scmp.ne.s32.totalorder %s7760_s3, %s7035_s0  ;;  %s53_s28 = int_to_ptr.vmem [resolvable:$true] %s52_s28 }
   0xc   :  { %p7039_p1 = scmp.lt.u32.totalorder %s7035_s0, %s7760_s3 }
   0xe   :  { %p7041_p2 = pnand %p7039_p1, %p7036_p0 }
  0x10   :  { %7044 = shalt.err (!%p7041_p2)
}
  0x11   :  { %s7045_s22 = scalar_lea.vmem %s53_s28, 2048  ;;  %p7050_p4 = scmp.lt.s32.totalorder %s53_s28, %s53_s28 }
  0x12   :  { %p7046_p3 = scmp.ne.s32.totalorder %s53_s28, %s7045_s22  ;;  %p7051_p5 = scmp.lt.s32.totalorder %s7045_s22, %s7045_s22 }
  0x14   :  { %p7052_p6 = por %p7051_p5, %p7050_p4 }
  0x16   :  { %p7053_p7 = pnand %p7052_p6, %p7046_p3 }
  0x18   :  { %7056 = shalt.err (!%p7053_p7)
}
  0x19   :  { %s7777_s2 = smov 128   ;;  %s7778_s23 = smov 8  }
  0x1a   :  { %58 = dma.hbm_to_vmem [thread:$0]  %s7760_s3, 2048, %s53_s28, [#allocation6], %s7777_s2, %s7777_s2, %s7778_s23  }
  0x1b   :  { %s7294_s26 = smov [#allocation8]   ;;  %s7057_s0 = scalar_lea.hbm %s7762_s5, 8192 }
  0x1c   :  { %s74_s27 = sshll.u32 %s7294_s26, 4  ;;  %p7058_p8 = scmp.ne.s32.totalorder %s7762_s5, %s7057_s0  ;;  %s75_s27 = int_to_ptr.vmem [resolvable:$true] %s74_s27 }
  0x1d   :  { %p7061_p9 = scmp.lt.u32.totalorder %s7057_s0, %s7762_s5 }
  0x1f   :  { %p7063_p10 = pnand %p7061_p9, %p7058_p8 }
  0x21   :  { %7066 = shalt.err (!%p7063_p10)
}
  0x22   :  { %s7067_s22 = scalar_lea.vmem %s75_s27, 8192  ;;  %p7072_p12 = scmp.lt.s32.totalorder %s75_s27, %s75_s27 }
  0x23   :  { %p7068_p11 = scmp.ne.s32.totalorder %s75_s27, %s7067_s22  ;;  %p7073_p13 = scmp.lt.s32.totalorder %s7067_s22, %s7067_s22 }
  0x25   :  { %p7074_p0 = por %p7073_p13, %p7072_p12 }
  0x27   :  { %p7075_p1 = pnand %p7074_p0, %p7068_p11 }
  0x29   :  { %7078 = shalt.err (!%p7075_p1)
}
  0x2a   :  { %s7295_s3 = smov 256   ;;  %s7296_s28 = smov 16  }
  0x2b   :  { %80 = dma.hbm_to_vmem [thread:$0]  %s7762_s5, 8192, %s75_s27, [#allocation9], %s7295_s3, %s7295_s3, %s7296_s28  }
  0x2c   :  { %s7297_s26 = smov [#allocation11]   ;;  %s7298_s30 = smov [#allocation14]  }
  0x2d   :  { %s102_s29 = sshll.u32 %s7297_s26, 4  ;;  %s124_s19 = sshll.u32 %s7298_s30, 4  ;;  %s103_s29 = int_to_ptr.vmem [resolvable:$true] %s102_s29  ;;  %s7435_s19 = int_to_ptr.vmem [resolvable:$true] %s124_s19 }
  0x2e   :  { %s7079_s20 = scalar_lea.hbm %s7766_s9, 32768 }
  0x2f   :  { %p7080_p2 = scmp.ne.s32.totalorder %s7766_s9, %s7079_s20  ;;  %p7083_p3 = scmp.lt.u32.totalorder %s7079_s20, %s7766_s9 }
  0x31   :  { %p7085_p4 = pnand %p7083_p3, %p7080_p2 }
  0x33   :  { %7088 = shalt.err (!%p7085_p4)
}
  0x34   :  { %s7089_s5 = scalar_lea.vmem %s103_s29, 32768  ;;  %p7094_p6 = scmp.lt.s32.totalorder %s103_s29, %s103_s29 }
  0x35   :  { %p7090_p5 = scmp.ne.s32.totalorder %s103_s29, %s7089_s5  ;;  %p7095_p7 = scmp.lt.s32.totalorder %s7089_s5, %s7089_s5 }
  0x37   :  { %p7096_p8 = por %p7095_p7, %p7094_p6 }
  0x39   :  { %p7097_p9 = pnand %p7096_p8, %p7090_p5 }
  0x3b   :  { %7100 = shalt.err (!%p7097_p9)
}
  0x3c   :  { %108 = dma.hbm_to_vmem [thread:$0]  %s7766_s9, 32768, %s103_s29, [#allocation12], %s7295_s3, %s7295_s3, %s7296_s28  }
  0x3d   :  { %s7101_s30 = scalar_lea.hbm %s7768_s11, 8192 }
  0x3e   :  { %p7102_p10 = scmp.ne.s32.totalorder %s7768_s11, %s7101_s30  ;;  %p7105_p11 = scmp.lt.u32.totalorder %s7101_s30, %s7768_s11 }
  0x40   :  { %p7107_p12 = pnand %p7105_p11, %p7102_p10 }
  0x42   :  { %7110 = shalt.err (!%p7107_p12)
}
  0x43   :  { %s7111_s20 = scalar_lea.vmem %s7435_s19, 8192  ;;  %p7116_p0 = scmp.lt.s32.totalorder %s7435_s19, %s7435_s19 }
  0x44   :  { %p7112_p13 = scmp.ne.s32.totalorder %s7435_s19, %s7111_s20  ;;  %p7117_p1 = scmp.lt.s32.totalorder %s7111_s20, %s7111_s20 }
  0x46   :  { %p7118_p2 = por %p7117_p1, %p7116_p0 }
  0x48   :  { %p7119_p3 = pnand %p7118_p2, %p7112_p13 }
  0x4a   :  { %7122 = shalt.err (!%p7119_p3)
}
  0x4b   :  { %s7782_s9 = smov 8   ;;  %s7783_s3 = smov 128  }
  0x4c   :  { %130 = dma.hbm_to_vmem [thread:$0]  %s7768_s11, 8192, %s7435_s19, [#allocation15], %s7783_s3, %s7783_s3, %s7782_s9  }
  0x4d   :  { %s7299_s21 = smov [#allocation2]   ;;  %s7784_s24 = sld [smem:[#allocation28_spill]] }
  0x4e   :  { %s38_s22 = sshll.u32 %s7299_s21, 4  ;;  %s39_s22 = int_to_ptr.vmem [resolvable:$true] %s38_s22 }
  0x53   :  { %s7123_s25 = scalar_lea.hbm %s7784_s24, 512 }
  0x54   :  { %p7124_p4 = scmp.ne.s32.totalorder %s7784_s24, %s7123_s25  ;;  %p7127_p5 = scmp.lt.u32.totalorder %s7123_s25, %s7784_s24 }
  0x56   :  { %p7129_p6 = pnand %p7127_p5, %p7124_p4 }
  0x58   :  { %7132 = shalt.err (!%p7129_p6)
}
  0x59   :  { %s7133_s23 = scalar_lea.vmem %s39_s22, 512  ;;  %p7138_p8 = scmp.lt.s32.totalorder %s39_s22, %s39_s22 }
  0x5a   :  { %p7134_p7 = scmp.ne.s32.totalorder %s39_s22, %s7133_s23  ;;  %p7139_p9 = scmp.lt.s32.totalorder %s7133_s23, %s7133_s23 }
  0x5c   :  { %p7140_p10 = por %p7139_p9, %p7138_p8 }
  0x5e   :  { %p7141_p11 = pnand %p7140_p10, %p7134_p7 }
  0x60   :  { %7144 = shalt.err (!%p7141_p11)
}
  0x61   :  { %s7300_s11 = smov 64   ;;  %s7301_s19 = smov 4  }
  0x62   :  { %44 = dma.hbm_to_vmem [thread:$0]  %s7784_s24, 512, %s39_s22, [#allocation3], %s7300_s11, %s7300_s11, %s7301_s19  }
  0x63   :  { %s7302_s9 = smov [#allocation7]   ;;  %s7303_s28 = smov [#allocation10]  }
  0x64   :  { %s65_s3 = sshll.u32 %s7302_s9, 4  ;;  %s88_s29 = sshll.u32 %s7303_s28, 4  ;;  %s66_s3 = int_to_ptr.vmem [resolvable:$true] %s65_s3  ;;  %s89_s29 = int_to_ptr.vmem [resolvable:$true] %s88_s29 }
  0x65   :  { %s7145_s27 = scalar_lea.hbm %s7761_s4, 32 }
  0x66   :  { %p7146_p12 = scmp.ne.s32.totalorder %s7761_s4, %s7145_s27  ;;  %p7149_p13 = scmp.lt.u32.totalorder %s7145_s27, %s7761_s4 }
  0x68   :  { %p7151_p0 = pnand %p7149_p13, %p7146_p12 }
  0x6a   :  { %7154 = shalt.err (!%p7151_p0)
}
  0x6b   :  { %s7155_s22 = scalar_lea.vmem %s66_s3, 32  ;;  %p7160_p2 = scmp.lt.s32.totalorder %s66_s3, %s66_s3 }
  0x6c   :  { %p7156_p1 = scmp.ne.s32.totalorder %s66_s3, %s7155_s22  ;;  %p7161_p3 = scmp.lt.s32.totalorder %s7155_s22, %s7155_s22 }
  0x6e   :  { %p7162_p4 = por %p7161_p3, %p7160_p2 }
  0x70   :  { %p7163_p5 = pnand %p7162_p4, %p7156_p1 }
  0x72   :  { %7166 = shalt.err (!%p7163_p5)
}
  0x73   :  { %68 = dma.hbm_to_vmem [thread:$0]  %s7761_s4, 32, %s66_s3, [#allocation6]  }
  0x74   :  { %s7167_s19 = scalar_lea.hbm %s7764_s7, 32768 }
  0x75   :  { %p7168_p6 = scmp.ne.s32.totalorder %s7764_s7, %s7167_s19  ;;  %p7171_p7 = scmp.lt.u32.totalorder %s7167_s19, %s7764_s7 }
  0x77   :  { %p7173_p8 = pnand %p7171_p7, %p7168_p6 }
  0x79   :  { %7176 = shalt.err (!%p7173_p8)
}
  0x7a   :  { %s7177_s21 = scalar_lea.vmem %s89_s29, 32768  ;;  %p7182_p10 = scmp.lt.s32.totalorder %s89_s29, %s89_s29 }
  0x7b   :  { %p7178_p9 = scmp.ne.s32.totalorder %s89_s29, %s7177_s21  ;;  %p7183_p11 = scmp.lt.s32.totalorder %s7177_s21, %s7177_s21 }
  0x7d   :  { %p7184_p12 = por %p7183_p11, %p7182_p10 }
  0x7f   :  { %p7185_p13 = pnand %p7184_p12, %p7178_p9 }
  0x81   :  { %7188 = shalt.err (!%p7185_p13)
}
  0x82   :  { %s7304_s4 = smov 512   ;;  %s7305_s3 = smov 32  }
  0x83   :  { %94 = dma.hbm_to_vmem [thread:$0]  %s7764_s7, 32768, %s89_s29, [#allocation9], %s7304_s4, %s7304_s4, %s7305_s3  }
  0x84   :  { %s7306_s25 = smov [#allocation13]   ;;  %s7307_s30 = smov [#allocation16]  }
  0x85   :  { %s115_s26 = sshll.u32 %s7306_s25, 4  ;;  %s137_s0 = sshll.u32 %s7307_s30, 4  ;;  %s116_s26 = int_to_ptr.vmem [resolvable:$true] %s115_s26  ;;  %s138_s0 = int_to_ptr.vmem [resolvable:$true] %s137_s0 }
  0x86   :  { %s7189_s2 = scalar_lea.hbm %s7767_s10, 64 }
  0x87   :  { %p7190_p0 = scmp.ne.s32.totalorder %s7767_s10, %s7189_s2  ;;  %p7193_p1 = scmp.lt.u32.totalorder %s7189_s2, %s7767_s10 }
  0x89   :  { %p7195_p2 = pnand %p7193_p1, %p7190_p0 }
  0x8b   :  { %7198 = shalt.err (!%p7195_p2)
}
  0x8c   :  { %s7199_s7 = scalar_lea.vmem %s116_s26, 64  ;;  %p7204_p4 = scmp.lt.s32.totalorder %s116_s26, %s116_s26 }
  0x8d   :  { %p7200_p3 = scmp.ne.s32.totalorder %s116_s26, %s7199_s7  ;;  %p7205_p5 = scmp.lt.s32.totalorder %s7199_s7, %s7199_s7 }
  0x8f   :  { %p7206_p6 = por %p7205_p5, %p7204_p4 }
  0x91   :  { %p7207_p7 = pnand %p7206_p6, %p7200_p3 }
  0x93   :  { %7210 = shalt.err (!%p7207_p7)
}
  0x94   :  { %118 = dma.hbm_to_vmem [thread:$0]  %s7767_s10, 64, %s116_s26, [#allocation12]  }
  0x95   :  { %s7211_s21 = scalar_lea.hbm %s7769_s12, 32 }
  0x96   :  { %p7212_p8 = scmp.ne.s32.totalorder %s7769_s12, %s7211_s21  ;;  %p7215_p9 = scmp.lt.u32.totalorder %s7211_s21, %s7769_s12 }
  0x98   :  { %p7217_p10 = pnand %p7215_p9, %p7212_p8 }
  0x9a   :  { %7220 = shalt.err (!%p7217_p10)
}
  0x9b   :  { %s7221_s25 = scalar_lea.vmem %s138_s0, 32  ;;  %p7226_p12 = scmp.lt.s32.totalorder %s138_s0, %s138_s0 }
  0x9c   :  { %p7222_p11 = scmp.ne.s32.totalorder %s138_s0, %s7221_s25  ;;  %p7227_p13 = scmp.lt.s32.totalorder %s7221_s25, %s7221_s25 }
  0x9e   :  { %p7228_p0 = por %p7227_p13, %p7226_p12 }
  0xa0   :  { %p7229_p1 = pnand %p7228_p0, %p7222_p11 }
  0xa2   :  { %7232 = shalt.err (!%p7229_p1)
}
  0xa3   :  { %140 = dma.hbm_to_vmem [thread:$0]  %s7769_s12, 32, %s138_s0, [#allocation15]  }
  0xa4   :  { %7277 = dma.done.wait [#allocation3], 512  }
  0xa5   :  { %7278 = vsyncadd [#allocation3], 4294966784 }
  0xa6   :  { %7279 = dma.done.wait [#allocation6], 2080  }
  0xa7   :  { %7280 = vsyncadd [#allocation6], 4294965216 }
  0xa8   :  { %7281 = dma.done.wait [#allocation9], 40960  }
  0xa9   :  { %7282 = vsyncadd [#allocation9], 4294926336 }
  0xaa   :  { %7283 = dma.done.wait [#allocation12], 32832  }
  0xab   :  { %7284 = vsyncadd [#allocation12], 4294934464 }
  0xac   :  { %7285 = dma.done.wait [#allocation15], 8224  }
  0xad   :  { %7286 = vsyncadd [#allocation15], 4294959072  ;;  %v7308_v0 = vmov 0.0   ;;  %vm7309_vm0 = vmmov 0   ;;  %v6403_v1 = vld [vmem:[#allocation2] sm:$0xff]   ;;  %v6404_v2 = vld [vmem:[#allocation2 + $0x8] sm:$0xff]  }
  0xae   :  { %6291 = vmatprep.subr.bf16.mxu1 %v7308_v0  ;;  %6299 = vmatprep.mubr.msk.bf16.mxu1 %vm7309_vm0, %v7308_v0  ;;  %v6405_v3 = vld [vmem:[#allocation2 + $0x10] sm:$0xff]   ;;  %v6406_v4 = vld [vmem:[#allocation2 + $0x18] sm:$0xff]   ;;  %v6409_v5 = vld [vmem:[#allocation5 + $0x4] ss:$8 sps:$4 sm:$0xff]   ;;  %s7785_s0 = sld [smem:[#allocation27_spill]]  ;;  %vm217_vm1 = vcmask 523264  }
  0xaf   :  { %6292 = vmatpush3.bf16.msra.mxu1 %v6403_v1  ;;  %v6407_v7 = vld [vmem:[#allocation5] ss:$8 sps:$4 sm:$0xff]   ;;  %v6412_v8 = vld [vmem:[#allocation5 + $0x14] ss:$8 sps:$4 sm:$0xff]   ;;  %v6410_v9 = vld [vmem:[#allocation5 + $0x10] ss:$8 sps:$4 sm:$0xff]  }
  0xb0   :  { %6293 = vmatprep.subr.bf16.mxu1 %v7308_v0  ;;  %v6415_v10 = vld [vmem:[#allocation5 + $0x24] ss:$8 sps:$4 sm:$0xff]   ;;  %v6413_v11 = vld [vmem:[#allocation5 + $0x20] ss:$8 sps:$4 sm:$0xff]   ;;  %v6418_v12 = vld [vmem:[#allocation5 + $0x34] ss:$8 sps:$4 sm:$0xff]  }
  0xb1   :  { %v6416_v13 = vld [vmem:[#allocation5 + $0x30] ss:$8 sps:$4 sm:$0xff]   ;;  %v6421_v14 = vld [vmem:[#allocation5 + $0x44] ss:$8 sps:$4 sm:$0xff]   ;;  %v6419_v15 = vld [vmem:[#allocation5 + $0x40] ss:$8 sps:$4 sm:$0xff]  }
  0xb2   :  { %v6424_v16 = vld [vmem:[#allocation5 + $0x54] ss:$8 sps:$4 sm:$0xff]   ;;  %v6422_v17 = vld [vmem:[#allocation5 + $0x50] ss:$8 sps:$4 sm:$0xff]   ;;  %v6427_v18 = vld [vmem:[#allocation5 + $0x64] ss:$8 sps:$4 sm:$0xff]  }
  0xb3   :  { %6294 = vmatpush3.bf16.msra.mxu1 %v6404_v2  ;;  %v6425_v19 = vld [vmem:[#allocation5 + $0x60] ss:$8 sps:$4 sm:$0xff]   ;;  %v6430_v20 = vld [vmem:[#allocation5 + $0x74] ss:$8 sps:$4 sm:$0xff]   ;;  %v6428_v21 = vld [vmem:[#allocation5 + $0x70] ss:$8 sps:$4 sm:$0xff]  }
  0xb4   :  { %6295 = vmatprep.subr.bf16.mxu1 %v7308_v0  ;;  %v177_v6 = vld [vmem:[%s7785_s0] sm:$0xf]  ;;  %v7310_v22 = vmov 0   ;;  %v6431_v23 = vld [vmem:[#allocation8 + $0x4] ss:$16 sps:$4 sm:$0xff]   ;;  %s7786_s2 = sld [smem:[#allocation29_spill]] }
  0xb5   :  { %v6435_v24 = vld [vmem:[#allocation8 + $0xc] ss:$16 sps:$4 sm:$0xff]   ;;  %v6436_v25 = vld [vmem:[#allocation8] ss:$16 sps:$4 sm:$0xff]   ;;  %v6437_v26 = vld [vmem:[#allocation8 + $0x24] ss:$16 sps:$4 sm:$0xff]   ;;  %822 = vmatprep.subr.bf16.mxu0 %v6431_v23 }
  0xb6   :  { %v6442_v27 = vld [vmem:[#allocation8 + $0x20] ss:$16 sps:$4 sm:$0xff]   ;;  %823 = vmatpush1.bf16.msra.mxu0 %v6436_v25  ;;  %v6443_v28 = vld [vmem:[#allocation8 + $0x44] ss:$16 sps:$4 sm:$0xff]   ;;  %v6433_v59 = vld [vmem:[#allocation8 + $0x8] ss:$16 sps:$4 sm:$0xff]  }
  0xb7   :  { %6296 = vmatpush3.bf16.msra.mxu1 %v6405_v3  ;;  %824 = vmatprep.subr.bf16.mxu0 %v6437_v26  ;;  %v6448_v29 = vld [vmem:[#allocation8 + $0x40] ss:$16 sps:$4 sm:$0xff]   ;;  %v6449_v30 = vld [vmem:[#allocation8 + $0x64] ss:$16 sps:$4 sm:$0xff]   ;;  %v6441_v61 = vld [vmem:[#allocation8 + $0x2c] ss:$16 sps:$4 sm:$0xff]  }
  0xb8   :  { %6297 = vmatprep.subr.bf16.mxu1 %v7308_v0  ;;  %v6454_v31 = vld [vmem:[#allocation8 + $0x60] ss:$16 sps:$4 sm:$0xff]   ;;  %v6455_v32 = vld [vmem:[#allocation8 + $0x84] ss:$16 sps:$4 sm:$0xff]   ;;  %v6439_v62 = vld [vmem:[#allocation8 + $0x28] ss:$16 sps:$4 sm:$0xff]  }
  0xb9   :  { %v6460_v33 = vld [vmem:[#allocation8 + $0x80] ss:$16 sps:$4 sm:$0xff]   ;;  %v6461_v34 = vld [vmem:[#allocation8 + $0xa4] ss:$16 sps:$4 sm:$0xff]   ;;  %v6447_v63 = vld [vmem:[#allocation8 + $0x4c] ss:$16 sps:$4 sm:$0xff]  }
  0xba   :  { %825 = vmatpush1.bf16.msra.mxu0 %v6442_v27  ;;  %v6466_v35 = vld [vmem:[#allocation8 + $0xa0] ss:$16 sps:$4 sm:$0xff]   ;;  %v6467_v36 = vld [vmem:[#allocation8 + $0xc4] ss:$16 sps:$4 sm:$0xff]   ;;  %v5558_v52 = vld [vmem:[%s7786_s2] ss:$0 sm:$0xff] }
  0xbb   :  { %6298 = vmatpush3.bf16.msra.mxu1 %v6406_v4  ;;  %826 = vmatprep.subr.bf16.mxu0 %v6443_v28  ;;  %v6472_v37 = vld [vmem:[#allocation8 + $0xc0] ss:$16 sps:$4 sm:$0xff]   ;;  %v6473_v38 = vld [vmem:[#allocation8 + $0xe4] ss:$16 sps:$4 sm:$0xff]   ;;  %v6445_v1 = vld [vmem:[#allocation8 + $0x48] ss:$16 sps:$4 sm:$0xff]  }
  0xbc   :  { %371 = vmatprep.subr.bf16.mxu1 %v6409_v5  ;;  %v6478_v39 = vld [vmem:[#allocation8 + $0xe0] ss:$16 sps:$4 sm:$0xff]   ;;  %v6479_v40 = vld [vmem:[#allocation8 + $0x104] ss:$16 sps:$4 sm:$0xff]   ;;  %v6453_v2 = vld [vmem:[#allocation8 + $0x6c] ss:$16 sps:$4 sm:$0xff]  }
  0xbd   :  { %v6484_v41 = vld [vmem:[#allocation8 + $0x100] ss:$16 sps:$4 sm:$0xff]   ;;  %v6485_v42 = vld [vmem:[#allocation8 + $0x124] ss:$16 sps:$4 sm:$0xff]   ;;  %v6451_v3 = vld [vmem:[#allocation8 + $0x68] ss:$16 sps:$4 sm:$0xff]  }
  0xbe   :  { %6300 = vmatmul.mubr.msk.bf16.vlgmr.msra.gmra.mrb[0].mxu1 %vm217_vm1, %v177_v6  ;;  %827 = vmatpush1.bf16.msra.mxu0 %v6448_v29  ;;  %v6490_v43 = vld [vmem:[#allocation8 + $0x120] ss:$16 sps:$4 sm:$0xff]   ;;  %v6491_v44 = vld [vmem:[#allocation8 + $0x144] ss:$16 sps:$4 sm:$0xff]   ;;  %v6459_v4 = vld [vmem:[#allocation8 + $0x8c] ss:$16 sps:$4 sm:$0xff]  }
  0xbf   :  { %372 = vmatpush1.bf16.msra.mxu1 %v6407_v7  ;;  %403 = vmatprep.mubr.bf16.mxu1 %v7310_v22  ;;  %v6496_v45 = vld [vmem:[#allocation8 + $0x140] ss:$16 sps:$4 sm:$0xff]   ;;  %v6497_v46 = vld [vmem:[#allocation8 + $0x164] ss:$16 sps:$4 sm:$0xff]   ;;  %v6457_v5 = vld [vmem:[#allocation8 + $0x88] ss:$16 sps:$4 sm:$0xff]  }
  0xc0   :  { %373 = vmatprep.subr.bf16.mxu1 %v6412_v8  ;;  %828 = vmatprep.subr.bf16.mxu0 %v6449_v30  ;;  %v6502_v47 = vld [vmem:[#allocation8 + $0x160] ss:$16 sps:$4 sm:$0xff]   ;;  %v6503_v48 = vld [vmem:[#allocation8 + $0x184] ss:$16 sps:$4 sm:$0xff]   ;;  %v6465_v6 = vld [vmem:[#allocation8 + $0xac] ss:$16 sps:$4 sm:$0xff]  }
  0xc1   :  { %v6508_v49 = vld [vmem:[#allocation8 + $0x180] ss:$16 sps:$4 sm:$0xff]   ;;  %v6509_v50 = vld [vmem:[#allocation8 + $0x1a4] ss:$16 sps:$4 sm:$0xff]   ;;  %v6463_v7 = vld [vmem:[#allocation8 + $0xa8] ss:$16 sps:$4 sm:$0xff]  }
  0xc2   :  { %829 = vmatpush1.bf16.msra.mxu0 %v6454_v31  ;;  %v6514_v51 = vld [vmem:[#allocation8 + $0x1a0] ss:$16 sps:$4 sm:$0xff]   ;;  %v6471_v8 = vld [vmem:[#allocation8 + $0xcc] ss:$16 sps:$4 sm:$0xff]   ;;  %v6511_v23 = vld [vmem:[#allocation8 + $0x1a8] ss:$16 sps:$4 sm:$0xff]  }
  0xc3   :  { %374 = vmatpush1.bf16.msra.mxu1 %v6410_v9  ;;  %830 = vmatprep.subr.bf16.mxu0 %v6455_v32  ;;  %v6469_v9 = vld [vmem:[#allocation8 + $0xc8] ss:$16 sps:$4 sm:$0xff]   ;;  %v6513_v22 = vld [vmem:[#allocation8 + $0x1ac] ss:$16 sps:$4 sm:$0xff]   ;;  %v6520_v27 = vld [vmem:[#allocation8 + $0x1c0] ss:$16 sps:$4 sm:$0xff]  }
  0xc4   :  { %375 = vmatprep.subr.bf16.mxu1 %v6415_v10  ;;  %v6477_v10 = vld [vmem:[#allocation8 + $0xec] ss:$16 sps:$4 sm:$0xff]   ;;  %v6517_v26 = vld [vmem:[#allocation8 + $0x1c8] ss:$16 sps:$4 sm:$0xff]   ;;  %v6521_v28 = vld [vmem:[#allocation8 + $0x1e4] ss:$16 sps:$4 sm:$0xff]  }
  0xc5   :  { %v6519_v25 = vld [vmem:[#allocation8 + $0x1cc] ss:$16 sps:$4 sm:$0xff]   ;;  %v6523_v30 = vld [vmem:[#allocation8 + $0x1e8] ss:$16 sps:$4 sm:$0xff]   ;;  %v6526_v31 = vld [vmem:[#allocation8 + $0x1e0] ss:$16 sps:$4 sm:$0xff]  }
  0xc6   :  { %831 = vmatpush1.bf16.msra.mxu0 %v6460_v33  ;;  %v6525_v29 = vld [vmem:[#allocation8 + $0x1ec] ss:$16 sps:$4 sm:$0xff]   ;;  %v912_v32 = vld [vmem:[#allocation10] sm:$0xff]  ;;  %s7311_s19 = smov [#allocation17]  }
  0xc7   :  { %376 = vmatpush1.bf16.msra.mxu1 %v6413_v11  ;;  %832 = vmatprep.subr.bf16.mxu0 %v6461_v34  ;;  %v6475_v11 = vld [vmem:[#allocation8 + $0xe8] ss:$16 sps:$4 sm:$0xff]   ;;  %v916_v33 = vld [vmem:[#allocation10 + $0x20] sm:$0xff] }
  0xc8   :  { %377 = vmatprep.subr.bf16.mxu1 %v6418_v12  ;;  %v6483_v12 = vld [vmem:[#allocation8 + $0x10c] ss:$16 sps:$4 sm:$0xff]  }
  0xc9   :  { %v913_v34 = vld [vmem:[#allocation10 + $0x8] sm:$0xff] }
  0xca   :  { %833 = vmatpush1.bf16.msra.mxu0 %v6466_v35  ;;  %v5644_v35 = vcombine.low %v912_v32, %v916_v33 }
  0xcb   :  { %378 = vmatpush1.bf16.msra.mxu1 %v6416_v13  ;;  %834 = vmatprep.subr.bf16.mxu0 %v6467_v36  ;;  %v6481_v13 = vld [vmem:[#allocation8 + $0x108] ss:$16 sps:$4 sm:$0xff]   ;;  %v5645_v36 = vcombine.high %v912_v32, %v916_v33  ;;  %v960_v32 = vld [vmem:[#allocation10 + $0x180] sm:$0xff] }
  0xcc   :  { %379 = vmatprep.subr.bf16.mxu1 %v6421_v14  ;;  %v6489_v14 = vld [vmem:[#allocation8 + $0x12c] ss:$16 sps:$4 sm:$0xff]   ;;  %v964_v33 = vld [vmem:[#allocation10 + $0x1a0] sm:$0xff] }
  0xce   :  { %835 = vmatpush1.bf16.msra.mxu0 %v6472_v37  ;;  %v917_v37 = vld [vmem:[#allocation10 + $0x28] sm:$0xff] }
  0xcf   :  { %380 = vmatpush1.bf16.msra.mxu1 %v6419_v15  ;;  %836 = vmatprep.subr.bf16.mxu0 %v6473_v38  ;;  %v6487_v15 = vld [vmem:[#allocation8 + $0x128] ss:$16 sps:$4 sm:$0xff]   ;;  %v5646_v38 = vcombine.low %v913_v34, %v917_v37 }
  0xd0   :  { %381 = vmatprep.subr.bf16.mxu1 %v6424_v16  ;;  %v6495_v16 = vld [vmem:[#allocation8 + $0x14c] ss:$16 sps:$4 sm:$0xff]  }
  0xd2   :  { %837 = vmatpush1.bf16.msra.mxu0 %v6478_v39  ;;  %v5647_v39 = vcombine.high %v913_v34, %v917_v37  ;;  %v961_v34 = vld [vmem:[#allocation10 + $0x188] sm:$0xff] }
  0xd3   :  { %382 = vmatpush1.bf16.msra.mxu1 %v6422_v17  ;;  %838 = vmatprep.subr.bf16.mxu0 %v6479_v40  ;;  %v6493_v17 = vld [vmem:[#allocation8 + $0x148] ss:$16 sps:$4 sm:$0xff]   ;;  %v281_v40 = vlaneseq }
  0xd4   :  { %383 = vmatprep.subr.bf16.mxu1 %v6427_v18  ;;  %v6501_v18 = vld [vmem:[#allocation8 + $0x16c] ss:$16 sps:$4 sm:$0xff]  }
  0xd6   :  { %839 = vmatpush1.bf16.msra.mxu0 %v6484_v41  ;;  %v7542_v41 = vshrl.u32 %v281_v40, 7  ;;  %v968_v40 = vld [vmem:[#allocation10 + $0x1c0] sm:$0xff] }
  0xd7   :  { %384 = vmatpush1.bf16.msra.mxu1 %v6425_v19  ;;  %840 = vmatprep.subr.bf16.mxu0 %v6485_v42  ;;  %v6499_v19 = vld [vmem:[#allocation8 + $0x168] ss:$16 sps:$4 sm:$0xff]  }
  0xd8   :  { %385 = vmatprep.subr.bf16.mxu1 %v6430_v20  ;;  %v6507_v20 = vld [vmem:[#allocation8 + $0x18c] ss:$16 sps:$4 sm:$0xff]   ;;  %v7545_v42 = vsub.s32 0, %v7542_v41 }
  0xda   :  { %841 = vmatpush1.bf16.msra.mxu0 %v6490_v43  ;;  %v279_v43 = vld [vmem:[#allocation7] sm:$0x3] }
  0xdb   :  { %386 = vmatpush1.bf16.msra.mxu1 %v6428_v21  ;;  %842 = vmatprep.subr.bf16.mxu0 %v6491_v44  ;;  %v6505_v21 = vld [vmem:[#allocation8 + $0x188] ss:$16 sps:$4 sm:$0xff]   ;;  %v7548_v44 = vsub.s32 1, %v7542_v41 }
  0xdc   :  { %863 = vmatprep.subr.bf16.mxu1 %v6435_v24  ;;  %v6515_v24 = vld [vmem:[#allocation8 + $0x1c4] ss:$16 sps:$4 sm:$0xff]  }
  0xde   :  { %843 = vmatpush1.bf16.msra.mxu0 %v6496_v45  ;;  %v284_v45 = vrot.slane %v279_v43, %v7545_v42 }
  0xdf   :  { %844 = vmatprep.subr.bf16.mxu0 %v6497_v46  ;;  %v288_v46 = vrot.slane %v279_v43, %v7548_v44  ;;  %v972_v43 = vld [vmem:[#allocation10 + $0x1e0] sm:$0xff] }
  0xe2   :  { %845 = vmatpush1.bf16.msra.mxu0 %v6502_v47 }
  0xe3   :  { %846 = vmatprep.subr.bf16.mxu0 %v6503_v48 }
  0xe6   :  { %847 = vmatpush1.bf16.msra.mxu0 %v6508_v49 }
  0xe7   :  { %848 = vmatprep.subr.bf16.mxu0 %v6509_v50 }
  0xea   :  { %849 = vmatpush1.bf16.msra.mxu0 %v6514_v51 }
  0xeb   :  { %850 = vmatprep.subr.bf16.mxu0 %v6515_v24  ;;  %v952_v24 = vld [vmem:[#allocation10 + $0x140] sm:$0xff] }
  0xee   :  { %851 = vmatpush1.bf16.msra.mxu0 %v6520_v27  ;;  %v957_v27 = vld [vmem:[#allocation10 + $0x168] sm:$0xff] }
  0xef   :  { %852 = vmatprep.subr.bf16.mxu0 %v6521_v28 }
  0xf2   :  { %853 = vmatpush1.bf16.msra.mxu0 %v6526_v31 }
  0xf3   :  { %2490 = vmatprep.subr.bf16.mxu0 %v5645_v36 }
 0x191   :  { %v255_v53 = vpop.f32.mrb[0].mxu1 }
 0x192   :  { %v256_v54 = vadd.f32 %v5558_v52, %v255_v53  ;;  %v6301_v55 = vpop.f32.mrb[1].mxu1 }
 0x193   :  { %v258_v56 = vpop.f32.mrb[2].mxu1 }
 0x194   :  { %v261_v57 = vmax.f32 %v256_v54, 0.0  ;;  %v6302_v58 = vpop.f32.mrb[3].mxu1  ;;  %v920_v54 = vld [vmem:[#allocation10 + $0x40] sm:$0xff] }
 0x195   :  { %v924_v56 = vld [vmem:[#allocation10 + $0x60] sm:$0xff]  ;;  %v925_v58 = vld [vmem:[#allocation10 + $0x68] sm:$0xff] }
 0x196   :  { %v262_v60 = vpack.c.bf16 %v261_v57, %v261_v57  ;;  %v921_v57 = vld [vmem:[#allocation10 + $0x48] sm:$0xff] }
 0x198   :  { %404 = vmatmul.mubr.bf16.vlgmr.msra.gmra.mrb[4].mxu1 %v262_v60 }
 0x199   :  { %864 = vmatpush1.bf16.msra.mxu1 %v6433_v59 }
 0x19a   :  { %865 = vmatprep.subr.bf16.mxu1 %v6441_v61  ;;  %v5653_v61 = vcombine.high %v920_v54, %v924_v56 }
 0x19d   :  { %866 = vmatpush1.bf16.msra.mxu1 %v6439_v62  ;;  %v5655_v62 = vcombine.high %v921_v57, %v925_v58 }
 0x19e   :  { %867 = vmatprep.subr.bf16.mxu1 %v6447_v63  ;;  %v928_v63 = vld [vmem:[#allocation10 + $0x80] sm:$0xff] }
 0x1a1   :  { %868 = vmatpush1.bf16.msra.mxu1 %v6445_v1  ;;  %v932_v1 = vld [vmem:[#allocation10 + $0xa0] sm:$0xff] }
 0x1a2   :  { %869 = vmatprep.subr.bf16.mxu1 %v6453_v2  ;;  %v929_v2 = vld [vmem:[#allocation10 + $0x88] sm:$0xff] }
 0x1a5   :  { %870 = vmatpush1.bf16.msra.mxu1 %v6451_v3  ;;  %v933_v3 = vld [vmem:[#allocation10 + $0xa8] sm:$0xff] }
 0x1a6   :  { %871 = vmatprep.subr.bf16.mxu1 %v6459_v4  ;;  %v5652_v4 = vcombine.low %v920_v54, %v924_v56  ;;  %v981_v54 = vld [vmem:[#allocation10 + $0x228] sm:$0xff] }
 0x1a9   :  { %872 = vmatpush1.bf16.msra.mxu1 %v6457_v5  ;;  %v5654_v5 = vcombine.low %v921_v57, %v925_v58 }
 0x1aa   :  { %873 = vmatprep.subr.bf16.mxu1 %v6465_v6  ;;  %v5661_v6 = vcombine.high %v928_v63, %v932_v1 }
 0x1ad   :  { %874 = vmatpush1.bf16.msra.mxu1 %v6463_v7  ;;  %v5663_v7 = vcombine.high %v929_v2, %v933_v3 }
 0x1ae   :  { %875 = vmatprep.subr.bf16.mxu1 %v6471_v8  ;;  %v936_v8 = vld [vmem:[#allocation10 + $0xc0] sm:$0xff] }
 0x1b1   :  { %876 = vmatpush1.bf16.msra.mxu1 %v6469_v9  ;;  %v940_v9 = vld [vmem:[#allocation10 + $0xe0] sm:$0xff] }
 0x1b2   :  { %877 = vmatprep.subr.bf16.mxu1 %v6477_v10  ;;  %v937_v10 = vld [vmem:[#allocation10 + $0xc8] sm:$0xff] }
 0x1b5   :  { %878 = vmatpush1.bf16.msra.mxu1 %v6475_v11  ;;  %v941_v11 = vld [vmem:[#allocation10 + $0xe8] sm:$0xff] }
 0x1b6   :  { %879 = vmatprep.subr.bf16.mxu1 %v6483_v12  ;;  %v5660_v12 = vcombine.low %v928_v63, %v932_v1 }
 0x1b9   :  { %880 = vmatpush1.bf16.msra.mxu1 %v6481_v13  ;;  %v5662_v13 = vcombine.low %v929_v2, %v933_v3 }
 0x1ba   :  { %881 = vmatprep.subr.bf16.mxu1 %v6489_v14  ;;  %v5669_v14 = vcombine.high %v936_v8, %v940_v9 }
 0x1bd   :  { %882 = vmatpush1.bf16.msra.mxu1 %v6487_v15  ;;  %v5671_v15 = vcombine.high %v937_v10, %v941_v11 }
 0x1be   :  { %883 = vmatprep.subr.bf16.mxu1 %v6495_v16  ;;  %v944_v16 = vld [vmem:[#allocation10 + $0x100] sm:$0xff] }
 0x1c1   :  { %884 = vmatpush1.bf16.msra.mxu1 %v6493_v17  ;;  %v948_v17 = vld [vmem:[#allocation10 + $0x120] sm:$0xff] }
 0x1c2   :  { %885 = vmatprep.subr.bf16.mxu1 %v6501_v18  ;;  %v945_v18 = vld [vmem:[#allocation10 + $0x108] sm:$0xff]  ;;  %v5676_v28 = vcombine.low %v944_v16, %v948_v17 }
 0x1c5   :  { %886 = vmatpush1.bf16.msra.mxu1 %v6499_v19  ;;  %v949_v19 = vld [vmem:[#allocation10 + $0x128] sm:$0xff] }
 0x1c6   :  { %887 = vmatprep.subr.bf16.mxu1 %v6507_v20  ;;  %v5668_v20 = vcombine.low %v936_v8, %v940_v9 }
 0x1c9   :  { %888 = vmatpush1.bf16.msra.mxu1 %v6505_v21  ;;  %v5670_v21 = vcombine.low %v937_v10, %v941_v11 }
 0x1ca   :  { %889 = vmatprep.subr.bf16.mxu1 %v6513_v22  ;;  %v5677_v22 = vcombine.high %v944_v16, %v948_v17 }
 0x1cd   :  { %890 = vmatpush1.bf16.msra.mxu1 %v6511_v23  ;;  %v5679_v23 = vcombine.high %v945_v18, %v949_v19 }
 0x1ce   :  { %891 = vmatprep.subr.bf16.mxu1 %v6519_v25  ;;  %v956_v25 = vld [vmem:[#allocation10 + $0x160] sm:$0xff] }
 0x1cf   :  { %v5684_v36 = vcombine.low %v952_v24, %v956_v25 }
 0x1d1   :  { %892 = vmatpush1.bf16.msra.mxu1 %v6517_v26  ;;  %v953_v26 = vld [vmem:[#allocation10 + $0x148] sm:$0xff] }
 0x1d2   :  { %893 = vmatprep.subr.bf16.mxu1 %v6525_v29  ;;  %v5678_v29 = vcombine.low %v945_v18, %v949_v19  ;;  %v5687_v31 = vcombine.high %v953_v26, %v957_v27  ;;  %v5686_v37 = vcombine.low %v953_v26, %v957_v27 }
 0x1d5   :  { %894 = vmatpush1.bf16.msra.mxu1 %v6523_v30  ;;  %v5685_v30 = vcombine.high %v952_v24, %v956_v25 }
 0x1d6   :  { %2572 = vmatprep.subr.bf16.mxu1 %v5647_v39 }
 0x26b   :  { %v405_v47 = vpop.f32.mrb[4].mxu1 }
 0x26c   :  { %v406_v48 = vadd.f32 %v405_v47, %v284_v45  ;;  %v407_v49 = vpop.f32.mrb[5].mxu1  ;;  %v969_v45 = vld [vmem:[#allocation10 + $0x1c8] sm:$0xff]  ;;  %v5692_v47 = vcombine.low %v960_v32, %v964_v33 }
 0x26d   :  { %v408_v50 = vadd.f32 %v407_v49, %v288_v46  ;;  %v409_v51 = vpop.f32.mrb[6].mxu1  ;;  %v973_v46 = vld [vmem:[#allocation10 + $0x1e8] sm:$0xff]  ;;  %v5701_v49 = vcombine.high %v968_v40, %v972_v43 }
 0x26e   :  { %v412_v52 = vmax.f32 %v406_v48, 0.0  ;;  %v410_v53 = vpop.f32.mrb[7].mxu1  ;;  %v976_v51 = vld [vmem:[#allocation10 + $0x200] sm:$0xff]  ;;  %v5702_v56 = vcombine.low %v969_v45, %v973_v46 }
 0x26f   :  { %v413_v55 = vmax.f32 %v408_v50, 0.0  ;;  %v5703_v50 = vcombine.high %v969_v45, %v973_v46  ;;  %v977_v53 = vld [vmem:[#allocation10 + $0x208] sm:$0xff] }
 0x270   :  { %v414_v60 = vpack.c.bf16 %v412_v52, %v412_v52  ;;  %v980_v52 = vld [vmem:[#allocation10 + $0x220] sm:$0xff]  ;;  %v5711_v58 = vcombine.high %v977_v53, %v981_v54  ;;  %v5710_v1 = vcombine.low %v977_v53, %v981_v54  ;;  %v1029_v45 = vld [vmem:[#allocation10 + $0x3a8] sm:$0xff] }
 0x271   :  { %v415_v59 = vpack.c.bf16 %v413_v55, %v413_v55  ;;  %v5700_v55 = vcombine.low %v968_v40, %v972_v43  ;;  %v5709_v57 = vcombine.high %v976_v51, %v980_v52  ;;  %v5708_v63 = vcombine.low %v976_v51, %v980_v52  ;;  %v1025_v40 = vld [vmem:[#allocation10 + $0x388] sm:$0xff] }
 0x272   :  { %v1033_v51 = vld [vmem:[#allocation10 + $0x3c8] sm:$0xff] }
 0x273   :  { %854 = vmatprep.mubr.bf16.mxu0 %v415_v59  ;;  %895 = vmatprep.mubr.bf16.mxu1 %v415_v59  ;;  %v984_v59 = vld [vmem:[#allocation10 + $0x240] sm:$0xff]  ;;  %v1037_v53 = vld [vmem:[#allocation10 + $0x3e8] sm:$0xff] }
 0x274   :  { %855 = vmatmul.mubr.bf16.vlgmr.msra.gmra.mrb[0].mxu0 %v414_v60  ;;  %896 = vmatmul.mubr.bf16.vlgmr.msra.gmra.mrb[8].mxu1 %v414_v60  ;;  %v988_v60 = vld [vmem:[#allocation10 + $0x260] sm:$0xff] }
 0x275   :  { %2491 = vmatpush1.bf16.msra.mxu0 %v5644_v35  ;;  %2573 = vmatpush1.bf16.msra.mxu1 %v5646_v38  ;;  %v965_v35 = vld [vmem:[#allocation10 + $0x1a8] sm:$0xff]  ;;  %v5693_v38 = vcombine.high %v960_v32, %v964_v33  ;;  %v5717_v2 = vcombine.high %v984_v59, %v988_v60  ;;  %v5716_v8 = vcombine.low %v984_v59, %v988_v60 }
 0x276   :  { %2492 = vmatprep.subr.bf16.mxu0 %v5653_v61  ;;  %2574 = vmatprep.subr.bf16.mxu1 %v5655_v62  ;;  %v5695_v39 = vcombine.high %v961_v34, %v965_v35  ;;  %v5694_v48 = vcombine.low %v961_v34, %v965_v35  ;;  %v985_v61 = vld [vmem:[#allocation10 + $0x248] sm:$0xff] }
 0x277   :  { %v989_v62 = vld [vmem:[#allocation10 + $0x268] sm:$0xff] }
 0x278   :  { %v5719_v3 = vcombine.high %v985_v61, %v989_v62  ;;  %v5718_v9 = vcombine.low %v985_v61, %v989_v62  ;;  %v1041_v59 = vld [vmem:[#allocation10 + $0x408] sm:$0xff] }
 0x279   :  { %2493 = vmatpush1.bf16.msra.mxu0 %v5652_v4  ;;  %2575 = vmatpush1.bf16.msra.mxu1 %v5654_v5  ;;  %v992_v4 = vld [vmem:[#allocation10 + $0x280] sm:$0xff]  ;;  %v1045_v61 = vld [vmem:[#allocation10 + $0x428] sm:$0xff] }
 0x27a   :  { %2494 = vmatprep.subr.bf16.mxu0 %v5661_v6  ;;  %2576 = vmatprep.subr.bf16.mxu1 %v5663_v7  ;;  %v996_v5 = vld [vmem:[#allocation10 + $0x2a0] sm:$0xff]  ;;  %v993_v6 = vld [vmem:[#allocation10 + $0x288] sm:$0xff] }
 0x27b   :  { %v997_v7 = vld [vmem:[#allocation10 + $0x2a8] sm:$0xff]  ;;  %v5725_v10 = vcombine.high %v992_v4, %v996_v5  ;;  %v5724_v16 = vcombine.low %v992_v4, %v996_v5 }
 0x27c   :  { %v5727_v11 = vcombine.high %v993_v6, %v997_v7  ;;  %v5726_v17 = vcombine.low %v993_v6, %v997_v7 }
 0x27d   :  { %2495 = vmatpush1.bf16.msra.mxu0 %v5660_v12  ;;  %2577 = vmatpush1.bf16.msra.mxu1 %v5662_v13  ;;  %v1000_v12 = vld [vmem:[#allocation10 + $0x2c0] sm:$0xff] }
 0x27e   :  { %2496 = vmatprep.subr.bf16.mxu0 %v5669_v14  ;;  %2578 = vmatprep.subr.bf16.mxu1 %v5671_v15  ;;  %v1004_v13 = vld [vmem:[#allocation10 + $0x2e0] sm:$0xff]  ;;  %v1001_v14 = vld [vmem:[#allocation10 + $0x2c8] sm:$0xff] }
 0x27f   :  { %v1005_v15 = vld [vmem:[#allocation10 + $0x2e8] sm:$0xff]  ;;  %v5733_v18 = vcombine.high %v1000_v12, %v1004_v13  ;;  %v5732_v24 = vcombine.low %v1000_v12, %v1004_v13 }
 0x280   :  { %v5735_v19 = vcombine.high %v1001_v14, %v1005_v15  ;;  %v5734_v25 = vcombine.low %v1001_v14, %v1005_v15 }
 0x281   :  { %2497 = vmatpush1.bf16.msra.mxu0 %v5668_v20  ;;  %2579 = vmatpush1.bf16.msra.mxu1 %v5670_v21  ;;  %v1008_v20 = vld [vmem:[#allocation10 + $0x300] sm:$0xff] }
 0x282   :  { %2498 = vmatprep.subr.bf16.mxu0 %v5677_v22  ;;  %2580 = vmatprep.subr.bf16.mxu1 %v5679_v23  ;;  %v1012_v21 = vld [vmem:[#allocation10 + $0x320] sm:$0xff]  ;;  %v1009_v22 = vld [vmem:[#allocation10 + $0x308] sm:$0xff] }
 0x283   :  { %v1013_v23 = vld [vmem:[#allocation10 + $0x328] sm:$0xff]  ;;  %v5741_v26 = vcombine.high %v1008_v20, %v1012_v21  ;;  %v5740_v32 = vcombine.low %v1008_v20, %v1012_v21  ;;  %v1048_v20 = vld [vmem:[#allocation10 + $0x440] sm:$0xff] }
 0x284   :  { %v5743_v27 = vcombine.high %v1009_v22, %v1013_v23  ;;  %v5742_v33 = vcombine.low %v1009_v22, %v1013_v23  ;;  %v1052_v22 = vld [vmem:[#allocation10 + $0x460] sm:$0xff]  ;;  %v1049_v23 = vld [vmem:[#allocation10 + $0x448] sm:$0xff] }
 0x285   :  { %2499 = vmatpush1.bf16.msra.mxu0 %v5676_v28  ;;  %2581 = vmatpush1.bf16.msra.mxu1 %v5678_v29  ;;  %v1016_v28 = vld [vmem:[#allocation10 + $0x340] sm:$0xff] }
 0x286   :  { %2500 = vmatprep.subr.bf16.mxu0 %v5685_v30  ;;  %2582 = vmatprep.subr.bf16.mxu1 %v5687_v31  ;;  %v1020_v29 = vld [vmem:[#allocation10 + $0x360] sm:$0xff]  ;;  %v1017_v30 = vld [vmem:[#allocation10 + $0x348] sm:$0xff] }
 0x287   :  { %v1021_v31 = vld [vmem:[#allocation10 + $0x368] sm:$0xff]  ;;  %v5749_v34 = vcombine.high %v1016_v28, %v1020_v29 }
 0x288   :  { %v5751_v35 = vcombine.high %v1017_v30, %v1021_v31 }
 0x289   :  { %2501 = vmatpush1.bf16.msra.mxu0 %v5684_v36  ;;  %2583 = vmatpush1.bf16.msra.mxu1 %v5686_v37  ;;  %v5748_v36 = vcombine.low %v1016_v28, %v1020_v29  ;;  %v5750_v37 = vcombine.low %v1017_v30, %v1021_v31  ;;  %v5781_v28 = vcombine.high %v1048_v20, %v1052_v22  ;;  %v1060_v30 = vld [vmem:[#allocation10 + $0x4a0] sm:$0xff]  ;;  %v1057_v31 = vld [vmem:[#allocation10 + $0x488] sm:$0xff] }
 0x28a   :  { %2502 = vmatprep.subr.bf16.mxu0 %v5693_v38  ;;  %2584 = vmatprep.subr.bf16.mxu1 %v5695_v39  ;;  %v1024_v38 = vld [vmem:[#allocation10 + $0x380] sm:$0xff] }
 0x28b   :  { %v1028_v39 = vld [vmem:[#allocation10 + $0x3a0] sm:$0xff] }
 0x28c   :  { %v5757_v43 = vcombine.high %v1024_v38, %v1028_v39  ;;  %v5756_v46 = vcombine.low %v1024_v38, %v1028_v39  ;;  %v1064_v38 = vld [vmem:[#allocation10 + $0x4c0] sm:$0xff] }
 0x28d   :  { %2503 = vmatpush1.bf16.msra.mxu0 %v5692_v47  ;;  %2585 = vmatpush1.bf16.msra.mxu1 %v5694_v48  ;;  %v5758_v47 = vcombine.low %v1025_v40, %v1029_v45  ;;  %v5759_v48 = vcombine.high %v1025_v40, %v1029_v45  ;;  %v1068_v39 = vld [vmem:[#allocation10 + $0x4e0] sm:$0xff]  ;;  %v1065_v40 = vld [vmem:[#allocation10 + $0x4c8] sm:$0xff] }
 0x28e   :  { %2504 = vmatprep.subr.bf16.mxu0 %v5701_v49  ;;  %2586 = vmatprep.subr.bf16.mxu1 %v5703_v50  ;;  %v1032_v49 = vld [vmem:[#allocation10 + $0x3c0] sm:$0xff] }
 0x28f   :  { %v1036_v50 = vld [vmem:[#allocation10 + $0x3e0] sm:$0xff] }
 0x290   :  { %v5765_v52 = vcombine.high %v1032_v49, %v1036_v50  ;;  %v5764_v54 = vcombine.low %v1032_v49, %v1036_v50  ;;  %v1072_v49 = vld [vmem:[#allocation10 + $0x500] sm:$0xff] }
 0x291   :  { %2505 = vmatpush1.bf16.msra.mxu0 %v5700_v55  ;;  %2587 = vmatpush1.bf16.msra.mxu1 %v5702_v56  ;;  %v5766_v55 = vcombine.low %v1033_v51, %v1037_v53  ;;  %v5767_v56 = vcombine.high %v1033_v51, %v1037_v53  ;;  %v1076_v50 = vld [vmem:[#allocation10 + $0x520] sm:$0xff]  ;;  %v1073_v51 = vld [vmem:[#allocation10 + $0x508] sm:$0xff]  ;;  %v5796_v53 = vcombine.low %v1064_v38, %v1068_v39 }
 0x292   :  { %2506 = vmatprep.subr.bf16.mxu0 %v5709_v57  ;;  %2588 = vmatprep.subr.bf16.mxu1 %v5711_v58  ;;  %v1040_v57 = vld [vmem:[#allocation10 + $0x400] sm:$0xff] }
 0x293   :  { %v1044_v58 = vld [vmem:[#allocation10 + $0x420] sm:$0xff] }
 0x294   :  { %v5773_v60 = vcombine.high %v1040_v57, %v1044_v58  ;;  %v5772_v62 = vcombine.low %v1040_v57, %v1044_v58  ;;  %v1080_v57 = vld [vmem:[#allocation10 + $0x540] sm:$0xff] }
 0x295   :  { %2507 = vmatpush1.bf16.msra.mxu0 %v5708_v63  ;;  %2589 = vmatpush1.bf16.msra.mxu1 %v5710_v1  ;;  %v5774_v63 = vcombine.low %v1041_v59, %v1045_v61  ;;  %v5775_v1 = vcombine.high %v1041_v59, %v1045_v61  ;;  %v1084_v58 = vld [vmem:[#allocation10 + $0x560] sm:$0xff]  ;;  %v1081_v59 = vld [vmem:[#allocation10 + $0x548] sm:$0xff]  ;;  %v5804_v61 = vcombine.low %v1072_v49, %v1076_v50 }
 0x296   :  { %2508 = vmatprep.subr.bf16.mxu0 %v5717_v2  ;;  %2590 = vmatprep.subr.bf16.mxu1 %v5719_v3  ;;  %v7555_v2 = vld [vmem:[%s7763_s6] sm:$0xf]  ;;  %v7558_v3 = vsub.s32 3, %v7542_v41 }
 0x297   :  { %v485_v4 = vrot.slane %v7555_v2, %v7545_v42  ;;  %v489_v5 = vrot.slane %v7555_v2, %v7548_v44 }
 0x298   :  { %v497_v6 = vrot.slane %v7555_v2, %v7558_v3 }
 0x299   :  { %2509 = vmatpush1.bf16.msra.mxu0 %v5716_v8  ;;  %2591 = vmatpush1.bf16.msra.mxu1 %v5718_v9 }
 0x29a   :  { %2510 = vmatprep.subr.bf16.mxu0 %v5725_v10  ;;  %2592 = vmatprep.subr.bf16.mxu1 %v5727_v11 }
 0x29d   :  { %2511 = vmatpush1.bf16.msra.mxu0 %v5724_v16  ;;  %2593 = vmatpush1.bf16.msra.mxu1 %v5726_v17 }
 0x29e   :  { %2512 = vmatprep.subr.bf16.mxu0 %v5733_v18  ;;  %2594 = vmatprep.subr.bf16.mxu1 %v5735_v19 }
 0x2a1   :  { %2513 = vmatpush1.bf16.msra.mxu0 %v5732_v24  ;;  %2595 = vmatpush1.bf16.msra.mxu1 %v5734_v25  ;;  %v1053_v24 = vld [vmem:[#allocation10 + $0x468] sm:$0xff] }
 0x2a2   :  { %2514 = vmatprep.subr.bf16.mxu0 %v5741_v26  ;;  %2596 = vmatprep.subr.bf16.mxu1 %v5743_v27  ;;  %v1056_v27 = vld [vmem:[#allocation10 + $0x480] sm:$0xff]  ;;  %v5783_v29 = vcombine.high %v1049_v23, %v1053_v24 }
 0x2a3   :  { %v5788_v45 = vcombine.low %v1056_v27, %v1060_v30 }
 0x2a5   :  { %2515 = vmatpush1.bf16.msra.mxu0 %v5740_v32  ;;  %2597 = vmatpush1.bf16.msra.mxu1 %v5742_v33  ;;  %v1061_v32 = vld [vmem:[#allocation10 + $0x4a8] sm:$0xff] }
 0x2a6   :  { %2516 = vmatprep.subr.bf16.mxu0 %v5749_v34  ;;  %2598 = vmatprep.subr.bf16.mxu1 %v5751_v35  ;;  %v5780_v34 = vcombine.low %v1048_v20, %v1052_v22  ;;  %v5782_v35 = vcombine.low %v1049_v23, %v1053_v24  ;;  %v1108_v22 = vld [vmem:[#allocation10 + $0x620] sm:$0xff]  ;;  %v1105_v23 = vld [vmem:[#allocation10 + $0x608] sm:$0xff] }
 0x2a7   :  { %v1109_v24 = vld [vmem:[#allocation10 + $0x628] sm:$0xff] }
 0x2a9   :  { %2517 = vmatpush1.bf16.msra.mxu0 %v5748_v36  ;;  %2599 = vmatpush1.bf16.msra.mxu1 %v5750_v37  ;;  %v5789_v36 = vcombine.high %v1056_v27, %v1060_v30  ;;  %v5791_v37 = vcombine.high %v1057_v31, %v1061_v32  ;;  %v5839_v30 = vcombine.high %v1105_v23, %v1109_v24 }
 0x2aa   :  { %2518 = vmatprep.subr.bf16.mxu0 %v5757_v43  ;;  %2600 = vmatprep.subr.bf16.mxu1 %v5759_v48  ;;  %v1069_v43 = vld [vmem:[#allocation10 + $0x4e8] sm:$0xff] }
 0x2ab   :  { %v5799_v48 = vcombine.high %v1065_v40, %v1069_v43 }
 0x2ad   :  { %2519 = vmatpush1.bf16.msra.mxu0 %v5756_v46  ;;  %2601 = vmatpush1.bf16.msra.mxu1 %v5758_v47  ;;  %v5790_v46 = vcombine.low %v1057_v31, %v1061_v32  ;;  %v5797_v47 = vcombine.high %v1064_v38, %v1068_v39  ;;  %v1112_v31 = vld [vmem:[#allocation10 + $0x640] sm:$0xff] }
 0x2ae   :  { %2520 = vmatprep.subr.bf16.mxu0 %v5765_v52  ;;  %2602 = vmatprep.subr.bf16.mxu1 %v5767_v56  ;;  %v1077_v52 = vld [vmem:[#allocation10 + $0x528] sm:$0xff]  ;;  %v1116_v32 = vld [vmem:[#allocation10 + $0x660] sm:$0xff] }
 0x2af   :  { %v5807_v56 = vcombine.high %v1073_v51, %v1077_v52  ;;  %v5845_v38 = vcombine.high %v1112_v31, %v1116_v32 }
 0x2b1   :  { %2521 = vmatpush1.bf16.msra.mxu0 %v5764_v54  ;;  %2603 = vmatpush1.bf16.msra.mxu1 %v5766_v55  ;;  %v5798_v54 = vcombine.low %v1065_v40, %v1069_v43  ;;  %v5805_v55 = vcombine.high %v1072_v49, %v1076_v50  ;;  %v1120_v40 = vld [vmem:[#allocation10 + $0x680] sm:$0xff] }
 0x2b2   :  { %2531 = vmatprep.subr.bf16.mxu0 %v5773_v60  ;;  %2613 = vmatprep.subr.bf16.mxu1 %v5775_v1  ;;  %v1085_v60 = vld [vmem:[#allocation10 + $0x568] sm:$0xff]  ;;  %v1124_v43 = vld [vmem:[#allocation10 + $0x6a0] sm:$0xff] }
 0x2b3   :  { %v5815_v1 = vcombine.high %v1081_v59, %v1085_v60  ;;  %v5853_v49 = vcombine.high %v1120_v40, %v1124_v43 }
 0x347   :  { %v856_v7 = vpop.f32.mrb[0].mxu0  ;;  %v7566_v8 = vpop.f32.mrb[8].mxu1 }
 0x348   :  { %v857_v9 = vadd.f32 %v856_v7, %v485_v4  ;;  %v858_v10 = vpop.f32.mrb[1].mxu0  ;;  %v899_v11 = vpop.f32.mrb[9].mxu1  ;;  %v1088_v4 = vld [vmem:[#allocation10 + $0x580] sm:$0xff]  ;;  %v1093_v7 = vld [vmem:[#allocation10 + $0x5a8] sm:$0xff] }
 0x349   :  { %v859_v12 = vadd.f32 %v858_v10, %v489_v5  ;;  %v900_v13 = vadd.f32 %v899_v11, %v497_v6  ;;  %v860_v14 = vpop.f32.mrb[2].mxu0  ;;  %v901_v15 = vpop.f32.mrb[10].mxu1  ;;  %v1092_v5 = vld [vmem:[#allocation10 + $0x5a0] sm:$0xff]  ;;  %v1089_v6 = vld [vmem:[#allocation10 + $0x588] sm:$0xff]  ;;  %v5814_v10 = vcombine.low %v1081_v59, %v1085_v60 }
 0x34a   :  { %v904_v16 = vmax.f32 %v857_v9, 0.0  ;;  %v861_v17 = vpop.f32.mrb[3].mxu0  ;;  %v902_v18 = vpop.f32.mrb[11].mxu1  ;;  %v5812_v9 = vcombine.low %v1080_v57, %v1084_v58  ;;  %v5821_v11 = vcombine.high %v1088_v4, %v1092_v5  ;;  %v1100_v14 = vld [vmem:[#allocation10 + $0x5e0] sm:$0xff]  ;;  %v1097_v15 = vld [vmem:[#allocation10 + $0x5c8] sm:$0xff] }
 0x34b   :  { %v905_v19 = vmax.f32 %v859_v12, 0.0  ;;  %v907_v21 = vmax.f32 %v900_v13, 0.0  ;;  %v5823_v12 = vcombine.high %v1089_v6, %v1093_v7  ;;  %v1096_v13 = vld [vmem:[#allocation10 + $0x5c0] sm:$0xff]  ;;  %v5820_v17 = vcombine.low %v1088_v4, %v1092_v5 }
 0x34c   :  { %v7570_v26 = vpack.c.bf16 %v904_v16, %v904_v16  ;;  %v1101_v16 = vld [vmem:[#allocation10 + $0x5e8] sm:$0xff]  ;;  %v5822_v18 = vcombine.low %v1089_v6, %v1093_v7  ;;  %v5828_v27 = vcombine.low %v1096_v13, %v1100_v14  ;;  %v1136_v59 = vld [vmem:[#allocation10 + $0x700] sm:$0xff] }
 0x34d   :  { %v7568_v25 = vpack.c.bf16 %v905_v19, %v905_v19  ;;  %v7574_v33 = vpack.c.bf16 %v907_v21, %v907_v21  ;;  %v5829_v19 = vcombine.high %v1096_v13, %v1100_v14  ;;  %v5831_v20 = vcombine.high %v1097_v15, %v1101_v16  ;;  %v1104_v21 = vld [vmem:[#allocation10 + $0x600] sm:$0xff] }
 0x34e   :  { %v1140_v60 = vld [vmem:[#allocation10 + $0x720] sm:$0xff]  ;;  %v7581_v13 = vsub.s32 2, %v7542_v41 }
 0x34f   :  { %2522 = vmatprep.mubr.bf16.mxu0 %v7568_v25  ;;  %2604 = vmatprep.mubr.bf16.mxu1 %v7568_v25  ;;  %v5869_v4 = vcombine.high %v1136_v59, %v1140_v60  ;;  %v1144_v6 = vld [vmem:[#allocation10 + $0x740] sm:$0xff] }
 0x350   :  { %2523 = vmatmul.mubr.bf16.vlgmr.msra.gmra.mrb[4].mxu0 %v7570_v26  ;;  %2605 = vmatmul.mubr.bf16.vlgmr.msra.gmra.mrb[12].mxu1 %v7570_v26  ;;  %v1148_v7 = vld [vmem:[#allocation10 + $0x760] sm:$0xff] }
 0x351   :  { %2532 = vmatpush1.bf16.msra.mxu0 %v5772_v62  ;;  %2614 = vmatpush1.bf16.msra.mxu1 %v5774_v63  ;;  %v5806_v62 = vcombine.low %v1073_v51, %v1077_v52  ;;  %v5813_v63 = vcombine.high %v1080_v57, %v1084_v58  ;;  %v1128_v51 = vld [vmem:[#allocation10 + $0x6c0] sm:$0xff]  ;;  %v5877_v14 = vcombine.high %v1144_v6, %v1148_v7 }
 0x352   :  { %2563 = vmatprep.mubr.bf16.mxu0 %v7574_v33  ;;  %2645 = vmatprep.mubr.bf16.mxu1 %v7574_v33  ;;  %v1132_v52 = vld [vmem:[#allocation10 + $0x6e0] sm:$0xff] }
 0x353   :  { %2533 = vmatprep.subr.bf16.mxu0 %v5781_v28  ;;  %2615 = vmatprep.subr.bf16.mxu1 %v5783_v29  ;;  %v5830_v28 = vcombine.low %v1097_v15, %v1101_v16  ;;  %v5837_v29 = vcombine.high %v1104_v21, %v1108_v22  ;;  %v5861_v57 = vcombine.high %v1128_v51, %v1132_v52  ;;  %v1152_v16 = vld [vmem:[#allocation10 + $0x780] sm:$0xff] }
 0x355   :  { %2534 = vmatpush1.bf16.msra.mxu0 %v5780_v34  ;;  %2616 = vmatpush1.bf16.msra.mxu1 %v5782_v35  ;;  %v1113_v34 = vld [vmem:[#allocation10 + $0x648] sm:$0xff] }
 0x356   :  { %2535 = vmatprep.subr.bf16.mxu0 %v5789_v36  ;;  %2617 = vmatprep.subr.bf16.mxu1 %v5791_v37  ;;  %v1117_v35 = vld [vmem:[#allocation10 + $0x668] sm:$0xff]  ;;  %v5836_v36 = vcombine.low %v1104_v21, %v1108_v22  ;;  %v5838_v37 = vcombine.low %v1105_v23, %v1109_v24  ;;  %v493_v22 = vrot.slane %v7555_v2, %v7581_v13  ;;  %v918_v2 = vld [vmem:[#allocation10 + $0x30] sm:$0xff] }
 0x357   :  { %v5847_v39 = vcombine.high %v1113_v34, %v1117_v35 }
 0x359   :  { %2536 = vmatpush1.bf16.msra.mxu0 %v5788_v45  ;;  %2618 = vmatpush1.bf16.msra.mxu1 %v5790_v46  ;;  %v1121_v45 = vld [vmem:[#allocation10 + $0x688] sm:$0xff] }
 0x35a   :  { %2537 = vmatprep.subr.bf16.mxu0 %v5797_v47  ;;  %2619 = vmatprep.subr.bf16.mxu1 %v5799_v48  ;;  %v1125_v46 = vld [vmem:[#allocation10 + $0x6a8] sm:$0xff]  ;;  %v5844_v47 = vcombine.low %v1112_v31, %v1116_v32  ;;  %v5846_v48 = vcombine.low %v1113_v34, %v1117_v35  ;;  %v898_v34 = vadd.f32 %v7566_v8, %v493_v22  ;;  %v923_v8 = vld [vmem:[#allocation10 + $0x58] sm:$0xff] }
 0x35b   :  { %v5855_v50 = vcombine.high %v1121_v45, %v1125_v46  ;;  %v955_v22 = vld [vmem:[#allocation10 + $0x158] sm:$0xff] }
 0x35d   :  { %2538 = vmatpush1.bf16.msra.mxu0 %v5796_v53  ;;  %2620 = vmatpush1.bf16.msra.mxu1 %v5798_v54  ;;  %v1129_v53 = vld [vmem:[#allocation10 + $0x6c8] sm:$0xff] }
 0x35e   :  { %2539 = vmatprep.subr.bf16.mxu0 %v5805_v55  ;;  %2621 = vmatprep.subr.bf16.mxu1 %v5807_v56  ;;  %v1133_v54 = vld [vmem:[#allocation10 + $0x6e8] sm:$0xff]  ;;  %v5852_v55 = vcombine.low %v1120_v40, %v1124_v43  ;;  %v5854_v56 = vcombine.low %v1121_v45, %v1125_v46  ;;  %v906_v45 = vmax.f32 %v898_v34, 0.0  ;;  %v967_v34 = vld [vmem:[#allocation10 + $0x1b8] sm:$0xff] }
 0x35f   :  { %v5863_v58 = vcombine.high %v1129_v53, %v1133_v54 }
 0x361   :  { %2540 = vmatpush1.bf16.msra.mxu0 %v5804_v61  ;;  %2622 = vmatpush1.bf16.msra.mxu1 %v5806_v62  ;;  %v1137_v61 = vld [vmem:[#allocation10 + $0x708] sm:$0xff] }
 0x362   :  { %2541 = vmatprep.subr.bf16.mxu0 %v5813_v63  ;;  %2623 = vmatprep.subr.bf16.mxu1 %v5815_v1  ;;  %v1141_v62 = vld [vmem:[#allocation10 + $0x728] sm:$0xff]  ;;  %v5860_v63 = vcombine.low %v1128_v51, %v1132_v52  ;;  %v5862_v1 = vcombine.low %v1129_v53, %v1133_v54  ;;  %v7586_v52 = vpack.c.bf16 %v906_v45, %v906_v45 }
 0x363   :  { %v5871_v5 = vcombine.high %v1137_v61, %v1141_v62 }
 0x365   :  { %2542 = vmatpush1.bf16.msra.mxu0 %v5812_v9  ;;  %2624 = vmatpush1.bf16.msra.mxu1 %v5814_v10  ;;  %v1145_v9 = vld [vmem:[#allocation10 + $0x748] sm:$0xff] }
 0x366   :  { %2543 = vmatprep.subr.bf16.mxu0 %v5821_v11  ;;  %2625 = vmatprep.subr.bf16.mxu1 %v5823_v12  ;;  %v1149_v10 = vld [vmem:[#allocation10 + $0x768] sm:$0xff]  ;;  %v5868_v11 = vcombine.low %v1136_v59, %v1140_v60  ;;  %v5870_v12 = vcombine.low %v1137_v61, %v1141_v62  ;;  %v935_v59 = vld [vmem:[#allocation10 + $0xb8] sm:$0xff] }
 0x367   :  { %v5879_v15 = vcombine.high %v1145_v9, %v1149_v10  ;;  %v5878_v21 = vcombine.low %v1145_v9, %v1149_v10 }
 0x369   :  { %2544 = vmatpush1.bf16.msra.mxu0 %v5820_v17  ;;  %2626 = vmatpush1.bf16.msra.mxu1 %v5822_v18  ;;  %v1156_v17 = vld [vmem:[#allocation10 + $0x7a0] sm:$0xff]  ;;  %v1153_v18 = vld [vmem:[#allocation10 + $0x788] sm:$0xff] }
 0x36a   :  { %2545 = vmatprep.subr.bf16.mxu0 %v5829_v19  ;;  %2627 = vmatprep.subr.bf16.mxu1 %v5831_v20  ;;  %v1157_v19 = vld [vmem:[#allocation10 + $0x7a8] sm:$0xff]  ;;  %v5876_v20 = vcombine.low %v1144_v6, %v1148_v7  ;;  %v5885_v23 = vcombine.high %v1152_v16, %v1156_v17  ;;  %v5884_v31 = vcombine.low %v1152_v16, %v1156_v17  ;;  %v943_v6 = vld [vmem:[#allocation10 + $0xf8] sm:$0xff] }
 0x36b   :  { %v5887_v24 = vcombine.high %v1153_v18, %v1157_v19  ;;  %v5886_v32 = vcombine.low %v1153_v18, %v1157_v19 }
 0x36d   :  { %2546 = vmatpush1.bf16.msra.mxu0 %v5828_v27  ;;  %2628 = vmatpush1.bf16.msra.mxu1 %v5830_v28  ;;  %v1160_v27 = vld [vmem:[#allocation10 + $0x7c0] sm:$0xff] }
 0x36e   :  { %2547 = vmatprep.subr.bf16.mxu0 %v5837_v29  ;;  %2629 = vmatprep.subr.bf16.mxu1 %v5839_v30  ;;  %v1164_v28 = vld [vmem:[#allocation10 + $0x7e0] sm:$0xff]  ;;  %v1161_v29 = vld [vmem:[#allocation10 + $0x7c8] sm:$0xff] }
 0x36f   :  { %v1165_v30 = vld [vmem:[#allocation10 + $0x7e8] sm:$0xff]  ;;  %v5893_v35 = vcombine.high %v1160_v27, %v1164_v28  ;;  %v5892_v40 = vcombine.low %v1160_v27, %v1164_v28 }
 0x370   :  { %v5894_v43 = vcombine.low %v1161_v29, %v1165_v30 }
 0x371   :  { %2548 = vmatpush1.bf16.msra.mxu0 %v5836_v36  ;;  %2630 = vmatpush1.bf16.msra.mxu1 %v5838_v37  ;;  %v5895_v36 = vcombine.high %v1161_v29, %v1165_v30  ;;  %v914_v37 = vld [vmem:[#allocation10 + $0x10] sm:$0xff] }
 0x372   :  { %2549 = vmatprep.subr.bf16.mxu0 %v5845_v38  ;;  %2631 = vmatprep.subr.bf16.mxu1 %v5847_v39  ;;  %v915_v38 = vld [vmem:[#allocation10 + $0x18] sm:$0xff]  ;;  %v5649_v46 = vcombine.high %v914_v37, %v918_v2  ;;  %v5648_v51 = vcombine.low %v914_v37, %v918_v2  ;;  %v962_v30 = vld [vmem:[#allocation10 + $0x190] sm:$0xff] }
 0x373   :  { %v919_v39 = vld [vmem:[#allocation10 + $0x38] sm:$0xff] }
 0x374   :  { %v5650_v53 = vcombine.low %v915_v38, %v919_v39 }
 0x375   :  { %2550 = vmatpush1.bf16.msra.mxu0 %v5844_v47  ;;  %2632 = vmatpush1.bf16.msra.mxu1 %v5846_v48  ;;  %v5651_v47 = vcombine.high %v915_v38, %v919_v39  ;;  %v922_v48 = vld [vmem:[#allocation10 + $0x50] sm:$0xff] }
 0x376   :  { %2551 = vmatprep.subr.bf16.mxu0 %v5853_v49  ;;  %2633 = vmatprep.subr.bf16.mxu1 %v5855_v50  ;;  %v926_v49 = vld [vmem:[#allocation10 + $0x70] sm:$0xff]  ;;  %v927_v50 = vld [vmem:[#allocation10 + $0x78] sm:$0xff] }
 0x377   :  { %v5657_v54 = vcombine.high %v922_v48, %v926_v49  ;;  %v5656_v60 = vcombine.low %v922_v48, %v926_v49  ;;  %v5658_v61 = vcombine.low %v923_v8, %v927_v50  ;;  %v970_v38 = vld [vmem:[#allocation10 + $0x1d0] sm:$0xff] }
 0x378   :  { %v974_v39 = vld [vmem:[#allocation10 + $0x1f0] sm:$0xff] }
 0x379   :  { %2552 = vmatpush1.bf16.msra.mxu0 %v5852_v55  ;;  %2634 = vmatpush1.bf16.msra.mxu1 %v5854_v56  ;;  %v5659_v55 = vcombine.high %v923_v8, %v927_v50  ;;  %v930_v56 = vld [vmem:[#allocation10 + $0x90] sm:$0xff]  ;;  %v979_v50 = vld [vmem:[#allocation10 + $0x218] sm:$0xff] }
 0x37a   :  { %2553 = vmatprep.subr.bf16.mxu0 %v5861_v57  ;;  %2635 = vmatprep.subr.bf16.mxu1 %v5863_v58  ;;  %v934_v57 = vld [vmem:[#allocation10 + $0xb0] sm:$0xff]  ;;  %v931_v58 = vld [vmem:[#allocation10 + $0x98] sm:$0xff] }
 0x37b   :  { %v5665_v62 = vcombine.high %v930_v56, %v934_v57  ;;  %v5664_v7 = vcombine.low %v930_v56, %v934_v57  ;;  %v5666_v9 = vcombine.low %v931_v58, %v935_v59  ;;  %v978_v49 = vld [vmem:[#allocation10 + $0x210] sm:$0xff] }
 0x37c   :  { %v982_v8 = vld [vmem:[#allocation10 + $0x230] sm:$0xff] }
 0x37d   :  { %2554 = vmatpush1.bf16.msra.mxu0 %v5860_v63  ;;  %2636 = vmatpush1.bf16.msra.mxu1 %v5862_v1  ;;  %v5667_v63 = vcombine.high %v931_v58, %v935_v59  ;;  %v938_v1 = vld [vmem:[#allocation10 + $0xd0] sm:$0xff]  ;;  %v987_v59 = vld [vmem:[#allocation10 + $0x258] sm:$0xff] }
 0x37e   :  { %2555 = vmatprep.subr.bf16.mxu0 %v5869_v4  ;;  %2637 = vmatprep.subr.bf16.mxu1 %v5871_v5  ;;  %v942_v4 = vld [vmem:[#allocation10 + $0xf0] sm:$0xff]  ;;  %v939_v5 = vld [vmem:[#allocation10 + $0xd8] sm:$0xff] }
 0x37f   :  { %v5673_v10 = vcombine.high %v938_v1, %v942_v4  ;;  %v5672_v16 = vcombine.low %v938_v1, %v942_v4  ;;  %v5674_v17 = vcombine.low %v939_v5, %v943_v6  ;;  %v986_v57 = vld [vmem:[#allocation10 + $0x250] sm:$0xff] }
 0x380   :  { %v990_v58 = vld [vmem:[#allocation10 + $0x270] sm:$0xff] }
 0x381   :  { %2556 = vmatpush1.bf16.msra.mxu0 %v5868_v11  ;;  %2638 = vmatpush1.bf16.msra.mxu1 %v5870_v12  ;;  %v5675_v11 = vcombine.high %v939_v5, %v943_v6  ;;  %v946_v12 = vld [vmem:[#allocation10 + $0x110] sm:$0xff]  ;;  %v995_v6 = vld [vmem:[#allocation10 + $0x298] sm:$0xff] }
 0x382   :  { %2557 = vmatprep.subr.bf16.mxu0 %v5877_v14  ;;  %2639 = vmatprep.subr.bf16.mxu1 %v5879_v15  ;;  %v950_v14 = vld [vmem:[#allocation10 + $0x130] sm:$0xff]  ;;  %v951_v15 = vld [vmem:[#allocation10 + $0x138] sm:$0xff] }
 0x383   :  { %v5681_v18 = vcombine.high %v946_v12, %v950_v14  ;;  %v994_v4 = vld [vmem:[#allocation10 + $0x290] sm:$0xff] }
 0x384   :  { %v998_v5 = vld [vmem:[#allocation10 + $0x2b0] sm:$0xff] }
 0x385   :  { %2558 = vmatpush1.bf16.msra.mxu0 %v5876_v20  ;;  %2640 = vmatpush1.bf16.msra.mxu1 %v5878_v21  ;;  %v954_v20 = vld [vmem:[#allocation10 + $0x150] sm:$0xff] }
 0x386   :  { %2559 = vmatprep.subr.bf16.mxu0 %v5885_v23  ;;  %2641 = vmatprep.subr.bf16.mxu1 %v5887_v24  ;;  %v958_v21 = vld [vmem:[#allocation10 + $0x170] sm:$0xff]  ;;  %v959_v23 = vld [vmem:[#allocation10 + $0x178] sm:$0xff]  ;;  %v5680_v24 = vcombine.low %v946_v12, %v950_v14 }
 0x387   :  { %v5689_v28 = vcombine.high %v954_v20, %v958_v21  ;;  %v5691_v29 = vcombine.high %v955_v22, %v959_v23  ;;  %v1002_v14 = vld [vmem:[#allocation10 + $0x2d0] sm:$0xff] }
 0x389   :  { %2560 = vmatpush1.bf16.msra.mxu0 %v5884_v31  ;;  %2642 = vmatpush1.bf16.msra.mxu1 %v5886_v32  ;;  %v966_v31 = vld [vmem:[#allocation10 + $0x1b0] sm:$0xff]  ;;  %v963_v32 = vld [vmem:[#allocation10 + $0x198] sm:$0xff] }
 0x38a   :  { %2561 = vmatprep.subr.bf16.mxu0 %v5893_v35  ;;  %2643 = vmatprep.subr.bf16.mxu1 %v5895_v36  ;;  %v5688_v35 = vcombine.low %v954_v20, %v958_v21  ;;  %v5690_v36 = vcombine.low %v955_v22, %v959_v23  ;;  %v5697_v37 = vcombine.high %v962_v30, %v966_v31  ;;  %v1010_v21 = vld [vmem:[#allocation10 + $0x310] sm:$0xff]  ;;  %v1011_v23 = vld [vmem:[#allocation10 + $0x318] sm:$0xff] }
 0x38b   :  { %v5699_v2 = vcombine.high %v963_v32, %v967_v34  ;;  %v5696_v45 = vcombine.low %v962_v30, %v966_v31  ;;  %v1014_v22 = vld [vmem:[#allocation10 + $0x330] sm:$0xff] }
 0x38c   :  { %v1018_v31 = vld [vmem:[#allocation10 + $0x350] sm:$0xff] }
 0x38d   :  { %2562 = vmatpush1.bf16.msra.mxu0 %v5892_v40  ;;  %2644 = vmatpush1.bf16.msra.mxu1 %v5894_v43  ;;  %v971_v40 = vld [vmem:[#allocation10 + $0x1d8] sm:$0xff] }
 0x38e   :  { %2654 = vmatprep.subr.bf16.mxu0 %v5649_v46  ;;  %2736 = vmatprep.subr.bf16.mxu1 %v5651_v47  ;;  %v975_v43 = vld [vmem:[#allocation10 + $0x1f8] sm:$0xff]  ;;  %v5698_v46 = vcombine.low %v963_v32, %v967_v34  ;;  %v5705_v47 = vcombine.high %v970_v38, %v974_v39  ;;  %v1022_v32 = vld [vmem:[#allocation10 + $0x370] sm:$0xff] }
 0x38f   :  { %v5707_v48 = vcombine.high %v971_v40, %v975_v43  ;;  %v1019_v34 = vld [vmem:[#allocation10 + $0x358] sm:$0xff] }
 0x390   :  { %2564 = vmatmul.mubr.bf16.vlgmr.msra.gmra.mrb[4].mxu0 %v7586_v52  ;;  %2646 = vmatmul.mubr.bf16.vlgmr.msra.gmra.mrb[12].mxu1 %v7586_v52 }
 0x391   :  { %2655 = vmatpush1.bf16.msra.mxu0 %v5648_v51  ;;  %2686 = vmatprep.mubr.bf16.mxu0 %v7568_v25  ;;  %v983_v51 = vld [vmem:[#allocation10 + $0x238] sm:$0xff] }
 0x392   :  { %2737 = vmatpush1.bf16.msra.mxu1 %v5650_v53  ;;  %2768 = vmatprep.mubr.bf16.mxu1 %v7568_v25  ;;  %v947_v25 = vld [vmem:[#allocation10 + $0x118] sm:$0xff]  ;;  %v5704_v53 = vcombine.low %v970_v38, %v974_v39  ;;  %v5715_v56 = vcombine.high %v979_v50, %v983_v51  ;;  %v1026_v39 = vld [vmem:[#allocation10 + $0x390] sm:$0xff] }
 0x393   :  { %2656 = vmatprep.subr.bf16.mxu0 %v5657_v54  ;;  %2738 = vmatprep.subr.bf16.mxu1 %v5659_v55  ;;  %v5683_v19 = vcombine.high %v947_v25, %v951_v15  ;;  %v5682_v27 = vcombine.low %v947_v25, %v951_v15  ;;  %v5706_v54 = vcombine.low %v971_v40, %v975_v43  ;;  %v1006_v25 = vld [vmem:[#allocation10 + $0x2f0] sm:$0xff]  ;;  %v1003_v15 = vld [vmem:[#allocation10 + $0x2d8] sm:$0xff] }
 0x394   :  { %v5713_v55 = vcombine.high %v978_v49, %v982_v8  ;;  %v1030_v40 = vld [vmem:[#allocation10 + $0x3b0] sm:$0xff]  ;;  %v1027_v43 = vld [vmem:[#allocation10 + $0x398] sm:$0xff] }
 0x395   :  { %2657 = vmatpush1.bf16.msra.mxu0 %v5656_v60  ;;  %v991_v60 = vld [vmem:[#allocation10 + $0x278] sm:$0xff] }
 0x396   :  { %2739 = vmatpush1.bf16.msra.mxu1 %v5658_v61  ;;  %2658 = vmatprep.subr.bf16.mxu0 %v5665_v62  ;;  %v5712_v61 = vcombine.low %v978_v49, %v982_v8  ;;  %v5714_v62 = vcombine.low %v979_v50, %v983_v51  ;;  %v5723_v1 = vcombine.high %v987_v59, %v991_v60  ;;  %v1034_v8 = vld [vmem:[#allocation10 + $0x3d0] sm:$0xff]  ;;  %v1035_v51 = vld [vmem:[#allocation10 + $0x3d8] sm:$0xff] }
 0x397   :  { %2740 = vmatprep.subr.bf16.mxu1 %v5667_v63  ;;  %v5721_v63 = vcombine.high %v986_v57, %v990_v58  ;;  %v1038_v50 = vld [vmem:[#allocation10 + $0x3f0] sm:$0xff] }
 0x399   :  { %2659 = vmatpush1.bf16.msra.mxu0 %v5664_v7  ;;  %v999_v7 = vld [vmem:[#allocation10 + $0x2b8] sm:$0xff] }
 0x39a   :  { %2741 = vmatpush1.bf16.msra.mxu1 %v5666_v9  ;;  %2660 = vmatprep.subr.bf16.mxu0 %v5673_v10  ;;  %v5720_v9 = vcombine.low %v986_v57, %v990_v58  ;;  %v5722_v10 = vcombine.low %v987_v59, %v991_v60  ;;  %v5731_v12 = vcombine.high %v995_v6, %v999_v7  ;;  %v1042_v58 = vld [vmem:[#allocation10 + $0x410] sm:$0xff]  ;;  %v1043_v60 = vld [vmem:[#allocation10 + $0x418] sm:$0xff] }
 0x39b   :  { %2742 = vmatprep.subr.bf16.mxu1 %v5675_v11  ;;  %v5729_v11 = vcombine.high %v994_v4, %v998_v5  ;;  %v1046_v59 = vld [vmem:[#allocation10 + $0x430] sm:$0xff] }
 0x39d   :  { %2661 = vmatpush1.bf16.msra.mxu0 %v5672_v16  ;;  %v1007_v16 = vld [vmem:[#allocation10 + $0x2f8] sm:$0xff] }
 0x39e   :  { %2743 = vmatpush1.bf16.msra.mxu1 %v5674_v17  ;;  %2662 = vmatprep.subr.bf16.mxu0 %v5681_v18  ;;  %v5728_v17 = vcombine.low %v994_v4, %v998_v5  ;;  %v5730_v18 = vcombine.low %v995_v6, %v999_v7  ;;  %v5739_v20 = vcombine.high %v1003_v15, %v1007_v16  ;;  %v1050_v5 = vld [vmem:[#allocation10 + $0x450] sm:$0xff] }
 0x39f   :  { %2744 = vmatprep.subr.bf16.mxu1 %v5683_v19  ;;  %v5737_v19 = vcombine.high %v1002_v14, %v1006_v25  ;;  %v1054_v6 = vld [vmem:[#allocation10 + $0x470] sm:$0xff]  ;;  %v5776_v7 = vcombine.low %v1042_v58, %v1046_v59 }
 0x3a1   :  { %2663 = vmatpush1.bf16.msra.mxu0 %v5680_v24  ;;  %v1015_v24 = vld [vmem:[#allocation10 + $0x338] sm:$0xff] }
 0x3a2   :  { %2745 = vmatpush1.bf16.msra.mxu1 %v5682_v27  ;;  %2664 = vmatprep.subr.bf16.mxu0 %v5689_v28  ;;  %v5736_v27 = vcombine.low %v1002_v14, %v1006_v25  ;;  %v5738_v28 = vcombine.low %v1003_v15, %v1007_v16  ;;  %v5747_v30 = vcombine.high %v1011_v23, %v1015_v24  ;;  %v1058_v14 = vld [vmem:[#allocation10 + $0x490] sm:$0xff]  ;;  %v1059_v16 = vld [vmem:[#allocation10 + $0x498] sm:$0xff] }
 0x3a3   :  { %2746 = vmatprep.subr.bf16.mxu1 %v5691_v29  ;;  %v5745_v29 = vcombine.high %v1010_v21, %v1014_v22  ;;  %v1062_v25 = vld [vmem:[#allocation10 + $0x4b0] sm:$0xff] }
 0x3a5   :  { %2665 = vmatpush1.bf16.msra.mxu0 %v5688_v35  ;;  %v1023_v35 = vld [vmem:[#allocation10 + $0x378] sm:$0xff] }
 0x3a6   :  { %2747 = vmatpush1.bf16.msra.mxu1 %v5690_v36  ;;  %2666 = vmatprep.subr.bf16.mxu0 %v5697_v37  ;;  %v5744_v36 = vcombine.low %v1010_v21, %v1014_v22  ;;  %v5746_v37 = vcombine.low %v1011_v23, %v1015_v24  ;;  %v5755_v38 = vcombine.high %v1019_v34, %v1023_v35  ;;  %v1066_v22 = vld [vmem:[#allocation10 + $0x4d0] sm:$0xff]  ;;  %v1067_v24 = vld [vmem:[#allocation10 + $0x4d8] sm:$0xff] }
 0x3a7   :  { %2748 = vmatprep.subr.bf16.mxu1 %v5699_v2  ;;  %v5753_v2 = vcombine.high %v1018_v31, %v1022_v32  ;;  %v1070_v23 = vld [vmem:[#allocation10 + $0x4f0] sm:$0xff] }
 0x3a9   :  { %2667 = vmatpush1.bf16.msra.mxu0 %v5696_v45  ;;  %v1031_v45 = vld [vmem:[#allocation10 + $0x3b8] sm:$0xff] }
 0x3aa   :  { %2749 = vmatpush1.bf16.msra.mxu1 %v5698_v46  ;;  %2668 = vmatprep.subr.bf16.mxu0 %v5705_v47  ;;  %v5752_v46 = vcombine.low %v1018_v31, %v1022_v32  ;;  %v5754_v47 = vcombine.low %v1019_v34, %v1023_v35  ;;  %v5763_v49 = vcombine.high %v1027_v43, %v1031_v45  ;;  %v1074_v31 = vld [vmem:[#allocation10 + $0x510] sm:$0xff]  ;;  %v1075_v34 = vld [vmem:[#allocation10 + $0x518] sm:$0xff] }
 0x3ab   :  { %2750 = vmatprep.subr.bf16.mxu1 %v5707_v48  ;;  %v5761_v48 = vcombine.high %v1026_v39, %v1030_v40  ;;  %v1078_v32 = vld [vmem:[#allocation10 + $0x530] sm:$0xff]  ;;  %v1079_v35 = vld [vmem:[#allocation10 + $0x538] sm:$0xff] }
 0x3ad   :  { %2669 = vmatpush1.bf16.msra.mxu0 %v5704_v53  ;;  %v1039_v53 = vld [vmem:[#allocation10 + $0x3f8] sm:$0xff] }
 0x3ae   :  { %2751 = vmatpush1.bf16.msra.mxu1 %v5706_v54  ;;  %2670 = vmatprep.subr.bf16.mxu0 %v5713_v55  ;;  %v5760_v54 = vcombine.low %v1026_v39, %v1030_v40  ;;  %v5762_v55 = vcombine.low %v1027_v43, %v1031_v45  ;;  %v5771_v57 = vcombine.high %v1035_v51, %v1039_v53  ;;  %v1086_v39 = vld [vmem:[#allocation10 + $0x570] sm:$0xff]  ;;  %v1083_v40 = vld [vmem:[#allocation10 + $0x558] sm:$0xff] }
 0x3af   :  { %2752 = vmatprep.subr.bf16.mxu1 %v5715_v56  ;;  %v5769_v56 = vcombine.high %v1034_v8, %v1038_v50  ;;  %v1087_v43 = vld [vmem:[#allocation10 + $0x578] sm:$0xff]  ;;  %v5808_v45 = vcombine.low %v1074_v31, %v1078_v32 }
 0x3b1   :  { %2671 = vmatpush1.bf16.msra.mxu0 %v5712_v61  ;;  %v1047_v61 = vld [vmem:[#allocation10 + $0x438] sm:$0xff] }
 0x3b2   :  { %2753 = vmatpush1.bf16.msra.mxu1 %v5714_v62  ;;  %2672 = vmatprep.subr.bf16.mxu0 %v5721_v63  ;;  %v5768_v62 = vcombine.low %v1034_v8, %v1038_v50  ;;  %v5770_v63 = vcombine.low %v1035_v51, %v1039_v53  ;;  %v5779_v4 = vcombine.high %v1043_v60, %v1047_v61  ;;  %v1094_v8 = vld [vmem:[#allocation10 + $0x5b0] sm:$0xff]  ;;  %v1091_v50 = vld [vmem:[#allocation10 + $0x598] sm:$0xff] }
 0x3b3   :  { %2754 = vmatprep.subr.bf16.mxu1 %v5723_v1  ;;  %v5777_v1 = vcombine.high %v1042_v58, %v1046_v59  ;;  %v1095_v51 = vld [vmem:[#allocation10 + $0x5b8] sm:$0xff]  ;;  %v1102_v58 = vld [vmem:[#allocation10 + $0x5f0] sm:$0xff] }
 0x3b4   :  { %v1099_v59 = vld [vmem:[#allocation10 + $0x5d8] sm:$0xff] }
 0x3b5   :  { %2673 = vmatpush1.bf16.msra.mxu0 %v5720_v9  ;;  %v1051_v9 = vld [vmem:[#allocation10 + $0x458] sm:$0xff] }
 0x3b6   :  { %2755 = vmatpush1.bf16.msra.mxu1 %v5722_v10  ;;  %2674 = vmatprep.subr.bf16.mxu0 %v5729_v11  ;;  %v1055_v10 = vld [vmem:[#allocation10 + $0x478] sm:$0xff]  ;;  %v5778_v11 = vcombine.low %v1043_v60, %v1047_v61 }
 0x3b7   :  { %2756 = vmatprep.subr.bf16.mxu1 %v5731_v12  ;;  %v5785_v12 = vcombine.high %v1050_v5, %v1054_v6  ;;  %v5787_v15 = vcombine.high %v1051_v9, %v1055_v10  ;;  %v1103_v60 = vld [vmem:[#allocation10 + $0x5f8] sm:$0xff] }
 0x3b9   :  { %2675 = vmatpush1.bf16.msra.mxu0 %v5728_v17  ;;  %v1063_v17 = vld [vmem:[#allocation10 + $0x4b8] sm:$0xff] }
 0x3ba   :  { %2757 = vmatpush1.bf16.msra.mxu1 %v5730_v18  ;;  %2676 = vmatprep.subr.bf16.mxu0 %v5737_v19  ;;  %v5784_v18 = vcombine.low %v1050_v5, %v1054_v6  ;;  %v5786_v19 = vcombine.low %v1051_v9, %v1055_v10  ;;  %v5795_v21 = vcombine.high %v1059_v16, %v1063_v17  ;;  %v1110_v5 = vld [vmem:[#allocation10 + $0x630] sm:$0xff]  ;;  %v1107_v6 = vld [vmem:[#allocation10 + $0x618] sm:$0xff] }
 0x3bb   :  { %2758 = vmatprep.subr.bf16.mxu1 %v5739_v20  ;;  %v5793_v20 = vcombine.high %v1058_v14, %v1062_v25  ;;  %v5834_v10 = vcombine.low %v1099_v59, %v1103_v60 }
 0x3bd   :  { %2677 = vmatpush1.bf16.msra.mxu0 %v5736_v27  ;;  %v1071_v27 = vld [vmem:[#allocation10 + $0x4f8] sm:$0xff] }
 0x3be   :  { %2759 = vmatpush1.bf16.msra.mxu1 %v5738_v28  ;;  %2678 = vmatprep.subr.bf16.mxu0 %v5745_v29  ;;  %v5792_v28 = vcombine.low %v1058_v14, %v1062_v25  ;;  %v5801_v29 = vcombine.high %v1066_v22, %v1070_v23  ;;  %v1114_v14 = vld [vmem:[#allocation10 + $0x650] sm:$0xff] }
 0x3bf   :  { %2760 = vmatprep.subr.bf16.mxu1 %v5747_v30  ;;  %v5803_v30 = vcombine.high %v1067_v24, %v1071_v27  ;;  %v1118_v25 = vld [vmem:[#allocation10 + $0x670] sm:$0xff] }
 0x3c1   :  { %2679 = vmatpush1.bf16.msra.mxu0 %v5744_v36  ;;  %v5802_v36 = vcombine.low %v1067_v24, %v1071_v27  ;;  %v1127_v24 = vld [vmem:[#allocation10 + $0x6b8] sm:$0xff]  ;;  %v5848_v27 = vcombine.low %v1114_v14, %v1118_v25 }
 0x3c2   :  { %2761 = vmatpush1.bf16.msra.mxu1 %v5746_v37  ;;  %2680 = vmatprep.subr.bf16.mxu0 %v5753_v2  ;;  %v5809_v37 = vcombine.high %v1074_v31, %v1078_v32  ;;  %v5811_v2 = vcombine.high %v1075_v34, %v1079_v35  ;;  %v1134_v31 = vld [vmem:[#allocation10 + $0x6f0] sm:$0xff]  ;;  %v1131_v32 = vld [vmem:[#allocation10 + $0x6d8] sm:$0xff] }
 0x3c3   :  { %2762 = vmatprep.subr.bf16.mxu1 %v5755_v38  ;;  %v1082_v38 = vld [vmem:[#allocation10 + $0x550] sm:$0xff] }
 0x3c4   :  { %v5816_v53 = vcombine.low %v1082_v38, %v1086_v39 }
 0x3c5   :  { %2681 = vmatpush1.bf16.msra.mxu0 %v5752_v46  ;;  %v5810_v46 = vcombine.low %v1075_v34, %v1079_v35  ;;  %v1135_v34 = vld [vmem:[#allocation10 + $0x6f8] sm:$0xff] }
 0x3c6   :  { %2763 = vmatpush1.bf16.msra.mxu1 %v5754_v47  ;;  %2682 = vmatprep.subr.bf16.mxu0 %v5761_v48  ;;  %v5817_v47 = vcombine.high %v1082_v38, %v1086_v39  ;;  %v5819_v48 = vcombine.high %v1083_v40, %v1087_v43  ;;  %v1142_v38 = vld [vmem:[#allocation10 + $0x730] sm:$0xff]  ;;  %v1139_v39 = vld [vmem:[#allocation10 + $0x718] sm:$0xff] }
 0x3c7   :  { %2764 = vmatprep.subr.bf16.mxu1 %v5763_v49  ;;  %v1090_v49 = vld [vmem:[#allocation10 + $0x590] sm:$0xff] }
 0x3c8   :  { %v5824_v61 = vcombine.low %v1090_v49, %v1094_v8 }
 0x3c9   :  { %2683 = vmatpush1.bf16.msra.mxu0 %v5760_v54  ;;  %v5818_v54 = vcombine.low %v1083_v40, %v1087_v43  ;;  %v1143_v40 = vld [vmem:[#allocation10 + $0x738] sm:$0xff] }
 0x3ca   :  { %2765 = vmatpush1.bf16.msra.mxu1 %v5762_v55  ;;  %2684 = vmatprep.subr.bf16.mxu0 %v5769_v56  ;;  %v5825_v55 = vcombine.high %v1090_v49, %v1094_v8  ;;  %v5827_v56 = vcombine.high %v1091_v50, %v1095_v51  ;;  %v1150_v49 = vld [vmem:[#allocation10 + $0x770] sm:$0xff]  ;;  %v1147_v8 = vld [vmem:[#allocation10 + $0x758] sm:$0xff] }
 0x3cb   :  { %2766 = vmatprep.subr.bf16.mxu1 %v5771_v57  ;;  %v1098_v57 = vld [vmem:[#allocation10 + $0x5d0] sm:$0xff] }
 0x3cc   :  { %v5832_v9 = vcombine.low %v1098_v57, %v1102_v58 }
 0x3cd   :  { %2685 = vmatpush1.bf16.msra.mxu0 %v5768_v62  ;;  %v5826_v62 = vcombine.low %v1091_v50, %v1095_v51  ;;  %v1151_v50 = vld [vmem:[#allocation10 + $0x778] sm:$0xff] }
 0x3ce   :  { %2767 = vmatpush1.bf16.msra.mxu1 %v5770_v63  ;;  %2695 = vmatprep.subr.bf16.mxu0 %v5777_v1  ;;  %v5833_v63 = vcombine.high %v1098_v57, %v1102_v58  ;;  %v5835_v1 = vcombine.high %v1099_v59, %v1103_v60  ;;  %v1158_v57 = vld [vmem:[#allocation10 + $0x7b0] sm:$0xff]  ;;  %v1155_v58 = vld [vmem:[#allocation10 + $0x798] sm:$0xff] }
 0x3cf   :  { %2777 = vmatprep.subr.bf16.mxu1 %v5779_v4  ;;  %v1106_v4 = vld [vmem:[#allocation10 + $0x610] sm:$0xff]  ;;  %v1159_v59 = vld [vmem:[#allocation10 + $0x7b8] sm:$0xff] }
 0x3d0   :  { %2687 = vmatmul.mubr.bf16.vlgmr.msra.gmra.mrb[8].mxu0 %v7570_v26 }
 0x3d1   :  { %2769 = vmatmul.mubr.bf16.vlgmr.msra.gmra.mrb[16].mxu1 %v7570_v26  ;;  %2696 = vmatpush1.bf16.msra.mxu0 %v5776_v7  ;;  %v5794_v26 = vcombine.low %v1059_v16, %v1063_v17  ;;  %v1111_v7 = vld [vmem:[#allocation10 + $0x638] sm:$0xff]  ;;  %v5840_v17 = vcombine.low %v1106_v4, %v1110_v5 }
 0x3d2   :  { %2727 = vmatprep.mubr.bf16.mxu0 %v7574_v33  ;;  %2778 = vmatpush1.bf16.msra.mxu1 %v5778_v11  ;;  %v5841_v11 = vcombine.high %v1106_v4, %v1110_v5  ;;  %v1119_v16 = vld [vmem:[#allocation10 + $0x678] sm:$0xff]  ;;  %v1166_v4 = vld [vmem:[#allocation10 + $0x7f0] sm:$0xff] }
 0x3d3   :  { %2809 = vmatprep.mubr.bf16.mxu1 %v7574_v33  ;;  %2697 = vmatprep.subr.bf16.mxu0 %v5785_v12  ;;  %v5800_v33 = vcombine.low %v1066_v22, %v1070_v23  ;;  %v5843_v12 = vcombine.high %v1107_v6, %v1111_v7  ;;  %v1126_v22 = vld [vmem:[#allocation10 + $0x6b0] sm:$0xff]  ;;  %v1123_v23 = vld [vmem:[#allocation10 + $0x698] sm:$0xff] }
 0x3d4   :  { %2779 = vmatprep.subr.bf16.mxu1 %v5787_v15  ;;  %v1115_v15 = vld [vmem:[#allocation10 + $0x658] sm:$0xff] }
 0x3d5   :  { %2698 = vmatpush1.bf16.msra.mxu0 %v5784_v18  ;;  %v5842_v18 = vcombine.low %v1107_v6, %v1111_v7  ;;  %v1163_v5 = vld [vmem:[#allocation10 + $0x7d8] sm:$0xff] }
 0x3d6   :  { %2780 = vmatpush1.bf16.msra.mxu1 %v5786_v19  ;;  %2699 = vmatprep.subr.bf16.mxu0 %v5793_v20  ;;  %v5849_v19 = vcombine.high %v1114_v14, %v1118_v25  ;;  %v5851_v20 = vcombine.high %v1115_v15, %v1119_v16  ;;  %v1167_v6 = vld [vmem:[#allocation10 + $0x7f8] sm:$0xff]  ;;  %v6529_v25 = vld [vmem:[#allocation11 + $0x4] ss:$16 sps:$4 sm:$0xff]  }
 0x3d7   :  { %2781 = vmatprep.subr.bf16.mxu1 %v5795_v21  ;;  %v1122_v21 = vld [vmem:[#allocation10 + $0x690] sm:$0xff]  ;;  %v5898_v14 = vcombine.low %v1163_v5, %v1167_v6 }
 0x3d8   :  { %v5856_v35 = vcombine.low %v1122_v21, %v1126_v22 }
 0x3d9   :  { %2700 = vmatpush1.bf16.msra.mxu0 %v5792_v28  ;;  %v5850_v28 = vcombine.low %v1115_v15, %v1119_v16  ;;  %v6532_v15 = vld [vmem:[#allocation11 + $0xc] ss:$16 sps:$4 sm:$0xff]   ;;  %v6527_v16 = vld [vmem:[#allocation11] ss:$16 sps:$4 sm:$0xff]  }
 0x3da   :  { %2782 = vmatpush1.bf16.msra.mxu1 %v5794_v26  ;;  %2701 = vmatprep.subr.bf16.mxu0 %v5801_v29  ;;  %v5857_v26 = vcombine.high %v1122_v21, %v1126_v22  ;;  %v5859_v29 = vcombine.high %v1123_v23, %v1127_v24  ;;  %v6536_v21 = vld [vmem:[#allocation11 + $0x28] ss:$16 sps:$4 sm:$0xff]   ;;  %v6541_v22 = vld [vmem:[#allocation11 + $0x44] ss:$16 sps:$4 sm:$0xff]  }
 0x3db   :  { %2783 = vmatprep.subr.bf16.mxu1 %v5803_v30  ;;  %v1130_v30 = vld [vmem:[#allocation10 + $0x6d0] sm:$0xff] }
 0x3dc   :  { %v5864_v43 = vcombine.low %v1130_v30, %v1134_v31 }
 0x3dd   :  { %2702 = vmatpush1.bf16.msra.mxu0 %v5800_v33  ;;  %v5858_v33 = vcombine.low %v1123_v23, %v1127_v24  ;;  %v6544_v23 = vld [vmem:[#allocation11 + $0x4c] ss:$16 sps:$4 sm:$0xff]   ;;  %v6539_v24 = vld [vmem:[#allocation11 + $0x40] ss:$16 sps:$4 sm:$0xff]  }
 0x3de   :  { %2784 = vmatpush1.bf16.msra.mxu1 %v5802_v36  ;;  %2703 = vmatprep.subr.bf16.mxu0 %v5809_v37  ;;  %v5865_v36 = vcombine.high %v1130_v30, %v1134_v31  ;;  %v5867_v37 = vcombine.high %v1131_v32, %v1135_v34  ;;  %v6553_v30 = vld [vmem:[#allocation11 + $0x84] ss:$16 sps:$4 sm:$0xff]   ;;  %v6556_v31 = vld [vmem:[#allocation11 + $0x8c] ss:$16 sps:$4 sm:$0xff]  }
 0x3df   :  { %2785 = vmatprep.subr.bf16.mxu1 %v5811_v2  ;;  %v1138_v2 = vld [vmem:[#allocation10 + $0x710] sm:$0xff] }
 0x3e0   :  { %v5872_v51 = vcombine.low %v1138_v2, %v1142_v38 }
 0x3e1   :  { %2704 = vmatpush1.bf16.msra.mxu0 %v5808_v45  ;;  %v5866_v45 = vcombine.low %v1131_v32, %v1135_v34  ;;  %v6551_v32 = vld [vmem:[#allocation11 + $0x80] ss:$16 sps:$4 sm:$0xff]   ;;  %v6554_v34 = vld [vmem:[#allocation11 + $0x88] ss:$16 sps:$4 sm:$0xff]  }
 0x3e2   :  { %2786 = vmatpush1.bf16.msra.mxu1 %v5810_v46  ;;  %2705 = vmatprep.subr.bf16.mxu0 %v5817_v47  ;;  %v5873_v46 = vcombine.high %v1138_v2, %v1142_v38  ;;  %v5875_v47 = vcombine.high %v1139_v39, %v1143_v40  ;;  %v6565_v2 = vld [vmem:[#allocation11 + $0xc4] ss:$16 sps:$4 sm:$0xff]   ;;  %v6568_v38 = vld [vmem:[#allocation11 + $0xcc] ss:$16 sps:$4 sm:$0xff]  }
 0x3e3   :  { %2787 = vmatprep.subr.bf16.mxu1 %v5819_v48  ;;  %v1146_v48 = vld [vmem:[#allocation10 + $0x750] sm:$0xff] }
 0x3e4   :  { %v5880_v60 = vcombine.low %v1146_v48, %v1150_v49 }
 0x3e5   :  { %2706 = vmatpush1.bf16.msra.mxu0 %v5816_v53  ;;  %v5874_v53 = vcombine.low %v1139_v39, %v1143_v40  ;;  %v6563_v39 = vld [vmem:[#allocation11 + $0xc0] ss:$16 sps:$4 sm:$0xff]   ;;  %v6566_v40 = vld [vmem:[#allocation11 + $0xc8] ss:$16 sps:$4 sm:$0xff]  }
 0x3e6   :  { %2788 = vmatpush1.bf16.msra.mxu1 %v5818_v54  ;;  %2707 = vmatprep.subr.bf16.mxu0 %v5825_v55  ;;  %v5881_v54 = vcombine.high %v1146_v48, %v1150_v49  ;;  %v5883_v55 = vcombine.high %v1147_v8, %v1151_v50  ;;  %v6577_v48 = vld [vmem:[#allocation11 + $0x104] ss:$16 sps:$4 sm:$0xff]   ;;  %v6580_v49 = vld [vmem:[#allocation11 + $0x10c] ss:$16 sps:$4 sm:$0xff]  }
 0x3e7   :  { %2789 = vmatprep.subr.bf16.mxu1 %v5827_v56  ;;  %v1154_v56 = vld [vmem:[#allocation10 + $0x790] sm:$0xff] }
 0x3e8   :  { %v5888_v7 = vcombine.low %v1154_v56, %v1158_v57 }
 0x3e9   :  { %2708 = vmatpush1.bf16.msra.mxu0 %v5824_v61  ;;  %v5882_v61 = vcombine.low %v1147_v8, %v1151_v50  ;;  %v6575_v8 = vld [vmem:[#allocation11 + $0x100] ss:$16 sps:$4 sm:$0xff]   ;;  %v6578_v50 = vld [vmem:[#allocation11 + $0x108] ss:$16 sps:$4 sm:$0xff]  }
 0x3ea   :  { %2790 = vmatpush1.bf16.msra.mxu1 %v5826_v62  ;;  %2709 = vmatprep.subr.bf16.mxu0 %v5833_v63  ;;  %v5889_v62 = vcombine.high %v1154_v56, %v1158_v57  ;;  %v5891_v63 = vcombine.high %v1155_v58, %v1159_v59  ;;  %v6589_v56 = vld [vmem:[#allocation11 + $0x144] ss:$16 sps:$4 sm:$0xff]   ;;  %v6592_v57 = vld [vmem:[#allocation11 + $0x14c] ss:$16 sps:$4 sm:$0xff]  }
 0x3eb   :  { %2791 = vmatprep.subr.bf16.mxu1 %v5835_v1  ;;  %v1162_v1 = vld [vmem:[#allocation10 + $0x7d0] sm:$0xff] }
 0x3ed   :  { %2710 = vmatpush1.bf16.msra.mxu0 %v5832_v9  ;;  %v5890_v9 = vcombine.low %v1155_v58, %v1159_v59  ;;  %v6587_v58 = vld [vmem:[#allocation11 + $0x140] ss:$16 sps:$4 sm:$0xff]   ;;  %v6590_v59 = vld [vmem:[#allocation11 + $0x148] ss:$16 sps:$4 sm:$0xff]  }
 0x3ee   :  { %2792 = vmatpush1.bf16.msra.mxu1 %v5834_v10  ;;  %2711 = vmatprep.subr.bf16.mxu0 %v5841_v11  ;;  %v5897_v10 = vcombine.high %v1162_v1, %v1166_v4  ;;  %v5899_v11 = vcombine.high %v1163_v5, %v1167_v6  ;;  %v6599_v5 = vld [vmem:[#allocation11 + $0x180] ss:$16 sps:$4 sm:$0xff]   ;;  %v6602_v6 = vld [vmem:[#allocation11 + $0x188] ss:$16 sps:$4 sm:$0xff]  }
 0x3ef   :  { %2793 = vmatprep.subr.bf16.mxu1 %v5843_v12  ;;  %v5896_v12 = vcombine.low %v1162_v1, %v1166_v4  ;;  %v6601_v1 = vld [vmem:[#allocation11 + $0x184] ss:$16 sps:$4 sm:$0xff]   ;;  %v6604_v4 = vld [vmem:[#allocation11 + $0x18c] ss:$16 sps:$4 sm:$0xff]  }
 0x3f1   :  { %2712 = vmatpush1.bf16.msra.mxu0 %v5840_v17  ;;  %v6530_v17 = vld [vmem:[#allocation11 + $0x8] ss:$16 sps:$4 sm:$0xff]  }
 0x3f2   :  { %2794 = vmatpush1.bf16.msra.mxu1 %v5842_v18  ;;  %2713 = vmatprep.subr.bf16.mxu0 %v5849_v19  ;;  %v6535_v18 = vld [vmem:[#allocation11 + $0x24] ss:$16 sps:$4 sm:$0xff]   ;;  %v6538_v19 = vld [vmem:[#allocation11 + $0x2c] ss:$16 sps:$4 sm:$0xff]  }
 0x3f3   :  { %2795 = vmatprep.subr.bf16.mxu1 %v5851_v20  ;;  %v6533_v20 = vld [vmem:[#allocation11 + $0x20] ss:$16 sps:$4 sm:$0xff]  }
 0x3f5   :  { %2714 = vmatpush1.bf16.msra.mxu0 %v5848_v27  ;;  %v6542_v27 = vld [vmem:[#allocation11 + $0x48] ss:$16 sps:$4 sm:$0xff]  }
 0x3f6   :  { %2796 = vmatpush1.bf16.msra.mxu1 %v5850_v28  ;;  %2715 = vmatprep.subr.bf16.mxu0 %v5857_v26  ;;  %v6547_v28 = vld [vmem:[#allocation11 + $0x64] ss:$16 sps:$4 sm:$0xff]   ;;  %v6550_v26 = vld [vmem:[#allocation11 + $0x6c] ss:$16 sps:$4 sm:$0xff]  }
 0x3f7   :  { %2797 = vmatprep.subr.bf16.mxu1 %v5859_v29  ;;  %v6545_v29 = vld [vmem:[#allocation11 + $0x60] ss:$16 sps:$4 sm:$0xff]  }
 0x3f9   :  { %2716 = vmatpush1.bf16.msra.mxu0 %v5856_v35  ;;  %v6559_v35 = vld [vmem:[#allocation11 + $0xa4] ss:$16 sps:$4 sm:$0xff]  }
 0x3fa   :  { %2798 = vmatpush1.bf16.msra.mxu1 %v5858_v33  ;;  %2717 = vmatprep.subr.bf16.mxu0 %v5865_v36  ;;  %v6562_v33 = vld [vmem:[#allocation11 + $0xac] ss:$16 sps:$4 sm:$0xff]   ;;  %v6557_v36 = vld [vmem:[#allocation11 + $0xa0] ss:$16 sps:$4 sm:$0xff]  }
 0x3fb   :  { %2799 = vmatprep.subr.bf16.mxu1 %v5867_v37  ;;  %v6560_v37 = vld [vmem:[#allocation11 + $0xa8] ss:$16 sps:$4 sm:$0xff]  }
 0x3fd   :  { %2718 = vmatpush1.bf16.msra.mxu0 %v5864_v43  ;;  %v6571_v43 = vld [vmem:[#allocation11 + $0xe4] ss:$16 sps:$4 sm:$0xff]  }
 0x3fe   :  { %2800 = vmatpush1.bf16.msra.mxu1 %v5866_v45  ;;  %2719 = vmatprep.subr.bf16.mxu0 %v5873_v46  ;;  %v6574_v45 = vld [vmem:[#allocation11 + $0xec] ss:$16 sps:$4 sm:$0xff]   ;;  %v6569_v46 = vld [vmem:[#allocation11 + $0xe0] ss:$16 sps:$4 sm:$0xff]  }
 0x3ff   :  { %2801 = vmatprep.subr.bf16.mxu1 %v5875_v47  ;;  %v6572_v47 = vld [vmem:[#allocation11 + $0xe8] ss:$16 sps:$4 sm:$0xff]  }
 0x401   :  { %2720 = vmatpush1.bf16.msra.mxu0 %v5872_v51  ;;  %v6583_v51 = vld [vmem:[#allocation11 + $0x124] ss:$16 sps:$4 sm:$0xff]  }
 0x402   :  { %2802 = vmatpush1.bf16.msra.mxu1 %v5874_v53  ;;  %2721 = vmatprep.subr.bf16.mxu0 %v5881_v54  ;;  %v6586_v53 = vld [vmem:[#allocation11 + $0x12c] ss:$16 sps:$4 sm:$0xff]   ;;  %v6581_v54 = vld [vmem:[#allocation11 + $0x120] ss:$16 sps:$4 sm:$0xff]  }
 0x403   :  { %2803 = vmatprep.subr.bf16.mxu1 %v5883_v55  ;;  %v6584_v55 = vld [vmem:[#allocation11 + $0x128] ss:$16 sps:$4 sm:$0xff]  }
 0x405   :  { %2722 = vmatpush1.bf16.msra.mxu0 %v5880_v60  ;;  %v6595_v60 = vld [vmem:[#allocation11 + $0x164] ss:$16 sps:$4 sm:$0xff]  }
 0x406   :  { %2804 = vmatpush1.bf16.msra.mxu1 %v5882_v61  ;;  %2723 = vmatprep.subr.bf16.mxu0 %v5889_v62  ;;  %v6598_v61 = vld [vmem:[#allocation11 + $0x16c] ss:$16 sps:$4 sm:$0xff]   ;;  %v6593_v62 = vld [vmem:[#allocation11 + $0x160] ss:$16 sps:$4 sm:$0xff]  }
 0x407   :  { %2805 = vmatprep.subr.bf16.mxu1 %v5891_v63  ;;  %v6596_v63 = vld [vmem:[#allocation11 + $0x168] ss:$16 sps:$4 sm:$0xff]  }
 0x409   :  { %2724 = vmatpush1.bf16.msra.mxu0 %v5888_v7  ;;  %v6607_v7 = vld [vmem:[#allocation11 + $0x1a4] ss:$16 sps:$4 sm:$0xff]  }
 0x40a   :  { %2806 = vmatpush1.bf16.msra.mxu1 %v5890_v9  ;;  %2725 = vmatprep.subr.bf16.mxu0 %v5897_v10  ;;  %v6610_v9 = vld [vmem:[#allocation11 + $0x1ac] ss:$16 sps:$4 sm:$0xff]   ;;  %v6605_v10 = vld [vmem:[#allocation11 + $0x1a0] ss:$16 sps:$4 sm:$0xff]  }
 0x40b   :  { %2807 = vmatprep.subr.bf16.mxu1 %v5899_v11  ;;  %v6608_v11 = vld [vmem:[#allocation11 + $0x1a8] ss:$16 sps:$4 sm:$0xff]  }
 0x40d   :  { %2726 = vmatpush1.bf16.msra.mxu0 %v5896_v12  ;;  %v6613_v12 = vld [vmem:[#allocation11 + $0x1c4] ss:$16 sps:$4 sm:$0xff]  }
 0x40e   :  { %2808 = vmatpush1.bf16.msra.mxu1 %v5898_v14  ;;  %4412 = vmatprep.subr.bf16.mxu0 %v6529_v25  ;;  %v6616_v14 = vld [vmem:[#allocation11 + $0x1cc] ss:$16 sps:$4 sm:$0xff]   ;;  %v6611_v25 = vld [vmem:[#allocation11 + $0x1c0] ss:$16 sps:$4 sm:$0xff]  }
 0x40f   :  { %4576 = vmatprep.subr.bf16.mxu1 %v6532_v15  ;;  %v6614_v15 = vld [vmem:[#allocation11 + $0x1c8] ss:$16 sps:$4 sm:$0xff]  }
 0x410   :  { %2728 = vmatmul.mubr.bf16.vlgmr.msra.gmra.mrb[8].mxu0 %v7586_v52 }
 0x411   :  { %2810 = vmatmul.mubr.bf16.vlgmr.msra.gmra.mrb[16].mxu1 %v7586_v52  ;;  %4413 = vmatpush1.bf16.msra.mxu0 %v6527_v16  ;;  %v6548_v52 = vld [vmem:[#allocation11 + $0x68] ss:$16 sps:$4 sm:$0xff]   ;;  %v6619_v16 = vld [vmem:[#allocation11 + $0x1e4] ss:$16 sps:$4 sm:$0xff]  }
 0x412   :  { %4577 = vmatpush1.bf16.msra.mxu1 %v6530_v17  ;;  %4414 = vmatprep.subr.bf16.mxu0 %v6535_v18  ;;  %v6622_v17 = vld [vmem:[#allocation11 + $0x1ec] ss:$16 sps:$4 sm:$0xff]   ;;  %v6617_v18 = vld [vmem:[#allocation11 + $0x1e0] ss:$16 sps:$4 sm:$0xff]  }
 0x413   :  { %4578 = vmatprep.subr.bf16.mxu1 %v6538_v19  ;;  %v6620_v19 = vld [vmem:[#allocation11 + $0x1e8] ss:$16 sps:$4 sm:$0xff]  }
 0x415   :  { %4415 = vmatpush1.bf16.msra.mxu0 %v6533_v20  ;;  %v6625_v20 = vld [vmem:[#allocation11 + $0x204] ss:$16 sps:$4 sm:$0xff]  }
 0x416   :  { %4579 = vmatpush1.bf16.msra.mxu1 %v6536_v21  ;;  %4416 = vmatprep.subr.bf16.mxu0 %v6541_v22  ;;  %v6628_v21 = vld [vmem:[#allocation11 + $0x20c] ss:$16 sps:$4 sm:$0xff]  }
 0x417   :  { %4580 = vmatprep.subr.bf16.mxu1 %v6544_v23  ;;  %v7601_v22 = vld [vmem:[%s7765_s8] sm:$0xff]  ;;  %s5531_s8 = sshll.u32 %s7311_s19, 4  ;;  %s5532_s8 = int_to_ptr.vmem [resolvable:$true] %s5531_s8 }
 0x418   :  { %v1173_v23 = vrot.slane %v7601_v22, %v7545_v42  ;;  %s7233_s1 = scalar_lea.vmem %s5532_s8, 512  ;;  %p7238_p3 = scmp.lt.s32.totalorder %s5532_s8, %s5532_s8 }
 0x419   :  { %4417 = vmatpush1.bf16.msra.mxu0 %v6539_v24  ;;  %v1181_v24 = vrot.slane %v7601_v22, %v7581_v13  ;;  %p7234_p2 = scmp.ne.s32.totalorder %s5532_s8, %s7233_s1  ;;  %p7239_p4 = scmp.lt.s32.totalorder %s7233_s1, %s7233_s1 }
 0x41a   :  { %4581 = vmatpush1.bf16.msra.mxu1 %v6542_v27  ;;  %4418 = vmatprep.subr.bf16.mxu0 %v6547_v28  ;;  %v1177_v27 = vrot.slane %v7601_v22, %v7548_v44  ;;  %v1185_v28 = vrot.slane %v7601_v22, %v7558_v3 }
 0x41b   :  { %4582 = vmatprep.subr.bf16.mxu1 %v6550_v26  ;;  %p7240_p5 = por %p7239_p4, %p7238_p3 }
 0x41d   :  { %4419 = vmatpush1.bf16.msra.mxu0 %v6545_v29  ;;  %p7241_p6 = pnand %p7240_p5, %p7234_p2 }
 0x41e   :  { %4583 = vmatpush1.bf16.msra.mxu1 %v6548_v52  ;;  %4420 = vmatprep.subr.bf16.mxu0 %v6553_v30 }
 0x41f   :  { %4584 = vmatprep.subr.bf16.mxu1 %v6556_v31 }
 0x421   :  { %4421 = vmatpush1.bf16.msra.mxu0 %v6551_v32 }
 0x422   :  { %4585 = vmatpush1.bf16.msra.mxu1 %v6554_v34  ;;  %4422 = vmatprep.subr.bf16.mxu0 %v6559_v35 }
 0x423   :  { %4586 = vmatprep.subr.bf16.mxu1 %v6562_v33 }
 0x425   :  { %4423 = vmatpush1.bf16.msra.mxu0 %v6557_v36 }
 0x426   :  { %4587 = vmatpush1.bf16.msra.mxu1 %v6560_v37  ;;  %4424 = vmatprep.subr.bf16.mxu0 %v6565_v2 }
 0x427   :  { %4588 = vmatprep.subr.bf16.mxu1 %v6568_v38 }
 0x429   :  { %4425 = vmatpush1.bf16.msra.mxu0 %v6563_v39 }
 0x42a   :  { %4589 = vmatpush1.bf16.msra.mxu1 %v6566_v40  ;;  %4426 = vmatprep.subr.bf16.mxu0 %v6571_v43  ;;  %v6623_v43 = vld [vmem:[#allocation11 + $0x200] ss:$16 sps:$4 sm:$0xff]  }
 0x42b   :  { %4590 = vmatprep.subr.bf16.mxu1 %v6574_v45  ;;  %v6626_v45 = vld [vmem:[#allocation11 + $0x208] ss:$16 sps:$4 sm:$0xff]  }
 0x42d   :  { %4427 = vmatpush1.bf16.msra.mxu0 %v6569_v46 }
 0x42e   :  { %4591 = vmatpush1.bf16.msra.mxu1 %v6572_v47  ;;  %4428 = vmatprep.subr.bf16.mxu0 %v6577_v48  ;;  %v6631_v47 = vld [vmem:[#allocation11 + $0x224] ss:$16 sps:$4 sm:$0xff]   ;;  %v6634_v48 = vld [vmem:[#allocation11 + $0x22c] ss:$16 sps:$4 sm:$0xff]  }
 0x42f   :  { %4592 = vmatprep.subr.bf16.mxu1 %v6580_v49 }
 0x431   :  { %4429 = vmatpush1.bf16.msra.mxu0 %v6575_v8  ;;  %v6629_v8 = vld [vmem:[#allocation11 + $0x220] ss:$16 sps:$4 sm:$0xff]  }
 0x432   :  { %4593 = vmatpush1.bf16.msra.mxu1 %v6578_v50  ;;  %4430 = vmatprep.subr.bf16.mxu0 %v6583_v51  ;;  %v6632_v50 = vld [vmem:[#allocation11 + $0x228] ss:$16 sps:$4 sm:$0xff]   ;;  %v6637_v51 = vld [vmem:[#allocation11 + $0x244] ss:$16 sps:$4 sm:$0xff]  }
 0x433   :  { %4594 = vmatprep.subr.bf16.mxu1 %v6586_v53  ;;  %v6640_v53 = vld [vmem:[#allocation11 + $0x24c] ss:$16 sps:$4 sm:$0xff]  }
 0x435   :  { %4431 = vmatpush1.bf16.msra.mxu0 %v6581_v54  ;;  %v6635_v54 = vld [vmem:[#allocation11 + $0x240] ss:$16 sps:$4 sm:$0xff]  }
 0x436   :  { %4595 = vmatpush1.bf16.msra.mxu1 %v6584_v55  ;;  %4432 = vmatprep.subr.bf16.mxu0 %v6589_v56  ;;  %v6638_v55 = vld [vmem:[#allocation11 + $0x248] ss:$16 sps:$4 sm:$0xff]   ;;  %v6643_v56 = vld [vmem:[#allocation11 + $0x264] ss:$16 sps:$4 sm:$0xff]  }
 0x437   :  { %4596 = vmatprep.subr.bf16.mxu1 %v6592_v57  ;;  %v6646_v57 = vld [vmem:[#allocation11 + $0x26c] ss:$16 sps:$4 sm:$0xff]  }
 0x439   :  { %4433 = vmatpush1.bf16.msra.mxu0 %v6587_v58  ;;  %v6641_v58 = vld [vmem:[#allocation11 + $0x260] ss:$16 sps:$4 sm:$0xff]  }
 0x43a   :  { %4597 = vmatpush1.bf16.msra.mxu1 %v6590_v59  ;;  %4434 = vmatprep.subr.bf16.mxu0 %v6595_v60  ;;  %v6644_v59 = vld [vmem:[#allocation11 + $0x268] ss:$16 sps:$4 sm:$0xff]   ;;  %v6649_v60 = vld [vmem:[#allocation11 + $0x284] ss:$16 sps:$4 sm:$0xff]  }
 0x43b   :  { %4598 = vmatprep.subr.bf16.mxu1 %v6598_v61  ;;  %v6652_v61 = vld [vmem:[#allocation11 + $0x28c] ss:$16 sps:$4 sm:$0xff]  }
 0x43d   :  { %4435 = vmatpush1.bf16.msra.mxu0 %v6593_v62  ;;  %v6647_v62 = vld [vmem:[#allocation11 + $0x280] ss:$16 sps:$4 sm:$0xff]  }
 0x43e   :  { %4599 = vmatpush1.bf16.msra.mxu1 %v6596_v63  ;;  %4436 = vmatprep.subr.bf16.mxu0 %v6601_v1  ;;  %v6650_v63 = vld [vmem:[#allocation11 + $0x288] ss:$16 sps:$4 sm:$0xff]   ;;  %v6655_v1 = vld [vmem:[#allocation11 + $0x2a4] ss:$16 sps:$4 sm:$0xff]  }
 0x43f   :  { %4600 = vmatprep.subr.bf16.mxu1 %v6604_v4  ;;  %v6658_v4 = vld [vmem:[#allocation11 + $0x2ac] ss:$16 sps:$4 sm:$0xff]  }
 0x441   :  { %4437 = vmatpush1.bf16.msra.mxu0 %v6599_v5  ;;  %v6653_v5 = vld [vmem:[#allocation11 + $0x2a0] ss:$16 sps:$4 sm:$0xff]  }
 0x442   :  { %4601 = vmatpush1.bf16.msra.mxu1 %v6602_v6  ;;  %4438 = vmatprep.subr.bf16.mxu0 %v6607_v7  ;;  %v6656_v6 = vld [vmem:[#allocation11 + $0x2a8] ss:$16 sps:$4 sm:$0xff]   ;;  %v6661_v7 = vld [vmem:[#allocation11 + $0x2c4] ss:$16 sps:$4 sm:$0xff]  }
 0x443   :  { %4602 = vmatprep.subr.bf16.mxu1 %v6610_v9  ;;  %v6664_v9 = vld [vmem:[#allocation11 + $0x2cc] ss:$16 sps:$4 sm:$0xff]  }
 0x445   :  { %4439 = vmatpush1.bf16.msra.mxu0 %v6605_v10  ;;  %v6659_v10 = vld [vmem:[#allocation11 + $0x2c0] ss:$16 sps:$4 sm:$0xff]  }
 0x446   :  { %4603 = vmatpush1.bf16.msra.mxu1 %v6608_v11  ;;  %4440 = vmatprep.subr.bf16.mxu0 %v6613_v12  ;;  %v6662_v11 = vld [vmem:[#allocation11 + $0x2c8] ss:$16 sps:$4 sm:$0xff]   ;;  %v6667_v12 = vld [vmem:[#allocation11 + $0x2e4] ss:$16 sps:$4 sm:$0xff]  }
 0x447   :  { %4604 = vmatprep.subr.bf16.mxu1 %v6616_v14  ;;  %v6670_v14 = vld [vmem:[#allocation11 + $0x2ec] ss:$16 sps:$4 sm:$0xff]  }
 0x449   :  { %4441 = vmatpush1.bf16.msra.mxu0 %v6611_v25  ;;  %v6665_v25 = vld [vmem:[#allocation11 + $0x2e0] ss:$16 sps:$4 sm:$0xff]  }
 0x44a   :  { %4605 = vmatpush1.bf16.msra.mxu1 %v6614_v15  ;;  %4442 = vmatprep.subr.bf16.mxu0 %v6619_v16  ;;  %v6668_v15 = vld [vmem:[#allocation11 + $0x2e8] ss:$16 sps:$4 sm:$0xff]   ;;  %v6673_v16 = vld [vmem:[#allocation11 + $0x304] ss:$16 sps:$4 sm:$0xff]  }
 0x44b   :  { %4606 = vmatprep.subr.bf16.mxu1 %v6622_v17  ;;  %v6676_v17 = vld [vmem:[#allocation11 + $0x30c] ss:$16 sps:$4 sm:$0xff]  }
 0x44d   :  { %4443 = vmatpush1.bf16.msra.mxu0 %v6617_v18  ;;  %v6671_v18 = vld [vmem:[#allocation11 + $0x300] ss:$16 sps:$4 sm:$0xff]  }
 0x44e   :  { %4607 = vmatpush1.bf16.msra.mxu1 %v6620_v19  ;;  %4453 = vmatprep.subr.bf16.mxu0 %v6625_v20  ;;  %v6674_v19 = vld [vmem:[#allocation11 + $0x308] ss:$16 sps:$4 sm:$0xff]   ;;  %v6679_v20 = vld [vmem:[#allocation11 + $0x324] ss:$16 sps:$4 sm:$0xff]  }
 0x44f   :  { %4617 = vmatprep.subr.bf16.mxu1 %v6628_v21  ;;  %v6682_v21 = vld [vmem:[#allocation11 + $0x32c] ss:$16 sps:$4 sm:$0xff]  }
 0x463   :  { %v2565_v26 = vpop.f32.mrb[4].mxu0  ;;  %v2647_v29 = vpop.f32.mrb[12].mxu1 }
 0x464   :  { %v6323_v52 = vadd.f32 %v2565_v26, %v1173_v23  ;;  %v7611_v30 = vadd.f32 %v2647_v29, %v1181_v24  ;;  %v2567_v31 = vpop.f32.mrb[5].mxu0  ;;  %v2649_v32 = vpop.f32.mrb[13].mxu1  ;;  %v6677_v23 = vld [vmem:[#allocation11 + $0x320] ss:$16 sps:$4 sm:$0xff]   ;;  %v6680_v24 = vld [vmem:[#allocation11 + $0x328] ss:$16 sps:$4 sm:$0xff]  }
 0x465   :  { %v6324_v34 = vadd.f32 %v2567_v31, %v1177_v27  ;;  %v6326_v35 = vadd.f32 %v2649_v32, %v1185_v28  ;;  %v2569_v33 = vpop.f32.mrb[6].mxu0  ;;  %v2651_v36 = vpop.f32.mrb[14].mxu1  ;;  %v6685_v27 = vld [vmem:[#allocation11 + $0x344] ss:$16 sps:$4 sm:$0xff]   ;;  %v6688_v28 = vld [vmem:[#allocation11 + $0x34c] ss:$16 sps:$4 sm:$0xff]  }
 0x466   :  { %v2570_v37 = vpop.f32.mrb[7].mxu0  ;;  %v2652_v2 = vpop.f32.mrb[15].mxu1  ;;  %v2818_v46 = vpack.c.bf16 %v6323_v52, %v6323_v52  ;;  %v6683_v26 = vld [vmem:[#allocation11 + $0x340] ss:$16 sps:$4 sm:$0xff]   ;;  %v6686_v29 = vld [vmem:[#allocation11 + $0x348] ss:$16 sps:$4 sm:$0xff]  }
 0x467   :  { %v2819_v38 = vpack.c.bf16 %v6324_v34, %v6324_v34  ;;  %v6251_v39 = vpack.c.bf16 %v6324_v34, %v6323_v52  ;;  %v6252_v40 = vpack.c.bf16 %v6326_v35, %v7611_v30  ;;  %v2821_v49 = vpack.c.bf16 %v6326_v35, %v6326_v35  ;;  %v6691_v52 = vld [vmem:[#allocation11 + $0x364] ss:$16 sps:$4 sm:$0xff]   ;;  %v6694_v31 = vld [vmem:[#allocation11 + $0x36c] ss:$16 sps:$4 sm:$0xff]   ;;  %v6689_v32 = vld [vmem:[#allocation11 + $0x360] ss:$16 sps:$4 sm:$0xff]  }
 0x468   :  { %v6692_v34 = vld [vmem:[#allocation11 + $0x368] ss:$16 sps:$4 sm:$0xff]   ;;  %v6697_v35 = vld [vmem:[#allocation11 + $0x384] ss:$16 sps:$4 sm:$0xff]   ;;  %v6700_v33 = vld [vmem:[#allocation11 + $0x38c] ss:$16 sps:$4 sm:$0xff]  }
 0x469   :  { %2850 = vst [vmem:[#allocation17] sm:$0xff] %v6251_v39  ;;  %2851 = vst [vmem:[#allocation17 + $0x8] sm:$0xff] %v6252_v40  ;;  %4444 = vmatprep.mubr.bf16.mxu0 %v2819_v38  ;;  %4608 = vmatprep.mubr.bf16.mxu1 %v2819_v38  ;;  %v6695_v36 = vld [vmem:[#allocation11 + $0x380] ss:$16 sps:$4 sm:$0xff]   ;;  %v6698_v37 = vld [vmem:[#allocation11 + $0x388] ss:$16 sps:$4 sm:$0xff]  }
 0x46a   :  { %4445 = vmatmul.mubr.bf16.vlgmr.msra.gmra.mrb[12].mxu0 %v2818_v46  ;;  %4609 = vmatmul.mubr.bf16.vlgmr.msra.gmra.mrb[20].mxu1 %v2818_v46  ;;  %v6703_v2 = vld [vmem:[#allocation11 + $0x3a4] ss:$16 sps:$4 sm:$0xff]   ;;  %v6706_v38 = vld [vmem:[#allocation11 + $0x3ac] ss:$16 sps:$4 sm:$0xff]   ;;  %v6701_v39 = vld [vmem:[#allocation11 + $0x3a0] ss:$16 sps:$4 sm:$0xff]  }
 0x46b   :  { %4454 = vmatpush1.bf16.msra.mxu0 %v6623_v43  ;;  %4618 = vmatpush1.bf16.msra.mxu1 %v6626_v45  ;;  %v6704_v40 = vld [vmem:[#allocation11 + $0x3a8] ss:$16 sps:$4 sm:$0xff]   ;;  %v6709_v43 = vld [vmem:[#allocation11 + $0x3c4] ss:$16 sps:$4 sm:$0xff]   ;;  %v6712_v45 = vld [vmem:[#allocation11 + $0x3cc] ss:$16 sps:$4 sm:$0xff]  }
 0x46c   :  { %4485 = vmatprep.mubr.bf16.mxu0 %v2821_v49  ;;  %4649 = vmatprep.mubr.bf16.mxu1 %v2821_v49  ;;  %v6707_v46 = vld [vmem:[#allocation11 + $0x3c0] ss:$16 sps:$4 sm:$0xff]   ;;  %v6718_v49 = vld [vmem:[#allocation11 + $0x3ec] ss:$16 sps:$4 sm:$0xff]  }
 0x46d   :  { %4455 = vmatprep.subr.bf16.mxu0 %v6631_v47  ;;  %4619 = vmatprep.subr.bf16.mxu1 %v6634_v48  ;;  %v6710_v47 = vld [vmem:[#allocation11 + $0x3c8] ss:$16 sps:$4 sm:$0xff]   ;;  %v6715_v48 = vld [vmem:[#allocation11 + $0x3e4] ss:$16 sps:$4 sm:$0xff]  }
 0x46f   :  { %4456 = vmatpush1.bf16.msra.mxu0 %v6629_v8  ;;  %4620 = vmatpush1.bf16.msra.mxu1 %v6632_v50  ;;  %v6713_v8 = vld [vmem:[#allocation11 + $0x3e0] ss:$16 sps:$4 sm:$0xff]   ;;  %v6716_v50 = vld [vmem:[#allocation11 + $0x3e8] ss:$16 sps:$4 sm:$0xff]  }
 0x470   :  { %4457 = vmatprep.subr.bf16.mxu0 %v6637_v51  ;;  %4621 = vmatprep.subr.bf16.mxu1 %v6640_v53  ;;  %v6721_v51 = vld [vmem:[#allocation11 + $0x404] ss:$16 sps:$4 sm:$0xff]   ;;  %v6724_v53 = vld [vmem:[#allocation11 + $0x40c] ss:$16 sps:$4 sm:$0xff]  }
 0x473   :  { %4458 = vmatpush1.bf16.msra.mxu0 %v6635_v54  ;;  %4622 = vmatpush1.bf16.msra.mxu1 %v6638_v55  ;;  %v6719_v54 = vld [vmem:[#allocation11 + $0x400] ss:$16 sps:$4 sm:$0xff]   ;;  %v6722_v55 = vld [vmem:[#allocation11 + $0x408] ss:$16 sps:$4 sm:$0xff]  }
 0x474   :  { %4459 = vmatprep.subr.bf16.mxu0 %v6643_v56  ;;  %4623 = vmatprep.subr.bf16.mxu1 %v6646_v57  ;;  %v2820_v56 = vpack.c.bf16 %v7611_v30, %v7611_v30  ;;  %v6727_v57 = vld [vmem:[#allocation11 + $0x424] ss:$16 sps:$4 sm:$0xff]  }
 0x475   :  { %v6739_v30 = vld [vmem:[#allocation11 + $0x464] ss:$16 sps:$4 sm:$0xff]  }
 0x477   :  { %4460 = vmatpush1.bf16.msra.mxu0 %v6641_v58  ;;  %4624 = vmatpush1.bf16.msra.mxu1 %v6644_v59  ;;  %v6730_v58 = vld [vmem:[#allocation11 + $0x42c] ss:$16 sps:$4 sm:$0xff]   ;;  %v6725_v59 = vld [vmem:[#allocation11 + $0x420] ss:$16 sps:$4 sm:$0xff]  }
 0x478   :  { %4461 = vmatprep.subr.bf16.mxu0 %v6649_v60  ;;  %4625 = vmatprep.subr.bf16.mxu1 %v6652_v61  ;;  %v6728_v60 = vld [vmem:[#allocation11 + $0x428] ss:$16 sps:$4 sm:$0xff]   ;;  %v6733_v61 = vld [vmem:[#allocation11 + $0x444] ss:$16 sps:$4 sm:$0xff]  }
 0x47b   :  { %4462 = vmatpush1.bf16.msra.mxu0 %v6647_v62  ;;  %4626 = vmatpush1.bf16.msra.mxu1 %v6650_v63  ;;  %v6736_v62 = vld [vmem:[#allocation11 + $0x44c] ss:$16 sps:$4 sm:$0xff]   ;;  %v6731_v63 = vld [vmem:[#allocation11 + $0x440] ss:$16 sps:$4 sm:$0xff]  }
 0x47c   :  { %4463 = vmatprep.subr.bf16.mxu0 %v6655_v1  ;;  %4627 = vmatprep.subr.bf16.mxu1 %v6658_v4  ;;  %v6734_v1 = vld [vmem:[#allocation11 + $0x448] ss:$16 sps:$4 sm:$0xff]   ;;  %v6742_v4 = vld [vmem:[#allocation11 + $0x46c] ss:$16 sps:$4 sm:$0xff]  }
 0x47f   :  { %4464 = vmatpush1.bf16.msra.mxu0 %v6653_v5  ;;  %4628 = vmatpush1.bf16.msra.mxu1 %v6656_v6  ;;  %v6737_v5 = vld [vmem:[#allocation11 + $0x460] ss:$16 sps:$4 sm:$0xff]   ;;  %v6740_v6 = vld [vmem:[#allocation11 + $0x468] ss:$16 sps:$4 sm:$0xff]  }
 0x480   :  { %4465 = vmatprep.subr.bf16.mxu0 %v6661_v7  ;;  %4629 = vmatprep.subr.bf16.mxu1 %v6664_v9  ;;  %v6745_v7 = vld [vmem:[#allocation11 + $0x484] ss:$16 sps:$4 sm:$0xff]   ;;  %v6748_v9 = vld [vmem:[#allocation11 + $0x48c] ss:$16 sps:$4 sm:$0xff]  }
 0x483   :  { %4466 = vmatpush1.bf16.msra.mxu0 %v6659_v10  ;;  %4630 = vmatpush1.bf16.msra.mxu1 %v6662_v11  ;;  %v6743_v10 = vld [vmem:[#allocation11 + $0x480] ss:$16 sps:$4 sm:$0xff]   ;;  %v6746_v11 = vld [vmem:[#allocation11 + $0x488] ss:$16 sps:$4 sm:$0xff]  }
 0x484   :  { %4467 = vmatprep.subr.bf16.mxu0 %v6667_v12  ;;  %4631 = vmatprep.subr.bf16.mxu1 %v6670_v14  ;;  %v6751_v12 = vld [vmem:[#allocation11 + $0x4a4] ss:$16 sps:$4 sm:$0xff]   ;;  %v6754_v14 = vld [vmem:[#allocation11 + $0x4ac] ss:$16 sps:$4 sm:$0xff]  }
 0x487   :  { %4468 = vmatpush1.bf16.msra.mxu0 %v6665_v25  ;;  %4632 = vmatpush1.bf16.msra.mxu1 %v6668_v15  ;;  %v6749_v25 = vld [vmem:[#allocation11 + $0x4a0] ss:$16 sps:$4 sm:$0xff]   ;;  %v6752_v15 = vld [vmem:[#allocation11 + $0x4a8] ss:$16 sps:$4 sm:$0xff]  }
 0x488   :  { %4469 = vmatprep.subr.bf16.mxu0 %v6673_v16  ;;  %4633 = vmatprep.subr.bf16.mxu1 %v6676_v17  ;;  %v6757_v16 = vld [vmem:[#allocation11 + $0x4c4] ss:$16 sps:$4 sm:$0xff]   ;;  %v6760_v17 = vld [vmem:[#allocation11 + $0x4cc] ss:$16 sps:$4 sm:$0xff]  }
 0x48b   :  { %4470 = vmatpush1.bf16.msra.mxu0 %v6671_v18  ;;  %4634 = vmatpush1.bf16.msra.mxu1 %v6674_v19  ;;  %v6755_v18 = vld [vmem:[#allocation11 + $0x4c0] ss:$16 sps:$4 sm:$0xff]   ;;  %v6758_v19 = vld [vmem:[#allocation11 + $0x4c8] ss:$16 sps:$4 sm:$0xff]  }
 0x48c   :  { %4471 = vmatprep.subr.bf16.mxu0 %v6679_v20  ;;  %4635 = vmatprep.subr.bf16.mxu1 %v6682_v21  ;;  %v6763_v20 = vld [vmem:[#allocation11 + $0x4e4] ss:$16 sps:$4 sm:$0xff]   ;;  %v6766_v21 = vld [vmem:[#allocation11 + $0x4ec] ss:$16 sps:$4 sm:$0xff]  }
 0x48f   :  { %4472 = vmatpush1.bf16.msra.mxu0 %v6677_v23  ;;  %4636 = vmatpush1.bf16.msra.mxu1 %v6680_v24  ;;  %v6761_v23 = vld [vmem:[#allocation11 + $0x4e0] ss:$16 sps:$4 sm:$0xff]   ;;  %v6764_v24 = vld [vmem:[#allocation11 + $0x4e8] ss:$16 sps:$4 sm:$0xff]  }
 0x490   :  { %4473 = vmatprep.subr.bf16.mxu0 %v6685_v27  ;;  %4637 = vmatprep.subr.bf16.mxu1 %v6688_v28  ;;  %v6769_v27 = vld [vmem:[#allocation11 + $0x504] ss:$16 sps:$4 sm:$0xff]   ;;  %v6772_v28 = vld [vmem:[#allocation11 + $0x50c] ss:$16 sps:$4 sm:$0xff]  }
 0x493   :  { %4474 = vmatpush1.bf16.msra.mxu0 %v6683_v26  ;;  %4638 = vmatpush1.bf16.msra.mxu1 %v6686_v29  ;;  %v6767_v26 = vld [vmem:[#allocation11 + $0x500] ss:$16 sps:$4 sm:$0xff]   ;;  %v6770_v29 = vld [vmem:[#allocation11 + $0x508] ss:$16 sps:$4 sm:$0xff]  }
 0x494   :  { %4475 = vmatprep.subr.bf16.mxu0 %v6691_v52  ;;  %4639 = vmatprep.subr.bf16.mxu1 %v6694_v31  ;;  %v6775_v52 = vld [vmem:[#allocation11 + $0x524] ss:$16 sps:$4 sm:$0xff]   ;;  %v6778_v31 = vld [vmem:[#allocation11 + $0x52c] ss:$16 sps:$4 sm:$0xff]  }
 0x497   :  { %4476 = vmatpush1.bf16.msra.mxu0 %v6689_v32  ;;  %4640 = vmatpush1.bf16.msra.mxu1 %v6692_v34  ;;  %v6773_v32 = vld [vmem:[#allocation11 + $0x520] ss:$16 sps:$4 sm:$0xff]   ;;  %v6776_v34 = vld [vmem:[#allocation11 + $0x528] ss:$16 sps:$4 sm:$0xff]  }
 0x498   :  { %4477 = vmatprep.subr.bf16.mxu0 %v6697_v35  ;;  %4641 = vmatprep.subr.bf16.mxu1 %v6700_v33  ;;  %v6781_v35 = vld [vmem:[#allocation11 + $0x544] ss:$16 sps:$4 sm:$0xff]   ;;  %v6784_v33 = vld [vmem:[#allocation11 + $0x54c] ss:$16 sps:$4 sm:$0xff]  }
 0x49b   :  { %4478 = vmatpush1.bf16.msra.mxu0 %v6695_v36  ;;  %4642 = vmatpush1.bf16.msra.mxu1 %v6698_v37  ;;  %v6779_v36 = vld [vmem:[#allocation11 + $0x540] ss:$16 sps:$4 sm:$0xff]   ;;  %v6782_v37 = vld [vmem:[#allocation11 + $0x548] ss:$16 sps:$4 sm:$0xff]  }
 0x49c   :  { %4479 = vmatprep.subr.bf16.mxu0 %v6703_v2  ;;  %4643 = vmatprep.subr.bf16.mxu1 %v6706_v38  ;;  %v6787_v2 = vld [vmem:[#allocation11 + $0x564] ss:$16 sps:$4 sm:$0xff]   ;;  %v6790_v38 = vld [vmem:[#allocation11 + $0x56c] ss:$16 sps:$4 sm:$0xff]  }
 0x49f   :  { %4480 = vmatpush1.bf16.msra.mxu0 %v6701_v39  ;;  %4644 = vmatpush1.bf16.msra.mxu1 %v6704_v40  ;;  %v6785_v39 = vld [vmem:[#allocation11 + $0x560] ss:$16 sps:$4 sm:$0xff]   ;;  %v6788_v40 = vld [vmem:[#allocation11 + $0x568] ss:$16 sps:$4 sm:$0xff]  }
 0x4a0   :  { %4481 = vmatprep.subr.bf16.mxu0 %v6709_v43  ;;  %4645 = vmatprep.subr.bf16.mxu1 %v6712_v45  ;;  %v6793_v43 = vld [vmem:[#allocation11 + $0x584] ss:$16 sps:$4 sm:$0xff]   ;;  %v6796_v45 = vld [vmem:[#allocation11 + $0x58c] ss:$16 sps:$4 sm:$0xff]  }
 0x4a3   :  { %4482 = vmatpush1.bf16.msra.mxu0 %v6707_v46  ;;  %4646 = vmatpush1.bf16.msra.mxu1 %v6710_v47  ;;  %v6791_v46 = vld [vmem:[#allocation11 + $0x580] ss:$16 sps:$4 sm:$0xff]   ;;  %v6794_v47 = vld [vmem:[#allocation11 + $0x588] ss:$16 sps:$4 sm:$0xff]  }
 0x4a4   :  { %4483 = vmatprep.subr.bf16.mxu0 %v6715_v48  ;;  %4647 = vmatprep.subr.bf16.mxu1 %v6718_v49  ;;  %v6799_v48 = vld [vmem:[#allocation11 + $0x5a4] ss:$16 sps:$4 sm:$0xff]   ;;  %v6802_v49 = vld [vmem:[#allocation11 + $0x5ac] ss:$16 sps:$4 sm:$0xff]  }
 0x4a7   :  { %4484 = vmatpush1.bf16.msra.mxu0 %v6713_v8  ;;  %4648 = vmatpush1.bf16.msra.mxu1 %v6716_v50  ;;  %v6797_v8 = vld [vmem:[#allocation11 + $0x5a0] ss:$16 sps:$4 sm:$0xff]   ;;  %v6800_v50 = vld [vmem:[#allocation11 + $0x5a8] ss:$16 sps:$4 sm:$0xff]  }
 0x4a8   :  { %4494 = vmatprep.subr.bf16.mxu0 %v6721_v51  ;;  %4658 = vmatprep.subr.bf16.mxu1 %v6724_v53  ;;  %v6805_v51 = vld [vmem:[#allocation11 + $0x5c4] ss:$16 sps:$4 sm:$0xff]   ;;  %v6808_v53 = vld [vmem:[#allocation11 + $0x5cc] ss:$16 sps:$4 sm:$0xff]  }
 0x4aa   :  { %4486 = vmatmul.mubr.bf16.vlgmr.msra.gmra.mrb[12].mxu0 %v2820_v56  ;;  %4650 = vmatmul.mubr.bf16.vlgmr.msra.gmra.mrb[20].mxu1 %v2820_v56  ;;  %v1192_v56 = vsub.s32 5, %v7542_v41 }
 0x4ab   :  { %4495 = vmatpush1.bf16.msra.mxu0 %v6719_v54  ;;  %4659 = vmatpush1.bf16.msra.mxu1 %v6722_v55  ;;  %v1188_v54 = vsub.s32 4, %v7542_v41  ;;  %v1196_v55 = vsub.s32 6, %v7542_v41 }
 0x4ac   :  { %4496 = vmatprep.subr.bf16.mxu0 %v6727_v57  ;;  %4660 = vmatprep.subr.bf16.mxu1 %v6730_v58  ;;  %v1200_v57 = vsub.s32 7, %v7542_v41  ;;  %v6803_v58 = vld [vmem:[#allocation11 + $0x5c0] ss:$16 sps:$4 sm:$0xff]  }
 0x4ad   :  { %v6809_v41 = vld [vmem:[#allocation11 + $0x5e0] ss:$16 sps:$4 sm:$0xff]  }
 0x4af   :  { %4497 = vmatpush1.bf16.msra.mxu0 %v6725_v59  ;;  %4661 = vmatpush1.bf16.msra.mxu1 %v6728_v60  ;;  %v6806_v59 = vld [vmem:[#allocation11 + $0x5c8] ss:$16 sps:$4 sm:$0xff]   ;;  %v1189_v60 = vrot.slane %v7601_v22, %v1188_v54  ;;  %v6859_v54 = vld [vmem:[#allocation11 + $0x6e4] ss:$16 sps:$4 sm:$0xff]  }
 0x4b0   :  { %4498 = vmatprep.subr.bf16.mxu0 %v6733_v61  ;;  %4662 = vmatprep.subr.bf16.mxu1 %v6736_v62  ;;  %v6811_v61 = vld [vmem:[#allocation11 + $0x5e4] ss:$16 sps:$4 sm:$0xff]   ;;  %v6814_v62 = vld [vmem:[#allocation11 + $0x5ec] ss:$16 sps:$4 sm:$0xff]  }
 0x4b3   :  { %4499 = vmatpush1.bf16.msra.mxu0 %v6731_v63  ;;  %4663 = vmatpush1.bf16.msra.mxu1 %v6734_v1  ;;  %v1197_v63 = vrot.slane %v7601_v22, %v1196_v55  ;;  %v1193_v1 = vrot.slane %v7601_v22, %v1192_v56  ;;  %v6862_v55 = vld [vmem:[#allocation11 + $0x6ec] ss:$16 sps:$4 sm:$0xff]   ;;  %v6857_v56 = vld [vmem:[#allocation11 + $0x6e0] ss:$16 sps:$4 sm:$0xff]  }
 0x4b4   :  { %4500 = vmatprep.subr.bf16.mxu0 %v6739_v30  ;;  %4664 = vmatprep.subr.bf16.mxu1 %v6742_v4  ;;  %v1201_v30 = vrot.slane %v7601_v22, %v1200_v57  ;;  %v6860_v57 = vld [vmem:[#allocation11 + $0x6e8] ss:$16 sps:$4 sm:$0xff]  }
 0x4b7   :  { %4501 = vmatpush1.bf16.msra.mxu0 %v6737_v5  ;;  %4665 = vmatpush1.bf16.msra.mxu1 %v6740_v6  ;;  %v6812_v5 = vld [vmem:[#allocation11 + $0x5e8] ss:$16 sps:$4 sm:$0xff]  }
 0x4b8   :  { %4502 = vmatprep.subr.bf16.mxu0 %v6745_v7  ;;  %4666 = vmatprep.subr.bf16.mxu1 %v6748_v9 }
 0x4bb   :  { %4503 = vmatpush1.bf16.msra.mxu0 %v6743_v10  ;;  %4667 = vmatpush1.bf16.msra.mxu1 %v6746_v11  ;;  %v6817_v10 = vld [vmem:[#allocation11 + $0x604] ss:$16 sps:$4 sm:$0xff]   ;;  %v6820_v11 = vld [vmem:[#allocation11 + $0x60c] ss:$16 sps:$4 sm:$0xff]  }
 0x4bc   :  { %4504 = vmatprep.subr.bf16.mxu0 %v6751_v12  ;;  %4668 = vmatprep.subr.bf16.mxu1 %v6754_v14 }
 0x4bf   :  { %4505 = vmatpush1.bf16.msra.mxu0 %v6749_v25  ;;  %4669 = vmatpush1.bf16.msra.mxu1 %v6752_v15 }
 0x4c0   :  { %4506 = vmatprep.subr.bf16.mxu0 %v6757_v16  ;;  %4670 = vmatprep.subr.bf16.mxu1 %v6760_v17 }
 0x4c3   :  { %4507 = vmatpush1.bf16.msra.mxu0 %v6755_v18  ;;  %4671 = vmatpush1.bf16.msra.mxu1 %v6758_v19 }
 0x4c4   :  { %4508 = vmatprep.subr.bf16.mxu0 %v6763_v20  ;;  %4672 = vmatprep.subr.bf16.mxu1 %v6766_v21  ;;  %v6815_v21 = vld [vmem:[#allocation11 + $0x600] ss:$16 sps:$4 sm:$0xff]  }
 0x4c7   :  { %4509 = vmatpush1.bf16.msra.mxu0 %v6761_v23  ;;  %4673 = vmatpush1.bf16.msra.mxu1 %v6764_v24  ;;  %v6818_v23 = vld [vmem:[#allocation11 + $0x608] ss:$16 sps:$4 sm:$0xff]  }
 0x4c8   :  { %4510 = vmatprep.subr.bf16.mxu0 %v6769_v27  ;;  %4674 = vmatprep.subr.bf16.mxu1 %v6772_v28  ;;  %v6823_v28 = vld [vmem:[#allocation11 + $0x624] ss:$16 sps:$4 sm:$0xff]  }
 0x4cb   :  { %4511 = vmatpush1.bf16.msra.mxu0 %v6767_v26  ;;  %4675 = vmatpush1.bf16.msra.mxu1 %v6770_v29  ;;  %v6826_v26 = vld [vmem:[#allocation11 + $0x62c] ss:$16 sps:$4 sm:$0xff]  }
 0x4cc   :  { %4512 = vmatprep.subr.bf16.mxu0 %v6775_v52  ;;  %4676 = vmatprep.subr.bf16.mxu1 %v6778_v31  ;;  %v6821_v52 = vld [vmem:[#allocation11 + $0x620] ss:$16 sps:$4 sm:$0xff]   ;;  %v6824_v31 = vld [vmem:[#allocation11 + $0x628] ss:$16 sps:$4 sm:$0xff]  }
 0x4cf   :  { %4513 = vmatpush1.bf16.msra.mxu0 %v6773_v32  ;;  %4677 = vmatpush1.bf16.msra.mxu1 %v6776_v34  ;;  %v6829_v32 = vld [vmem:[#allocation11 + $0x644] ss:$16 sps:$4 sm:$0xff]   ;;  %v6832_v34 = vld [vmem:[#allocation11 + $0x64c] ss:$16 sps:$4 sm:$0xff]  }
 0x4d0   :  { %4514 = vmatprep.subr.bf16.mxu0 %v6781_v35  ;;  %4678 = vmatprep.subr.bf16.mxu1 %v6784_v33  ;;  %v6827_v35 = vld [vmem:[#allocation11 + $0x640] ss:$16 sps:$4 sm:$0xff]   ;;  %v6830_v33 = vld [vmem:[#allocation11 + $0x648] ss:$16 sps:$4 sm:$0xff]  }
 0x4d3   :  { %4515 = vmatpush1.bf16.msra.mxu0 %v6779_v36  ;;  %4679 = vmatpush1.bf16.msra.mxu1 %v6782_v37  ;;  %v6835_v36 = vld [vmem:[#allocation11 + $0x664] ss:$16 sps:$4 sm:$0xff]   ;;  %v6838_v37 = vld [vmem:[#allocation11 + $0x66c] ss:$16 sps:$4 sm:$0xff]  }
 0x4d4   :  { %4516 = vmatprep.subr.bf16.mxu0 %v6787_v2  ;;  %4680 = vmatprep.subr.bf16.mxu1 %v6790_v38  ;;  %v6833_v2 = vld [vmem:[#allocation11 + $0x660] ss:$16 sps:$4 sm:$0xff]   ;;  %v6836_v38 = vld [vmem:[#allocation11 + $0x668] ss:$16 sps:$4 sm:$0xff]  }
 0x4d7   :  { %4517 = vmatpush1.bf16.msra.mxu0 %v6785_v39  ;;  %4681 = vmatpush1.bf16.msra.mxu1 %v6788_v40  ;;  %v6841_v39 = vld [vmem:[#allocation11 + $0x684] ss:$16 sps:$4 sm:$0xff]   ;;  %v6844_v40 = vld [vmem:[#allocation11 + $0x68c] ss:$16 sps:$4 sm:$0xff]  }
 0x4d8   :  { %4518 = vmatprep.subr.bf16.mxu0 %v6793_v43  ;;  %4682 = vmatprep.subr.bf16.mxu1 %v6796_v45  ;;  %v6839_v43 = vld [vmem:[#allocation11 + $0x680] ss:$16 sps:$4 sm:$0xff]   ;;  %v6842_v45 = vld [vmem:[#allocation11 + $0x688] ss:$16 sps:$4 sm:$0xff]  }
 0x4db   :  { %4519 = vmatpush1.bf16.msra.mxu0 %v6791_v46  ;;  %4683 = vmatpush1.bf16.msra.mxu1 %v6794_v47  ;;  %v6847_v46 = vld [vmem:[#allocation11 + $0x6a4] ss:$16 sps:$4 sm:$0xff]   ;;  %v6850_v47 = vld [vmem:[#allocation11 + $0x6ac] ss:$16 sps:$4 sm:$0xff]  }
 0x4dc   :  { %4520 = vmatprep.subr.bf16.mxu0 %v6799_v48  ;;  %4684 = vmatprep.subr.bf16.mxu1 %v6802_v49  ;;  %v6845_v48 = vld [vmem:[#allocation11 + $0x6a0] ss:$16 sps:$4 sm:$0xff]   ;;  %v6848_v49 = vld [vmem:[#allocation11 + $0x6a8] ss:$16 sps:$4 sm:$0xff]  }
 0x4df   :  { %4521 = vmatpush1.bf16.msra.mxu0 %v6797_v8  ;;  %4685 = vmatpush1.bf16.msra.mxu1 %v6800_v50  ;;  %v6853_v8 = vld [vmem:[#allocation11 + $0x6c4] ss:$16 sps:$4 sm:$0xff]   ;;  %v6856_v50 = vld [vmem:[#allocation11 + $0x6cc] ss:$16 sps:$4 sm:$0xff]  }
 0x4e0   :  { %4522 = vmatprep.subr.bf16.mxu0 %v6805_v51  ;;  %4686 = vmatprep.subr.bf16.mxu1 %v6808_v53  ;;  %v6851_v51 = vld [vmem:[#allocation11 + $0x6c0] ss:$16 sps:$4 sm:$0xff]   ;;  %v6854_v53 = vld [vmem:[#allocation11 + $0x6c8] ss:$16 sps:$4 sm:$0xff]  }
 0x4e3   :  { %4523 = vmatpush1.bf16.msra.mxu0 %v6803_v58  ;;  %4687 = vmatpush1.bf16.msra.mxu1 %v6806_v59  ;;  %v2729_v4 = vpop.f32.mrb[8].mxu0  ;;  %v6865_v58 = vld [vmem:[#allocation11 + $0x704] ss:$16 sps:$4 sm:$0xff]   ;;  %v6868_v59 = vld [vmem:[#allocation11 + $0x70c] ss:$16 sps:$4 sm:$0xff]  }
 0x4e4   :  { %v6327_v6 = vadd.f32 %v2729_v4, %v1189_v60  ;;  %v2811_v7 = vpop.f32.mrb[16].mxu1  ;;  %v2731_v9 = vpop.f32.mrb[9].mxu0  ;;  %4524 = vmatprep.subr.bf16.mxu0 %v6811_v61  ;;  %4688 = vmatprep.subr.bf16.mxu1 %v6814_v62  ;;  %v6863_v60 = vld [vmem:[#allocation11 + $0x700] ss:$16 sps:$4 sm:$0xff]   ;;  %v6866_v61 = vld [vmem:[#allocation11 + $0x708] ss:$16 sps:$4 sm:$0xff]  }
 0x4e5   :  { %v7624_v12 = vadd.f32 %v2811_v7, %v1197_v63  ;;  %v6328_v14 = vadd.f32 %v2731_v9, %v1193_v1  ;;  %v2813_v25 = vpop.f32.mrb[17].mxu1  ;;  %v2733_v15 = vpop.f32.mrb[10].mxu0  ;;  %v6871_v62 = vld [vmem:[#allocation11 + $0x724] ss:$16 sps:$4 sm:$0xff]   ;;  %v6874_v63 = vld [vmem:[#allocation11 + $0x72c] ss:$16 sps:$4 sm:$0xff]  }
 0x4e6   :  { %v6330_v16 = vadd.f32 %v2813_v25, %v1201_v30  ;;  %v2815_v17 = vpop.f32.mrb[18].mxu1  ;;  %v2734_v22 = vpop.f32.mrb[11].mxu0  ;;  %v2822_v24 = vpack.c.bf16 %v6327_v6, %v6327_v6  ;;  %v6869_v1 = vld [vmem:[#allocation11 + $0x720] ss:$16 sps:$4 sm:$0xff]   ;;  %v6872_v30 = vld [vmem:[#allocation11 + $0x728] ss:$16 sps:$4 sm:$0xff]  }
 0x4e7   :  { %v2823_v18 = vpack.c.bf16 %v6328_v14, %v6328_v14  ;;  %v6253_v19 = vpack.c.bf16 %v6328_v14, %v6327_v6  ;;  %v2816_v20 = vpop.f32.mrb[19].mxu1  ;;  %4525 = vmatpush1.bf16.msra.mxu0 %v6809_v41  ;;  %4689 = vmatpush1.bf16.msra.mxu1 %v6812_v5  ;;  %v6877_v4 = vld [vmem:[#allocation11 + $0x744] ss:$16 sps:$4 sm:$0xff]   ;;  %v6880_v41 = vld [vmem:[#allocation11 + $0x74c] ss:$16 sps:$4 sm:$0xff]  }
 0x4e8   :  { %v6254_v27 = vpack.c.bf16 %v6330_v16, %v7624_v12  ;;  %4535 = vmatprep.subr.bf16.mxu0 %v6817_v10  ;;  %4699 = vmatprep.subr.bf16.mxu1 %v6820_v11  ;;  %v2825_v29 = vpack.c.bf16 %v6330_v16, %v6330_v16  ;;  %v6875_v5 = vld [vmem:[#allocation11 + $0x740] ss:$16 sps:$4 sm:$0xff]   ;;  %v6878_v6 = vld [vmem:[#allocation11 + $0x748] ss:$16 sps:$4 sm:$0xff]   ;;  %v6883_v7 = vld [vmem:[#allocation11 + $0x764] ss:$16 sps:$4 sm:$0xff]  }
 0x4e9   :  { %2852 = vst [vmem:[#allocation17 + $0x10] sm:$0xff] %v6253_v19  ;;  %4526 = vmatprep.mubr.bf16.mxu0 %v2823_v18  ;;  %4690 = vmatprep.mubr.bf16.mxu1 %v2823_v18  ;;  %v6886_v9 = vld [vmem:[#allocation11 + $0x76c] ss:$16 sps:$4 sm:$0xff]   ;;  %v6881_v10 = vld [vmem:[#allocation11 + $0x760] ss:$16 sps:$4 sm:$0xff]  }
 0x4ea   :  { %2853 = vst [vmem:[#allocation17 + $0x18] sm:$0xff] %v6254_v27  ;;  %4527 = vmatmul.mubr.bf16.vlgmr.msra.gmra.mrb[12].mxu0 %v2822_v24  ;;  %4691 = vmatmul.mubr.bf16.vlgmr.msra.gmra.mrb[20].mxu1 %v2822_v24  ;;  %v6884_v11 = vld [vmem:[#allocation11 + $0x768] ss:$16 sps:$4 sm:$0xff]   ;;  %v6889_v14 = vld [vmem:[#allocation11 + $0x784] ss:$16 sps:$4 sm:$0xff]  }
 0x4eb   :  { %4536 = vmatpush1.bf16.msra.mxu0 %v6815_v21  ;;  %4700 = vmatpush1.bf16.msra.mxu1 %v6818_v23  ;;  %v6892_v25 = vld [vmem:[#allocation11 + $0x78c] ss:$16 sps:$4 sm:$0xff]   ;;  %v6887_v15 = vld [vmem:[#allocation11 + $0x780] ss:$16 sps:$4 sm:$0xff]   ;;  %v6890_v16 = vld [vmem:[#allocation11 + $0x788] ss:$16 sps:$4 sm:$0xff]  }
 0x4ec   :  { %4567 = vmatprep.mubr.bf16.mxu0 %v2825_v29  ;;  %4731 = vmatprep.mubr.bf16.mxu1 %v2825_v29  ;;  %v6895_v17 = vld [vmem:[#allocation11 + $0x7a4] ss:$16 sps:$4 sm:$0xff]   ;;  %v6898_v22 = vld [vmem:[#allocation11 + $0x7ac] ss:$16 sps:$4 sm:$0xff]   ;;  %v6893_v18 = vld [vmem:[#allocation11 + $0x7a0] ss:$16 sps:$4 sm:$0xff]  }
 0x4ed   :  { %4537 = vmatprep.subr.bf16.mxu0 %v6823_v28  ;;  %4701 = vmatprep.subr.bf16.mxu1 %v6826_v26  ;;  %v6896_v19 = vld [vmem:[#allocation11 + $0x7a8] ss:$16 sps:$4 sm:$0xff]   ;;  %v6901_v20 = vld [vmem:[#allocation11 + $0x7c4] ss:$16 sps:$4 sm:$0xff]   ;;  %v6904_v21 = vld [vmem:[#allocation11 + $0x7cc] ss:$16 sps:$4 sm:$0xff]  }
 0x4ee   :  { %v6899_v23 = vld [vmem:[#allocation11 + $0x7c0] ss:$16 sps:$4 sm:$0xff]   ;;  %v6902_v24 = vld [vmem:[#allocation11 + $0x7c8] ss:$16 sps:$4 sm:$0xff]   ;;  %v6907_v27 = vld [vmem:[#allocation11 + $0x7e4] ss:$16 sps:$4 sm:$0xff]  }
 0x4ef   :  { %4538 = vmatpush1.bf16.msra.mxu0 %v6821_v52  ;;  %4702 = vmatpush1.bf16.msra.mxu1 %v6824_v31  ;;  %v6910_v28 = vld [vmem:[#allocation11 + $0x7ec] ss:$16 sps:$4 sm:$0xff]   ;;  %v6905_v26 = vld [vmem:[#allocation11 + $0x7e0] ss:$16 sps:$4 sm:$0xff]   ;;  %v6908_v29 = vld [vmem:[#allocation11 + $0x7e8] ss:$16 sps:$4 sm:$0xff]  }
 0x4f0   :  { %4539 = vmatprep.subr.bf16.mxu0 %v6829_v32  ;;  %4703 = vmatprep.subr.bf16.mxu1 %v6832_v34  ;;  %v6913_v52 = vld [vmem:[#allocation14 + $0x4] ss:$8 sps:$4 sm:$0xff]   ;;  %v6911_v31 = vld [vmem:[#allocation14] ss:$8 sps:$4 sm:$0xff]   ;;  %v2824_v32 = vpack.c.bf16 %v7624_v12, %v7624_v12  ;;  %v6916_v34 = vld [vmem:[#allocation14 + $0x14] ss:$8 sps:$4 sm:$0xff]  }
 0x4f1   :  { %v6928_v12 = vld [vmem:[#allocation14 + $0x54] ss:$8 sps:$4 sm:$0xff]  }
 0x4f3   :  { %4540 = vmatpush1.bf16.msra.mxu0 %v6827_v35  ;;  %4704 = vmatpush1.bf16.msra.mxu1 %v6830_v33  ;;  %v6914_v35 = vld [vmem:[#allocation14 + $0x10] ss:$8 sps:$4 sm:$0xff]   ;;  %v6919_v33 = vld [vmem:[#allocation14 + $0x24] ss:$8 sps:$4 sm:$0xff]  }
 0x4f4   :  { %4541 = vmatprep.subr.bf16.mxu0 %v6835_v36  ;;  %4705 = vmatprep.subr.bf16.mxu1 %v6838_v37  ;;  %v6917_v36 = vld [vmem:[#allocation14 + $0x20] ss:$8 sps:$4 sm:$0xff]   ;;  %v6922_v37 = vld [vmem:[#allocation14 + $0x34] ss:$8 sps:$4 sm:$0xff]  }
 0x4f7   :  { %4542 = vmatpush1.bf16.msra.mxu0 %v6833_v2  ;;  %4706 = vmatpush1.bf16.msra.mxu1 %v6836_v38  ;;  %v6920_v2 = vld [vmem:[#allocation14 + $0x30] ss:$8 sps:$4 sm:$0xff]   ;;  %v6925_v38 = vld [vmem:[#allocation14 + $0x44] ss:$8 sps:$4 sm:$0xff]  }
 0x4f8   :  { %4543 = vmatprep.subr.bf16.mxu0 %v6841_v39  ;;  %4707 = vmatprep.subr.bf16.mxu1 %v6844_v40  ;;  %v6923_v39 = vld [vmem:[#allocation14 + $0x40] ss:$8 sps:$4 sm:$0xff]   ;;  %v6926_v40 = vld [vmem:[#allocation14 + $0x50] ss:$8 sps:$4 sm:$0xff]  }
 0x4fb   :  { %4544 = vmatpush1.bf16.msra.mxu0 %v6839_v43  ;;  %4708 = vmatpush1.bf16.msra.mxu1 %v6842_v45  ;;  %v6931_v43 = vld [vmem:[#allocation14 + $0x64] ss:$8 sps:$4 sm:$0xff]   ;;  %v6929_v45 = vld [vmem:[#allocation14 + $0x60] ss:$8 sps:$4 sm:$0xff]  }
 0x4fc   :  { %4545 = vmatprep.subr.bf16.mxu0 %v6847_v46  ;;  %4709 = vmatprep.subr.bf16.mxu1 %v6850_v47  ;;  %v6934_v46 = vld [vmem:[#allocation14 + $0x74] ss:$8 sps:$4 sm:$0xff]   ;;  %v6932_v47 = vld [vmem:[#allocation14 + $0x70] ss:$8 sps:$4 sm:$0xff]  }
 0x4ff   :  { %4546 = vmatpush1.bf16.msra.mxu0 %v6845_v48  ;;  %4710 = vmatpush1.bf16.msra.mxu1 %v6848_v49  ;;  %v6937_v48 = vld [vmem:[#allocation14 + $0x84] ss:$8 sps:$4 sm:$0xff]   ;;  %v6935_v49 = vld [vmem:[#allocation14 + $0x80] ss:$8 sps:$4 sm:$0xff]  }
 0x500   :  { %4547 = vmatprep.subr.bf16.mxu0 %v6853_v8  ;;  %4711 = vmatprep.subr.bf16.mxu1 %v6856_v50  ;;  %v6940_v8 = vld [vmem:[#allocation14 + $0x94] ss:$8 sps:$4 sm:$0xff]   ;;  %v6938_v50 = vld [vmem:[#allocation14 + $0x90] ss:$8 sps:$4 sm:$0xff]  }
 0x503   :  { %4548 = vmatpush1.bf16.msra.mxu0 %v6851_v51  ;;  %4712 = vmatpush1.bf16.msra.mxu1 %v6854_v53  ;;  %v6943_v51 = vld [vmem:[#allocation14 + $0xa4] ss:$8 sps:$4 sm:$0xff]   ;;  %v6941_v53 = vld [vmem:[#allocation14 + $0xa0] ss:$8 sps:$4 sm:$0xff]  }
 0x504   :  { %4549 = vmatprep.subr.bf16.mxu0 %v6859_v54  ;;  %4713 = vmatprep.subr.bf16.mxu1 %v6862_v55  ;;  %v6946_v54 = vld [vmem:[#allocation14 + $0xb4] ss:$8 sps:$4 sm:$0xff]   ;;  %v6944_v55 = vld [vmem:[#allocation14 + $0xb0] ss:$8 sps:$4 sm:$0xff]  }
 0x507   :  { %4550 = vmatpush1.bf16.msra.mxu0 %v6857_v56  ;;  %4714 = vmatpush1.bf16.msra.mxu1 %v6860_v57  ;;  %v6949_v56 = vld [vmem:[#allocation14 + $0xc4] ss:$8 sps:$4 sm:$0xff]   ;;  %v6947_v57 = vld [vmem:[#allocation14 + $0xc0] ss:$8 sps:$4 sm:$0xff]  }
 0x508   :  { %4551 = vmatprep.subr.bf16.mxu0 %v6865_v58  ;;  %4715 = vmatprep.subr.bf16.mxu1 %v6868_v59  ;;  %v6952_v58 = vld [vmem:[#allocation14 + $0xd4] ss:$8 sps:$4 sm:$0xff]   ;;  %v6950_v59 = vld [vmem:[#allocation14 + $0xd0] ss:$8 sps:$4 sm:$0xff]  }
 0x50b   :  { %4552 = vmatpush1.bf16.msra.mxu0 %v6863_v60  ;;  %4716 = vmatpush1.bf16.msra.mxu1 %v6866_v61  ;;  %v6955_v60 = vld [vmem:[#allocation14 + $0xe4] ss:$8 sps:$4 sm:$0xff]   ;;  %v6953_v61 = vld [vmem:[#allocation14 + $0xe0] ss:$8 sps:$4 sm:$0xff]  }
 0x50c   :  { %4553 = vmatprep.subr.bf16.mxu0 %v6871_v62  ;;  %4717 = vmatprep.subr.bf16.mxu1 %v6874_v63  ;;  %v6958_v62 = vld [vmem:[#allocation14 + $0xf4] ss:$8 sps:$4 sm:$0xff]   ;;  %v6956_v63 = vld [vmem:[#allocation14 + $0xf0] ss:$8 sps:$4 sm:$0xff]  }
 0x50f   :  { %4554 = vmatpush1.bf16.msra.mxu0 %v6869_v1  ;;  %4718 = vmatpush1.bf16.msra.mxu1 %v6872_v30  ;;  %v6961_v1 = vld [vmem:[#allocation14 + $0x104] ss:$8 sps:$4 sm:$0xff]   ;;  %v7007_v30 = vld [vmem:[%s7770_s13 + $0x40] sm:$0xff]  }
 0x510   :  { %4555 = vmatprep.subr.bf16.mxu0 %v6877_v4  ;;  %4719 = vmatprep.subr.bf16.mxu1 %v6880_v41  ;;  %v7008_v4 = vld [vmem:[%s7770_s13] sm:$0xff]   ;;  %v7009_v41 = vld [vmem:[%s7770_s13 + $0x48] sm:$0xff]  }
 0x513   :  { %4556 = vmatpush1.bf16.msra.mxu0 %v6875_v5  ;;  %4720 = vmatpush1.bf16.msra.mxu1 %v6878_v6  ;;  %v7010_v5 = vld [vmem:[%s7770_s13 + $0x8] sm:$0xff]   ;;  %v7011_v6 = vld [vmem:[%s7770_s13 + $0x50] sm:$0xff]  }
 0x514   :  { %4557 = vmatprep.subr.bf16.mxu0 %v6883_v7  ;;  %4721 = vmatprep.subr.bf16.mxu1 %v6886_v9  ;;  %v7012_v7 = vld [vmem:[%s7770_s13 + $0x10] sm:$0xff]   ;;  %v7013_v9 = vld [vmem:[%s7770_s13 + $0x58] sm:$0xff]  }
 0x517   :  { %4558 = vmatpush1.bf16.msra.mxu0 %v6881_v10  ;;  %4722 = vmatpush1.bf16.msra.mxu1 %v6884_v11  ;;  %v7014_v10 = vld [vmem:[%s7770_s13 + $0x18] sm:$0xff]   ;;  %v7015_v11 = vld [vmem:[%s7770_s13 + $0x60] sm:$0xff]  }
 0x518   :  { %4559 = vmatprep.subr.bf16.mxu0 %v6889_v14  ;;  %4723 = vmatprep.subr.bf16.mxu1 %v6892_v25  ;;  %v7016_v14 = vld [vmem:[%s7770_s13 + $0x20] sm:$0xff]   ;;  %v7017_v25 = vld [vmem:[%s7770_s13 + $0x68] sm:$0xff]  }
 0x51b   :  { %4560 = vmatpush1.bf16.msra.mxu0 %v6887_v15  ;;  %4724 = vmatpush1.bf16.msra.mxu1 %v6890_v16  ;;  %v7018_v15 = vld [vmem:[%s7770_s13 + $0x28] sm:$0xff]   ;;  %v7665_v16 = vld [vmem:[#allocation13] sm:$0xf] }
 0x51c   :  { %4561 = vmatprep.subr.bf16.mxu0 %v6895_v17  ;;  %4725 = vmatprep.subr.bf16.mxu1 %v6898_v22  ;;  %v3115_v17 = vrot.slane %v7665_v16, %v7545_v42  ;;  %v3119_v22 = vrot.slane %v7665_v16, %v7548_v44 }
 0x51f   :  { %4562 = vmatpush1.bf16.msra.mxu0 %v6893_v18  ;;  %4726 = vmatpush1.bf16.msra.mxu1 %v6896_v19  ;;  %v3127_v18 = vrot.slane %v7665_v16, %v7558_v3 }
 0x520   :  { %4563 = vmatprep.subr.bf16.mxu0 %v6901_v20  ;;  %4727 = vmatprep.subr.bf16.mxu1 %v6904_v21 }
 0x523   :  { %4564 = vmatpush1.bf16.msra.mxu0 %v6899_v23  ;;  %4728 = vmatpush1.bf16.msra.mxu1 %v6902_v24 }
 0x524   :  { %4565 = vmatprep.subr.bf16.mxu0 %v6907_v27  ;;  %4729 = vmatprep.subr.bf16.mxu1 %v6910_v28 }
 0x527   :  { %4566 = vmatpush1.bf16.msra.mxu0 %v6905_v26  ;;  %4730 = vmatpush1.bf16.msra.mxu1 %v6908_v29 }
 0x528   :  { %5144 = vmatprep.subr.bf16.mxu0 %v6913_v52  ;;  %6260 = vmatprep.subr.bf16.mxu1 %v7007_v30  ;;  %v3123_v30 = vrot.slane %v7665_v16, %v7581_v13  ;;  %v7020_v13 = vld [vmem:[%s7770_s13 + $0x30] sm:$0xff]  }
 0x52a   :  { %4568 = vmatmul.mubr.bf16.vlgmr.msra.gmra.mrb[12].mxu0 %v2824_v32  ;;  %4732 = vmatmul.mubr.bf16.vlgmr.msra.gmra.mrb[20].mxu1 %v2824_v32 }
 0x52b   :  { %5145 = vmatpush1.bf16.msra.mxu0 %v6911_v31  ;;  %6261 = vmatpush3.bf16.msra.mxu1 %v7008_v4  ;;  %v7003_v4 = vld [vmem:[#allocation14 + $0x1e4] ss:$8 sps:$4 sm:$0xff]  }
 0x52c   :  { %5146 = vmatprep.subr.bf16.mxu0 %v6916_v34  ;;  %6262 = vmatprep.subr.bf16.mxu1 %v7009_v41  ;;  %v7001_v41 = vld [vmem:[#allocation14 + $0x1e0] ss:$8 sps:$4 sm:$0xff]  }
 0x52f   :  { %5147 = vmatpush1.bf16.msra.mxu0 %v6914_v35  ;;  %6263 = vmatpush3.bf16.msra.mxu1 %v7010_v5 }
 0x530   :  { %5148 = vmatprep.subr.bf16.mxu0 %v6919_v33  ;;  %6264 = vmatprep.subr.bf16.mxu1 %v7011_v6  ;;  %v7006_v6 = vld [vmem:[#allocation14 + $0x1f4] ss:$8 sps:$4 sm:$0xff]  }
 0x533   :  { %5149 = vmatpush1.bf16.msra.mxu0 %v6917_v36  ;;  %6265 = vmatpush3.bf16.msra.mxu1 %v7012_v7  ;;  %v6959_v36 = vld [vmem:[#allocation14 + $0x100] ss:$8 sps:$4 sm:$0xff]   ;;  %v7004_v7 = vld [vmem:[#allocation14 + $0x1f0] ss:$8 sps:$4 sm:$0xff]  }
 0x534   :  { %5150 = vmatprep.subr.bf16.mxu0 %v6922_v37  ;;  %6266 = vmatprep.subr.bf16.mxu1 %v7013_v9 }
 0x537   :  { %5151 = vmatpush1.bf16.msra.mxu0 %v6920_v2  ;;  %6267 = vmatpush3.bf16.msra.mxu1 %v7014_v10  ;;  %v6964_v2 = vld [vmem:[#allocation14 + $0x114] ss:$8 sps:$4 sm:$0xff]  }
 0x538   :  { %5152 = vmatprep.subr.bf16.mxu0 %v6925_v38  ;;  %6268 = vmatprep.subr.bf16.mxu1 %v7015_v11  ;;  %v6962_v38 = vld [vmem:[#allocation14 + $0x110] ss:$8 sps:$4 sm:$0xff]  }
 0x539   :  { %v7019_v11 = vld [vmem:[%s7770_s13 + $0x70] sm:$0xff]  }
 0x53b   :  { %5153 = vmatpush1.bf16.msra.mxu0 %v6923_v39  ;;  %6269 = vmatpush3.bf16.msra.mxu1 %v7016_v14  ;;  %v6967_v39 = vld [vmem:[#allocation14 + $0x124] ss:$8 sps:$4 sm:$0xff]   ;;  %v7021_v14 = vld [vmem:[%s7770_s13 + $0x78] sm:$0xff]  }
 0x53c   :  { %5154 = vmatprep.subr.bf16.mxu0 %v6928_v12  ;;  %6270 = vmatprep.subr.bf16.mxu1 %v7017_v25  ;;  %v6965_v12 = vld [vmem:[#allocation14 + $0x120] ss:$8 sps:$4 sm:$0xff]   ;;  %v7022_v25 = vld [vmem:[%s7770_s13 + $0x38] sm:$0xff]  }
 0x53f   :  { %5155 = vmatpush1.bf16.msra.mxu0 %v6926_v40  ;;  %6271 = vmatpush3.bf16.msra.mxu1 %v7018_v15  ;;  %v6970_v40 = vld [vmem:[#allocation14 + $0x134] ss:$8 sps:$4 sm:$0xff]   ;;  %v4812_v15 = vld [vmem:[#allocation16] sm:$0x3] }
 0x540   :  { %5156 = vmatprep.subr.bf16.mxu0 %v6931_v43  ;;  %v6968_v43 = vld [vmem:[#allocation14 + $0x130] ss:$8 sps:$4 sm:$0xff]   ;;  %6272 = vmatprep.subr.bf16.mxu1 %v7019_v11  ;;  %v4817_v16 = vrot.slane %v4812_v15, %v7545_v42  ;;  %v7024_v42 = vld [vmem:[%s7772_s15 + $0x8] sm:$0xff]  }
 0x543   :  { %5157 = vmatpush1.bf16.msra.mxu0 %v6929_v45  ;;  %v6973_v45 = vld [vmem:[#allocation14 + $0x144] ss:$8 sps:$4 sm:$0xff]   ;;  %6273 = vmatpush3.bf16.msra.mxu1 %v7020_v13 }
 0x544   :  { %5158 = vmatprep.subr.bf16.mxu0 %v6934_v46  ;;  %v6971_v46 = vld [vmem:[#allocation14 + $0x140] ss:$8 sps:$4 sm:$0xff]   ;;  %6274 = vmatprep.subr.bf16.mxu1 %v7021_v14 }
 0x547   :  { %5159 = vmatpush1.bf16.msra.mxu0 %v6932_v47  ;;  %v6976_v47 = vld [vmem:[#allocation14 + $0x154] ss:$8 sps:$4 sm:$0xff]   ;;  %6275 = vmatpush3.bf16.msra.mxu1 %v7022_v25 }
 0x548   :  { %5160 = vmatprep.subr.bf16.mxu0 %v6937_v48  ;;  %v6974_v48 = vld [vmem:[#allocation14 + $0x150] ss:$8 sps:$4 sm:$0xff]   ;;  %6303 = vmatprep.subr.bf16.mxu1 %v7308_v0 }
 0x54b   :  { %5161 = vmatpush1.bf16.msra.mxu0 %v6935_v49  ;;  %v6979_v49 = vld [vmem:[#allocation14 + $0x164] ss:$8 sps:$4 sm:$0xff]  }
 0x54c   :  { %5162 = vmatprep.subr.bf16.mxu0 %v6940_v8  ;;  %v6977_v8 = vld [vmem:[#allocation14 + $0x160] ss:$8 sps:$4 sm:$0xff]  }
 0x54f   :  { %5163 = vmatpush1.bf16.msra.mxu0 %v6938_v50  ;;  %v6982_v50 = vld [vmem:[#allocation14 + $0x174] ss:$8 sps:$4 sm:$0xff]  }
 0x550   :  { %5164 = vmatprep.subr.bf16.mxu0 %v6943_v51  ;;  %v6980_v51 = vld [vmem:[#allocation14 + $0x170] ss:$8 sps:$4 sm:$0xff]  }
 0x553   :  { %5165 = vmatpush1.bf16.msra.mxu0 %v6941_v53  ;;  %v6985_v53 = vld [vmem:[#allocation14 + $0x184] ss:$8 sps:$4 sm:$0xff]  }
 0x554   :  { %5166 = vmatprep.subr.bf16.mxu0 %v6946_v54  ;;  %v6983_v54 = vld [vmem:[#allocation14 + $0x180] ss:$8 sps:$4 sm:$0xff]  }
 0x557   :  { %5167 = vmatpush1.bf16.msra.mxu0 %v6944_v55  ;;  %v6988_v55 = vld [vmem:[#allocation14 + $0x194] ss:$8 sps:$4 sm:$0xff]  }
 0x558   :  { %5168 = vmatprep.subr.bf16.mxu0 %v6949_v56  ;;  %v6986_v56 = vld [vmem:[#allocation14 + $0x190] ss:$8 sps:$4 sm:$0xff]  }
 0x55b   :  { %5169 = vmatpush1.bf16.msra.mxu0 %v6947_v57  ;;  %v6991_v57 = vld [vmem:[#allocation14 + $0x1a4] ss:$8 sps:$4 sm:$0xff]  }
 0x55c   :  { %5170 = vmatprep.subr.bf16.mxu0 %v6952_v58  ;;  %v6989_v58 = vld [vmem:[#allocation14 + $0x1a0] ss:$8 sps:$4 sm:$0xff]  }
 0x55f   :  { %5171 = vmatpush1.bf16.msra.mxu0 %v6950_v59  ;;  %v6994_v59 = vld [vmem:[#allocation14 + $0x1b4] ss:$8 sps:$4 sm:$0xff]  }
 0x560   :  { %5172 = vmatprep.subr.bf16.mxu0 %v6955_v60  ;;  %v6992_v60 = vld [vmem:[#allocation14 + $0x1b0] ss:$8 sps:$4 sm:$0xff]  }
 0x563   :  { %5173 = vmatpush1.bf16.msra.mxu0 %v6953_v61  ;;  %v6997_v61 = vld [vmem:[#allocation14 + $0x1c4] ss:$8 sps:$4 sm:$0xff]  }
 0x564   :  { %5174 = vmatprep.subr.bf16.mxu0 %v6958_v62  ;;  %v6995_v62 = vld [vmem:[#allocation14 + $0x1c0] ss:$8 sps:$4 sm:$0xff]  }
 0x567   :  { %5175 = vmatpush1.bf16.msra.mxu0 %v6956_v63  ;;  %v7000_v63 = vld [vmem:[#allocation14 + $0x1d4] ss:$8 sps:$4 sm:$0xff]  }
 0x568   :  { %5185 = vmatprep.subr.bf16.mxu0 %v6961_v1  ;;  %v6998_v1 = vld [vmem:[#allocation14 + $0x1d0] ss:$8 sps:$4 sm:$0xff]  }
 0x5fd   :  { %v4569_v19 = vpop.f32.mrb[12].mxu0  ;;  %v7673_v20 = vpop.f32.mrb[20].mxu1 }
 0x5fe   :  { %v6331_v21 = vadd.f32 %v4569_v19, %v3115_v17  ;;  %v4571_v23 = vpop.f32.mrb[13].mxu0  ;;  %v4735_v24 = vpop.f32.mrb[21].mxu1  ;;  %v6333_v5 = vadd.f32 %v7673_v20, %v3123_v30  ;;  %v4821_v17 = vrot.slane %v4812_v15, %v7548_v44  ;;  %v7025_v44 = vld [vmem:[%s7772_s15 + $0x10] sm:$0xff]  }
 0x5ff   :  { %v6332_v27 = vadd.f32 %v4571_v23, %v3119_v22  ;;  %v6334_v28 = vadd.f32 %v4735_v24, %v3127_v18  ;;  %v4573_v26 = vpop.f32.mrb[14].mxu0  ;;  %v4737_v29 = vpop.f32.mrb[22].mxu1 }
 0x600   :  { %v4740_v52 = vmax.f32 %v6331_v21, 0.0  ;;  %v4574_v31 = vpop.f32.mrb[15].mxu0  ;;  %v4738_v32 = vpop.f32.mrb[23].mxu1  ;;  %v4742_v9 = vmax.f32 %v6333_v5, 0.0  ;;  %v7023_v26 = vld [vmem:[%s7772_s15] sm:$0xff]  }
 0x601   :  { %v4741_v34 = vmax.f32 %v6332_v27, 0.0  ;;  %v4743_v35 = vmax.f32 %v6334_v28, 0.0  ;;  %v7027_v31 = vld [vmem:[%s7772_s15 + $0x20] sm:$0xff]   ;;  %v7028_v32 = vld [vmem:[%s7772_s15 + $0x28] sm:$0xff]  }
 0x602   :  { %v4744_v37 = vpack.c.bf16 %v4740_v52, %v4740_v52  ;;  %v4746_v10 = vpack.c.bf16 %v4742_v9, %v4742_v9  ;;  %v7026_v52 = vld [vmem:[%s7772_s15 + $0x18] sm:$0xff]  }
 0x603   :  { %v4745_v33 = vpack.c.bf16 %v4741_v34, %v4741_v34  ;;  %v4747_v3 = vpack.c.bf16 %v4743_v35, %v4743_v35  ;;  %v7029_v34 = vld [vmem:[%s7772_s15 + $0x30] sm:$0xff]   ;;  %v7030_v35 = vld [vmem:[%s7772_s15 + $0x38] sm:$0xff]  }
 0x605   :  { %5176 = vmatprep.mubr.bf16.mxu0 %v4745_v33 }
 0x606   :  { %5177 = vmatmul.mubr.bf16.vlgmr.msra.gmra.mrb[16].mxu0 %v4744_v37 }
 0x607   :  { %5186 = vmatpush1.bf16.msra.mxu0 %v6959_v36  ;;  %5217 = vmatprep.mubr.bf16.mxu0 %v4747_v3  ;;  %v6224_v36 = vld [vmem:[%s7771_s14] ss:$0 sm:$0xff] }
 0x608   :  { %5187 = vmatprep.subr.bf16.mxu0 %v6964_v2 }
 0x60b   :  { %5188 = vmatpush1.bf16.msra.mxu0 %v6962_v38 }
 0x60c   :  { %5189 = vmatprep.subr.bf16.mxu0 %v6967_v39 }
 0x60f   :  { %5190 = vmatpush1.bf16.msra.mxu0 %v6965_v12 }
 0x610   :  { %5191 = vmatprep.subr.bf16.mxu0 %v6970_v40 }
 0x613   :  { %5192 = vmatpush1.bf16.msra.mxu0 %v6968_v43 }
 0x614   :  { %5193 = vmatprep.subr.bf16.mxu0 %v6973_v45 }
 0x617   :  { %5194 = vmatpush1.bf16.msra.mxu0 %v6971_v46 }
 0x618   :  { %5195 = vmatprep.subr.bf16.mxu0 %v6976_v47 }
 0x61b   :  { %5196 = vmatpush1.bf16.msra.mxu0 %v6974_v48 }
 0x61c   :  { %5197 = vmatprep.subr.bf16.mxu0 %v6979_v49 }
 0x61f   :  { %5198 = vmatpush1.bf16.msra.mxu0 %v6977_v8 }
 0x620   :  { %5199 = vmatprep.subr.bf16.mxu0 %v6982_v50 }
 0x623   :  { %5200 = vmatpush1.bf16.msra.mxu0 %v6980_v51 }
 0x624   :  { %5201 = vmatprep.subr.bf16.mxu0 %v6985_v53 }
 0x627   :  { %5202 = vmatpush1.bf16.msra.mxu0 %v6983_v54 }
 0x628   :  { %5203 = vmatprep.subr.bf16.mxu0 %v6988_v55 }
 0x62b   :  { %5204 = vmatpush1.bf16.msra.mxu0 %v6986_v56 }
 0x62c   :  { %5205 = vmatprep.subr.bf16.mxu0 %v6991_v57 }
 0x62f   :  { %5206 = vmatpush1.bf16.msra.mxu0 %v6989_v58 }
 0x630   :  { %5207 = vmatprep.subr.bf16.mxu0 %v6994_v59 }
 0x633   :  { %5208 = vmatpush1.bf16.msra.mxu0 %v6992_v60 }
 0x634   :  { %5209 = vmatprep.subr.bf16.mxu0 %v6997_v61 }
 0x637   :  { %5210 = vmatpush1.bf16.msra.mxu0 %v6995_v62 }
 0x638   :  { %5211 = vmatprep.subr.bf16.mxu0 %v7000_v63 }
 0x63b   :  { %5212 = vmatpush1.bf16.msra.mxu0 %v6998_v1 }
 0x63c   :  { %5213 = vmatprep.subr.bf16.mxu0 %v7003_v4 }
 0x63f   :  { %5214 = vmatpush1.bf16.msra.mxu0 %v7001_v41 }
 0x640   :  { %5215 = vmatprep.subr.bf16.mxu0 %v7006_v6 }
 0x643   :  { %5216 = vmatpush1.bf16.msra.mxu0 %v7004_v7 }
 0x646   :  { %5218 = vmatmul.mubr.bf16.vlgmr.msra.gmra.mrb[16].mxu0 %v4746_v10 }
 0x719   :  { %v5219_v22 = vpop.f32.mrb[16].mxu0 }
 0x71a   :  { %v6335_v18 = vadd.f32 %v5219_v22, %v4817_v16  ;;  %v5221_v19 = vpop.f32.mrb[17].mxu0 }
 0x71b   :  { %v6336_v20 = vadd.f32 %v5221_v19, %v4821_v17  ;;  %v5223_v21 = vpop.f32.mrb[18].mxu0 }
 0x71c   :  { %v5226_v23 = vmax.f32 %v6335_v18, 0.0  ;;  %v5224_v24 = vpop.f32.mrb[19].mxu0 }
 0x71d   :  { %v5227_v27 = vmax.f32 %v6336_v20, 0.0 }
 0x71e   :  { %v5228_v29 = vpack.c.bf16 %v5226_v23, %v5226_v23 }
 0x71f   :  { %v5229_v28 = vpack.c.bf16 %v5227_v27, %v5227_v27 }
 0x721   :  { %5397 = vmatprep.mubr.bf16.mxu1 %v5229_v28 }
 0x722   :  { %5398 = vmatmul.mubr.bf16.vlgmr.msra.gmra.mrb[24].mxu1 %v5228_v29 }
 0x723   :  { %6304 = vmatpush3.bf16.msra.mxu1 %v7023_v26  ;;  %6319 = vmatprep.mubr.msk.bf16.mxu1 %vm7309_vm0, %v7308_v0 }
 0x724   :  { %6305 = vmatprep.subr.bf16.mxu1 %v7308_v0 }
 0x727   :  { %6306 = vmatpush3.bf16.msra.mxu1 %v7024_v42 }
 0x728   :  { %6307 = vmatprep.subr.bf16.mxu1 %v7308_v0 }
 0x72b   :  { %6308 = vmatpush3.bf16.msra.mxu1 %v7025_v44 }
 0x72c   :  { %6309 = vmatprep.subr.bf16.mxu1 %v7308_v0 }
 0x72f   :  { %6310 = vmatpush3.bf16.msra.mxu1 %v7026_v52 }
 0x730   :  { %6311 = vmatprep.subr.bf16.mxu1 %v7308_v0 }
 0x733   :  { %6312 = vmatpush3.bf16.msra.mxu1 %v7027_v31 }
 0x734   :  { %6313 = vmatprep.subr.bf16.mxu1 %v7308_v0 }
 0x737   :  { %6314 = vmatpush3.bf16.msra.mxu1 %v7028_v32 }
 0x738   :  { %6315 = vmatprep.subr.bf16.mxu1 %v7308_v0 }
 0x73b   :  { %6316 = vmatpush3.bf16.msra.mxu1 %v7029_v34 }
 0x73c   :  { %6317 = vmatprep.subr.bf16.mxu1 %v7308_v0 }
 0x73f   :  { %6318 = vmatpush3.bf16.msra.mxu1 %v7030_v35 }
 0x7f5   :  { %v6276_v33 = vpop.f32.mrb[24].mxu1 }
 0x7f6   :  { %v6277_v37 = vpop.f32.mrb[25].mxu1 }
 0x7f7   :  { %v6278_v2 = vadd.f32 %v6277_v37, %v6276_v33  ;;  %v6279_v3 = vpop.f32.mrb[26].mxu1 }
 0x7f8   :  { %v6280_v38 = vpop.f32.mrb[27].mxu1 }
 0x7f9   :  { %v5400_v39 = vadd.f32 %v6278_v2, %v6224_v36 }
 0x7fb   :  { %v5405_v12 = vmax.f32 %v5400_v39, 0.0 }
 0x7fd   :  { %v5406_v40 = vpack.c.bf16 %v5405_v12, %v5405_v12 }
 0x7ff   :  { %6320 = vmatmul.mubr.bf16.vlgmr.msra.gmra.mrb[28].mxu1 %v5406_v40 }
 0x800   :  { %7244 = shalt.err (!%p7241_p6)
}
 0x801   :  { %s7245_s7 = scalar_lea.hbm %s7774_s17, 512 }
 0x802   :  { %p7246_p7 = scmp.ne.s32.totalorder %s7774_s17, %s7245_s7  ;;  %p7249_p8 = scmp.lt.u32.totalorder %s7245_s7, %s7774_s17 }
 0x804   :  { %p7251_p9 = pnand %p7249_p8, %p7246_p7 }
 0x806   :  { %7254 = shalt.err (!%p7251_p9)
}
 0x807   :  { %5534 = dma.vmem_to_hbm [thread:$0]  %s5532_s8, 512, %s7774_s17, [#allocation4]   ;;  %v6241_v0 = vld [vmem:[%s7773_s16] ss:$0 sm:$0xff] }
 0x808   :  { %s7312_s5 = smov [#allocation18]  }
 0x809   :  { %s5541_s27 = sshll.u32 %s7312_s5, 4  ;;  %s5542_s27 = int_to_ptr.vmem [resolvable:$true] %s5541_s27 }
 0x80a   :  { %s7255_s17 = scalar_lea.vmem %s5542_s27, 128  ;;  %p7260_p11 = scmp.lt.s32.totalorder %s5542_s27, %s5542_s27 }
 0x80b   :  { %p7256_p10 = scmp.ne.s32.totalorder %s5542_s27, %s7255_s17  ;;  %p7261_p12 = scmp.lt.s32.totalorder %s7255_s17, %s7255_s17 }
 0x80d   :  { %p7262_p13 = por %p7261_p12, %p7260_p11 }
 0x80f   :  { %p7263_p0 = pnand %p7262_p13, %p7256_p10 }
 0x8d2   :  { %v5512_v43 = vpop.f32.mrb[28].mxu1 }
 0x8d3   :  { %v5513_v45 = vadd.f32 %v6241_v0, %v5512_v43  ;;  %v6321_v46 = vpop.f32.mrb[29].mxu1 }
 0x8d4   :  { %v5515_v47 = vpop.f32.mrb[30].mxu1 }
 0x8d5   :  { %v6250_v48 = vmul.f32 -1.442695, %v5513_v45  ;;  %v6322_v49 = vpop.f32.mrb[31].mxu1 }
 0x8d7   :  { %7031 = vpow2.f32 %v6250_v48 }
 0x8e1   :  { %v7032_v8 = vpop.eup %7031 }
 0x8e2   :  { %v5521_v50 = vadd.f32 1.0, %v7032_v8 }
 0x8e4   :  { %7033 = vrcp.f32 %v5521_v50 }
 0x8ee   :  { %v7034_v51 = vpop.eup %7033 }
 0x8ef   :  { %5524 = vst.msk [vmem:[#allocation18] sm:$0xff] %vm217_vm1, %v7034_v51 }
 0x8f0   :  { %7266 = shalt.err (!%p7263_p0)
}
 0x8f1   :  { %s7267_s10 = scalar_lea.hbm %s7775_s18, 128 }
 0x8f2   :  { %p7268_p1 = scmp.ne.s32.totalorder %s7775_s18, %s7267_s10  ;;  %p7271_p2 = scmp.lt.u32.totalorder %s7267_s10, %s7775_s18 }
 0x8f4   :  { %p7273_p3 = pnand %p7271_p2, %p7268_p1 }
 0x8f6   :  { %7276 = shalt.err (!%p7273_p3)
}
 0x8f7   :  { %5544 = dma.vmem_to_hbm [thread:$0]  %s5542_s27, 128, %s7775_s18, [#allocation19]  }
 0x8f8   :  { %7287 = dma.done.wait [#allocation4], 512  }
 0x8f9   :  { %7288 = vsyncadd [#allocation4], 4294966784 }
 0x8fa   :  { %7289 = dma.done.wait [#allocation19], 128  }
 0x8fb   :  { %7290 = vsyncadd [#allocation19], 4294967168 }
 0x8fc   :  { %5551 = vsyncpa [#allocation3], 1 }
 0x8fd   :  { %5552 = vsyncpa [#allocation6], 1 }
 0x8fe   :  { %5553 = vsyncpa [#allocation9], 1 }
 0x8ff   :  { %5554 = vsyncpa [#allocation12], 1 }
 0x900   :  { %5555 = vsyncpa [#allocation15], 1 }
 0x901   :  { %5556 = vsyncpa [#allocation4], 1 }
 0x902   :  { %5557 = vsyncpa [#allocation19], 1 }

// kernel: tpu_custom_call.1
= control target key start
LH: loop header
LB: loop body
LE: loop exit
PB: predicated region body
PF: predicated region fallthrough
CT: control target
= control target key end

     0   :  { %s7757_s0 = inlined_call_operand.vmem [shape: bf16[8,64], index: 0, kind: input, shape index: {}]   ;;  %s7758_s1 = inlined_call_operand.hbm [shape: bf16[64,128], index: 1, kind: input, shape index: {}]   ;;  %s7759_s2 = inlined_call_operand.vmem [shape: f32[1,128], index: 2, kind: input, shape index: {}]   ;;  %s7760_s3 = inlined_call_operand.hbm [shape: bf16[128,256], index: 3, kind: input, shape index: {}]   ;;  %s7761_s4 = inlined_call_operand.hbm [shape: f32[1,256], index: 4, kind: input, shape index: {}]   ;;  %s7762_s5 = inlined_call_operand.hbm [shape: bf16[256,512], index: 5, kind: input, shape index: {}]   ;;  %s7763_s6 = inlined_call_operand.vmem [shape: f32[1,512], index: 6, kind: input, shape index: {}]   ;;  %s7764_s7 = inlined_call_operand.hbm [shape: bf16[512,1024], index: 7, kind: input, shape index: {}]   ;;  %s7765_s8 = inlined_call_operand.vmem [shape: f32[1,1024], index: 8, kind: input, shape index: {}]   ;;  %s7766_s9 = inlined_call_operand.hbm [shape: bf16[1024,512], index: 9, kind: input, shape index: {}]   ;;  %s7767_s10 = inlined_call_operand.hbm [shape: f32[1,512], index: 10, kind: input, shape index: {}]   ;;  %s7768_s11 = inlined_call_operand.hbm [shape: bf16[512,256], index: 11, kind: input, shape index: {}]   ;;  %s7769_s12 = inlined_call_operand.hbm [shape: f32[1,256], index: 12, kind: input, shape index: {}]   ;;  %s7770_s13 = inlined_call_operand.vmem [shape: bf16[256,128], index: 13, kind: input, shape index: {}]   ;;  %s7771_s14 = inlined_call_operand.vmem [shape: f32[1,128], index: 14, kind: input, shape index: {}]   ;;  %s7772_s15 = inlined_call_operand.vmem [shape: bf16[128,64], index: 15, kind: input, shape index: {}]   ;;  %s7773_s16 = inlined_call_operand.vmem [shape: f32[1,64], index: 16, kind: input, shape index: {}]   ;;  %s7774_s17 = inlined_call_operand.hbm [shape: bf16[8,1024], index: 17, kind: output, shape index: {0}]   ;;  %s7775_s18 = inlined_call_operand.hbm [shape: f32[8,64], index: 18, kind: output, shape index: {1}]  }
   0x1   :  { %7779 = sst [smem:[#allocation27_spill]] %s7757_s0 }
   0x2   :  { %7780 = sst [smem:[#allocation28_spill]] %s7758_s1 }
   0x3   :  { %7781 = sst [smem:[#allocation29_spill]] %s7759_s2 }
   0x4   :  { %24 = vsyncpa [#allocation3], 0 }
   0x5   :  { %25 = vsyncpa [#allocation6], 0 }
   0x6   :  { %26 = vsyncpa [#allocation9], 0 }
   0x7   :  { %27 = vsyncpa [#allocation12], 0 }
   0x8   :  { %28 = vsyncpa [#allocation15], 0 }
   0x9   :  { %29 = vsyncpa [#allocation4], 0 }
   0xa   :  { %30 = vsyncpa [#allocation19], 0  ;;  %s7291_s27 = smov [#allocation5]   ;;  %s7035_s0 = scalar_lea.hbm %s7760_s3, 2048 }
   0xb   :  { %s52_s28 = sshll.u32 %s7291_s27, 4  ;;  %p7036_p0 = scmp.ne.s32.totalorder %s7760_s3, %s7035_s0  ;;  %s53_s28 = int_to_ptr.vmem [resolvable:$true] %s52_s28 }
   0xc   :  { %p7039_p1 = scmp.lt.u32.totalorder %s7035_s0, %s7760_s3 }
   0xe   :  { %p7041_p2 = pnand %p7039_p1, %p7036_p0 }
  0x10   :  { %7044 = shalt.err (!%p7041_p2)
}
  0x11   :  { %s7045_s22 = scalar_lea.vmem %s53_s28, 2048  ;;  %p7050_p4 = scmp.lt.s32.totalorder %s53_s28, %s53_s28 }
  0x12   :  { %p7046_p3 = scmp.ne.s32.totalorder %s53_s28, %s7045_s22  ;;  %p7051_p5 = scmp.lt.s32.totalorder %s7045_s22, %s7045_s22 }
  0x14   :  { %p7052_p6 = por %p7051_p5, %p7050_p4 }
  0x16   :  { %p7053_p7 = pnand %p7052_p6, %p7046_p3 }
  0x18   :  { %7056 = shalt.err (!%p7053_p7)
}
  0x19   :  { %s7777_s2 = smov 128   ;;  %s7778_s23 = smov 8  }
  0x1a   :  { %58 = dma.hbm_to_vmem [thread:$0]  %s7760_s3, 2048, %s53_s28, [#allocation6], %s7777_s2, %s7777_s2, %s7778_s23  }
  0x1b   :  { %s7294_s26 = smov [#allocation8]   ;;  %s7057_s0 = scalar_lea.hbm %s7762_s5, 8192 }
  0x1c   :  { %s74_s27 = sshll.u32 %s7294_s26, 4  ;;  %p7058_p8 = scmp.ne.s32.totalorder %s7762_s5, %s7057_s0  ;;  %s75_s27 = int_to_ptr.vmem [resolvable:$true] %s74_s27 }
  0x1d   :  { %p7061_p9 = scmp.lt.u32.totalorder %s7057_s0, %s7762_s5 }
  0x1f   :  { %p7063_p10 = pnand %p7061_p9, %p7058_p8 }
  0x21   :  { %7066 = shalt.err (!%p7063_p10)
}
  0x22   :  { %s7067_s22 = scalar_lea.vmem %s75_s27, 8192  ;;  %p7072_p12 = scmp.lt.s32.totalorder %s75_s27, %s75_s27 }
  0x23   :  { %p7068_p11 = scmp.ne.s32.totalorder %s75_s27, %s7067_s22  ;;  %p7073_p13 = scmp.lt.s32.totalorder %s7067_s22, %s7067_s22 }
  0x25   :  { %p7074_p0 = por %p7073_p13, %p7072_p12 }
  0x27   :  { %p7075_p1 = pnand %p7074_p0, %p7068_p11 }
  0x29   :  { %7078 = shalt.err (!%p7075_p1)
}
  0x2a   :  { %s7295_s3 = smov 256   ;;  %s7296_s28 = smov 16  }
  0x2b   :  { %80 = dma.hbm_to_vmem [thread:$0]  %s7762_s5, 8192, %s75_s27, [#allocation9], %s7295_s3, %s7295_s3, %s7296_s28  }
  0x2c   :  { %s7297_s26 = smov [#allocation11]   ;;  %s7298_s30 = smov [#allocation14]  }
  0x2d   :  { %s102_s29 = sshll.u32 %s7297_s26, 4  ;;  %s124_s19 = sshll.u32 %s7298_s30, 4  ;;  %s103_s29 = int_to_ptr.vmem [resolvable:$true] %s102_s29  ;;  %s7435_s19 = int_to_ptr.vmem [resolvable:$true] %s124_s19 }
  0x2e   :  { %s7079_s20 = scalar_lea.hbm %s7766_s9, 32768 }
  0x2f   :  { %p7080_p2 = scmp.ne.s32.totalorder %s7766_s9, %s7079_s20  ;;  %p7083_p3 = scmp.lt.u32.totalorder %s7079_s20, %s7766_s9 }
  0x31   :  { %p7085_p4 = pnand %p7083_p3, %p7080_p2 }
  0x33   :  { %7088 = shalt.err (!%p7085_p4)
}
  0x34   :  { %s7089_s5 = scalar_lea.vmem %s103_s29, 32768  ;;  %p7094_p6 = scmp.lt.s32.totalorder %s103_s29, %s103_s29 }
  0x35   :  { %p7090_p5 = scmp.ne.s32.totalorder %s103_s29, %s7089_s5  ;;  %p7095_p7 = scmp.lt.s32.totalorder %s7089_s5, %s7089_s5 }
  0x37   :  { %p7096_p8 = por %p7095_p7, %p7094_p6 }
  0x39   :  { %p7097_p9 = pnand %p7096_p8, %p7090_p5 }
  0x3b   :  { %7100 = shalt.err (!%p7097_p9)
}
  0x3c   :  { %108 = dma.hbm_to_vmem [thread:$0]  %s7766_s9, 32768, %s103_s29, [#allocation12], %s7295_s3, %s7295_s3, %s7296_s28  }
  0x3d   :  { %s7101_s30 = scalar_lea.hbm %s7768_s11, 8192 }
  0x3e   :  { %p7102_p10 = scmp.ne.s32.totalorder %s7768_s11, %s7101_s30  ;;  %p7105_p11 = scmp.lt.u32.totalorder %s7101_s30, %s7768_s11 }
  0x40   :  { %p7107_p12 = pnand %p7105_p11, %p7102_p10 }
  0x42   :  { %7110 = shalt.err (!%p7107_p12)
}
  0x43   :  { %s7111_s20 = scalar_lea.vmem %s7435_s19, 8192  ;;  %p7116_p0 = scmp.lt.s32.totalorder %s7435_s19, %s7435_s19 }
  0x44   :  { %p7112_p13 = scmp.ne.s32.totalorder %s7435_s19, %s7111_s20  ;;  %p7117_p1 = scmp.lt.s32.totalorder %s7111_s20, %s7111_s20 }
  0x46   :  { %p7118_p2 = por %p7117_p1, %p7116_p0 }
  0x48   :  { %p7119_p3 = pnand %p7118_p2, %p7112_p13 }
  0x4a   :  { %7122 = shalt.err (!%p7119_p3)
}
  0x4b   :  { %s7782_s9 = smov 8   ;;  %s7783_s3 = smov 128  }
  0x4c   :  { %130 = dma.hbm_to_vmem [thread:$0]  %s7768_s11, 8192, %s7435_s19, [#allocation15], %s7783_s3, %s7783_s3, %s7782_s9  }
  0x4d   :  { %s7299_s21 = smov [#allocation2]   ;;  %s7784_s24 = sld [smem:[#allocation28_spill]] }
  0x4e   :  { %s38_s22 = sshll.u32 %s7299_s21, 4  ;;  %s39_s22 = int_to_ptr.vmem [resolvable:$true] %s38_s22 }
  0x53   :  { %s7123_s25 = scalar_lea.hbm %s7784_s24, 512 }
  0x54   :  { %p7124_p4 = scmp.ne.s32.totalorder %s7784_s24, %s7123_s25  ;;  %p7127_p5 = scmp.lt.u32.totalorder %s7123_s25, %s7784_s24 }
  0x56   :  { %p7129_p6 = pnand %p7127_p5, %p7124_p4 }
  0x58   :  { %7132 = shalt.err (!%p7129_p6)
}
  0x59   :  { %s7133_s23 = scalar_lea.vmem %s39_s22, 512  ;;  %p7138_p8 = scmp.lt.s32.totalorder %s39_s22, %s39_s22 }
  0x5a   :  { %p7134_p7 = scmp.ne.s32.totalorder %s39_s22, %s7133_s23  ;;  %p7139_p9 = scmp.lt.s32.totalorder %s7133_s23, %s7133_s23 }
  0x5c   :  { %p7140_p10 = por %p7139_p9, %p7138_p8 }
  0x5e   :  { %p7141_p11 = pnand %p7140_p10, %p7134_p7 }
  0x60   :  { %7144 = shalt.err (!%p7141_p11)
}
  0x61   :  { %s7300_s11 = smov 64   ;;  %s7301_s19 = smov 4  }
  0x62   :  { %44 = dma.hbm_to_vmem [thread:$0]  %s7784_s24, 512, %s39_s22, [#allocation3], %s7300_s11, %s7300_s11, %s7301_s19  }
  0x63   :  { %s7302_s9 = smov [#allocation7]   ;;  %s7303_s28 = smov [#allocation10]  }
  0x64   :  { %s65_s3 = sshll.u32 %s7302_s9, 4  ;;  %s88_s29 = sshll.u32 %s7303_s28, 4  ;;  %s66_s3 = int_to_ptr.vmem [resolvable:$true] %s65_s3  ;;  %s89_s29 = int_to_ptr.vmem [resolvable:$true] %s88_s29 }
  0x65   :  { %s7145_s27 = scalar_lea.hbm %s7761_s4, 32 }
  0x66   :  { %p7146_p12 = scmp.ne.s32.totalorder %s7761_s4, %s7145_s27  ;;  %p7149_p13 = scmp.lt.u32.totalorder %s7145_s27, %s7761_s4 }
  0x68   :  { %p7151_p0 = pnand %p7149_p13, %p7146_p12 }
  0x6a   :  { %7154 = shalt.err (!%p7151_p0)
}
  0x6b   :  { %s7155_s22 = scalar_lea.vmem %s66_s3, 32  ;;  %p7160_p2 = scmp.lt.s32.totalorder %s66_s3, %s66_s3 }
  0x6c   :  { %p7156_p1 = scmp.ne.s32.totalorder %s66_s3, %s7155_s22  ;;  %p7161_p3 = scmp.lt.s32.totalorder %s7155_s22, %s7155_s22 }
  0x6e   :  { %p7162_p4 = por %p7161_p3, %p7160_p2 }
  0x70   :  { %p7163_p5 = pnand %p7162_p4, %p7156_p1 }
  0x72   :  { %7166 = shalt.err (!%p7163_p5)
}
  0x73   :  { %68 = dma.hbm_to_vmem [thread:$0]  %s7761_s4, 32, %s66_s3, [#allocation6]  }
  0x74   :  { %s7167_s19 = scalar_lea.hbm %s7764_s7, 32768 }
  0x75   :  { %p7168_p6 = scmp.ne.s32.totalorder %s7764_s7, %s7167_s19  ;;  %p7171_p7 = scmp.lt.u32.totalorder %s7167_s19, %s7764_s7 }
  0x77   :  { %p7173_p8 = pnand %p7171_p7, %p7168_p6 }
  0x79   :  { %7176 = shalt.err (!%p7173_p8)
}
  0x7a   :  { %s7177_s21 = scalar_lea.vmem %s89_s29, 32768  ;;  %p7182_p10 = scmp.lt.s32.totalorder %s89_s29, %s89_s29 }
  0x7b   :  { %p7178_p9 = scmp.ne.s32.totalorder %s89_s29, %s7177_s21  ;;  %p7183_p11 = scmp.lt.s32.totalorder %s7177_s21, %s7177_s21 }
  0x7d   :  { %p7184_p12 = por %p7183_p11, %p7182_p10 }
  0x7f   :  { %p7185_p13 = pnand %p7184_p12, %p7178_p9 }
  0x81   :  { %7188 = shalt.err (!%p7185_p13)
}
  0x82   :  { %s7304_s4 = smov 512   ;;  %s7305_s3 = smov 32  }
  0x83   :  { %94 = dma.hbm_to_vmem [thread:$0]  %s7764_s7, 32768, %s89_s29, [#allocation9], %s7304_s4, %s7304_s4, %s7305_s3  }
  0x84   :  { %s7306_s25 = smov [#allocation13]   ;;  %s7307_s30 = smov [#allocation16]  }
  0x85   :  { %s115_s26 = sshll.u32 %s7306_s25, 4  ;;  %s137_s0 = sshll.u32 %s7307_s30, 4  ;;  %s116_s26 = int_to_ptr.vmem [resolvable:$true] %s115_s26  ;;  %s138_s0 = int_to_ptr.vmem [resolvable:$true] %s137_s0 }
  0x86   :  { %s7189_s2 = scalar_lea.hbm %s7767_s10, 64 }
  0x87   :  { %p7190_p0 = scmp.ne.s32.totalorder %s7767_s10, %s7189_s2  ;;  %p7193_p1 = scmp.lt.u32.totalorder %s7189_s2, %s7767_s10 }
  0x89   :  { %p7195_p2 = pnand %p7193_p1, %p7190_p0 }
  0x8b   :  { %7198 = shalt.err (!%p7195_p2)
}
  0x8c   :  { %s7199_s7 = scalar_lea.vmem %s116_s26, 64  ;;  %p7204_p4 = scmp.lt.s32.totalorder %s116_s26, %s116_s26 }
  0x8d   :  { %p7200_p3 = scmp.ne.s32.totalorder %s116_s26, %s7199_s7  ;;  %p7205_p5 = scmp.lt.s32.totalorder %s7199_s7, %s7199_s7 }
  0x8f   :  { %p7206_p6 = por %p7205_p5, %p7204_p4 }
  0x91   :  { %p7207_p7 = pnand %p7206_p6, %p7200_p3 }
  0x93   :  { %7210 = shalt.err (!%p7207_p7)
}
  0x94   :  { %118 = dma.hbm_to_vmem [thread:$0]  %s7767_s10, 64, %s116_s26, [#allocation12]  }
  0x95   :  { %s7211_s21 = scalar_lea.hbm %s7769_s12, 32 }
  0x96   :  { %p7212_p8 = scmp.ne.s32.totalorder %s7769_s12, %s7211_s21  ;;  %p7215_p9 = scmp.lt.u32.totalorder %s7211_s21, %s7769_s12 }
  0x98   :  { %p7217_p10 = pnand %p7215_p9, %p7212_p8 }
  0x9a   :  { %7220 = shalt.err (!%p7217_p10)
}
  0x9b   :  { %s7221_s25 = scalar_lea.vmem %s138_s0, 32  ;;  %p7226_p12 = scmp.lt.s32.totalorder %s138_s0, %s138_s0 }
  0x9c   :  { %p7222_p11 = scmp.ne.s32.totalorder %s138_s0, %s7221_s25  ;;  %p7227_p13 = scmp.lt.s32.totalorder %s7221_s25, %s7221_s25 }
  0x9e   :  { %p7228_p0 = por %p7227_p13, %p7226_p12 }
  0xa0   :  { %p7229_p1 = pnand %p7228_p0, %p7222_p11 }
  0xa2   :  { %7232 = shalt.err (!%p7229_p1)
}
  0xa3   :  { %140 = dma.hbm_to_vmem [thread:$0]  %s7769_s12, 32, %s138_s0, [#allocation15]  }
  0xa4   :  { %7277 = dma.done.wait [#allocation3], 512  }
  0xa5   :  { %7278 = vsyncadd [#allocation3], 4294966784 }
  0xa6   :  { %7279 = dma.done.wait [#allocation6], 2080  }
  0xa7   :  { %7280 = vsyncadd [#allocation6], 4294965216 }
  0xa8   :  { %7281 = dma.done.wait [#allocation9], 40960  }
  0xa9   :  { %7282 = vsyncadd [#allocation9], 4294926336 }
  0xaa   :  { %7283 = dma.done.wait [#allocation12], 32832  }
  0xab   :  { %7284 = vsyncadd [#allocation12], 4294934464 }
  0xac   :  { %7285 = dma.done.wait [#allocation15], 8224  }
  0xad   :  { %7286 = vsyncadd [#allocation15], 4294959072  ;;  %v7308_v0 = vmov 0.0   ;;  %vm7309_vm0 = vmmov 0   ;;  %v6403_v1 = vld [vmem:[#allocation2] sm:$0xff]   ;;  %v6404_v2 = vld [vmem:[#allocation2 + $0x8] sm:$0xff]  }
  0xae   :  { %6291 = vmatprep.subr.bf16.mxu1 %v7308_v0  ;;  %6299 = vmatprep.mubr.msk.bf16.mxu1 %vm7309_vm0, %v7308_v0  ;;  %v6405_v3 = vld [vmem:[#allocation2 + $0x10] sm:$0xff]   ;;  %v6406_v4 = vld [vmem:[#allocation2 + $0x18] sm:$0xff]   ;;  %v6409_v5 = vld [vmem:[#allocation5 + $0x4] ss:$8 sps:$4 sm:$0xff]   ;;  %s7785_s0 = sld [smem:[#allocation27_spill]]  ;;  %vm217_vm1 = vcmask 523264  }
  0xaf   :  { %6292 = vmatpush3.bf16.msra.mxu1 %v6403_v1  ;;  %v6407_v7 = vld [vmem:[#allocation5] ss:$8 sps:$4 sm:$0xff]   ;;  %v6412_v8 = vld [vmem:[#allocation5 + $0x14] ss:$8 sps:$4 sm:$0xff]   ;;  %v6410_v9 = vld [vmem:[#allocation5 + $0x10] ss:$8 sps:$4 sm:$0xff]  }
  0xb0   :  { %6293 = vmatprep.subr.bf16.mxu1 %v7308_v0  ;;  %v6415_v10 = vld [vmem:[#allocation5 + $0x24] ss:$8 sps:$4 sm:$0xff]   ;;  %v6413_v11 = vld [vmem:[#allocation5 + $0x20] ss:$8 sps:$4 sm:$0xff]   ;;  %v6418_v12 = vld [vmem:[#allocation5 + $0x34] ss:$8 sps:$4 sm:$0xff]  }
  0xb1   :  { %v6416_v13 = vld [vmem:[#allocation5 + $0x30] ss:$8 sps:$4 sm:$0xff]   ;;  %v6421_v14 = vld [vmem:[#allocation5 + $0x44] ss:$8 sps:$4 sm:$0xff]   ;;  %v6419_v15 = vld [vmem:[#allocation5 + $0x40] ss:$8 sps:$4 sm:$0xff]  }
  0xb2   :  { %v6424_v16 = vld [vmem:[#allocation5 + $0x54] ss:$8 sps:$4 sm:$0xff]   ;;  %v6422_v17 = vld [vmem:[#allocation5 + $0x50] ss:$8 sps:$4 sm:$0xff]   ;;  %v6427_v18 = vld [vmem:[#allocation5 + $0x64] ss:$8 sps:$4 sm:$0xff]  }
  0xb3   :  { %6294 = vmatpush3.bf16.msra.mxu1 %v6404_v2  ;;  %v6425_v19 = vld [vmem:[#allocation5 + $0x60] ss:$8 sps:$4 sm:$0xff]   ;;  %v6430_v20 = vld [vmem:[#allocation5 + $0x74] ss:$8 sps:$4 sm:$0xff]   ;;  %v6428_v21 = vld [vmem:[#allocation5 + $0x70] ss:$8 sps:$4 sm:$0xff]  }
  0xb4   :  { %6295 = vmatprep.subr.bf16.mxu1 %v7308_v0  ;;  %v177_v6 = vld [vmem:[%s7785_s0] sm:$0xf]  ;;  %v7310_v22 = vmov 0   ;;  %v6431_v23 = vld [vmem:[#allocation8 + $0x4] ss:$16 sps:$4 sm:$0xff]   ;;  %s7786_s2 = sld [smem:[#allocation29_spill]] }
  0xb5   :  { %v6435_v24 = vld [vmem:[#allocation8 + $0xc] ss:$16 sps:$4 sm:$0xff]   ;;  %v6436_v25 = vld [vmem:[#allocation8] ss:$16 sps:$4 sm:$0xff]   ;;  %v6437_v26 = vld [vmem:[#allocation8 + $0x24] ss:$16 sps:$4 sm:$0xff]   ;;  %822 = vmatprep.subr.bf16.mxu0 %v6431_v23 }
  0xb6   :  { %v6442_v27 = vld [vmem:[#allocation8 + $0x20] ss:$16 sps:$4 sm:$0xff]   ;;  %823 = vmatpush1.bf16.msra.mxu0 %v6436_v25  ;;  %v6443_v28 = vld [vmem:[#allocation8 + $0x44] ss:$16 sps:$4 sm:$0xff]   ;;  %v6433_v59 = vld [vmem:[#allocation8 + $0x8] ss:$16 sps:$4 sm:$0xff]  }
  0xb7   :  { %6296 = vmatpush3.bf16.msra.mxu1 %v6405_v3  ;;  %824 = vmatprep.subr.bf16.mxu0 %v6437_v26  ;;  %v6448_v29 = vld [vmem:[#allocation8 + $0x40] ss:$16 sps:$4 sm:$0xff]   ;;  %v6449_v30 = vld [vmem:[#allocation8 + $0x64] ss:$16 sps:$4 sm:$0xff]   ;;  %v6441_v61 = vld [vmem:[#allocation8 + $0x2c] ss:$16 sps:$4 sm:$0xff]  }
  0xb8   :  { %6297 = vmatprep.subr.bf16.mxu1 %v7308_v0  ;;  %v6454_v31 = vld [vmem:[#allocation8 + $0x60] ss:$16 sps:$4 sm:$0xff]   ;;  %v6455_v32 = vld [vmem:[#allocation8 + $0x84] ss:$16 sps:$4 sm:$0xff]   ;;  %v6439_v62 = vld [vmem:[#allocation8 + $0x28] ss:$16 sps:$4 sm:$0xff]  }
  0xb9   :  { %v6460_v33 = vld [vmem:[#allocation8 + $0x80] ss:$16 sps:$4 sm:$0xff]   ;;  %v6461_v34 = vld [vmem:[#allocation8 + $0xa4] ss:$16 sps:$4 sm:$0xff]   ;;  %v6447_v63 = vld [vmem:[#allocation8 + $0x4c] ss:$16 sps:$4 sm:$0xff]  }
  0xba   :  { %825 = vmatpush1.bf16.msra.mxu0 %v6442_v27  ;;  %v6466_v35 = vld [vmem:[#allocation8 + $0xa0] ss:$16 sps:$4 sm:$0xff]   ;;  %v6467_v36 = vld [vmem:[#allocation8 + $0xc4] ss:$16 sps:$4 sm:$0xff]   ;;  %v5558_v52 = vld [vmem:[%s7786_s2] ss:$0 sm:$0xff] }
  0xbb   :  { %6298 = vmatpush3.bf16.msra.mxu1 %v6406_v4  ;;  %826 = vmatprep.subr.bf16.mxu0 %v6443_v28  ;;  %v6472_v37 = vld [vmem:[#allocation8 + $0xc0] ss:$16 sps:$4 sm:$0xff]   ;;  %v6473_v38 = vld [vmem:[#allocation8 + $0xe4] ss:$16 sps:$4 sm:$0xff]   ;;  %v6445_v1 = vld [vmem:[#allocation8 + $0x48] ss:$16 sps:$4 sm:$0xff]  }
  0xbc   :  { %371 = vmatprep.subr.bf16.mxu1 %v6409_v5  ;;  %v6478_v39 = vld [vmem:[#allocation8 + $0xe0] ss:$16 sps:$4 sm:$0xff]   ;;  %v6479_v40 = vld [vmem:[#allocation8 + $0x104] ss:$16 sps:$4 sm:$0xff]   ;;  %v6453_v2 = vld [vmem:[#allocation8 + $0x6c] ss:$16 sps:$4 sm:$0xff]  }
  0xbd   :  { %v6484_v41 = vld [vmem:[#allocation8 + $0x100] ss:$16 sps:$4 sm:$0xff]   ;;  %v6485_v42 = vld [vmem:[#allocation8 + $0x124] ss:$16 sps:$4 sm:$0xff]   ;;  %v6451_v3 = vld [vmem:[#allocation8 + $0x68] ss:$16 sps:$4 sm:$0xff]  }
  0xbe   :  { %6300 = vmatmul.mubr.msk.bf16.vlgmr.msra.gmra.mrb[0].mxu1 %vm217_vm1, %v177_v6  ;;  %827 = vmatpush1.bf16.msra.mxu0 %v6448_v29  ;;  %v6490_v43 = vld [vmem:[#allocation8 + $0x120] ss:$16 sps:$4 sm:$0xff]   ;;  %v6491_v44 = vld [vmem:[#allocation8 + $0x144] ss:$16 sps:$4 sm:$0xff]   ;;  %v6459_v4 = vld [vmem:[#allocation8 + $0x8c] ss:$16 sps:$4 sm:$0xff]  }
  0xbf   :  { %372 = vmatpush1.bf16.msra.mxu1 %v6407_v7  ;;  %403 = vmatprep.mubr.bf16.mxu1 %v7310_v22  ;;  %v6496_v45 = vld [vmem:[#allocation8 + $0x140] ss:$16 sps:$4 sm:$0xff]   ;;  %v6497_v46 = vld [vmem:[#allocation8 + $0x164] ss:$16 sps:$4 sm:$0xff]   ;;  %v6457_v5 = vld [vmem:[#allocation8 + $0x88] ss:$16 sps:$4 sm:$0xff]  }
  0xc0   :  { %373 = vmatprep.subr.bf16.mxu1 %v6412_v8  ;;  %828 = vmatprep.subr.bf16.mxu0 %v6449_v30  ;;  %v6502_v47 = vld [vmem:[#allocation8 + $0x160] ss:$16 sps:$4 sm:$0xff]   ;;  %v6503_v48 = vld [vmem:[#allocation8 + $0x184] ss:$16 sps:$4 sm:$0xff]   ;;  %v6465_v6 = vld [vmem:[#allocation8 + $0xac] ss:$16 sps:$4 sm:$0xff]  }
  0xc1   :  { %v6508_v49 = vld [vmem:[#allocation8 + $0x180] ss:$16 sps:$4 sm:$0xff]   ;;  %v6509_v50 = vld [vmem:[#allocation8 + $0x1a4] ss:$16 sps:$4 sm:$0xff]   ;;  %v6463_v7 = vld [vmem:[#allocation8 + $0xa8] ss:$16 sps:$4 sm:$0xff]  }
  0xc2   :  { %829 = vmatpush1.bf16.msra.mxu0 %v6454_v31  ;;  %v6514_v51 = vld [vmem:[#allocation8 + $0x1a0] ss:$16 sps:$4 sm:$0xff]   ;;  %v6471_v8 = vld [vmem:[#allocation8 + $0xcc] ss:$16 sps:$4 sm:$0xff]   ;;  %v6511_v23 = vld [vmem:[#allocation8 + $0x1a8] ss:$16 sps:$4 sm:$0xff]  }
  0xc3   :  { %374 = vmatpush1.bf16.msra.mxu1 %v6410_v9  ;;  %830 = vmatprep.subr.bf16.mxu0 %v6455_v32  ;;  %v6469_v9 = vld [vmem:[#allocation8 + $0xc8] ss:$16 sps:$4 sm:$0xff]   ;;  %v6513_v22 = vld [vmem:[#allocation8 + $0x1ac] ss:$16 sps:$4 sm:$0xff]   ;;  %v6520_v27 = vld [vmem:[#allocation8 + $0x1c0] ss:$16 sps:$4 sm:$0xff]  }
  0xc4   :  { %375 = vmatprep.subr.bf16.mxu1 %v6415_v10  ;;  %v6477_v10 = vld [vmem:[#allocation8 + $0xec] ss:$16 sps:$4 sm:$0xff]   ;;  %v6517_v26 = vld [vmem:[#allocation8 + $0x1c8] ss:$16 sps:$4 sm:$0xff]   ;;  %v6521_v28 = vld [vmem:[#allocation8 + $0x1e4] ss:$16 sps:$4 sm:$0xff]  }
  0xc5   :  { %v6519_v25 = vld [vmem:[#allocation8 + $0x1cc] ss:$16 sps:$4 sm:$0xff]   ;;  %v6523_v30 = vld [vmem:[#allocation8 + $0x1e8] ss:$16 sps:$4 sm:$0xff]   ;;  %v6526_v31 = vld [vmem:[#allocation8 + $0x1e0] ss:$16 sps:$4 sm:$0xff]  }
  0xc6   :  { %831 = vmatpush1.bf16.msra.mxu0 %v6460_v33  ;;  %v6525_v29 = vld [vmem:[#allocation8 + $0x1ec] ss:$16 sps:$4 sm:$0xff]   ;;  %v912_v32 = vld [vmem:[#allocation10] sm:$0xff]  ;;  %s7311_s19 = smov [#allocation17]  }
  0xc7   :  { %376 = vmatpush1.bf16.msra.mxu1 %v6413_v11  ;;  %832 = vmatprep.subr.bf16.mxu0 %v6461_v34  ;;  %v6475_v11 = vld [vmem:[#allocation8 + $0xe8] ss:$16 sps:$4 sm:$0xff]   ;;  %v916_v33 = vld [vmem:[#allocation10 + $0x20] sm:$0xff] }
  0xc8   :  { %377 = vmatprep.subr.bf16.mxu1 %v6418_v12  ;;  %v6483_v12 = vld [vmem:[#allocation8 + $0x10c] ss:$16 sps:$4 sm:$0xff]  }
  0xc9   :  { %v913_v34 = vld [vmem:[#allocation10 + $0x8] sm:$0xff] }
  0xca   :  { %833 = vmatpush1.bf16.msra.mxu0 %v6466_v35  ;;  %v5644_v35 = vcombine.low %v912_v32, %v916_v33 }
  0xcb   :  { %378 = vmatpush1.bf16.msra.mxu1 %v6416_v13  ;;  %834 = vmatprep.subr.bf16.mxu0 %v6467_v36  ;;  %v6481_v13 = vld [vmem:[#allocation8 + $0x108] ss:$16 sps:$4 sm:$0xff]   ;;  %v5645_v36 = vcombine.high %v912_v32, %v916_v33  ;;  %v960_v32 = vld [vmem:[#allocation10 + $0x180] sm:$0xff] }
  0xcc   :  { %379 = vmatprep.subr.bf16.mxu1 %v6421_v14  ;;  %v6489_v14 = vld [vmem:[#allocation8 + $0x12c] ss:$16 sps:$4 sm:$0xff]   ;;  %v964_v33 = vld [vmem:[#allocation10 + $0x1a0] sm:$0xff] }
  0xce   :  { %835 = vmatpush1.bf16.msra.mxu0 %v6472_v37  ;;  %v917_v37 = vld [vmem:[#allocation10 + $0x28] sm:$0xff] }
  0xcf   :  { %380 = vmatpush1.bf16.msra.mxu1 %v6419_v15  ;;  %836 = vmatprep.subr.bf16.mxu0 %v6473_v38  ;;  %v6487_v15 = vld [vmem:[#allocation8 + $0x128] ss:$16 sps:$4 sm:$0xff]   ;;  %v5646_v38 = vcombine.low %v913_v34, %v917_v37 }
  0xd0   :  { %381 = vmatprep.subr.bf16.mxu1 %v6424_v16  ;;  %v6495_v16 = vld [vmem:[#allocation8 + $0x14c] ss:$16 sps:$4 sm:$0xff]  }
  0xd2   :  { %837 = vmatpush1.bf16.msra.mxu0 %v6478_v39  ;;  %v5647_v39 = vcombine.high %v913_v34, %v917_v37  ;;  %v961_v34 = vld [vmem:[#allocation10 + $0x188] sm:$0xff] }
  0xd3   :  { %382 = vmatpush1.bf16.msra.mxu1 %v6422_v17  ;;  %838 = vmatprep.subr.bf16.mxu0 %v6479_v40  ;;  %v6493_v17 = vld [vmem:[#allocation8 + $0x148] ss:$16 sps:$4 sm:$0xff]   ;;  %v281_v40 = vlaneseq }
  0xd4   :  { %383 = vmatprep.subr.bf16.mxu1 %v6427_v18  ;;  %v6501_v18 = vld [vmem:[#allocation8 + $0x16c] ss:$16 sps:$4 sm:$0xff]  }
  0xd6   :  { %839 = vmatpush1.bf16.msra.mxu0 %v6484_v41  ;;  %v7542_v41 = vshrl.u32 %v281_v40, 7  ;;  %v968_v40 = vld [vmem:[#allocation10 + $0x1c0] sm:$0xff] }
  0xd7   :  { %384 = vmatpush1.bf16.msra.mxu1 %v6425_v19  ;;  %840 = vmatprep.subr.bf16.mxu0 %v6485_v42  ;;  %v6499_v19 = vld [vmem:[#allocation8 + $0x168] ss:$16 sps:$4 sm:$0xff]  }
  0xd8   :  { %385 = vmatprep.subr.bf16.mxu1 %v6430_v20  ;;  %v6507_v20 = vld [vmem:[#allocation8 + $0x18c] ss:$16 sps:$4 sm:$0xff]   ;;  %v7545_v42 = vsub.s32 0, %v7542_v41 }
  0xda   :  { %841 = vmatpush1.bf16.msra.mxu0 %v6490_v43  ;;  %v279_v43 = vld [vmem:[#allocation7] sm:$0x3] }
  0xdb   :  { %386 = vmatpush1.bf16.msra.mxu1 %v6428_v21  ;;  %842 = vmatprep.subr.bf16.mxu0 %v6491_v44  ;;  %v6505_v21 = vld [vmem:[#allocation8 + $0x188] ss:$16 sps:$4 sm:$0xff]   ;;  %v7548_v44 = vsub.s32 1, %v7542_v41 }
  0xdc   :  { %863 = vmatprep.subr.bf16.mxu1 %v6435_v24  ;;  %v6515_v24 = vld [vmem:[#allocation8 + $0x1c4] ss:$16 sps:$4 sm:$0xff]  }
  0xde   :  { %843 = vmatpush1.bf16.msra.mxu0 %v6496_v45  ;;  %v284_v45 = vrot.slane %v279_v43, %v7545_v42 }
  0xdf   :  { %844 = vmatprep.subr.bf16.mxu0 %v6497_v46  ;;  %v288_v46 = vrot.slane %v279_v43, %v7548_v44  ;;  %v972_v43 = vld [vmem:[#allocation10 + $0x1e0] sm:$0xff] }
  0xe2   :  { %845 = vmatpush1.bf16.msra.mxu0 %v6502_v47 }
  0xe3   :  { %846 = vmatprep.subr.bf16.mxu0 %v6503_v48 }
  0xe6   :  { %847 = vmatpush1.bf16.msra.mxu0 %v6508_v49 }
  0xe7   :  { %848 = vmatprep.subr.bf16.mxu0 %v6509_v50 }
  0xea   :  { %849 = vmatpush1.bf16.msra.mxu0 %v6514_v51 }
  0xeb   :  { %850 = vmatprep.subr.bf16.mxu0 %v6515_v24  ;;  %v952_v24 = vld [vmem:[#allocation10 + $0x140] sm:$0xff] }
  0xee   :  { %851 = vmatpush1.bf16.msra.mxu0 %v6520_v27  ;;  %v957_v27 = vld [vmem:[#allocation10 + $0x168] sm:$0xff] }
  0xef   :  { %852 = vmatprep.subr.bf16.mxu0 %v6521_v28 }
  0xf2   :  { %853 = vmatpush1.bf16.msra.mxu0 %v6526_v31 }
  0xf3   :  { %2490 = vmatprep.subr.bf16.mxu0 %v5645_v36 }
 0x191   :  { %v255_v53 = vpop.f32.mrb[0].mxu1 }
 0x192   :  { %v256_v54 = vadd.f32 %v5558_v52, %v255_v53  ;;  %v6301_v55 = vpop.f32.mrb[1].mxu1 }
 0x193   :  { %v258_v56 = vpop.f32.mrb[2].mxu1 }
 0x194   :  { %v261_v57 = vmax.f32 %v256_v54, 0.0  ;;  %v6302_v58 = vpop.f32.mrb[3].mxu1  ;;  %v920_v54 = vld [vmem:[#allocation10 + $0x40] sm:$0xff] }
 0x195   :  { %v924_v56 = vld [vmem:[#allocation10 + $0x60] sm:$0xff]  ;;  %v925_v58 = vld [vmem:[#allocation10 + $0x68] sm:$0xff] }
 0x196   :  { %v262_v60 = vpack.c.bf16 %v261_v57, %v261_v57  ;;  %v921_v57 = vld [vmem:[#allocation10 + $0x48] sm:$0xff] }
 0x198   :  { %404 = vmatmul.mubr.bf16.vlgmr.msra.gmra.mrb[4].mxu1 %v262_v60 }
 0x199   :  { %864 = vmatpush1.bf16.msra.mxu1 %v6433_v59 }
 0x19a   :  { %865 = vmatprep.subr.bf16.mxu1 %v6441_v61  ;;  %v5653_v61 = vcombine.high %v920_v54, %v924_v56 }
 0x19d   :  { %866 = vmatpush1.bf16.msra.mxu1 %v6439_v62  ;;  %v5655_v62 = vcombine.high %v921_v57, %v925_v58 }
 0x19e   :  { %867 = vmatprep.subr.bf16.mxu1 %v6447_v63  ;;  %v928_v63 = vld [vmem:[#allocation10 + $0x80] sm:$0xff] }
 0x1a1   :  { %868 = vmatpush1.bf16.msra.mxu1 %v6445_v1  ;;  %v932_v1 = vld [vmem:[#allocation10 + $0xa0] sm:$0xff] }
 0x1a2   :  { %869 = vmatprep.subr.bf16.mxu1 %v6453_v2  ;;  %v929_v2 = vld [vmem:[#allocation10 + $0x88] sm:$0xff] }
 0x1a5   :  { %870 = vmatpush1.bf16.msra.mxu1 %v6451_v3  ;;  %v933_v3 = vld [vmem:[#allocation10 + $0xa8] sm:$0xff] }
 0x1a6   :  { %871 = vmatprep.subr.bf16.mxu1 %v6459_v4  ;;  %v5652_v4 = vcombine.low %v920_v54, %v924_v56  ;;  %v981_v54 = vld [vmem:[#allocation10 + $0x228] sm:$0xff] }
 0x1a9   :  { %872 = vmatpush1.bf16.msra.mxu1 %v6457_v5  ;;  %v5654_v5 = vcombine.low %v921_v57, %v925_v58 }
 0x1aa   :  { %873 = vmatprep.subr.bf16.mxu1 %v6465_v6  ;;  %v5661_v6 = vcombine.high %v928_v63, %v932_v1 }
 0x1ad   :  { %874 = vmatpush1.bf16.msra.mxu1 %v6463_v7  ;;  %v5663_v7 = vcombine.high %v929_v2, %v933_v3 }
 0x1ae   :  { %875 = vmatprep.subr.bf16.mxu1 %v6471_v8  ;;  %v936_v8 = vld [vmem:[#allocation10 + $0xc0] sm:$0xff] }
 0x1b1   :  { %876 = vmatpush1.bf16.msra.mxu1 %v6469_v9  ;;  %v940_v9 = vld [vmem:[#allocation10 + $0xe0] sm:$0xff] }
 0x1b2   :  { %877 = vmatprep.subr.bf16.mxu1 %v6477_v10  ;;  %v937_v10 = vld [vmem:[#allocation10 + $0xc8] sm:$0xff] }
 0x1b5   :  { %878 = vmatpush1.bf16.msra.mxu1 %v6475_v11  ;;  %v941_v11 = vld [vmem:[#allocation10 + $0xe8] sm:$0xff] }
 0x1b6   :  { %879 = vmatprep.subr.bf16.mxu1 %v6483_v12  ;;  %v5660_v12 = vcombine.low %v928_v63, %v932_v1 }
 0x1b9   :  { %880 = vmatpush1.bf16.msra.mxu1 %v6481_v13  ;;  %v5662_v13 = vcombine.low %v929_v2, %v933_v3 }
 0x1ba   :  { %881 = vmatprep.subr.bf16.mxu1 %v6489_v14  ;;  %v5669_v14 = vcombine.high %v936_v8, %v940_v9 }
 0x1bd   :  { %882 = vmatpush1.bf16.msra.mxu1 %v6487_v15  ;;  %v5671_v15 = vcombine.high %v937_v10, %v941_v11 }
 0x1be   :  { %883 = vmatprep.subr.bf16.mxu1 %v6495_v16  ;;  %v944_v16 = vld [vmem:[#allocation10 + $0x100] sm:$0xff] }
 0x1c1   :  { %884 = vmatpush1.bf16.msra.mxu1 %v6493_v17  ;;  %v948_v17 = vld [vmem:[#allocation10 + $0x120] sm:$0xff] }
 0x1c2   :  { %885 = vmatprep.subr.bf16.mxu1 %v6501_v18  ;;  %v945_v18 = vld [vmem:[#allocation10 + $0x108] sm:$0xff]  ;;  %v5676_v28 = vcombine.low %v944_v16, %v948_v17 }
 0x1c5   :  { %886 = vmatpush1.bf16.msra.mxu1 %v6499_v19  ;;  %v949_v19 = vld [vmem:[#allocation10 + $0x128] sm:$0xff] }
 0x1c6   :  { %887 = vmatprep.subr.bf16.mxu1 %v6507_v20  ;;  %v5668_v20 = vcombine.low %v936_v8, %v940_v9 }
 0x1c9   :  { %888 = vmatpush1.bf16.msra.mxu1 %v6505_v21  ;;  %v5670_v21 = vcombine.low %v937_v10, %v941_v11 }
 0x1ca   :  { %889 = vmatprep.subr.bf16.mxu1 %v6513_v22  ;;  %v5677_v22 = vcombine.high %v944_v16, %v948_v17 }
 0x1cd   :  { %890 = vmatpush1.bf16.msra.mxu1 %v6511_v23  ;;  %v5679_v23 = vcombine.high %v945_v18, %v949_v19 }
 0x1ce   :  { %891 = vmatprep.subr.bf16.mxu1 %v6519_v25  ;;  %v956_v25 = vld [vmem:[#allocation10 + $0x160] sm:$0xff] }
 0x1cf   :  { %v5684_v36 = vcombine.low %v952_v24, %v956_v25 }
 0x1d1   :  { %892 = vmatpush1.bf16.msra.mxu1 %v6517_v26  ;;  %v953_v26 = vld [vmem:[#allocation10 + $0x148] sm:$0xff] }
 0x1d2   :  { %893 = vmatprep.subr.bf16.mxu1 %v6525_v29  ;;  %v5678_v29 = vcombine.low %v945_v18, %v949_v19  ;;  %v5687_v31 = vcombine.high %v953_v26, %v957_v27  ;;  %v5686_v37 = vcombine.low %v953_v26, %v957_v27 }
 0x1d5   :  { %894 = vmatpush1.bf16.msra.mxu1 %v6523_v30  ;;  %v5685_v30 = vcombine.high %v952_v24, %v956_v25 }
 0x1d6   :  { %2572 = vmatprep.subr.bf16.mxu1 %v5647_v39 }
 0x26b   :  { %v405_v47 = vpop.f32.mrb[4].mxu1 }
 0x26c   :  { %v406_v48 = vadd.f32 %v405_v47, %v284_v45  ;;  %v407_v49 = vpop.f32.mrb[5].mxu1  ;;  %v969_v45 = vld [vmem:[#allocation10 + $0x1c8] sm:$0xff]  ;;  %v5692_v47 = vcombine.low %v960_v32, %v964_v33 }
 0x26d   :  { %v408_v50 = vadd.f32 %v407_v49, %v288_v46  ;;  %v409_v51 = vpop.f32.mrb[6].mxu1  ;;  %v973_v46 = vld [vmem:[#allocation10 + $0x1e8] sm:$0xff]  ;;  %v5701_v49 = vcombine.high %v968_v40, %v972_v43 }
 0x26e   :  { %v412_v52 = vmax.f32 %v406_v48, 0.0  ;;  %v410_v53 = vpop.f32.mrb[7].mxu1  ;;  %v976_v51 = vld [vmem:[#allocation10 + $0x200] sm:$0xff]  ;;  %v5702_v56 = vcombine.low %v969_v45, %v973_v46 }
 0x26f   :  { %v413_v55 = vmax.f32 %v408_v50, 0.0  ;;  %v5703_v50 = vcombine.high %v969_v45, %v973_v46  ;;  %v977_v53 = vld [vmem:[#allocation10 + $0x208] sm:$0xff] }
 0x270   :  { %v414_v60 = vpack.c.bf16 %v412_v52, %v412_v52  ;;  %v980_v52 = vld [vmem:[#allocation10 + $0x220] sm:$0xff]  ;;  %v5711_v58 = vcombine.high %v977_v53, %v981_v54  ;;  %v5710_v1 = vcombine.low %v977_v53, %v981_v54  ;;  %v1029_v45 = vld [vmem:[#allocation10 + $0x3a8] sm:$0xff] }
 0x271   :  { %v415_v59 = vpack.c.bf16 %v413_v55, %v413_v55  ;;  %v5700_v55 = vcombine.low %v968_v40, %v972_v43  ;;  %v5709_v57 = vcombine.high %v976_v51, %v980_v52  ;;  %v5708_v63 = vcombine.low %v976_v51, %v980_v52  ;;  %v1025_v40 = vld [vmem:[#allocation10 + $0x388] sm:$0xff] }
 0x272   :  { %v1033_v51 = vld [vmem:[#allocation10 + $0x3c8] sm:$0xff] }
 0x273   :  { %854 = vmatprep.mubr.bf16.mxu0 %v415_v59  ;;  %895 = vmatprep.mubr.bf16.mxu1 %v415_v59  ;;  %v984_v59 = vld [vmem:[#allocation10 + $0x240] sm:$0xff]  ;;  %v1037_v53 = vld [vmem:[#allocation10 + $0x3e8] sm:$0xff] }
 0x274   :  { %855 = vmatmul.mubr.bf16.vlgmr.msra.gmra.mrb[0].mxu0 %v414_v60  ;;  %896 = vmatmul.mubr.bf16.vlgmr.msra.gmra.mrb[8].mxu1 %v414_v60  ;;  %v988_v60 = vld [vmem:[#allocation10 + $0x260] sm:$0xff] }
 0x275   :  { %2491 = vmatpush1.bf16.msra.mxu0 %v5644_v35  ;;  %2573 = vmatpush1.bf16.msra.mxu1 %v5646_v38  ;;  %v965_v35 = vld [vmem:[#allocation10 + $0x1a8] sm:$0xff]  ;;  %v5693_v38 = vcombine.high %v960_v32, %v964_v33  ;;  %v5717_v2 = vcombine.high %v984_v59, %v988_v60  ;;  %v5716_v8 = vcombine.low %v984_v59, %v988_v60 }
 0x276   :  { %2492 = vmatprep.subr.bf16.mxu0 %v5653_v61  ;;  %2574 = vmatprep.subr.bf16.mxu1 %v5655_v62  ;;  %v5695_v39 = vcombine.high %v961_v34, %v965_v35  ;;  %v5694_v48 = vcombine.low %v961_v34, %v965_v35  ;;  %v985_v61 = vld [vmem:[#allocation10 + $0x248] sm:$0xff] }
 0x277   :  { %v989_v62 = vld [vmem:[#allocation10 + $0x268] sm:$0xff] }
 0x278   :  { %v5719_v3 = vcombine.high %v985_v61, %v989_v62  ;;  %v5718_v9 = vcombine.low %v985_v61, %v989_v62  ;;  %v1041_v59 = vld [vmem:[#allocation10 + $0x408] sm:$0xff] }
 0x279   :  { %2493 = vmatpush1.bf16.msra.mxu0 %v5652_v4  ;;  %2575 = vmatpush1.bf16.msra.mxu1 %v5654_v5  ;;  %v992_v4 = vld [vmem:[#allocation10 + $0x280] sm:$0xff]  ;;  %v1045_v61 = vld [vmem:[#allocation10 + $0x428] sm:$0xff] }
 0x27a   :  { %2494 = vmatprep.subr.bf16.mxu0 %v5661_v6  ;;  %2576 = vmatprep.subr.bf16.mxu1 %v5663_v7  ;;  %v996_v5 = vld [vmem:[#allocation10 + $0x2a0] sm:$0xff]  ;;  %v993_v6 = vld [vmem:[#allocation10 + $0x288] sm:$0xff] }
 0x27b   :  { %v997_v7 = vld [vmem:[#allocation10 + $0x2a8] sm:$0xff]  ;;  %v5725_v10 = vcombine.high %v992_v4, %v996_v5  ;;  %v5724_v16 = vcombine.low %v992_v4, %v996_v5 }
 0x27c   :  { %v5727_v11 = vcombine.high %v993_v6, %v997_v7  ;;  %v5726_v17 = vcombine.low %v993_v6, %v997_v7 }
 0x27d   :  { %2495 = vmatpush1.bf16.msra.mxu0 %v5660_v12  ;;  %2577 = vmatpush1.bf16.msra.mxu1 %v5662_v13  ;;  %v1000_v12 = vld [vmem:[#allocation10 + $0x2c0] sm:$0xff] }
 0x27e   :  { %2496 = vmatprep.subr.bf16.mxu0 %v5669_v14  ;;  %2578 = vmatprep.subr.bf16.mxu1 %v5671_v15  ;;  %v1004_v13 = vld [vmem:[#allocation10 + $0x2e0] sm:$0xff]  ;;  %v1001_v14 = vld [vmem:[#allocation10 + $0x2c8] sm:$0xff] }
 0x27f   :  { %v1005_v15 = vld [vmem:[#allocation10 + $0x2e8] sm:$0xff]  ;;  %v5733_v18 = vcombine.high %v1000_v12, %v1004_v13  ;;  %v5732_v24 = vcombine.low %v1000_v12, %v1004_v13 }
 0x280   :  { %v5735_v19 = vcombine.high %v1001_v14, %v1005_v15  ;;  %v5734_v25 = vcombine.low %v1001_v14, %v1005_v15 }
 0x281   :  { %2497 = vmatpush1.bf16.msra.mxu0 %v5668_v20  ;;  %2579 = vmatpush1.bf16.msra.mxu1 %v5670_v21  ;;  %v1008_v20 = vld [vmem:[#allocation10 + $0x300] sm:$0xff] }
 0x282   :  { %2498 = vmatprep.subr.bf16.mxu0 %v5677_v22  ;;  %2580 = vmatprep.subr.bf16.mxu1 %v5679_v23  ;;  %v1012_v21 = vld [vmem:[#allocation10 + $0x320] sm:$0xff]  ;;  %v1009_v22 = vld [vmem:[#allocation10 + $0x308] sm:$0xff] }
 0x283   :  { %v1013_v23 = vld [vmem:[#allocation10 + $0x328] sm:$0xff]  ;;  %v5741_v26 = vcombine.high %v1008_v20, %v1012_v21  ;;  %v5740_v32 = vcombine.low %v1008_v20, %v1012_v21  ;;  %v1048_v20 = vld [vmem:[#allocation10 + $0x440] sm:$0xff] }
 0x284   :  { %v5743_v27 = vcombine.high %v1009_v22, %v1013_v23  ;;  %v5742_v33 = vcombine.low %v1009_v22, %v1013_v23  ;;  %v1052_v22 = vld [vmem:[#allocation10 + $0x460] sm:$0xff]  ;;  %v1049_v23 = vld [vmem:[#allocation10 + $0x448] sm:$0xff] }
 0x285   :  { %2499 = vmatpush1.bf16.msra.mxu0 %v5676_v28  ;;  %2581 = vmatpush1.bf16.msra.mxu1 %v5678_v29  ;;  %v1016_v28 = vld [vmem:[#allocation10 + $0x340] sm:$0xff] }
 0x286   :  { %2500 = vmatprep.subr.bf16.mxu0 %v5685_v30  ;;  %2582 = vmatprep.subr.bf16.mxu1 %v5687_v31  ;;  %v1020_v29 = vld [vmem:[#allocation10 + $0x360] sm:$0xff]  ;;  %v1017_v30 = vld [vmem:[#allocation10 + $0x348] sm:$0xff] }
 0x287   :  { %v1021_v31 = vld [vmem:[#allocation10 + $0x368] sm:$0xff]  ;;  %v5749_v34 = vcombine.high %v1016_v28, %v1020_v29 }
 0x288   :  { %v5751_v35 = vcombine.high %v1017_v30, %v1021_v31 }
 0x289   :  { %2501 = vmatpush1.bf16.msra.mxu0 %v5684_v36  ;;  %2583 = vmatpush1.bf16.msra.mxu1 %v5686_v37  ;;  %v5748_v36 = vcombine.low %v1016_v28, %v1020_v29  ;;  %v5750_v37 = vcombine.low %v1017_v30, %v1021_v31  ;;  %v5781_v28 = vcombine.high %v1048_v20, %v1052_v22  ;;  %v1060_v30 = vld [vmem:[#allocation10 + $0x4a0] sm:$0xff]  ;;  %v1057_v31 = vld [vmem:[#allocation10 + $0x488] sm:$0xff] }
 0x28a   :  { %2502 = vmatprep.subr.bf16.mxu0 %v5693_v38  ;;  %2584 = vmatprep.subr.bf16.mxu1 %v5695_v39  ;;  %v1024_v38 = vld [vmem:[#allocation10 + $0x380] sm:$0xff] }
 0x28b   :  { %v1028_v39 = vld [vmem:[#allocation10 + $0x3a0] sm:$0xff] }
 0x28c   :  { %v5757_v43 = vcombine.high %v1024_v38, %v1028_v39  ;;  %v5756_v46 = vcombine.low %v1024_v38, %v1028_v39  ;;  %v1064_v38 = vld [vmem:[#allocation10 + $0x4c0] sm:$0xff] }
 0x28d   :  { %2503 = vmatpush1.bf16.msra.mxu0 %v5692_v47  ;;  %2585 = vmatpush1.bf16.msra.mxu1 %v5694_v48  ;;  %v5758_v47 = vcombine.low %v1025_v40, %v1029_v45  ;;  %v5759_v48 = vcombine.high %v1025_v40, %v1029_v45  ;;  %v1068_v39 = vld [vmem:[#allocation10 + $0x4e0] sm:$0xff]  ;;  %v1065_v40 = vld [vmem:[#allocation10 + $0x4c8] sm:$0xff] }
 0x28e   :  { %2504 = vmatprep.subr.bf16.mxu0 %v5701_v49  ;;  %2586 = vmatprep.subr.bf16.mxu1 %v5703_v50  ;;  %v1032_v49 = vld [vmem:[#allocation10 + $0x3c0] sm:$0xff] }
 0x28f   :  { %v1036_v50 = vld [vmem:[#allocation10 + $0x3e0] sm:$0xff] }
 0x290   :  { %v5765_v52 = vcombine.high %v1032_v49, %v1036_v50  ;;  %v5764_v54 = vcombine.low %v1032_v49, %v1036_v50  ;;  %v1072_v49 = vld [vmem:[#allocation10 + $0x500] sm:$0xff] }
 0x291   :  { %2505 = vmatpush1.bf16.msra.mxu0 %v5700_v55  ;;  %2587 = vmatpush1.bf16.msra.mxu1 %v5702_v56  ;;  %v5766_v55 = vcombine.low %v1033_v51, %v1037_v53  ;;  %v5767_v56 = vcombine.high %v1033_v51, %v1037_v53  ;;  %v1076_v50 = vld [vmem:[#allocation10 + $0x520] sm:$0xff]  ;;  %v1073_v51 = vld [vmem:[#allocation10 + $0x508] sm:$0xff]  ;;  %v5796_v53 = vcombine.low %v1064_v38, %v1068_v39 }
 0x292   :  { %2506 = vmatprep.subr.bf16.mxu0 %v5709_v57  ;;  %2588 = vmatprep.subr.bf16.mxu1 %v5711_v58  ;;  %v1040_v57 = vld [vmem:[#allocation10 + $0x400] sm:$0xff] }
 0x293   :  { %v1044_v58 = vld [vmem:[#allocation10 + $0x420] sm:$0xff] }
 0x294   :  { %v5773_v60 = vcombine.high %v1040_v57, %v1044_v58  ;;  %v5772_v62 = vcombine.low %v1040_v57, %v1044_v58  ;;  %v1080_v57 = vld [vmem:[#allocation10 + $0x540] sm:$0xff] }
 0x295   :  { %2507 = vmatpush1.bf16.msra.mxu0 %v5708_v63  ;;  %2589 = vmatpush1.bf16.msra.mxu1 %v5710_v1  ;;  %v5774_v63 = vcombine.low %v1041_v59, %v1045_v61  ;;  %v5775_v1 = vcombine.high %v1041_v59, %v1045_v61  ;;  %v1084_v58 = vld [vmem:[#allocation10 + $0x560] sm:$0xff]  ;;  %v1081_v59 = vld [vmem:[#allocation10 + $0x548] sm:$0xff]  ;;  %v5804_v61 = vcombine.low %v1072_v49, %v1076_v50 }
 0x296   :  { %2508 = vmatprep.subr.bf16.mxu0 %v5717_v2  ;;  %2590 = vmatprep.subr.bf16.mxu1 %v5719_v3  ;;  %v7555_v2 = vld [vmem:[%s7763_s6] sm:$0xf]  ;;  %v7558_v3 = vsub.s32 3, %v7542_v41 }
 0x297   :  { %v485_v4 = vrot.slane %v7555_v2, %v7545_v42  ;;  %v489_v5 = vrot.slane %v7555_v2, %v7548_v44 }
 0x298   :  { %v497_v6 = vrot.slane %v7555_v2, %v7558_v3 }
 0x299   :  { %2509 = vmatpush1.bf16.msra.mxu0 %v5716_v8  ;;  %2591 = vmatpush1.bf16.msra.mxu1 %v5718_v9 }
 0x29a   :  { %2510 = vmatprep.subr.bf16.mxu0 %v5725_v10  ;;  %2592 = vmatprep.subr.bf16.mxu1 %v5727_v11 }
 0x29d   :  { %2511 = vmatpush1.bf16.msra.mxu0 %v5724_v16  ;;  %2593 = vmatpush1.bf16.msra.mxu1 %v5726_v17 }
 0x29e   :  { %2512 = vmatprep.subr.bf16.mxu0 %v5733_v18  ;;  %2594 = vmatprep.subr.bf16.mxu1 %v5735_v19 }
 0x2a1   :  { %2513 = vmatpush1.bf16.msra.mxu0 %v5732_v24  ;;  %2595 = vmatpush1.bf16.msra.mxu1 %v5734_v25  ;;  %v1053_v24 = vld [vmem:[#allocation10 + $0x468] sm:$0xff] }
 0x2a2   :  { %2514 = vmatprep.subr.bf16.mxu0 %v5741_v26  ;;  %2596 = vmatprep.subr.bf16.mxu1 %v5743_v27  ;;  %v1056_v27 = vld [vmem:[#allocation10 + $0x480] sm:$0xff]  ;;  %v5783_v29 = vcombine.high %v1049_v23, %v1053_v24 }
 0x2a3   :  { %v5788_v45 = vcombine.low %v1056_v27, %v1060_v30 }
 0x2a5   :  { %2515 = vmatpush1.bf16.msra.mxu0 %v5740_v32  ;;  %2597 = vmatpush1.bf16.msra.mxu1 %v5742_v33  ;;  %v1061_v32 = vld [vmem:[#allocation10 + $0x4a8] sm:$0xff] }
 0x2a6   :  { %2516 = vmatprep.subr.bf16.mxu0 %v5749_v34  ;;  %2598 = vmatprep.subr.bf16.mxu1 %v5751_v35  ;;  %v5780_v34 = vcombine.low %v1048_v20, %v1052_v22  ;;  %v5782_v35 = vcombine.low %v1049_v23, %v1053_v24  ;;  %v1108_v22 = vld [vmem:[#allocation10 + $0x620] sm:$0xff]  ;;  %v1105_v23 = vld [vmem:[#allocation10 + $0x608] sm:$0xff] }
 0x2a7   :  { %v1109_v24 = vld [vmem:[#allocation10 + $0x628] sm:$0xff] }
 0x2a9   :  { %2517 = vmatpush1.bf16.msra.mxu0 %v5748_v36  ;;  %2599 = vmatpush1.bf16.msra.mxu1 %v5750_v37  ;;  %v5789_v36 = vcombine.high %v1056_v27, %v1060_v30  ;;  %v5791_v37 = vcombine.high %v1057_v31, %v1061_v32  ;;  %v5839_v30 = vcombine.high %v1105_v23, %v1109_v24 }
 0x2aa   :  { %2518 = vmatprep.subr.bf16.mxu0 %v5757_v43  ;;  %2600 = vmatprep.subr.bf16.mxu1 %v5759_v48  ;;  %v1069_v43 = vld [vmem:[#allocation10 + $0x4e8] sm:$0xff] }
 0x2ab   :  { %v5799_v48 = vcombine.high %v1065_v40, %v1069_v43 }
 0x2ad   :  { %2519 = vmatpush1.bf16.msra.mxu0 %v5756_v46  ;;  %2601 = vmatpush1.bf16.msra.mxu1 %v5758_v47  ;;  %v5790_v46 = vcombine.low %v1057_v31, %v1061_v32  ;;  %v5797_v47 = vcombine.high %v1064_v38, %v1068_v39  ;;  %v1112_v31 = vld [vmem:[#allocation10 + $0x640] sm:$0xff] }
 0x2ae   :  { %2520 = vmatprep.subr.bf16.mxu0 %v5765_v52  ;;  %2602 = vmatprep.subr.bf16.mxu1 %v5767_v56  ;;  %v1077_v52 = vld [vmem:[#allocation10 + $0x528] sm:$0xff]  ;;  %v1116_v32 = vld [vmem:[#allocation10 + $0x660] sm:$0xff] }
 0x2af   :  { %v5807_v56 = vcombine.high %v1073_v51, %v1077_v52  ;;  %v5845_v38 = vcombine.high %v1112_v31, %v1116_v32 }
 0x2b1   :  { %2521 = vmatpush1.bf16.msra.mxu0 %v5764_v54  ;;  %2603 = vmatpush1.bf16.msra.mxu1 %v5766_v55  ;;  %v5798_v54 = vcombine.low %v1065_v40, %v1069_v43  ;;  %v5805_v55 = vcombine.high %v1072_v49, %v1076_v50  ;;  %v1120_v40 = vld [vmem:[#allocation10 + $0x680] sm:$0xff] }
 0x2b2   :  { %2531 = vmatprep.subr.bf16.mxu0 %v5773_v60  ;;  %2613 = vmatprep.subr.bf16.mxu1 %v5775_v1  ;;  %v1085_v60 = vld [vmem:[#allocation10 + $0x568] sm:$0xff]  ;;  %v1124_v43 = vld [vmem:[#allocation10 + $0x6a0] sm:$0xff] }
 0x2b3   :  { %v5815_v1 = vcombine.high %v1081_v59, %v1085_v60  ;;  %v5853_v49 = vcombine.high %v1120_v40, %v1124_v43 }
 0x347   :  { %v856_v7 = vpop.f32.mrb[0].mxu0  ;;  %v7566_v8 = vpop.f32.mrb[8].mxu1 }
 0x348   :  { %v857_v9 = vadd.f32 %v856_v7, %v485_v4  ;;  %v858_v10 = vpop.f32.mrb[1].mxu0  ;;  %v899_v11 = vpop.f32.mrb[9].mxu1  ;;  %v1088_v4 = vld [vmem:[#allocation10 + $0x580] sm:$0xff]  ;;  %v1093_v7 = vld [vmem:[#allocation10 + $0x5a8] sm:$0xff] }
 0x349   :  { %v859_v12 = vadd.f32 %v858_v10, %v489_v5  ;;  %v900_v13 = vadd.f32 %v899_v11, %v497_v6  ;;  %v860_v14 = vpop.f32.mrb[2].mxu0  ;;  %v901_v15 = vpop.f32.mrb[10].mxu1  ;;  %v1092_v5 = vld [vmem:[#allocation10 + $0x5a0] sm:$0xff]  ;;  %v1089_v6 = vld [vmem:[#allocation10 + $0x588] sm:$0xff]  ;;  %v5814_v10 = vcombine.low %v1081_v59, %v1085_v60 }
 0x34a   :  { %v904_v16 = vmax.f32 %v857_v9, 0.0  ;;  %v861_v17 = vpop.f32.mrb[3].mxu0  ;;  %v902_v18 = vpop.f32.mrb[11].mxu1  ;;  %v5812_v9 = vcombine.low %v1080_v57, %v1084_v58  ;;  %v5821_v11 = vcombine.high %v1088_v4, %v1092_v5  ;;  %v1100_v14 = vld [vmem:[#allocation10 + $0x5e0] sm:$0xff]  ;;  %v1097_v15 = vld [vmem:[#allocation10 + $0x5c8] sm:$0xff] }
 0x34b   :  { %v905_v19 = vmax.f32 %v859_v12, 0.0  ;;  %v907_v21 = vmax.f32 %v900_v13, 0.0  ;;  %v5823_v12 = vcombine.high %v1089_v6, %v1093_v7  ;;  %v1096_v13 = vld [vmem:[#allocation10 + $0x5c0] sm:$0xff]  ;;  %v5820_v17 = vcombine.low %v1088_v4, %v1092_v5 }
 0x34c   :  { %v7570_v26 = vpack.c.bf16 %v904_v16, %v904_v16  ;;  %v1101_v16 = vld [vmem:[#allocation10 + $0x5e8] sm:$0xff]  ;;  %v5822_v18 = vcombine.low %v1089_v6, %v1093_v7  ;;  %v5828_v27 = vcombine.low %v1096_v13, %v1100_v14  ;;  %v1136_v59 = vld [vmem:[#allocation10 + $0x700] sm:$0xff] }
 0x34d   :  { %v7568_v25 = vpack.c.bf16 %v905_v19, %v905_v19  ;;  %v7574_v33 = vpack.c.bf16 %v907_v21, %v907_v21  ;;  %v5829_v19 = vcombine.high %v1096_v13, %v1100_v14  ;;  %v5831_v20 = vcombine.high %v1097_v15, %v1101_v16  ;;  %v1104_v21 = vld [vmem:[#allocation10 + $0x600] sm:$0xff] }
 0x34e   :  { %v1140_v60 = vld [vmem:[#allocation10 + $0x720] sm:$0xff]  ;;  %v7581_v13 = vsub.s32 2, %v7542_v41 }
 0x34f   :  { %2522 = vmatprep.mubr.bf16.mxu0 %v7568_v25  ;;  %2604 = vmatprep.mubr.bf16.mxu1 %v7568_v25  ;;  %v5869_v4 = vcombine.high %v1136_v59, %v1140_v60  ;;  %v1144_v6 = vld [vmem:[#allocation10 + $0x740] sm:$0xff] }
 0x350   :  { %2523 = vmatmul.mubr.bf16.vlgmr.msra.gmra.mrb[4].mxu0 %v7570_v26  ;;  %2605 = vmatmul.mubr.bf16.vlgmr.msra.gmra.mrb[12].mxu1 %v7570_v26  ;;  %v1148_v7 = vld [vmem:[#allocation10 + $0x760] sm:$0xff] }
 0x351   :  { %2532 = vmatpush1.bf16.msra.mxu0 %v5772_v62  ;;  %2614 = vmatpush1.bf16.msra.mxu1 %v5774_v63  ;;  %v5806_v62 = vcombine.low %v1073_v51, %v1077_v52  ;;  %v5813_v63 = vcombine.high %v1080_v57, %v1084_v58  ;;  %v1128_v51 = vld [vmem:[#allocation10 + $0x6c0] sm:$0xff]  ;;  %v5877_v14 = vcombine.high %v1144_v6, %v1148_v7 }
 0x352   :  { %2563 = vmatprep.mubr.bf16.mxu0 %v7574_v33  ;;  %2645 = vmatprep.mubr.bf16.mxu1 %v7574_v33  ;;  %v1132_v52 = vld [vmem:[#allocation10 + $0x6e0] sm:$0xff] }
 0x353   :  { %2533 = vmatprep.subr.bf16.mxu0 %v5781_v28  ;;  %2615 = vmatprep.subr.bf16.mxu1 %v5783_v29  ;;  %v5830_v28 = vcombine.low %v1097_v15, %v1101_v16  ;;  %v5837_v29 = vcombine.high %v1104_v21, %v1108_v22  ;;  %v5861_v57 = vcombine.high %v1128_v51, %v1132_v52  ;;  %v1152_v16 = vld [vmem:[#allocation10 + $0x780] sm:$0xff] }
 0x355   :  { %2534 = vmatpush1.bf16.msra.mxu0 %v5780_v34  ;;  %2616 = vmatpush1.bf16.msra.mxu1 %v5782_v35  ;;  %v1113_v34 = vld [vmem:[#allocation10 + $0x648] sm:$0xff] }
 0x356   :  { %2535 = vmatprep.subr.bf16.mxu0 %v5789_v36  ;;  %2617 = vmatprep.subr.bf16.mxu1 %v5791_v37  ;;  %v1117_v35 = vld [vmem:[#allocation10 + $0x668] sm:$0xff]  ;;  %v5836_v36 = vcombine.low %v1104_v21, %v1108_v22  ;;  %v5838_v37 = vcombine.low %v1105_v23, %v1109_v24  ;;  %v493_v22 = vrot.slane %v7555_v2, %v7581_v13  ;;  %v918_v2 = vld [vmem:[#allocation10 + $0x30] sm:$0xff] }
 0x357   :  { %v5847_v39 = vcombine.high %v1113_v34, %v1117_v35 }
 0x359   :  { %2536 = vmatpush1.bf16.msra.mxu0 %v5788_v45  ;;  %2618 = vmatpush1.bf16.msra.mxu1 %v5790_v46  ;;  %v1121_v45 = vld [vmem:[#allocation10 + $0x688] sm:$0xff] }
 0x35a   :  { %2537 = vmatprep.subr.bf16.mxu0 %v5797_v47  ;;  %2619 = vmatprep.subr.bf16.mxu1 %v5799_v48  ;;  %v1125_v46 = vld [vmem:[#allocation10 + $0x6a8] sm:$0xff]  ;;  %v5844_v47 = vcombine.low %v1112_v31, %v1116_v32  ;;  %v5846_v48 = vcombine.low %v1113_v34, %v1117_v35  ;;  %v898_v34 = vadd.f32 %v7566_v8, %v493_v22  ;;  %v923_v8 = vld [vmem:[#allocation10 + $0x58] sm:$0xff] }
 0x35b   :  { %v5855_v50 = vcombine.high %v1121_v45, %v1125_v46  ;;  %v955_v22 = vld [vmem:[#allocation10 + $0x158] sm:$0xff] }
 0x35d   :  { %2538 = vmatpush1.bf16.msra.mxu0 %v5796_v53  ;;  %2620 = vmatpush1.bf16.msra.mxu1 %v5798_v54  ;;  %v1129_v53 = vld [vmem:[#allocation10 + $0x6c8] sm:$0xff] }
 0x35e   :  { %2539 = vmatprep.subr.bf16.mxu0 %v5805_v55  ;;  %2621 = vmatprep.subr.bf16.mxu1 %v5807_v56  ;;  %v1133_v54 = vld [vmem:[#allocation10 + $0x6e8] sm:$0xff]  ;;  %v5852_v55 = vcombine.low %v1120_v40, %v1124_v43  ;;  %v5854_v56 = vcombine.low %v1121_v45, %v1125_v46  ;;  %v906_v45 = vmax.f32 %v898_v34, 0.0  ;;  %v967_v34 = vld [vmem:[#allocation10 + $0x1b8] sm:$0xff] }
 0x35f   :  { %v5863_v58 = vcombine.high %v1129_v53, %v1133_v54 }
 0x361   :  { %2540 = vmatpush1.bf16.msra.mxu0 %v5804_v61  ;;  %2622 = vmatpush1.bf16.msra.mxu1 %v5806_v62  ;;  %v1137_v61 = vld [vmem:[#allocation10 + $0x708] sm:$0xff] }
 0x362   :  { %2541 = vmatprep.subr.bf16.mxu0 %v5813_v63  ;;  %2623 = vmatprep.subr.bf16.mxu1 %v5815_v1  ;;  %v1141_v62 = vld [vmem:[#allocation10 + $0x728] sm:$0xff]  ;;  %v5860_v63 = vcombine.low %v1128_v51, %v1132_v52  ;;  %v5862_v1 = vcombine.low %v1129_v53, %v1133_v54  ;;  %v7586_v52 = vpack.c.bf16 %v906_v45, %v906_v45 }
 0x363   :  { %v5871_v5 = vcombine.high %v1137_v61, %v1141_v62 }
 0x365   :  { %2542 = vmatpush1.bf16.msra.mxu0 %v5812_v9  ;;  %2624 = vmatpush1.bf16.msra.mxu1 %v5814_v10  ;;  %v1145_v9 = vld [vmem:[#allocation10 + $0x748] sm:$0xff] }
 0x366   :  { %2543 = vmatprep.subr.bf16.mxu0 %v5821_v11  ;;  %2625 = vmatprep.subr.bf16.mxu1 %v5823_v12  ;;  %v1149_v10 = vld [vmem:[#allocation10 + $0x768] sm:$0xff]  ;;  %v5868_v11 = vcombine.low %v1136_v59, %v1140_v60  ;;  %v5870_v12 = vcombine.low %v1137_v61, %v1141_v62  ;;  %v935_v59 = vld [vmem:[#allocation10 + $0xb8] sm:$0xff] }
 0x367   :  { %v5879_v15 = vcombine.high %v1145_v9, %v1149_v10  ;;  %v5878_v21 = vcombine.low %v1145_v9, %v1149_v10 }
 0x369   :  { %2544 = vmatpush1.bf16.msra.mxu0 %v5820_v17  ;;  %2626 = vmatpush1.bf16.msra.mxu1 %v5822_v18  ;;  %v1156_v17 = vld [vmem:[#allocation10 + $0x7a0] sm:$0xff]  ;;  %v1153_v18 = vld [vmem:[#allocation10 + $0x788] sm:$0xff] }
 0x36a   :  { %2545 = vmatprep.subr.bf16.mxu0 %v5829_v19  ;;  %2627 = vmatprep.subr.bf16.mxu1 %v5831_v20  ;;  %v1157_v19 = vld [vmem:[#allocation10 + $0x7a8] sm:$0xff]  ;;  %v5876_v20 = vcombine.low %v1144_v6, %v1148_v7  ;;  %v5885_v23 = vcombine.high %v1152_v16, %v1156_v17  ;;  %v5884_v31 = vcombine.low %v1152_v16, %v1156_v17  ;;  %v943_v6 = vld [vmem:[#allocation10 + $0xf8] sm:$0xff] }
 0x36b   :  { %v5887_v24 = vcombine.high %v1153_v18, %v1157_v19  ;;  %v5886_v32 = vcombine.low %v1153_v18, %v1157_v19 }
 0x36d   :  { %2546 = vmatpush1.bf16.msra.mxu0 %v5828_v27  ;;  %2628 = vmatpush1.bf16.msra.mxu1 %v5830_v28  ;;  %v1160_v27 = vld [vmem:[#allocation10 + $0x7c0] sm:$0xff] }
 0x36e   :  { %2547 = vmatprep.subr.bf16.mxu0 %v5837_v29  ;;  %2629 = vmatprep.subr.bf16.mxu1 %v5839_v30  ;;  %v1164_v28 = vld [vmem:[#allocation10 + $0x7e0] sm:$0xff]  ;;  %v1161_v29 = vld [vmem:[#allocation10 + $0x7c8] sm:$0xff] }
 0x36f   :  { %v1165_v30 = vld [vmem:[#allocation10 + $0x7e8] sm:$0xff]  ;;  %v5893_v35 = vcombine.high %v1160_v27, %v1164_v28  ;;  %v5892_v40 = vcombine.low %v1160_v27, %v1164_v28 }
 0x370   :  { %v5894_v43 = vcombine.low %v1161_v29, %v1165_v30 }
 0x371   :  { %2548 = vmatpush1.bf16.msra.mxu0 %v5836_v36  ;;  %2630 = vmatpush1.bf16.msra.mxu1 %v5838_v37  ;;  %v5895_v36 = vcombine.high %v1161_v29, %v1165_v30  ;;  %v914_v37 = vld [vmem:[#allocation10 + $0x10] sm:$0xff] }
 0x372   :  { %2549 = vmatprep.subr.bf16.mxu0 %v5845_v38  ;;  %2631 = vmatprep.subr.bf16.mxu1 %v5847_v39  ;;  %v915_v38 = vld [vmem:[#allocation10 + $0x18] sm:$0xff]  ;;  %v5649_v46 = vcombine.high %v914_v37, %v918_v2  ;;  %v5648_v51 = vcombine.low %v914_v37, %v918_v2  ;;  %v962_v30 = vld [vmem:[#allocation10 + $0x190] sm:$0xff] }
 0x373   :  { %v919_v39 = vld [vmem:[#allocation10 + $0x38] sm:$0xff] }
 0x374   :  { %v5650_v53 = vcombine.low %v915_v38, %v919_v39 }
 0x375   :  { %2550 = vmatpush1.bf16.msra.mxu0 %v5844_v47  ;;  %2632 = vmatpush1.bf16.msra.mxu1 %v5846_v48  ;;  %v5651_v47 = vcombine.high %v915_v38, %v919_v39  ;;  %v922_v48 = vld [vmem:[#allocation10 + $0x50] sm:$0xff] }
 0x376   :  { %2551 = vmatprep.subr.bf16.mxu0 %v5853_v49  ;;  %2633 = vmatprep.subr.bf16.mxu1 %v5855_v50  ;;  %v926_v49 = vld [vmem:[#allocation10 + $0x70] sm:$0xff]  ;;  %v927_v50 = vld [vmem:[#allocation10 + $0x78] sm:$0xff] }
 0x377   :  { %v5657_v54 = vcombine.high %v922_v48, %v926_v49  ;;  %v5656_v60 = vcombine.low %v922_v48, %v926_v49  ;;  %v5658_v61 = vcombine.low %v923_v8, %v927_v50  ;;  %v970_v38 = vld [vmem:[#allocation10 + $0x1d0] sm:$0xff] }
 0x378   :  { %v974_v39 = vld [vmem:[#allocation10 + $0x1f0] sm:$0xff] }
 0x379   :  { %2552 = vmatpush1.bf16.msra.mxu0 %v5852_v55  ;;  %2634 = vmatpush1.bf16.msra.mxu1 %v5854_v56  ;;  %v5659_v55 = vcombine.high %v923_v8, %v927_v50  ;;  %v930_v56 = vld [vmem:[#allocation10 + $0x90] sm:$0xff]  ;;  %v979_v50 = vld [vmem:[#allocation10 + $0x218] sm:$0xff] }
 0x37a   :  { %2553 = vmatprep.subr.bf16.mxu0 %v5861_v57  ;;  %2635 = vmatprep.subr.bf16.mxu1 %v5863_v58  ;;  %v934_v57 = vld [vmem:[#allocation10 + $0xb0] sm:$0xff]  ;;  %v931_v58 = vld [vmem:[#allocation10 + $0x98] sm:$0xff] }
 0x37b   :  { %v5665_v62 = vcombine.high %v930_v56, %v934_v57  ;;  %v5664_v7 = vcombine.low %v930_v56, %v934_v57  ;;  %v5666_v9 = vcombine.low %v931_v58, %v935_v59  ;;  %v978_v49 = vld [vmem:[#allocation10 + $0x210] sm:$0xff] }
 0x37c   :  { %v982_v8 = vld [vmem:[#allocation10 + $0x230] sm:$0xff] }
 0x37d   :  { %2554 = vmatpush1.bf16.msra.mxu0 %v5860_v63  ;;  %2636 = vmatpush1.bf16.msra.mxu1 %v5862_v1  ;;  %v5667_v63 = vcombine.high %v931_v58, %v935_v59  ;;  %v938_v1 = vld [vmem:[#allocation10 + $0xd0] sm:$0xff]  ;;  %v987_v59 = vld [vmem:[#allocation10 + $0x258] sm:$0xff] }
 0x37e   :  { %2555 = vmatprep.subr.bf16.mxu0 %v5869_v4  ;;  %2637 = vmatprep.subr.bf16.mxu1 %v5871_v5  ;;  %v942_v4 = vld [vmem:[#allocation10 + $0xf0] sm:$0xff]  ;;  %v939_v5 = vld [vmem:[#allocation10 + $0xd8] sm:$0xff] }
 0x37f   :  { %v5673_v10 = vcombine.high %v938_v1, %v942_v4  ;;  %v5672_v16 = vcombine.low %v938_v1, %v942_v4  ;;  %v5674_v17 = vcombine.low %v939_v5, %v943_v6  ;;  %v986_v57 = vld [vmem:[#allocation10 + $0x250] sm:$0xff] }
 0x380   :  { %v990_v58 = vld [vmem:[#allocation10 + $0x270] sm:$0xff] }
 0x381   :  { %2556 = vmatpush1.bf16.msra.mxu0 %v5868_v11  ;;  %2638 = vmatpush1.bf16.msra.mxu1 %v5870_v12  ;;  %v5675_v11 = vcombine.high %v939_v5, %v943_v6  ;;  %v946_v12 = vld [vmem:[#allocation10 + $0x110] sm:$0xff]  ;;  %v995_v6 = vld [vmem:[#allocation10 + $0x298] sm:$0xff] }
 0x382   :  { %2557 = vmatprep.subr.bf16.mxu0 %v5877_v14  ;;  %2639 = vmatprep.subr.bf16.mxu1 %v5879_v15  ;;  %v950_v14 = vld [vmem:[#allocation10 + $0x130] sm:$0xff]  ;;  %v951_v15 = vld [vmem:[#allocation10 + $0x138] sm:$0xff] }
 0x383   :  { %v5681_v18 = vcombine.high %v946_v12, %v950_v14  ;;  %v994_v4 = vld [vmem:[#allocation10 + $0x290] sm:$0xff] }
 0x384   :  { %v998_v5 = vld [vmem:[#allocation10 + $0x2b0] sm:$0xff] }
 0x385   :  { %2558 = vmatpush1.bf16.msra.mxu0 %v5876_v20  ;;  %2640 = vmatpush1.bf16.msra.mxu1 %v5878_v21  ;;  %v954_v20 = vld [vmem:[#allocation10 + $0x150] sm:$0xff] }
 0x386   :  { %2559 = vmatprep.subr.bf16.mxu0 %v5885_v23  ;;  %2641 = vmatprep.subr.bf16.mxu1 %v5887_v24  ;;  %v958_v21 = vld [vmem:[#allocation10 + $0x170] sm:$0xff]  ;;  %v959_v23 = vld [vmem:[#allocation10 + $0x178] sm:$0xff]  ;;  %v5680_v24 = vcombine.low %v946_v12, %v950_v14 }
 0x387   :  { %v5689_v28 = vcombine.high %v954_v20, %v958_v21  ;;  %v5691_v29 = vcombine.high %v955_v22, %v959_v23  ;;  %v1002_v14 = vld [vmem:[#allocation10 + $0x2d0] sm:$0xff] }
 0x389   :  { %2560 = vmatpush1.bf16.msra.mxu0 %v5884_v31  ;;  %2642 = vmatpush1.bf16.msra.mxu1 %v5886_v32  ;;  %v966_v31 = vld [vmem:[#allocation10 + $0x1b0] sm:$0xff]  ;;  %v963_v32 = vld [vmem:[#allocation10 + $0x198] sm:$0xff] }
 0x38a   :  { %2561 = vmatprep.subr.bf16.mxu0 %v5893_v35  ;;  %2643 = vmatprep.subr.bf16.mxu1 %v5895_v36  ;;  %v5688_v35 = vcombine.low %v954_v20, %v958_v21  ;;  %v5690_v36 = vcombine.low %v955_v22, %v959_v23  ;;  %v5697_v37 = vcombine.high %v962_v30, %v966_v31  ;;  %v1010_v21 = vld [vmem:[#allocation10 + $0x310] sm:$0xff]  ;;  %v1011_v23 = vld [vmem:[#allocation10 + $0x318] sm:$0xff] }
 0x38b   :  { %v5699_v2 = vcombine.high %v963_v32, %v967_v34  ;;  %v5696_v45 = vcombine.low %v962_v30, %v966_v31  ;;  %v1014_v22 = vld [vmem:[#allocation10 + $0x330] sm:$0xff] }
 0x38c   :  { %v1018_v31 = vld [vmem:[#allocation10 + $0x350] sm:$0xff] }
 0x38d   :  { %2562 = vmatpush1.bf16.msra.mxu0 %v5892_v40  ;;  %2644 = vmatpush1.bf16.msra.mxu1 %v5894_v43  ;;  %v971_v40 = vld [vmem:[#allocation10 + $0x1d8] sm:$0xff] }
 0x38e   :  { %2654 = vmatprep.subr.bf16.mxu0 %v5649_v46  ;;  %2736 = vmatprep.subr.bf16.mxu1 %v5651_v47  ;;  %v975_v43 = vld [vmem:[#allocation10 + $0x1f8] sm:$0xff]  ;;  %v5698_v46 = vcombine.low %v963_v32, %v967_v34  ;;  %v5705_v47 = vcombine.high %v970_v38, %v974_v39  ;;  %v1022_v32 = vld [vmem:[#allocation10 + $0x370] sm:$0xff] }
 0x38f   :  { %v5707_v48 = vcombine.high %v971_v40, %v975_v43  ;;  %v1019_v34 = vld [vmem:[#allocation10 + $0x358] sm:$0xff] }
 0x390   :  { %2564 = vmatmul.mubr.bf16.vlgmr.msra.gmra.mrb[4].mxu0 %v7586_v52  ;;  %2646 = vmatmul.mubr.bf16.vlgmr.msra.gmra.mrb[12].mxu1 %v7586_v52 }
 0x391   :  { %2655 = vmatpush1.bf16.msra.mxu0 %v5648_v51  ;;  %2686 = vmatprep.mubr.bf16.mxu0 %v7568_v25  ;;  %v983_v51 = vld [vmem:[#allocation10 + $0x238] sm:$0xff] }
 0x392   :  { %2737 = vmatpush1.bf16.msra.mxu1 %v5650_v53  ;;  %2768 = vmatprep.mubr.bf16.mxu1 %v7568_v25  ;;  %v947_v25 = vld [vmem:[#allocation10 + $0x118] sm:$0xff]  ;;  %v5704_v53 = vcombine.low %v970_v38, %v974_v39  ;;  %v5715_v56 = vcombine.high %v979_v50, %v983_v51  ;;  %v1026_v39 = vld [vmem:[#allocation10 + $0x390] sm:$0xff] }
 0x393   :  { %2656 = vmatprep.subr.bf16.mxu0 %v5657_v54  ;;  %2738 = vmatprep.subr.bf16.mxu1 %v5659_v55  ;;  %v5683_v19 = vcombine.high %v947_v25, %v951_v15  ;;  %v5682_v27 = vcombine.low %v947_v25, %v951_v15  ;;  %v5706_v54 = vcombine.low %v971_v40, %v975_v43  ;;  %v1006_v25 = vld [vmem:[#allocation10 + $0x2f0] sm:$0xff]  ;;  %v1003_v15 = vld [vmem:[#allocation10 + $0x2d8] sm:$0xff] }
 0x394   :  { %v5713_v55 = vcombine.high %v978_v49, %v982_v8  ;;  %v1030_v40 = vld [vmem:[#allocation10 + $0x3b0] sm:$0xff]  ;;  %v1027_v43 = vld [vmem:[#allocation10 + $0x398] sm:$0xff] }
 0x395   :  { %2657 = vmatpush1.bf16.msra.mxu0 %v5656_v60  ;;  %v991_v60 = vld [vmem:[#allocation10 + $0x278] sm:$0xff] }
 0x396   :  { %2739 = vmatpush1.bf16.msra.mxu1 %v5658_v61  ;;  %2658 = vmatprep.subr.bf16.mxu0 %v5665_v62  ;;  %v5712_v61 = vcombine.low %v978_v49, %v982_v8  ;;  %v5714_v62 = vcombine.low %v979_v50, %v983_v51  ;;  %v5723_v1 = vcombine.high %v987_v59, %v991_v60  ;;  %v1034_v8 = vld [vmem:[#allocation10 + $0x3d0] sm:$0xff]  ;;  %v1035_v51 = vld [vmem:[#allocation10 + $0x3d8] sm:$0xff] }
 0x397   :  { %2740 = vmatprep.subr.bf16.mxu1 %v5667_v63  ;;  %v5721_v63 = vcombine.high %v986_v57, %v990_v58  ;;  %v1038_v50 = vld [vmem:[#allocation10 + $0x3f0] sm:$0xff] }
 0x399   :  { %2659 = vmatpush1.bf16.msra.mxu0 %v5664_v7  ;;  %v999_v7 = vld [vmem:[#allocation10 + $0x2b8] sm:$0xff] }
 0x39a   :  { %2741 = vmatpush1.bf16.msra.mxu1 %v5666_v9  ;;  %2660 = vmatprep.subr.bf16.mxu0 %v5673_v10  ;;  %v5720_v9 = vcombine.low %v986_v57, %v990_v58  ;;  %v5722_v10 = vcombine.low %v987_v59, %v991_v60  ;;  %v5731_v12 = vcombine.high %v995_v6, %v999_v7  ;;  %v1042_v58 = vld [vmem:[#allocation10 + $0x410] sm:$0xff]  ;;  %v1043_v60 = vld [vmem:[#allocation10 + $0x418] sm:$0xff] }
 0x39b   :  { %2742 = vmatprep.subr.bf16.mxu1 %v5675_v11  ;;  %v5729_v11 = vcombine.high %v994_v4, %v998_v5  ;;  %v1046_v59 = vld [vmem:[#allocation10 + $0x430] sm:$0xff] }
 0x39d   :  { %2661 = vmatpush1.bf16.msra.mxu0 %v5672_v16  ;;  %v1007_v16 = vld [vmem:[#allocation10 + $0x2f8] sm:$0xff] }
 0x39e   :  { %2743 = vmatpush1.bf16.msra.mxu1 %v5674_v17  ;;  %2662 = vmatprep.subr.bf16.mxu0 %v5681_v18  ;;  %v5728_v17 = vcombine.low %v994_v4, %v998_v5  ;;  %v5730_v18 = vcombine.low %v995_v6, %v999_v7  ;;  %v5739_v20 = vcombine.high %v1003_v15, %v1007_v16  ;;  %v1050_v5 = vld [vmem:[#allocation10 + $0x450] sm:$0xff] }
 0x39f   :  { %2744 = vmatprep.subr.bf16.mxu1 %v5683_v19  ;;  %v5737_v19 = vcombine.high %v1002_v14, %v1006_v25  ;;  %v1054_v6 = vld [vmem:[#allocation10 + $0x470] sm:$0xff]  ;;  %v5776_v7 = vcombine.low %v1042_v58, %v1046_v59 }
 0x3a1   :  { %2663 = vmatpush1.bf16.msra.mxu0 %v5680_v24  ;;  %v1015_v24 = vld [vmem:[#allocation10 + $0x338] sm:$0xff] }
 0x3a2   :  { %2745 = vmatpush1.bf16.msra.mxu1 %v5682_v27  ;;  %2664 = vmatprep.subr.bf16.mxu0 %v5689_v28  ;;  %v5736_v27 = vcombine.low %v1002_v14, %v1006_v25  ;;  %v5738_v28 = vcombine.low %v1003_v15, %v1007_v16  ;;  %v5747_v30 = vcombine.high %v1011_v23, %v1015_v24  ;;  %v1058_v14 = vld [vmem:[#allocation10 + $0x490] sm:$0xff]  ;;  %v1059_v16 = vld [vmem:[#allocation10 + $0x498] sm:$0xff] }
 0x3a3   :  { %2746 = vmatprep.subr.bf16.mxu1 %v5691_v29  ;;  %v5745_v29 = vcombine.high %v1010_v21, %v1014_v22  ;;  %v1062_v25 = vld [vmem:[#allocation10 + $0x4b0] sm:$0xff] }
 0x3a5   :  { %2665 = vmatpush1.bf16.msra.mxu0 %v5688_v35  ;;  %v1023_v35 = vld [vmem:[#allocation10 + $0x378] sm:$0xff] }
 0x3a6   :  { %2747 = vmatpush1.bf16.msra.mxu1 %v5690_v36  ;;  %2666 = vmatprep.subr.bf16.mxu0 %v5697_v37  ;;  %v5744_v36 = vcombine.low %v1010_v21, %v1014_v22  ;;  %v5746_v37 = vcombine.low %v1011_v23, %v1015_v24  ;;  %v5755_v38 = vcombine.high %v1019_v34, %v1023_v35  ;;  %v1066_v22 = vld [vmem:[#allocation10 + $0x4d0] sm:$0xff]  ;;  %v1067_v24 = vld [vmem:[#allocation10 + $0x4d8] sm:$0xff] }
 0x3a7   :  { %2748 = vmatprep.subr.bf16.mxu1 %v5699_v2  ;;  %v5753_v2 = vcombine.high %v1018_v31, %v1022_v32  ;;  %v1070_v23 = vld [vmem:[#allocation10 + $0x4f0] sm:$0xff] }
 0x3a9   :  { %2667 = vmatpush1.bf16.msra.mxu0 %v5696_v45  ;;  %v1031_v45 = vld [vmem:[#allocation10 + $0x3b8] sm:$0xff] }
 0x3aa   :  { %2749 = vmatpush1.bf16.msra.mxu1 %v5698_v46  ;;  %2668 = vmatprep.subr.bf16.mxu0 %v5705_v47  ;;  %v5752_v46 = vcombine.low %v1018_v31, %v1022_v32  ;;  %v5754_v47 = vcombine.low %v1019_v34, %v1023_v35  ;;  %v5763_v49 = vcombine.high %v1027_v43, %v1031_v45  ;;  %v1074_v31 = vld [vmem:[#allocation10 + $0x510] sm:$0xff]  ;;  %v1075_v34 = vld [vmem:[#allocation10 + $0x518] sm:$0xff] }
 0x3ab   :  { %2750 = vmatprep.subr.bf16.mxu1 %v5707_v48  ;;  %v5761_v48 = vcombine.high %v1026_v39, %v1030_v40  ;;  %v1078_v32 = vld [vmem:[#allocation10 + $0x530] sm:$0xff]  ;;  %v1079_v35 = vld [vmem:[#allocation10 + $0x538] sm:$0xff] }
 0x3ad   :  { %2669 = vmatpush1.bf16.msra.mxu0 %v5704_v53  ;;  %v1039_v53 = vld [vmem:[#allocation10 + $0x3f8] sm:$0xff] }
 0x3ae   :  { %2751 = vmatpush1.bf16.msra.mxu1 %v5706_v54  ;;  %2670 = vmatprep.subr.bf16.mxu0 %v5713_v55  ;;  %v5760_v54 = vcombine.low %v1026_v39, %v1030_v40  ;;  %v5762_v55 = vcombine.low %v1027_v43, %v1031_v45  ;;  %v5771_v57 = vcombine.high %v1035_v51, %v1039_v53  ;;  %v1086_v39 = vld [vmem:[#allocation10 + $0x570] sm:$0xff]  ;;  %v1083_v40 = vld [vmem:[#allocation10 + $0x558] sm:$0xff] }
 0x3af   :  { %2752 = vmatprep.subr.bf16.mxu1 %v5715_v56  ;;  %v5769_v56 = vcombine.high %v1034_v8, %v1038_v50  ;;  %v1087_v43 = vld [vmem:[#allocation10 + $0x578] sm:$0xff]  ;;  %v5808_v45 = vcombine.low %v1074_v31, %v1078_v32 }
 0x3b1   :  { %2671 = vmatpush1.bf16.msra.mxu0 %v5712_v61  ;;  %v1047_v61 = vld [vmem:[#allocation10 + $0x438] sm:$0xff] }
 0x3b2   :  { %2753 = vmatpush1.bf16.msra.mxu1 %v5714_v62  ;;  %2672 = vmatprep.subr.bf16.mxu0 %v5721_v63  ;;  %v5768_v62 = vcombine.low %v1034_v8, %v1038_v50  ;;  %v5770_v63 = vcombine.low %v1035_v51, %v1039_v53  ;;  %v5779_v4 = vcombine.high %v1043_v60, %v1047_v61  ;;  %v1094_v8 = vld [vmem:[#allocation10 + $0x5b0] sm:$0xff]  ;;  %v1091_v50 = vld [vmem:[#allocation10 + $0x598] sm:$0xff] }
 0x3b3   :  { %2754 = vmatprep.subr.bf16.mxu1 %v5723_v1  ;;  %v5777_v1 = vcombine.high %v1042_v58, %v1046_v59  ;;  %v1095_v51 = vld [vmem:[#allocation10 + $0x5b8] sm:$0xff]  ;;  %v1102_v58 = vld [vmem:[#allocation10 + $0x5f0] sm:$0xff] }
 0x3b4   :  { %v1099_v59 = vld [vmem:[#allocation10 + $0x5d8] sm:$0xff] }
 0x3b5   :  { %2673 = vmatpush1.bf16.msra.mxu0 %v5720_v9  ;;  %v1051_v9 = vld [vmem:[#allocation10 + $0x458] sm:$0xff] }
 0x3b6   :  { %2755 = vmatpush1.bf16.msra.mxu1 %v5722_v10  ;;  %2674 = vmatprep.subr.bf16.mxu0 %v5729_v11  ;;  %v1055_v10 = vld [vmem:[#allocation10 + $0x478] sm:$0xff]  ;;  %v5778_v11 = vcombine.low %v1043_v60, %v1047_v61 }
 0x3b7   :  { %2756 = vmatprep.subr.bf16.mxu1 %v5731_v12  ;;  %v5785_v12 = vcombine.high %v1050_v5, %v1054_v6  ;;  %v5787_v15 = vcombine.high %v1051_v9, %v1055_v10  ;;  %v1103_v60 = vld [vmem:[#allocation10 + $0x5f8] sm:$0xff] }
 0x3b9   :  { %2675 = vmatpush1.bf16.msra.mxu0 %v5728_v17  ;;  %v1063_v17 = vld [vmem:[#allocation10 + $0x4b8] sm:$0xff] }
 0x3ba   :  { %2757 = vmatpush1.bf16.msra.mxu1 %v5730_v18  ;;  %2676 = vmatprep.subr.bf16.mxu0 %v5737_v19  ;;  %v5784_v18 = vcombine.low %v1050_v5, %v1054_v6  ;;  %v5786_v19 = vcombine.low %v1051_v9, %v1055_v10  ;;  %v5795_v21 = vcombine.high %v1059_v16, %v1063_v17  ;;  %v1110_v5 = vld [vmem:[#allocation10 + $0x630] sm:$0xff]  ;;  %v1107_v6 = vld [vmem:[#allocation10 + $0x618] sm:$0xff] }
 0x3bb   :  { %2758 = vmatprep.subr.bf16.mxu1 %v5739_v20  ;;  %v5793_v20 = vcombine.high %v1058_v14, %v1062_v25  ;;  %v5834_v10 = vcombine.low %v1099_v59, %v1103_v60 }
 0x3bd   :  { %2677 = vmatpush1.bf16.msra.mxu0 %v5736_v27  ;;  %v1071_v27 = vld [vmem:[#allocation10 + $0x4f8] sm:$0xff] }
 0x3be   :  { %2759 = vmatpush1.bf16.msra.mxu1 %v5738_v28  ;;  %2678 = vmatprep.subr.bf16.mxu0 %v5745_v29  ;;  %v5792_v28 = vcombine.low %v1058_v14, %v1062_v25  ;;  %v5801_v29 = vcombine.high %v1066_v22, %v1070_v23  ;;  %v1114_v14 = vld [vmem:[#allocation10 + $0x650] sm:$0xff] }
 0x3bf   :  { %2760 = vmatprep.subr.bf16.mxu1 %v5747_v30  ;;  %v5803_v30 = vcombine.high %v1067_v24, %v1071_v27  ;;  %v1118_v25 = vld [vmem:[#allocation10 + $0x670] sm:$0xff] }
 0x3c1   :  { %2679 = vmatpush1.bf16.msra.mxu0 %v5744_v36  ;;  %v5802_v36 = vcombine.low %v1067_v24, %v1071_v27  ;;  %v1127_v24 = vld [vmem:[#allocation10 + $0x6b8] sm:$0xff]  ;;  %v5848_v27 = vcombine.low %v1114_v14, %v1118_v25 }
 0x3c2   :  { %2761 = vmatpush1.bf16.msra.mxu1 %v5746_v37  ;;  %2680 = vmatprep.subr.bf16.mxu0 %v5753_v2  ;;  %v5809_v37 = vcombine.high %v1074_v31, %v1078_v32  ;;  %v5811_v2 = vcombine.high %v1075_v34, %v1079_v35  ;;  %v1134_v31 = vld [vmem:[#allocation10 + $0x6f0] sm:$0xff]  ;;  %v1131_v32 = vld [vmem:[#allocation10 + $0x6d8] sm:$0xff] }
 0x3c3   :  { %2762 = vmatprep.subr.bf16.mxu1 %v5755_v38  ;;  %v1082_v38 = vld [vmem:[#allocation10 + $0x550] sm:$0xff] }
 0x3c4   :  { %v5816_v53 = vcombine.low %v1082_v38, %v1086_v39 }
 0x3c5   :  { %2681 = vmatpush1.bf16.msra.mxu0 %v5752_v46  ;;  %v5810_v46 = vcombine.low %v1075_v34, %v1079_v35  ;;  %v1135_v34 = vld [vmem:[#allocation10 + $0x6f8] sm:$0xff] }
 0x3c6   :  { %2763 = vmatpush1.bf16.msra.mxu1 %v5754_v47  ;;  %2682 = vmatprep.subr.bf16.mxu0 %v5761_v48  ;;  %v5817_v47 = vcombine.high %v1082_v38, %v1086_v39  ;;  %v5819_v48 = vcombine.high %v1083_v40, %v1087_v43  ;;  %v1142_v38 = vld [vmem:[#allocation10 + $0x730] sm:$0xff]  ;;  %v1139_v39 = vld [vmem:[#allocation10 + $0x718] sm:$0xff] }
 0x3c7   :  { %2764 = vmatprep.subr.bf16.mxu1 %v5763_v49  ;;  %v1090_v49 = vld [vmem:[#allocation10 + $0x590] sm:$0xff] }
 0x3c8   :  { %v5824_v61 = vcombine.low %v1090_v49, %v1094_v8 }
 0x3c9   :  { %2683 = vmatpush1.bf16.msra.mxu0 %v5760_v54  ;;  %v5818_v54 = vcombine.low %v1083_v40, %v1087_v43  ;;  %v1143_v40 = vld [vmem:[#allocation10 + $0x738] sm:$0xff] }
 0x3ca   :  { %2765 = vmatpush1.bf16.msra.mxu1 %v5762_v55  ;;  %2684 = vmatprep.subr.bf16.mxu0 %v5769_v56  ;;  %v5825_v55 = vcombine.high %v1090_v49, %v1094_v8  ;;  %v5827_v56 = vcombine.high %v1091_v50, %v1095_v51  ;;  %v1150_v49 = vld [vmem:[#allocation10 + $0x770] sm:$0xff]  ;;  %v1147_v8 = vld [vmem:[#allocation10 + $0x758] sm:$0xff] }
 0x3cb   :  { %2766 = vmatprep.subr.bf16.mxu1 %v5771_v57  ;;  %v1098_v57 = vld [vmem:[#allocation10 + $0x5d0] sm:$0xff] }
 0x3cc   :  { %v5832_v9 = vcombine.low %v1098_v57, %v1102_v58 }
 0x3cd   :  { %2685 = vmatpush1.bf16.msra.mxu0 %v5768_v62  ;;  %v5826_v62 = vcombine.low %v1091_v50, %v1095_v51  ;;  %v1151_v50 = vld [vmem:[#allocation10 + $0x778] sm:$0xff] }
 0x3ce   :  { %2767 = vmatpush1.bf16.msra.mxu1 %v5770_v63  ;;  %2695 = vmatprep.subr.bf16.mxu0 %v5777_v1  ;;  %v5833_v63 = vcombine.high %v1098_v57, %v1102_v58  ;;  %v5835_v1 = vcombine.high %v1099_v59, %v1103_v60  ;;  %v1158_v57 = vld [vmem:[#allocation10 + $0x7b0] sm:$0xff]  ;;  %v1155_v58 = vld [vmem:[#allocation10 + $0x798] sm:$0xff] }
 0x3cf   :  { %2777 = vmatprep.subr.bf16.mxu1 %v5779_v4  ;;  %v1106_v4 = vld [vmem:[#allocation10 + $0x610] sm:$0xff]  ;;  %v1159_v59 = vld [vmem:[#allocation10 + $0x7b8] sm:$0xff] }
 0x3d0   :  { %2687 = vmatmul.mubr.bf16.vlgmr.msra.gmra.mrb[8].mxu0 %v7570_v26 }
 0x3d1   :  { %2769 = vmatmul.mubr.bf16.vlgmr.msra.gmra.mrb[16].mxu1 %v7570_v26  ;;  %2696 = vmatpush1.bf16.msra.mxu0 %v5776_v7  ;;  %v5794_v26 = vcombine.low %v1059_v16, %v1063_v17  ;;  %v1111_v7 = vld [vmem:[#allocation10 + $0x638] sm:$0xff]  ;;  %v5840_v17 = vcombine.low %v1106_v4, %v1110_v5 }
 0x3d2   :  { %2727 = vmatprep.mubr.bf16.mxu0 %v7574_v33  ;;  %2778 = vmatpush1.bf16.msra.mxu1 %v5778_v11  ;;  %v5841_v11 = vcombine.high %v1106_v4, %v1110_v5  ;;  %v1119_v16 = vld [vmem:[#allocation10 + $0x678] sm:$0xff]  ;;  %v1166_v4 = vld [vmem:[#allocation10 + $0x7f0] sm:$0xff] }
 0x3d3   :  { %2809 = vmatprep.mubr.bf16.mxu1 %v7574_v33  ;;  %2697 = vmatprep.subr.bf16.mxu0 %v5785_v12  ;;  %v5800_v33 = vcombine.low %v1066_v22, %v1070_v23  ;;  %v5843_v12 = vcombine.high %v1107_v6, %v1111_v7  ;;  %v1126_v22 = vld [vmem:[#allocation10 + $0x6b0] sm:$0xff]  ;;  %v1123_v23 = vld [vmem:[#allocation10 + $0x698] sm:$0xff] }
 0x3d4   :  { %2779 = vmatprep.subr.bf16.mxu1 %v5787_v15  ;;  %v1115_v15 = vld [vmem:[#allocation10 + $0x658] sm:$0xff] }
 0x3d5   :  { %2698 = vmatpush1.bf16.msra.mxu0 %v5784_v18  ;;  %v5842_v18 = vcombine.low %v1107_v6, %v1111_v7  ;;  %v1163_v5 = vld [vmem:[#allocation10 + $0x7d8] sm:$0xff] }
 0x3d6   :  { %2780 = vmatpush1.bf16.msra.mxu1 %v5786_v19  ;;  %2699 = vmatprep.subr.bf16.mxu0 %v5793_v20  ;;  %v5849_v19 = vcombine.high %v1114_v14, %v1118_v25  ;;  %v5851_v20 = vcombine.high %v1115_v15, %v1119_v16  ;;  %v1167_v6 = vld [vmem:[#allocation10 + $0x7f8] sm:$0xff]  ;;  %v6529_v25 = vld [vmem:[#allocation11 + $0x4] ss:$16 sps:$4 sm:$0xff]  }
 0x3d7   :  { %2781 = vmatprep.subr.bf16.mxu1 %v5795_v21  ;;  %v1122_v21 = vld [vmem:[#allocation10 + $0x690] sm:$0xff]  ;;  %v5898_v14 = vcombine.low %v1163_v5, %v1167_v6 }
 0x3d8   :  { %v5856_v35 = vcombine.low %v1122_v21, %v1126_v22 }
 0x3d9   :  { %2700 = vmatpush1.bf16.msra.mxu0 %v5792_v28  ;;  %v5850_v28 = vcombine.low %v1115_v15, %v1119_v16  ;;  %v6532_v15 = vld [vmem:[#allocation11 + $0xc] ss:$16 sps:$4 sm:$0xff]   ;;  %v6527_v16 = vld [vmem:[#allocation11] ss:$16 sps:$4 sm:$0xff]  }
 0x3da   :  { %2782 = vmatpush1.bf16.msra.mxu1 %v5794_v26  ;;  %2701 = vmatprep.subr.bf16.mxu0 %v5801_v29  ;;  %v5857_v26 = vcombine.high %v1122_v21, %v1126_v22  ;;  %v5859_v29 = vcombine.high %v1123_v23, %v1127_v24  ;;  %v6536_v21 = vld [vmem:[#allocation11 + $0x28] ss:$16 sps:$4 sm:$0xff]   ;;  %v6541_v22 = vld [vmem:[#allocation11 + $0x44] ss:$16 sps:$4 sm:$0xff]  }
 0x3db   :  { %2783 = vmatprep.subr.bf16.mxu1 %v5803_v30  ;;  %v1130_v30 = vld [vmem:[#allocation10 + $0x6d0] sm:$0xff] }
 0x3dc   :  { %v5864_v43 = vcombine.low %v1130_v30, %v1134_v31 }
 0x3dd   :  { %2702 = vmatpush1.bf16.msra.mxu0 %v5800_v33  ;;  %v5858_v33 = vcombine.low %v1123_v23, %v1127_v24  ;;  %v6544_v23 = vld [vmem:[#allocation11 + $0x4c] ss:$16 sps:$4 sm:$0xff]   ;;  %v6539_v24 = vld [vmem:[#allocation11 + $0x40] ss:$16 sps:$4 sm:$0xff]  }
 0x3de   :  { %2784 = vmatpush1.bf16.msra.mxu1 %v5802_v36  ;;  %2703 = vmatprep.subr.bf16.mxu0 %v5809_v37  ;;  %v5865_v36 = vcombine.high %v1130_v30, %v1134_v31  ;;  %v5867_v37 = vcombine.high %v1131_v32, %v1135_v34  ;;  %v6553_v30 = vld [vmem:[#allocation11 + $0x84] ss:$16 sps:$4 sm:$0xff]   ;;  %v6556_v31 = vld [vmem:[#allocation11 + $0x8c] ss:$16 sps:$4 sm:$0xff]  }
 0x3df   :  { %2785 = vmatprep.subr.bf16.mxu1 %v5811_v2  ;;  %v1138_v2 = vld [vmem:[#allocation10 + $0x710] sm:$0xff] }
 0x3e0   :  { %v5872_v51 = vcombine.low %v1138_v2, %v1142_v38 }
 0x3e1   :  { %2704 = vmatpush1.bf16.msra.mxu0 %v5808_v45  ;;  %v5866_v45 = vcombine.low %v1131_v32, %v1135_v34  ;;  %v6551_v32 = vld [vmem:[#allocation11 + $0x80] ss:$16 sps:$4 sm:$0xff]   ;;  %v6554_v34 = vld [vmem:[#allocation11 + $0x88] ss:$16 sps:$4 sm:$0xff]  }
 0x3e2   :  { %2786 = vmatpush1.bf16.msra.mxu1 %v5810_v46  ;;  %2705 = vmatprep.subr.bf16.mxu0 %v5817_v47  ;;  %v5873_v46 = vcombine.high %v1138_v2, %v1142_v38  ;;  %v5875_v47 = vcombine.high %v1139_v39, %v1143_v40  ;;  %v6565_v2 = vld [vmem:[#allocation11 + $0xc4] ss:$16 sps:$4 sm:$0xff]   ;;  %v6568_v38 = vld [vmem:[#allocation11 + $0xcc] ss:$16 sps:$4 sm:$0xff]  }
 0x3e3   :  { %2787 = vmatprep.subr.bf16.mxu1 %v5819_v48  ;;  %v1146_v48 = vld [vmem:[#allocation10 + $0x750] sm:$0xff] }
 0x3e4   :  { %v5880_v60 = vcombine.low %v1146_v48, %v1150_v49 }
 0x3e5   :  { %2706 = vmatpush1.bf16.msra.mxu0 %v5816_v53  ;;  %v5874_v53 = vcombine.low %v1139_v39, %v1143_v40  ;;  %v6563_v39 = vld [vmem:[#allocation11 + $0xc0] ss:$16 sps:$4 sm:$0xff]   ;;  %v6566_v40 = vld [vmem:[#allocation11 + $0xc8] ss:$16 sps:$4 sm:$0xff]  }
 0x3e6   :  { %2788 = vmatpush1.bf16.msra.mxu1 %v5818_v54  ;;  %2707 = vmatprep.subr.bf16.mxu0 %v5825_v55  ;;  %v5881_v54 = vcombine.high %v1146_v48, %v1150_v49  ;;  %v5883_v55 = vcombine.high %v1147_v8, %v1151_v50  ;;  %v6577_v48 = vld [vmem:[#allocation11 + $0x104] ss:$16 sps:$4 sm:$0xff]   ;;  %v6580_v49 = vld [vmem:[#allocation11 + $0x10c] ss:$16 sps:$4 sm:$0xff]  }
 0x3e7   :  { %2789 = vmatprep.subr.bf16.mxu1 %v5827_v56  ;;  %v1154_v56 = vld [vmem:[#allocation10 + $0x790] sm:$0xff] }
 0x3e8   :  { %v5888_v7 = vcombine.low %v1154_v56, %v1158_v57 }
 0x3e9   :  { %2708 = vmatpush1.bf16.msra.mxu0 %v5824_v61  ;;  %v5882_v61 = vcombine.low %v1147_v8, %v1151_v50  ;;  %v6575_v8 = vld [vmem:[#allocation11 + $0x100] ss:$16 sps:$4 sm:$0xff]   ;;  %v6578_v50 = vld [vmem:[#allocation11 + $0x108] ss:$16 sps:$4 sm:$0xff]  }
 0x3ea   :  { %2790 = vmatpush1.bf16.msra.mxu1 %v5826_v62  ;;  %2709 = vmatprep.subr.bf16.mxu0 %v5833_v63  ;;  %v5889_v62 = vcombine.high %v1154_v56, %v1158_v57  ;;  %v5891_v63 = vcombine.high %v1155_v58, %v1159_v59  ;;  %v6589_v56 = vld [vmem:[#allocation11 + $0x144] ss:$16 sps:$4 sm:$0xff]   ;;  %v6592_v57 = vld [vmem:[#allocation11 + $0x14c] ss:$16 sps:$4 sm:$0xff]  }
 0x3eb   :  { %2791 = vmatprep.subr.bf16.mxu1 %v5835_v1  ;;  %v1162_v1 = vld [vmem:[#allocation10 + $0x7d0] sm:$0xff] }
 0x3ed   :  { %2710 = vmatpush1.bf16.msra.mxu0 %v5832_v9  ;;  %v5890_v9 = vcombine.low %v1155_v58, %v1159_v59  ;;  %v6587_v58 = vld [vmem:[#allocation11 + $0x140] ss:$16 sps:$4 sm:$0xff]   ;;  %v6590_v59 = vld [vmem:[#allocation11 + $0x148] ss:$16 sps:$4 sm:$0xff]  }
 0x3ee   :  { %2792 = vmatpush1.bf16.msra.mxu1 %v5834_v10  ;;  %2711 = vmatprep.subr.bf16.mxu0 %v5841_v11  ;;  %v5897_v10 = vcombine.high %v1162_v1, %v1166_v4  ;;  %v5899_v11 = vcombine.high %v1163_v5, %v1167_v6  ;;  %v6599_v5 = vld [vmem:[#allocation11 + $0x180] ss:$16 sps:$4 sm:$0xff]   ;;  %v6602_v6 = vld [vmem:[#allocation11 + $0x188] ss:$16 sps:$4 sm:$0xff]  }
 0x3ef   :  { %2793 = vmatprep.subr.bf16.mxu1 %v5843_v12  ;;  %v5896_v12 = vcombine.low %v1162_v1, %v1166_v4  ;;  %v6601_v1 = vld [vmem:[#allocation11 + $0x184] ss:$16 sps:$4 sm:$0xff]   ;;  %v6604_v4 = vld [vmem:[#allocation11 + $0x18c] ss:$16 sps:$4 sm:$0xff]  }
 0x3f1   :  { %2712 = vmatpush1.bf16.msra.mxu0 %v5840_v17  ;;  %v6530_v17 = vld [vmem:[#allocation11 + $0x8] ss:$16 sps:$4 sm:$0xff]  }
 0x3f2   :  { %2794 = vmatpush1.bf16.msra.mxu1 %v5842_v18  ;;  %2713 = vmatprep.subr.bf16.mxu0 %v5849_v19  ;;  %v6535_v18 = vld [vmem:[#allocation11 + $0x24] ss:$16 sps:$4 sm:$0xff]   ;;  %v6538_v19 = vld [vmem:[#allocation11 + $0x2c] ss:$16 sps:$4 sm:$0xff]  }
 0x3f3   :  { %2795 = vmatprep.subr.bf16.mxu1 %v5851_v20  ;;  %v6533_v20 = vld [vmem:[#allocation11 + $0x20] ss:$16 sps:$4 sm:$0xff]  }
 0x3f5   :  { %2714 = vmatpush1.bf16.msra.mxu0 %v5848_v27  ;;  %v6542_v27 = vld [vmem:[#allocation11 + $0x48] ss:$16 sps:$4 sm:$0xff]  }
 0x3f6   :  { %2796 = vmatpush1.bf16.msra.mxu1 %v5850_v28  ;;  %2715 = vmatprep.subr.bf16.mxu0 %v5857_v26  ;;  %v6547_v28 = vld [vmem:[#allocation11 + $0x64] ss:$16 sps:$4 sm:$0xff]   ;;  %v6550_v26 = vld [vmem:[#allocation11 + $0x6c] ss:$16 sps:$4 sm:$0xff]  }
 0x3f7   :  { %2797 = vmatprep.subr.bf16.mxu1 %v5859_v29  ;;  %v6545_v29 = vld [vmem:[#allocation11 + $0x60] ss:$16 sps:$4 sm:$0xff]  }
 0x3f9   :  { %2716 = vmatpush1.bf16.msra.mxu0 %v5856_v35  ;;  %v6559_v35 = vld [vmem:[#allocation11 + $0xa4] ss:$16 sps:$4 sm:$0xff]  }
 0x3fa   :  { %2798 = vmatpush1.bf16.msra.mxu1 %v5858_v33  ;;  %2717 = vmatprep.subr.bf16.mxu0 %v5865_v36  ;;  %v6562_v33 = vld [vmem:[#allocation11 + $0xac] ss:$16 sps:$4 sm:$0xff]   ;;  %v6557_v36 = vld [vmem:[#allocation11 + $0xa0] ss:$16 sps:$4 sm:$0xff]  }
 0x3fb   :  { %2799 = vmatprep.subr.bf16.mxu1 %v5867_v37  ;;  %v6560_v37 = vld [vmem:[#allocation11 + $0xa8] ss:$16 sps:$4 sm:$0xff]  }
 0x3fd   :  { %2718 = vmatpush1.bf16.msra.mxu0 %v5864_v43  ;;  %v6571_v43 = vld [vmem:[#allocation11 + $0xe4] ss:$16 sps:$4 sm:$0xff]  }
 0x3fe   :  { %2800 = vmatpush1.bf16.msra.mxu1 %v5866_v45  ;;  %2719 = vmatprep.subr.bf16.mxu0 %v5873_v46  ;;  %v6574_v45 = vld [vmem:[#allocation11 + $0xec] ss:$16 sps:$4 sm:$0xff]   ;;  %v6569_v46 = vld [vmem:[#allocation11 + $0xe0] ss:$16 sps:$4 sm:$0xff]  }
 0x3ff   :  { %2801 = vmatprep.subr.bf16.mxu1 %v5875_v47  ;;  %v6572_v47 = vld [vmem:[#allocation11 + $0xe8] ss:$16 sps:$4 sm:$0xff]  }
 0x401   :  { %2720 = vmatpush1.bf16.msra.mxu0 %v5872_v51  ;;  %v6583_v51 = vld [vmem:[#allocation11 + $0x124] ss:$16 sps:$4 sm:$0xff]  }
 0x402   :  { %2802 = vmatpush1.bf16.msra.mxu1 %v5874_v53  ;;  %2721 = vmatprep.subr.bf16.mxu0 %v5881_v54  ;;  %v6586_v53 = vld [vmem:[#allocation11 + $0x12c] ss:$16 sps:$4 sm:$0xff]   ;;  %v6581_v54 = vld [vmem:[#allocation11 + $0x120] ss:$16 sps:$4 sm:$0xff]  }
 0x403   :  { %2803 = vmatprep.subr.bf16.mxu1 %v5883_v55  ;;  %v6584_v55 = vld [vmem:[#allocation11 + $0x128] ss:$16 sps:$4 sm:$0xff]  }
 0x405   :  { %2722 = vmatpush1.bf16.msra.mxu0 %v5880_v60  ;;  %v6595_v60 = vld [vmem:[#allocation11 + $0x164] ss:$16 sps:$4 sm:$0xff]  }
 0x406   :  { %2804 = vmatpush1.bf16.msra.mxu1 %v5882_v61  ;;  %2723 = vmatprep.subr.bf16.mxu0 %v5889_v62  ;;  %v6598_v61 = vld [vmem:[#allocation11 + $0x16c] ss:$16 sps:$4 sm:$0xff]   ;;  %v6593_v62 = vld [vmem:[#allocation11 + $0x160] ss:$16 sps:$4 sm:$0xff]  }
 0x407   :  { %2805 = vmatprep.subr.bf16.mxu1 %v5891_v63  ;;  %v6596_v63 = vld [vmem:[#allocation11 + $0x168] ss:$16 sps:$4 sm:$0xff]  }
 0x409   :  { %2724 = vmatpush1.bf16.msra.mxu0 %v5888_v7  ;;  %v6607_v7 = vld [vmem:[#allocation11 + $0x1a4] ss:$16 sps:$4 sm:$0xff]  }
 0x40a   :  { %2806 = vmatpush1.bf16.msra.mxu1 %v5890_v9  ;;  %2725 = vmatprep.subr.bf16.mxu0 %v5897_v10  ;;  %v6610_v9 = vld [vmem:[#allocation11 + $0x1ac] ss:$16 sps:$4 sm:$0xff]   ;;  %v6605_v10 = vld [vmem:[#allocation11 + $0x1a0] ss:$16 sps:$4 sm:$0xff]  }
 0x40b   :  { %2807 = vmatprep.subr.bf16.mxu1 %v5899_v11  ;;  %v6608_v11 = vld [vmem:[#allocation11 + $0x1a8] ss:$16 sps:$4 sm:$0xff]  }
 0x40d   :  { %2726 = vmatpush1.bf16.msra.mxu0 %v5896_v12  ;;  %v6613_v12 = vld [vmem:[#allocation11 + $0x1c4] ss:$16 sps:$4 sm:$0xff]  }
 0x40e   :  { %2808 = vmatpush1.bf16.msra.mxu1 %v5898_v14  ;;  %4412 = vmatprep.subr.bf16.mxu0 %v6529_v25  ;;  %v6616_v14 = vld [vmem:[#allocation11 + $0x1cc] ss:$16 sps:$4 sm:$0xff]   ;;  %v6611_v25 = vld [vmem:[#allocation11 + $0x1c0] ss:$16 sps:$4 sm:$0xff]  }
 0x40f   :  { %4576 = vmatprep.subr.bf16.mxu1 %v6532_v15  ;;  %v6614_v15 = vld [vmem:[#allocation11 + $0x1c8] ss:$16 sps:$4 sm:$0xff]  }
 0x410   :  { %2728 = vmatmul.mubr.bf16.vlgmr.msra.gmra.mrb[8].mxu0 %v7586_v52 }
 0x411   :  { %2810 = vmatmul.mubr.bf16.vlgmr.msra.gmra.mrb[16].mxu1 %v7586_v52  ;;  %4413 = vmatpush1.bf16.msra.mxu0 %v6527_v16  ;;  %v6548_v52 = vld [vmem:[#allocation11 + $0x68] ss:$16 sps:$4 sm:$0xff]   ;;  %v6619_v16 = vld [vmem:[#allocation11 + $0x1e4] ss:$16 sps:$4 sm:$0xff]  }
 0x412   :  { %4577 = vmatpush1.bf16.msra.mxu1 %v6530_v17  ;;  %4414 = vmatprep.subr.bf16.mxu0 %v6535_v18  ;;  %v6622_v17 = vld [vmem:[#allocation11 + $0x1ec] ss:$16 sps:$4 sm:$0xff]   ;;  %v6617_v18 = vld [vmem:[#allocation11 + $0x1e0] ss:$16 sps:$4 sm:$0xff]  }
 0x413   :  { %4578 = vmatprep.subr.bf16.mxu1 %v6538_v19  ;;  %v6620_v19 = vld [vmem:[#allocation11 + $0x1e8] ss:$16 sps:$4 sm:$0xff]  }
 0x415   :  { %4415 = vmatpush1.bf16.msra.mxu0 %v6533_v20  ;;  %v6625_v20 = vld [vmem:[#allocation11 + $0x204] ss:$16 sps:$4 sm:$0xff]  }
 0x416   :  { %4579 = vmatpush1.bf16.msra.mxu1 %v6536_v21  ;;  %4416 = vmatprep.subr.bf16.mxu0 %v6541_v22  ;;  %v6628_v21 = vld [vmem:[#allocation11 + $0x20c] ss:$16 sps:$4 sm:$0xff]  }
 0x417   :  { %4580 = vmatprep.subr.bf16.mxu1 %v6544_v23  ;;  %v7601_v22 = vld [vmem:[%s7765_s8] sm:$0xff]  ;;  %s5531_s8 = sshll.u32 %s7311_s19, 4  ;;  %s5532_s8 = int_to_ptr.vmem [resolvable:$true] %s5531_s8 }
 0x418   :  { %v1173_v23 = vrot.slane %v7601_v22, %v7545_v42  ;;  %s7233_s1 = scalar_lea.vmem %s5532_s8, 512  ;;  %p7238_p3 = scmp.lt.s32.totalorder %s5532_s8, %s5532_s8 }
 0x419   :  { %4417 = vmatpush1.bf16.msra.mxu0 %v6539_v24  ;;  %v1181_v24 = vrot.slane %v7601_v22, %v7581_v13  ;;  %p7234_p2 = scmp.ne.s32.totalorder %s5532_s8, %s7233_s1  ;;  %p7239_p4 = scmp.lt.s32.totalorder %s7233_s1, %s7233_s1 }
 0x41a   :  { %4581 = vmatpush1.bf16.msra.mxu1 %v6542_v27  ;;  %4418 = vmatprep.subr.bf16.mxu0 %v6547_v28  ;;  %v1177_v27 = vrot.slane %v7601_v22, %v7548_v44  ;;  %v1185_v28 = vrot.slane %v7601_v22, %v7558_v3 }
 0x41b   :  { %4582 = vmatprep.subr.bf16.mxu1 %v6550_v26  ;;  %p7240_p5 = por %p7239_p4, %p7238_p3 }
 0x41d   :  { %4419 = vmatpush1.bf16.msra.mxu0 %v6545_v29  ;;  %p7241_p6 = pnand %p7240_p5, %p7234_p2 }
 0x41e   :  { %4583 = vmatpush1.bf16.msra.mxu1 %v6548_v52  ;;  %4420 = vmatprep.subr.bf16.mxu0 %v6553_v30 }
 0x41f   :  { %4584 = vmatprep.subr.bf16.mxu1 %v6556_v31 }
 0x421   :  { %4421 = vmatpush1.bf16.msra.mxu0 %v6551_v32 }
 0x422   :  { %4585 = vmatpush1.bf16.msra.mxu1 %v6554_v34  ;;  %4422 = vmatprep.subr.bf16.mxu0 %v6559_v35 }
 0x423   :  { %4586 = vmatprep.subr.bf16.mxu1 %v6562_v33 }
 0x425   :  { %4423 = vmatpush1.bf16.msra.mxu0 %v6557_v36 }
 0x426   :  { %4587 = vmatpush1.bf16.msra.mxu1 %v6560_v37  ;;  %4424 = vmatprep.subr.bf16.mxu0 %v6565_v2 }
 0x427   :  { %4588 = vmatprep.subr.bf16.mxu1 %v6568_v38 }
 0x429   :  { %4425 = vmatpush1.bf16.msra.mxu0 %v6563_v39 }
 0x42a   :  { %4589 = vmatpush1.bf16.msra.mxu1 %v6566_v40  ;;  %4426 = vmatprep.subr.bf16.mxu0 %v6571_v43  ;;  %v6623_v43 = vld [vmem:[#allocation11 + $0x200] ss:$16 sps:$4 sm:$0xff]  }
 0x42b   :  { %4590 = vmatprep.subr.bf16.mxu1 %v6574_v45  ;;  %v6626_v45 = vld [vmem:[#allocation11 + $0x208] ss:$16 sps:$4 sm:$0xff]  }
 0x42d   :  { %4427 = vmatpush1.bf16.msra.mxu0 %v6569_v46 }
 0x42e   :  { %4591 = vmatpush1.bf16.msra.mxu1 %v6572_v47  ;;  %4428 = vmatprep.subr.bf16.mxu0 %v6577_v48  ;;  %v6631_v47 = vld [vmem:[#allocation11 + $0x224] ss:$16 sps:$4 sm:$0xff]   ;;  %v6634_v48 = vld [vmem:[#allocation11 + $0x22c] ss:$16 sps:$4 sm:$0xff]  }
 0x42f   :  { %4592 = vmatprep.subr.bf16.mxu1 %v6580_v49 }
 0x431   :  { %4429 = vmatpush1.bf16.msra.mxu0 %v6575_v8  ;;  %v6629_v8 = vld [vmem:[#allocation11 + $0x220] ss:$16 sps:$4 sm:$0xff]  }
 0x432   :  { %4593 = vmatpush1.bf16.msra.mxu1 %v6578_v50  ;;  %4430 = vmatprep.subr.bf16.mxu0 %v6583_v51  ;;  %v6632_v50 = vld [vmem:[#allocation11 + $0x228] ss:$16 sps:$4 sm:$0xff]   ;;  %v6637_v51 = vld [vmem:[#allocation11 + $0x244] ss:$16 sps:$4 sm:$0xff]  }
 0x433   :  { %4594 = vmatprep.subr.bf16.mxu1 %v6586_v53  ;;  %v6640_v53 = vld [vmem:[#allocation11 + $0x24c] ss:$16 sps:$4 sm:$0xff]  }
 0x435   :  { %4431 = vmatpush1.bf16.msra.mxu0 %v6581_v54  ;;  %v6635_v54 = vld [vmem:[#allocation11 + $0x240] ss:$16 sps:$4 sm:$0xff]  }
 0x436   :  { %4595 = vmatpush1.bf16.msra.mxu1 %v6584_v55  ;;  %4432 = vmatprep.subr.bf16.mxu0 %v6589_v56  ;;  %v6638_v55 = vld [vmem:[#allocation11 + $0x248] ss:$16 sps:$4 sm:$0xff]   ;;  %v6643_v56 = vld [vmem:[#allocation11 + $0x264] ss:$16 sps:$4 sm:$0xff]  }
 0x437   :  { %4596 = vmatprep.subr.bf16.mxu1 %v6592_v57  ;;  %v6646_v57 = vld [vmem:[#allocation11 + $0x26c] ss:$16 sps:$4 sm:$0xff]  }
 0x439   :  { %4433 = vmatpush1.bf16.msra.mxu0 %v6587_v58  ;;  %v6641_v58 = vld [vmem:[#allocation11 + $0x260] ss:$16 sps:$4 sm:$0xff]  }
 0x43a   :  { %4597 = vmatpush1.bf16.msra.mxu1 %v6590_v59  ;;  %4434 = vmatprep.subr.bf16.mxu0 %v6595_v60  ;;  %v6644_v59 = vld [vmem:[#allocation11 + $0x268] ss:$16 sps:$4 sm:$0xff]   ;;  %v6649_v60 = vld [vmem:[#allocation11 + $0x284] ss:$16 sps:$4 sm:$0xff]  }
 0x43b   :  { %4598 = vmatprep.subr.bf16.mxu1 %v6598_v61  ;;  %v6652_v61 = vld [vmem:[#allocation11 + $0x28c] ss:$16 sps:$4 sm:$0xff]  }
 0x43d   :  { %4435 = vmatpush1.bf16.msra.mxu0 %v6593_v62  ;;  %v6647_v62 = vld [vmem:[#allocation11 + $0x280] ss:$16 sps:$4 sm:$0xff]  }
 0x43e   :  { %4599 = vmatpush1.bf16.msra.mxu1 %v6596_v63  ;;  %4436 = vmatprep.subr.bf16.mxu0 %v6601_v1  ;;  %v6650_v63 = vld [vmem:[#allocation11 + $0x288] ss:$16 sps:$4 sm:$0xff]   ;;  %v6655_v1 = vld [vmem:[#allocation11 + $0x2a4] ss:$16 sps:$4 sm:$0xff]  }
 0x43f   :  { %4600 = vmatprep.subr.bf16.mxu1 %v6604_v4  ;;  %v6658_v4 = vld [vmem:[#allocation11 + $0x2ac] ss:$16 sps:$4 sm:$0xff]  }
 0x441   :  { %4437 = vmatpush1.bf16.msra.mxu0 %v6599_v5  ;;  %v6653_v5 = vld [vmem:[#allocation11 + $0x2a0] ss:$16 sps:$4 sm:$0xff]  }
 0x442   :  { %4601 = vmatpush1.bf16.msra.mxu1 %v6602_v6  ;;  %4438 = vmatprep.subr.bf16.mxu0 %v6607_v7  ;;  %v6656_v6 = vld [vmem:[#allocation11 + $0x2a8] ss:$16 sps:$4 sm:$0xff]   ;;  %v6661_v7 = vld [vmem:[#allocation11 + $0x2c4] ss:$16 sps:$4 sm:$0xff]  }
 0x443   :  { %4602 = vmatprep.subr.bf16.mxu1 %v6610_v9  ;;  %v6664_v9 = vld [vmem:[#allocation11 + $0x2cc] ss:$16 sps:$4 sm:$0xff]  }
 0x445   :  { %4439 = vmatpush1.bf16.msra.mxu0 %v6605_v10  ;;  %v6659_v10 = vld [vmem:[#allocation11 + $0x2c0] ss:$16 sps:$4 sm:$0xff]  }
 0x446   :  { %4603 = vmatpush1.bf16.msra.mxu1 %v6608_v11  ;;  %4440 = vmatprep.subr.bf16.mxu0 %v6613_v12  ;;  %v6662_v11 = vld [vmem:[#allocation11 + $0x2c8] ss:$16 sps:$4 sm:$0xff]   ;;  %v6667_v12 = vld [vmem:[#allocation11 + $0x2e4] ss:$16 sps:$4 sm:$0xff]  }
 0x447   :  { %4604 = vmatprep.subr.bf16.mxu1 %v6616_v14  ;;  %v6670_v14 = vld [vmem:[#allocation11 + $0x2ec] ss:$16 sps:$4 sm:$0xff]  }
 0x449   :  { %4441 = vmatpush1.bf16.msra.mxu0 %v6611_v25  ;;  %v6665_v25 = vld [vmem:[#allocation11 + $0x2e0] ss:$16 sps:$4 sm:$0xff]  }
 0x44a   :  { %4605 = vmatpush1.bf16.msra.mxu1 %v6614_v15  ;;  %4442 = vmatprep.subr.bf16.mxu0 %v6619_v16  ;;  %v6668_v15 = vld [vmem:[#allocation11 + $0x2e8] ss:$16 sps:$4 sm:$0xff]   ;;  %v6673_v16 = vld [vmem:[#allocation11 + $0x304] ss:$16 sps:$4 sm:$0xff]  }
 0x44b   :  { %4606 = vmatprep.subr.bf16.mxu1 %v6622_v17  ;;  %v6676_v17 = vld [vmem:[#allocation11 + $0x30c] ss:$16 sps:$4 sm:$0xff]  }
 0x44d   :  { %4443 = vmatpush1.bf16.msra.mxu0 %v6617_v18  ;;  %v6671_v18 = vld [vmem:[#allocation11 + $0x300] ss:$16 sps:$4 sm:$0xff]  }
 0x44e   :  { %4607 = vmatpush1.bf16.msra.mxu1 %v6620_v19  ;;  %4453 = vmatprep.subr.bf16.mxu0 %v6625_v20  ;;  %v6674_v19 = vld [vmem:[#allocation11 + $0x308] ss:$16 sps:$4 sm:$0xff]   ;;  %v6679_v20 = vld [vmem:[#allocation11 + $0x324] ss:$16 sps:$4 sm:$0xff]  }
 0x44f   :  { %4617 = vmatprep.subr.bf16.mxu1 %v6628_v21  ;;  %v6682_v21 = vld [vmem:[#allocation11 + $0x32c] ss:$16 sps:$4 sm:$0xff]  }
 0x463   :  { %v2565_v26 = vpop.f32.mrb[4].mxu0  ;;  %v2647_v29 = vpop.f32.mrb[12].mxu1 }
 0x464   :  { %v6323_v52 = vadd.f32 %v2565_v26, %v1173_v23  ;;  %v7611_v30 = vadd.f32 %v2647_v29, %v1181_v24  ;;  %v2567_v31 = vpop.f32.mrb[5].mxu0  ;;  %v2649_v32 = vpop.f32.mrb[13].mxu1  ;;  %v6677_v23 = vld [vmem:[#allocation11 + $0x320] ss:$16 sps:$4 sm:$0xff]   ;;  %v6680_v24 = vld [vmem:[#allocation11 + $0x328] ss:$16 sps:$4 sm:$0xff]  }
 0x465   :  { %v6324_v34 = vadd.f32 %v2567_v31, %v1177_v27  ;;  %v6326_v35 = vadd.f32 %v2649_v32, %v1185_v28  ;;  %v2569_v33 = vpop.f32.mrb[6].mxu0  ;;  %v2651_v36 = vpop.f32.mrb[14].mxu1  ;;  %v6685_v27 = vld [vmem:[#allocation11 + $0x344] ss:$16 sps:$4 sm:$0xff]   ;;  %v6688_v28 = vld [vmem:[#allocation11 + $0x34c] ss:$16 sps:$4 sm:$0xff]  }
 0x466   :  { %v2570_v37 = vpop.f32.mrb[7].mxu0  ;;  %v2652_v2 = vpop.f32.mrb[15].mxu1  ;;  %v2818_v46 = vpack.c.bf16 %v6323_v52, %v6323_v52  ;;  %v6683_v26 = vld [vmem:[#allocation11 + $0x340] ss:$16 sps:$4 sm:$0xff]   ;;  %v6686_v29 = vld [vmem:[#allocation11 + $0x348] ss:$16 sps:$4 sm:$0xff]  }
 0x467   :  { %v2819_v38 = vpack.c.bf16 %v6324_v34, %v6324_v34  ;;  %v6251_v39 = vpack.c.bf16 %v6324_v34, %v6323_v52  ;;  %v6252_v40 = vpack.c.bf16 %v6326_v35, %v7611_v30  ;;  %v2821_v49 = vpack.c.bf16 %v6326_v35, %v6326_v35  ;;  %v6691_v52 = vld [vmem:[#allocation11 + $0x364] ss:$16 sps:$4 sm:$0xff]   ;;  %v6694_v31 = vld [vmem:[#allocation11 + $0x36c] ss:$16 sps:$4 sm:$0xff]   ;;  %v6689_v32 = vld [vmem:[#allocation11 + $0x360] ss:$16 sps:$4 sm:$0xff]  }
 0x468   :  { %v6692_v34 = vld [vmem:[#allocation11 + $0x368] ss:$16 sps:$4 sm:$0xff]   ;;  %v6697_v35 = vld [vmem:[#allocation11 + $0x384] ss:$16 sps:$4 sm:$0xff]   ;;  %v6700_v33 = vld [vmem:[#allocation11 + $0x38c] ss:$16 sps:$4 sm:$0xff]  }
 0x469   :  { %2850 = vst [vmem:[#allocation17] sm:$0xff] %v6251_v39  ;;  %2851 = vst [vmem:[#allocation17 + $0x8] sm:$0xff] %v6252_v40  ;;  %4444 = vmatprep.mubr.bf16.mxu0 %v2819_v38  ;;  %4608 = vmatprep.mubr.bf16.mxu1 %v2819_v38  ;;  %v6695_v36 = vld [vmem:[#allocation11 + $0x380] ss:$16 sps:$4 sm:$0xff]   ;;  %v6698_v37 = vld [vmem:[#allocation11 + $0x388] ss:$16 sps:$4 sm:$0xff]  }
 0x46a   :  { %4445 = vmatmul.mubr.bf16.vlgmr.msra.gmra.mrb[12].mxu0 %v2818_v46  ;;  %4609 = vmatmul.mubr.bf16.vlgmr.msra.gmra.mrb[20].mxu1 %v2818_v46  ;;  %v6703_v2 = vld [vmem:[#allocation11 + $0x3a4] ss:$16 sps:$4 sm:$0xff]   ;;  %v6706_v38 = vld [vmem:[#allocation11 + $0x3ac] ss:$16 sps:$4 sm:$0xff]   ;;  %v6701_v39 = vld [vmem:[#allocation11 + $0x3a0] ss:$16 sps:$4 sm:$0xff]  }
 0x46b   :  { %4454 = vmatpush1.bf16.msra.mxu0 %v6623_v43  ;;  %4618 = vmatpush1.bf16.msra.mxu1 %v6626_v45  ;;  %v6704_v40 = vld [vmem:[#allocation11 + $0x3a8] ss:$16 sps:$4 sm:$0xff]   ;;  %v6709_v43 = vld [vmem:[#allocation11 + $0x3c4] ss:$16 sps:$4 sm:$0xff]   ;;  %v6712_v45 = vld [vmem:[#allocation11 + $0x3cc] ss:$16 sps:$4 sm:$0xff]  }
 0x46c   :  { %4485 = vmatprep.mubr.bf16.mxu0 %v2821_v49  ;;  %4649 = vmatprep.mubr.bf16.mxu1 %v2821_v49  ;;  %v6707_v46 = vld [vmem:[#allocation11 + $0x3c0] ss:$16 sps:$4 sm:$0xff]   ;;  %v6718_v49 = vld [vmem:[#allocation11 + $0x3ec] ss:$16 sps:$4 sm:$0xff]  }
 0x46d   :  { %4455 = vmatprep.subr.bf16.mxu0 %v6631_v47  ;;  %4619 = vmatprep.subr.bf16.mxu1 %v6634_v48  ;;  %v6710_v47 = vld [vmem:[#allocation11 + $0x3c8] ss:$16 sps:$4 sm:$0xff]   ;;  %v6715_v48 = vld [vmem:[#allocation11 + $0x3e4] ss:$16 sps:$4 sm:$0xff]  }
 0x46f   :  { %4456 = vmatpush1.bf16.msra.mxu0 %v6629_v8  ;;  %4620 = vmatpush1.bf16.msra.mxu1 %v6632_v50  ;;  %v6713_v8 = vld [vmem:[#allocation11 + $0x3e0] ss:$16 sps:$4 sm:$0xff]   ;;  %v6716_v50 = vld [vmem:[#allocation11 + $0x3e8] ss:$16 sps:$4 sm:$0xff]  }
 0x470   :  { %4457 = vmatprep.subr.bf16.mxu0 %v6637_v51  ;;  %4621 = vmatprep.subr.bf16.mxu1 %v6640_v53  ;;  %v6721_v51 = vld [vmem:[#allocation11 + $0x404] ss:$16 sps:$4 sm:$0xff]   ;;  %v6724_v53 = vld [vmem:[#allocation11 + $0x40c] ss:$16 sps:$4 sm:$0xff]  }
 0x473   :  { %4458 = vmatpush1.bf16.msra.mxu0 %v6635_v54  ;;  %4622 = vmatpush1.bf16.msra.mxu1 %v6638_v55  ;;  %v6719_v54 = vld [vmem:[#allocation11 + $0x400] ss:$16 sps:$4 sm:$0xff]   ;;  %v6722_v55 = vld [vmem:[#allocation11 + $0x408] ss:$16 sps:$4 sm:$0xff]  }
 0x474   :  { %4459 = vmatprep.subr.bf16.mxu0 %v6643_v56  ;;  %4623 = vmatprep.subr.bf16.mxu1 %v6646_v57  ;;  %v2820_v56 = vpack.c.bf16 %v7611_v30, %v7611_v30  ;;  %v6727_v57 = vld [vmem:[#allocation11 + $0x424] ss:$16 sps:$4 sm:$0xff]  }
 0x475   :  { %v6739_v30 = vld [vmem:[#allocation11 + $0x464] ss:$16 sps:$4 sm:$0xff]  }
 0x477   :  { %4460 = vmatpush1.bf16.msra.mxu0 %v6641_v58  ;;  %4624 = vmatpush1.bf16.msra.mxu1 %v6644_v59  ;;  %v6730_v58 = vld [vmem:[#allocation11 + $0x42c] ss:$16 sps:$4 sm:$0xff]   ;;  %v6725_v59 = vld [vmem:[#allocation11 + $0x420] ss:$16 sps:$4 sm:$0xff]  }
 0x478   :  { %4461 = vmatprep.subr.bf16.mxu0 %v6649_v60  ;;  %4625 = vmatprep.subr.bf16.mxu1 %v6652_v61  ;;  %v6728_v60 = vld [vmem:[#allocation11 + $0x428] ss:$16 sps:$4 sm:$0xff]   ;;  %v6733_v61 = vld [vmem:[#allocation11 + $0x444] ss:$16 sps:$4 sm:$0xff]  }
 0x47b   :  { %4462 = vmatpush1.bf16.msra.mxu0 %v6647_v62  ;;  %4626 = vmatpush1.bf16.msra.mxu1 %v6650_v63  ;;  %v6736_v62 = vld [vmem:[#allocation11 + $0x44c] ss:$16 sps:$4 sm:$0xff]   ;;  %v6731_v63 = vld [vmem:[#allocation11 + $0x440] ss:$16 sps:$4 sm:$0xff]  }
 0x47c   :  { %4463 = vmatprep.subr.bf16.mxu0 %v6655_v1  ;;  %4627 = vmatprep.subr.bf16.mxu1 %v6658_v4  ;;  %v6734_v1 = vld [vmem:[#allocation11 + $0x448] ss:$16 sps:$4 sm:$0xff]   ;;  %v6742_v4 = vld [vmem:[#allocation11 + $0x46c] ss:$16 sps:$4 sm:$0xff]  }
 0x47f   :  { %4464 = vmatpush1.bf16.msra.mxu0 %v6653_v5  ;;  %4628 = vmatpush1.bf16.msra.mxu1 %v6656_v6  ;;  %v6737_v5 = vld [vmem:[#allocation11 + $0x460] ss:$16 sps:$4 sm:$0xff]   ;;  %v6740_v6 = vld [vmem:[#allocation11 + $0x468] ss:$16 sps:$4 sm:$0xff]  }
 0x480   :  { %4465 = vmatprep.subr.bf16.mxu0 %v6661_v7  ;;  %4629 = vmatprep.subr.bf16.mxu1 %v6664_v9  ;;  %v6745_v7 = vld [vmem:[#allocation11 + $0x484] ss:$16 sps:$4 sm:$0xff]   ;;  %v6748_v9 = vld [vmem:[#allocation11 + $0x48c] ss:$16 sps:$4 sm:$0xff]  }
 0x483   :  { %4466 = vmatpush1.bf16.msra.mxu0 %v6659_v10  ;;  %4630 = vmatpush1.bf16.msra.mxu1 %v6662_v11  ;;  %v6743_v10 = vld [vmem:[#allocation11 + $0x480] ss:$16 sps:$4 sm:$0xff]   ;;  %v6746_v11 = vld [vmem:[#allocation11 + $0x488] ss:$16 sps:$4 sm:$0xff]  }
 0x484   :  { %4467 = vmatprep.subr.bf16.mxu0 %v6667_v12  ;;  %4631 = vmatprep.subr.bf16.mxu1 %v6670_v14  ;;  %v6751_v12 = vld [vmem:[#allocation11 + $0x4a4] ss:$16 sps:$4 sm:$0xff]   ;;  %v6754_v14 = vld [vmem:[#allocation11 + $0x4ac] ss:$16 sps:$4 sm:$0xff]  }
 0x487   :  { %4468 = vmatpush1.bf16.msra.mxu0 %v6665_v25  ;;  %4632 = vmatpush1.bf16.msra.mxu1 %v6668_v15  ;;  %v6749_v25 = vld [vmem:[#allocation11 + $0x4a0] ss:$16 sps:$4 sm:$0xff]   ;;  %v6752_v15 = vld [vmem:[#allocation11 + $0x4a8] ss:$16 sps:$4 sm:$0xff]  }
 0x488   :  { %4469 = vmatprep.subr.bf16.mxu0 %v6673_v16  ;;  %4633 = vmatprep.subr.bf16.mxu1 %v6676_v17  ;;  %v6757_v16 = vld [vmem:[#allocation11 + $0x4c4] ss:$16 sps:$4 sm:$0xff]   ;;  %v6760_v17 = vld [vmem:[#allocation11 + $0x4cc] ss:$16 sps:$4 sm:$0xff]  }
 0x48b   :  { %4470 = vmatpush1.bf16.msra.mxu0 %v6671_v18  ;;  %4634 = vmatpush1.bf16.msra.mxu1 %v6674_v19  ;;  %v6755_v18 = vld [vmem:[#allocation11 + $0x4c0] ss:$16 sps:$4 sm:$0xff]   ;;  %v6758_v19 = vld [vmem:[#allocation11 + $0x4c8] ss:$16 sps:$4 sm:$0xff]  }
 0x48c   :  { %4471 = vmatprep.subr.bf16.mxu0 %v6679_v20  ;;  %4635 = vmatprep.subr.bf16.mxu1 %v6682_v21  ;;  %v6763_v20 = vld [vmem:[#allocation11 + $0x4e4] ss:$16 sps:$4 sm:$0xff]   ;;  %v6766_v21 = vld [vmem:[#allocation11 + $0x4ec] ss:$16 sps:$4 sm:$0xff]  }
 0x48f   :  { %4472 = vmatpush1.bf16.msra.mxu0 %v6677_v23  ;;  %4636 = vmatpush1.bf16.msra.mxu1 %v6680_v24  ;;  %v6761_v23 = vld [vmem:[#allocation11 + $0x4e0] ss:$16 sps:$4 sm:$0xff]   ;;  %v6764_v24 = vld [vmem:[#allocation11 + $0x4e8] ss:$16 sps:$4 sm:$0xff]  }
 0x490   :  { %4473 = vmatprep.subr.bf16.mxu0 %v6685_v27  ;;  %4637 = vmatprep.subr.bf16.mxu1 %v6688_v28  ;;  %v6769_v27 = vld [vmem:[#allocation11 + $0x504] ss:$16 sps:$4 sm:$0xff]   ;;  %v6772_v28 = vld [vmem:[#allocation11 + $0x50c] ss:$16 sps:$4 sm:$0xff]  }
 0x493   :  { %4474 = vmatpush1.bf16.msra.mxu0 %v6683_v26  ;;  %4638 = vmatpush1.bf16.msra.mxu1 %v6686_v29  ;;  %v6767_v26 = vld [vmem:[#allocation11 + $0x500] ss:$16 sps:$4 sm:$0xff]   ;;  %v6770_v29 = vld [vmem:[#allocation11 + $0x508] ss:$16 sps:$4 sm:$0xff]  }
 0x494   :  { %4475 = vmatprep.subr.bf16.mxu0 %v6691_v52  ;;  %4639 = vmatprep.subr.bf16.mxu1 %v6694_v31  ;;  %v6775_v52 = vld [vmem:[#allocation11 + $0x524] ss:$16 sps:$4 sm:$0xff]   ;;  %v6778_v31 = vld [vmem:[#allocation11 + $0x52c] ss:$16 sps:$4 sm:$0xff]  }
 0x497   :  { %4476 = vmatpush1.bf16.msra.mxu0 %v6689_v32  ;;  %4640 = vmatpush1.bf16.msra.mxu1 %v6692_v34  ;;  %v6773_v32 = vld [vmem:[#allocation11 + $0x520] ss:$16 sps:$4 sm:$0xff]   ;;  %v6776_v34 = vld [vmem:[#allocation11 + $0x528] ss:$16 sps:$4 sm:$0xff]  }
 0x498   :  { %4477 = vmatprep.subr.bf16.mxu0 %v6697_v35  ;;  %4641 = vmatprep.subr.bf16.mxu1 %v6700_v33  ;;  %v6781_v35 = vld [vmem:[#allocation11 + $0x544] ss:$16 sps:$4 sm:$0xff]   ;;  %v6784_v33 = vld [vmem:[#allocation11 + $0x54c] ss:$16 sps:$4 sm:$0xff]  }
 0x49b   :  { %4478 = vmatpush1.bf16.msra.mxu0 %v6695_v36  ;;  %4642 = vmatpush1.bf16.msra.mxu1 %v6698_v37  ;;  %v6779_v36 = vld [vmem:[#allocation11 + $0x540] ss:$16 sps:$4 sm:$0xff]   ;;  %v6782_v37 = vld [vmem:[#allocation11 + $0x548] ss:$16 sps:$4 sm:$0xff]  }
 0x49c   :  { %4479 = vmatprep.subr.bf16.mxu0 %v6703_v2  ;;  %4643 = vmatprep.subr.bf16.mxu1 %v6706_v38  ;;  %v6787_v2 = vld [vmem:[#allocation11 + $0x564] ss:$16 sps:$4 sm:$0xff]   ;;  %v6790_v38 = vld [vmem:[#allocation11 + $0x56c] ss:$16 sps:$4 sm:$0xff]  }
 0x49f   :  { %4480 = vmatpush1.bf16.msra.mxu0 %v6701_v39  ;;  %4644 = vmatpush1.bf16.msra.mxu1 %v6704_v40  ;;  %v6785_v39 = vld [vmem:[#allocation11 + $0x560] ss:$16 sps:$4 sm:$0xff]   ;;  %v6788_v40 = vld [vmem:[#allocation11 + $0x568] ss:$16 sps:$4 sm:$0xff]  }
 0x4a0   :  { %4481 = vmatprep.subr.bf16.mxu0 %v6709_v43  ;;  %4645 = vmatprep.subr.bf16.mxu1 %v6712_v45  ;;  %v6793_v43 = vld [vmem:[#allocation11 + $0x584] ss:$16 sps:$4 sm:$0xff]   ;;  %v6796_v45 = vld [vmem:[#allocation11 + $0x58c] ss:$16 sps:$4 sm:$0xff]  }
 0x4a3   :  { %4482 = vmatpush1.bf16.msra.mxu0 %v6707_v46  ;;  %4646 = vmatpush1.bf16.msra.mxu1 %v6710_v47  ;;  %v6791_v46 = vld [vmem:[#allocation11 + $0x580] ss:$16 sps:$4 sm:$0xff]   ;;  %v6794_v47 = vld [vmem:[#allocation11 + $0x588] ss:$16 sps:$4 sm:$0xff]  }
 0x4a4   :  { %4483 = vmatprep.subr.bf16.mxu0 %v6715_v48  ;;  %4647 = vmatprep.subr.bf16.mxu1 %v6718_v49  ;;  %v6799_v48 = vld [vmem:[#allocation11 + $0x5a4] ss:$16 sps:$4 sm:$0xff]   ;;  %v6802_v49 = vld [vmem:[#allocation11 + $0x5ac] ss:$16 sps:$4 sm:$0xff]  }
 0x4a7   :  { %4484 = vmatpush1.bf16.msra.mxu0 %v6713_v8  ;;  %4648 = vmatpush1.bf16.msra.mxu1 %v6716_v50  ;;  %v6797_v8 = vld [vmem:[#allocation11 + $0x5a0] ss:$16 sps:$4 sm:$0xff]   ;;  %v6800_v50 = vld [vmem:[#allocation11 + $0x5a8] ss:$16 sps:$4 sm:$0xff]  }
 0x4a8   :  { %4494 = vmatprep.subr.bf16.mxu0 %v6721_v51  ;;  %4658 = vmatprep.subr.bf16.mxu1 %v6724_v53  ;;  %v6805_v51 = vld [vmem:[#allocation11 + $0x5c4] ss:$16 sps:$4 sm:$0xff]   ;;  %v6808_v53 = vld [vmem:[#allocation11 + $0x5cc] ss:$16 sps:$4 sm:$0xff]  }
 0x4aa   :  { %4486 = vmatmul.mubr.bf16.vlgmr.msra.gmra.mrb[12].mxu0 %v2820_v56  ;;  %4650 = vmatmul.mubr.bf16.vlgmr.msra.gmra.mrb[20].mxu1 %v2820_v56  ;;  %v1192_v56 = vsub.s32 5, %v7542_v41 }
 0x4ab   :  { %4495 = vmatpush1.bf16.msra.mxu0 %v6719_v54  ;;  %4659 = vmatpush1.bf16.msra.mxu1 %v6722_v55  ;;  %v1188_v54 = vsub.s32 4, %v7542_v41  ;;  %v1196_v55 = vsub.s32 6, %v7542_v41 }
 0x4ac   :  { %4496 = vmatprep.subr.bf16.mxu0 %v6727_v57  ;;  %4660 = vmatprep.subr.bf16.mxu1 %v6730_v58  ;;  %v1200_v57 = vsub.s32 7, %v7542_v41  ;;  %v6803_v58 = vld [vmem:[#allocation11 + $0x5c0] ss:$16 sps:$4 sm:$0xff]  }
 0x4ad   :  { %v6809_v41 = vld [vmem:[#allocation11 + $0x5e0] ss:$16 sps:$4 sm:$0xff]  }
 0x4af   :  { %4497 = vmatpush1.bf16.msra.mxu0 %v6725_v59  ;;  %4661 = vmatpush1.bf16.msra.mxu1 %v6728_v60  ;;  %v6806_v59 = vld [vmem:[#allocation11 + $0x5c8] ss:$16 sps:$4 sm:$0xff]   ;;  %v1189_v60 = vrot.slane %v7601_v22, %v1188_v54  ;;  %v6859_v54 = vld [vmem:[#allocation11 + $0x6e4] ss:$16 sps:$4 sm:$0xff]  }
 0x4b0   :  { %4498 = vmatprep.subr.bf16.mxu0 %v6733_v61  ;;  %4662 = vmatprep.subr.bf16.mxu1 %v6736_v62  ;;  %v6811_v61 = vld [vmem:[#allocation11 + $0x5e4] ss:$16 sps:$4 sm:$0xff]   ;;  %v6814_v62 = vld [vmem:[#allocation11 + $0x5ec] ss:$16 sps:$4 sm:$0xff]  }
 0x4b3   :  { %4499 = vmatpush1.bf16.msra.mxu0 %v6731_v63  ;;  %4663 = vmatpush1.bf16.msra.mxu1 %v6734_v1  ;;  %v1197_v63 = vrot.slane %v7601_v22, %v1196_v55  ;;  %v1193_v1 = vrot.slane %v7601_v22, %v1192_v56  ;;  %v6862_v55 = vld [vmem:[#allocation11 + $0x6ec] ss:$16 sps:$4 sm:$0xff]   ;;  %v6857_v56 = vld [vmem:[#allocation11 + $0x6e0] ss:$16 sps:$4 sm:$0xff]  }
 0x4b4   :  { %4500 = vmatprep.subr.bf16.mxu0 %v6739_v30  ;;  %4664 = vmatprep.subr.bf16.mxu1 %v6742_v4  ;;  %v1201_v30 = vrot.slane %v7601_v22, %v1200_v57  ;;  %v6860_v57 = vld [vmem:[#allocation11 + $0x6e8] ss:$16 sps:$4 sm:$0xff]  }
 0x4b7   :  { %4501 = vmatpush1.bf16.msra.mxu0 %v6737_v5  ;;  %4665 = vmatpush1.bf16.msra.mxu1 %v6740_v6  ;;  %v6812_v5 = vld [vmem:[#allocation11 + $0x5e8] ss:$16 sps:$4 sm:$0xff]  }
 0x4b8   :  { %4502 = vmatprep.subr.bf16.mxu0 %v6745_v7  ;;  %4666 = vmatprep.subr.bf16.mxu1 %v6748_v9 }
 0x4bb   :  { %4503 = vmatpush1.bf16.msra.mxu0 %v6743_v10  ;;  %4667 = vmatpush1.bf16.msra.mxu1 %v6746_v11  ;;  %v6817_v10 = vld [vmem:[#allocation11 + $0x604] ss:$16 sps:$4 sm:$0xff]   ;;  %v6820_v11 = vld [vmem:[#allocation11 + $0x60c] ss:$16 sps:$4 sm:$0xff]  }
 0x4bc   :  { %4504 = vmatprep.subr.bf16.mxu0 %v6751_v12  ;;  %4668 = vmatprep.subr.bf16.mxu1 %v6754_v14 }
 0x4bf   :  { %4505 = vmatpush1.bf16.msra.mxu0 %v6749_v25  ;;  %4669 = vmatpush1.bf16.msra.mxu1 %v6752_v15 }
 0x4c0   :  { %4506 = vmatprep.subr.bf16.mxu0 %v6757_v16  ;;  %4670 = vmatprep.subr.bf16.mxu1 %v6760_v17 }
 0x4c3   :  { %4507 = vmatpush1.bf16.msra.mxu0 %v6755_v18  ;;  %4671 = vmatpush1.bf16.msra.mxu1 %v6758_v19 }
 0x4c4   :  { %4508 = vmatprep.subr.bf16.mxu0 %v6763_v20  ;;  %4672 = vmatprep.subr.bf16.mxu1 %v6766_v21  ;;  %v6815_v21 = vld [vmem:[#allocation11 + $0x600] ss:$16 sps:$4 sm:$0xff]  }
 0x4c7   :  { %4509 = vmatpush1.bf16.msra.mxu0 %v6761_v23  ;;  %4673 = vmatpush1.bf16.msra.mxu1 %v6764_v24  ;;  %v6818_v23 = vld [vmem:[#allocation11 + $0x608] ss:$16 sps:$4 sm:$0xff]  }
 0x4c8   :  { %4510 = vmatprep.subr.bf16.mxu0 %v6769_v27  ;;  %4674 = vmatprep.subr.bf16.mxu1 %v6772_v28  ;;  %v6823_v28 = vld [vmem:[#allocation11 + $0x624] ss:$16 sps:$4 sm:$0xff]  }
 0x4cb   :  { %4511 = vmatpush1.bf16.msra.mxu0 %v6767_v26  ;;  %4675 = vmatpush1.bf16.msra.mxu1 %v6770_v29  ;;  %v6826_v26 = vld [vmem:[#allocation11 + $0x62c] ss:$16 sps:$4 sm:$0xff]  }
 0x4cc   :  { %4512 = vmatprep.subr.bf16.mxu0 %v6775_v52  ;;  %4676 = vmatprep.subr.bf16.mxu1 %v6778_v31  ;;  %v6821_v52 = vld [vmem:[#allocation11 + $0x620] ss:$16 sps:$4 sm:$0xff]   ;;  %v6824_v31 = vld [vmem:[#allocation11 + $0x628] ss:$16 sps:$4 sm:$0xff]  }
 0x4cf   :  { %4513 = vmatpush1.bf16.msra.mxu0 %v6773_v32  ;;  %4677 = vmatpush1.bf16.msra.mxu1 %v6776_v34  ;;  %v6829_v32 = vld [vmem:[#allocation11 + $0x644] ss:$16 sps:$4 sm:$0xff]   ;;  %v6832_v34 = vld [vmem:[#allocation11 + $0x64c] ss:$16 sps:$4 sm:$0xff]  }
 0x4d0   :  { %4514 = vmatprep.subr.bf16.mxu0 %v6781_v35  ;;  %4678 = vmatprep.subr.bf16.mxu1 %v6784_v33  ;;  %v6827_v35 = vld [vmem:[#allocation11 + $0x640] ss:$16 sps:$4 sm:$0xff]   ;;  %v6830_v33 = vld [vmem:[#allocation11 + $0x648] ss:$16 sps:$4 sm:$0xff]  }
 0x4d3   :  { %4515 = vmatpush1.bf16.msra.mxu0 %v6779_v36  ;;  %4679 = vmatpush1.bf16.msra.mxu1 %v6782_v37  ;;  %v6835_v36 = vld [vmem:[#allocation11 + $0x664] ss:$16 sps:$4 sm:$0xff]   ;;  %v6838_v37 = vld [vmem:[#allocation11 + $0x66c] ss:$16 sps:$4 sm:$0xff]  }
 0x4d4   :  { %4516 = vmatprep.subr.bf16.mxu0 %v6787_v2  ;;  %4680 = vmatprep.subr.bf16.mxu1 %v6790_v38  ;;  %v6833_v2 = vld [vmem:[#allocation11 + $0x660] ss:$16 sps:$4 sm:$0xff]   ;;  %v6836_v38 = vld [vmem:[#allocation11 + $0x668] ss:$16 sps:$4 sm:$0xff]  }
 0x4d7   :  { %4517 = vmatpush1.bf16.msra.mxu0 %v6785_v39  ;;  %4681 = vmatpush1.bf16.msra.mxu1 %v6788_v40  ;;  %v6841_v39 = vld [vmem:[#allocation11 + $0x684] ss:$16 sps:$4 sm:$0xff]   ;;  %v6844_v40 = vld [vmem:[#allocation11 + $0x68c] ss:$16 sps:$4 sm:$0xff]  }
 0x4d8   :  { %4518 = vmatprep.subr.bf16.mxu0 %v6793_v43  ;;  %4682 = vmatprep.subr.bf16.mxu1 %v6796_v45  ;;  %v6839_v43 = vld [vmem:[#allocation11 + $0x680] ss:$16 sps:$4 sm:$0xff]   ;;  %v6842_v45 = vld [vmem:[#allocation11 + $0x688] ss:$16 sps:$4 sm:$0xff]  }
 0x4db   :  { %4519 = vmatpush1.bf16.msra.mxu0 %v6791_v46  ;;  %4683 = vmatpush1.bf16.msra.mxu1 %v6794_v47  ;;  %v6847_v46 = vld [vmem:[#allocation11 + $0x6a4] ss:$16 sps:$4 sm:$0xff]   ;;  %v6850_v47 = vld [vmem:[#allocation11 + $0x6ac] ss:$16 sps:$4 sm:$0xff]  }
 0x4dc   :  { %4520 = vmatprep.subr.bf16.mxu0 %v6799_v48  ;;  %4684 = vmatprep.subr.bf16.mxu1 %v6802_v49  ;;  %v6845_v48 = vld [vmem:[#allocation11 + $0x6a0] ss:$16 sps:$4 sm:$0xff]   ;;  %v6848_v49 = vld [vmem:[#allocation11 + $0x6a8] ss:$16 sps:$4 sm:$0xff]  }
 0x4df   :  { %4521 = vmatpush1.bf16.msra.mxu0 %v6797_v8  ;;  %4685 = vmatpush1.bf16.msra.mxu1 %v6800_v50  ;;  %v6853_v8 = vld [vmem:[#allocation11 + $0x6c4] ss:$16 sps:$4 sm:$0xff]   ;;  %v6856_v50 = vld [vmem:[#allocation11 + $0x6cc] ss:$16 sps:$4 sm:$0xff]  }
 0x4e0   :  { %4522 = vmatprep.subr.bf16.mxu0 %v6805_v51  ;;  %4686 = vmatprep.subr.bf16.mxu1 %v6808_v53  ;;  %v6851_v51 = vld [vmem:[#allocation11 + $0x6c0] ss:$16 sps:$4 sm:$0xff]   ;;  %v6854_v53 = vld [vmem:[#allocation11 + $0x6c8] ss:$16 sps:$4 sm:$0xff]  }
 0x4e3   :  { %4523 = vmatpush1.bf16.msra.mxu0 %v6803_v58  ;;  %4687 = vmatpush1.bf16.msra.mxu1 %v6806_v59  ;;  %v2729_v4 = vpop.f32.mrb[8].mxu0  ;;  %v6865_v58 = vld [vmem:[#allocation11 + $0x704] ss:$16 sps:$4 sm:$0xff]   ;;  %v6868_v59 = vld [vmem:[#allocation11 + $0x70c] ss:$16 sps:$4 sm:$0xff]  }
 0x4e4   :  { %v6327_v6 = vadd.f32 %v2729_v4, %v1189_v60  ;;  %v2811_v7 = vpop.f32.mrb[16].mxu1  ;;  %v2731_v9 = vpop.f32.mrb[9].mxu0  ;;  %4524 = vmatprep.subr.bf16.mxu0 %v6811_v61  ;;  %4688 = vmatprep.subr.bf16.mxu1 %v6814_v62  ;;  %v6863_v60 = vld [vmem:[#allocation11 + $0x700] ss:$16 sps:$4 sm:$0xff]   ;;  %v6866_v61 = vld [vmem:[#allocation11 + $0x708] ss:$16 sps:$4 sm:$0xff]  }
 0x4e5   :  { %v7624_v12 = vadd.f32 %v2811_v7, %v1197_v63  ;;  %v6328_v14 = vadd.f32 %v2731_v9, %v1193_v1  ;;  %v2813_v25 = vpop.f32.mrb[17].mxu1  ;;  %v2733_v15 = vpop.f32.mrb[10].mxu0  ;;  %v6871_v62 = vld [vmem:[#allocation11 + $0x724] ss:$16 sps:$4 sm:$0xff]   ;;  %v6874_v63 = vld [vmem:[#allocation11 + $0x72c] ss:$16 sps:$4 sm:$0xff]  }
 0x4e6   :  { %v6330_v16 = vadd.f32 %v2813_v25, %v1201_v30  ;;  %v2815_v17 = vpop.f32.mrb[18].mxu1  ;;  %v2734_v22 = vpop.f32.mrb[11].mxu0  ;;  %v2822_v24 = vpack.c.bf16 %v6327_v6, %v6327_v6  ;;  %v6869_v1 = vld [vmem:[#allocation11 + $0x720] ss:$16 sps:$4 sm:$0xff]   ;;  %v6872_v30 = vld [vmem:[#allocation11 + $0x728] ss:$16 sps:$4 sm:$0xff]  }
 0x4e7   :  { %v2823_v18 = vpack.c.bf16 %v6328_v14, %v6328_v14  ;;  %v6253_v19 = vpack.c.bf16 %v6328_v14, %v6327_v6  ;;  %v2816_v20 = vpop.f32.mrb[19].mxu1  ;;  %4525 = vmatpush1.bf16.msra.mxu0 %v6809_v41  ;;  %4689 = vmatpush1.bf16.msra.mxu1 %v6812_v5  ;;  %v6877_v4 = vld [vmem:[#allocation11 + $0x744] ss:$16 sps:$4 sm:$0xff]   ;;  %v6880_v41 = vld [vmem:[#allocation11 + $0x74c] ss:$16 sps:$4 sm:$0xff]  }
 0x4e8   :  { %v6254_v27 = vpack.c.bf16 %v6330_v16, %v7624_v12  ;;  %4535 = vmatprep.subr.bf16.mxu0 %v6817_v10  ;;  %4699 = vmatprep.subr.bf16.mxu1 %v6820_v11  ;;  %v2825_v29 = vpack.c.bf16 %v6330_v16, %v6330_v16  ;;  %v6875_v5 = vld [vmem:[#allocation11 + $0x740] ss:$16 sps:$4 sm:$0xff]   ;;  %v6878_v6 = vld [vmem:[#allocation11 + $0x748] ss:$16 sps:$4 sm:$0xff]   ;;  %v6883_v7 = vld [vmem:[#allocation11 + $0x764] ss:$16 sps:$4 sm:$0xff]  }
 0x4e9   :  { %2852 = vst [vmem:[#allocation17 + $0x10] sm:$0xff] %v6253_v19  ;;  %4526 = vmatprep.mubr.bf16.mxu0 %v2823_v18  ;;  %4690 = vmatprep.mubr.bf16.mxu1 %v2823_v18  ;;  %v6886_v9 = vld [vmem:[#allocation11 + $0x76c] ss:$16 sps:$4 sm:$0xff]   ;;  %v6881_v10 = vld [vmem:[#allocation11 + $0x760] ss:$16 sps:$4 sm:$0xff]  }
 0x4ea   :  { %2853 = vst [vmem:[#allocation17 + $0x18] sm:$0xff] %v6254_v27  ;;  %4527 = vmatmul.mubr.bf16.vlgmr.msra.gmra.mrb[12].mxu0 %v2822_v24  ;;  %4691 = vmatmul.mubr.bf16.vlgmr.msra.gmra.mrb[20].mxu1 %v2822_v24  ;;  %v6884_v11 = vld [vmem:[#allocation11 + $0x768] ss:$16 sps:$4 sm:$0xff]   ;;  %v6889_v14 = vld [vmem:[#allocation11 + $0x784] ss:$16 sps:$4 sm:$0xff]  }
 0x4eb   :  { %4536 = vmatpush1.bf16.msra.mxu0 %v6815_v21  ;;  %4700 = vmatpush1.bf16.msra.mxu1 %v6818_v23  ;;  %v6892_v25 = vld [vmem:[#allocation11 + $0x78c] ss:$16 sps:$4 sm:$0xff]   ;;  %v6887_v15 = vld [vmem:[#allocation11 + $0x780] ss:$16 sps:$4 sm:$0xff]   ;;  %v6890_v16 = vld [vmem:[#allocation11 + $0x788] ss:$16 sps:$4 sm:$0xff]  }
 0x4ec   :  { %4567 = vmatprep.mubr.bf16.mxu0 %v2825_v29  ;;  %4731 = vmatprep.mubr.bf16.mxu1 %v2825_v29  ;;  %v6895_v17 = vld [vmem:[#allocation11 + $0x7a4] ss:$16 sps:$4 sm:$0xff]   ;;  %v6898_v22 = vld [vmem:[#allocation11 + $0x7ac] ss:$16 sps:$4 sm:$0xff]   ;;  %v6893_v18 = vld [vmem:[#allocation11 + $0x7a0] ss:$16 sps:$4 sm:$0xff]  }
 0x4ed   :  { %4537 = vmatprep.subr.bf16.mxu0 %v6823_v28  ;;  %4701 = vmatprep.subr.bf16.mxu1 %v6826_v26  ;;  %v6896_v19 = vld [vmem:[#allocation11 + $0x7a8] ss:$16 sps:$4 sm:$0xff]   ;;  %v6901_v20 = vld [vmem:[#allocation11 + $0x7c4] ss:$16 sps:$4 sm:$0xff]   ;;  %v6904_v21 = vld [vmem:[#allocation11 + $0x7cc] ss:$16 sps:$4 sm:$0xff]  }
 0x4ee   :  { %v6899_v23 = vld [vmem:[#allocation11 + $0x7c0] ss:$16 sps:$4 sm:$0xff]   ;;  %v6902_v24 = vld [vmem:[#allocation11 + $0x7c8] ss:$16 sps:$4 sm:$0xff]   ;;  %v6907_v27 = vld [vmem:[#allocation11 + $0x7e4] ss:$16 sps:$4 sm:$0xff]  }
 0x4ef   :  { %4538 = vmatpush1.bf16.msra.mxu0 %v6821_v52  ;;  %4702 = vmatpush1.bf16.msra.mxu1 %v6824_v31  ;;  %v6910_v28 = vld [vmem:[#allocation11 + $0x7ec] ss:$16 sps:$4 sm:$0xff]   ;;  %v6905_v26 = vld [vmem:[#allocation11 + $0x7e0] ss:$16 sps:$4 sm:$0xff]   ;;  %v6908_v29 = vld [vmem:[#allocation11 + $0x7e8] ss:$16 sps:$4 sm:$0xff]  }
 0x4f0   :  { %4539 = vmatprep.subr.bf16.mxu0 %v6829_v32  ;;  %4703 = vmatprep.subr.bf16.mxu1 %v6832_v34  ;;  %v6913_v52 = vld [vmem:[#allocation14 + $0x4] ss:$8 sps:$4 sm:$0xff]   ;;  %v6911_v31 = vld [vmem:[#allocation14] ss:$8 sps:$4 sm:$0xff]   ;;  %v2824_v32 = vpack.c.bf16 %v7624_v12, %v7624_v12  ;;  %v6916_v34 = vld [vmem:[#allocation14 + $0x14] ss:$8 sps:$4 sm:$0xff]  }
 0x4f1   :  { %v6928_v12 = vld [vmem:[#allocation14 + $0x54] ss:$8 sps:$4 sm:$0xff]  }
 0x4f3   :  { %4540 = vmatpush1.bf16.msra.mxu0 %v6827_v35  ;;  %4704 = vmatpush1.bf16.msra.mxu1 %v6830_v33  ;;  %v6914_v35 = vld [vmem:[#allocation14 + $0x10] ss:$8 sps:$4 sm:$0xff]   ;;  %v6919_v33 = vld [vmem:[#allocation14 + $0x24] ss:$8 sps:$4 sm:$0xff]  }
 0x4f4   :  { %4541 = vmatprep.subr.bf16.mxu0 %v6835_v36  ;;  %4705 = vmatprep.subr.bf16.mxu1 %v6838_v37  ;;  %v6917_v36 = vld [vmem:[#allocation14 + $0x20] ss:$8 sps:$4 sm:$0xff]   ;;  %v6922_v37 = vld [vmem:[#allocation14 + $0x34] ss:$8 sps:$4 sm:$0xff]  }
 0x4f7   :  { %4542 = vmatpush1.bf16.msra.mxu0 %v6833_v2  ;;  %4706 = vmatpush1.bf16.msra.mxu1 %v6836_v38  ;;  %v6920_v2 = vld [vmem:[#allocation14 + $0x30] ss:$8 sps:$4 sm:$0xff]   ;;  %v6925_v38 = vld [vmem:[#allocation14 + $0x44] ss:$8 sps:$4 sm:$0xff]  }
 0x4f8   :  { %4543 = vmatprep.subr.bf16.mxu0 %v6841_v39  ;;  %4707 = vmatprep.subr.bf16.mxu1 %v6844_v40  ;;  %v6923_v39 = vld [vmem:[#allocation14 + $0x40] ss:$8 sps:$4 sm:$0xff]   ;;  %v6926_v40 = vld [vmem:[#allocation14 + $0x50] ss:$8 sps:$4 sm:$0xff]  }
 0x4fb   :  { %4544 = vmatpush1.bf16.msra.mxu0 %v6839_v43  ;;  %4708 = vmatpush1.bf16.msra.mxu1 %v6842_v45  ;;  %v6931_v43 = vld [vmem:[#allocation14 + $0x64] ss:$8 sps:$4 sm:$0xff]   ;;  %v6929_v45 = vld [vmem:[#allocation14 + $0x60] ss:$8 sps:$4 sm:$0xff]  }
 0x4fc   :  { %4545 = vmatprep.subr.bf16.mxu0 %v6847_v46  ;;  %4709 = vmatprep.subr.bf16.mxu1 %v6850_v47  ;;  %v6934_v46 = vld [vmem:[#allocation14 + $0x74] ss:$8 sps:$4 sm:$0xff]   ;;  %v6932_v47 = vld [vmem:[#allocation14 + $0x70] ss:$8 sps:$4 sm:$0xff]  }
 0x4ff   :  { %4546 = vmatpush1.bf16.msra.mxu0 %v6845_v48  ;;  %4710 = vmatpush1.bf16.msra.mxu1 %v6848_v49  ;;  %v6937_v48 = vld [vmem:[#allocation14 + $0x84] ss:$8 sps:$4 sm:$0xff]   ;;  %v6935_v49 = vld [vmem:[#allocation14 + $0x80] ss:$8 sps:$4 sm:$0xff]  }
 0x500   :  { %4547 = vmatprep.subr.bf16.mxu0 %v6853_v8  ;;  %4711 = vmatprep.subr.bf16.mxu1 %v6856_v50  ;;  %v6940_v8 = vld [vmem:[#allocation14 + $0x94] ss:$8 sps:$4 sm:$0xff]   ;;  %v6938_v50 = vld [vmem:[#allocation14 + $0x90] ss:$8 sps:$4 sm:$0xff]  }
 0x503   :  { %4548 = vmatpush1.bf16.msra.mxu0 %v6851_v51  ;;  %4712 = vmatpush1.bf16.msra.mxu1 %v6854_v53  ;;  %v6943_v51 = vld [vmem:[#allocation14 + $0xa4] ss:$8 sps:$4 sm:$0xff]   ;;  %v6941_v53 = vld [vmem:[#allocation14 + $0xa0] ss:$8 sps:$4 sm:$0xff]  }
 0x504   :  { %4549 = vmatprep.subr.bf16.mxu0 %v6859_v54  ;;  %4713 = vmatprep.subr.bf16.mxu1 %v6862_v55  ;;  %v6946_v54 = vld [vmem:[#allocation14 + $0xb4] ss:$8 sps:$4 sm:$0xff]   ;;  %v6944_v55 = vld [vmem:[#allocation14 + $0xb0] ss:$8 sps:$4 sm:$0xff]  }
 0x507   :  { %4550 = vmatpush1.bf16.msra.mxu0 %v6857_v56  ;;  %4714 = vmatpush1.bf16.msra.mxu1 %v6860_v57  ;;  %v6949_v56 = vld [vmem:[#allocation14 + $0xc4] ss:$8 sps:$4 sm:$0xff]   ;;  %v6947_v57 = vld [vmem:[#allocation14 + $0xc0] ss:$8 sps:$4 sm:$0xff]  }
 0x508   :  { %4551 = vmatprep.subr.bf16.mxu0 %v6865_v58  ;;  %4715 = vmatprep.subr.bf16.mxu1 %v6868_v59  ;;  %v6952_v58 = vld [vmem:[#allocation14 + $0xd4] ss:$8 sps:$4 sm:$0xff]   ;;  %v6950_v59 = vld [vmem:[#allocation14 + $0xd0] ss:$8 sps:$4 sm:$0xff]  }
 0x50b   :  { %4552 = vmatpush1.bf16.msra.mxu0 %v6863_v60  ;;  %4716 = vmatpush1.bf16.msra.mxu1 %v6866_v61  ;;  %v6955_v60 = vld [vmem:[#allocation14 + $0xe4] ss:$8 sps:$4 sm:$0xff]   ;;  %v6953_v61 = vld [vmem:[#allocation14 + $0xe0] ss:$8 sps:$4 sm:$0xff]  }
 0x50c   :  { %4553 = vmatprep.subr.bf16.mxu0 %v6871_v62  ;;  %4717 = vmatprep.subr.bf16.mxu1 %v6874_v63  ;;  %v6958_v62 = vld [vmem:[#allocation14 + $0xf4] ss:$8 sps:$4 sm:$0xff]   ;;  %v6956_v63 = vld [vmem:[#allocation14 + $0xf0] ss:$8 sps:$4 sm:$0xff]  }
 0x50f   :  { %4554 = vmatpush1.bf16.msra.mxu0 %v6869_v1  ;;  %4718 = vmatpush1.bf16.msra.mxu1 %v6872_v30  ;;  %v6961_v1 = vld [vmem:[#allocation14 + $0x104] ss:$8 sps:$4 sm:$0xff]   ;;  %v7007_v30 = vld [vmem:[%s7770_s13 + $0x40] sm:$0xff]  }
 0x510   :  { %4555 = vmatprep.subr.bf16.mxu0 %v6877_v4  ;;  %4719 = vmatprep.subr.bf16.mxu1 %v6880_v41  ;;  %v7008_v4 = vld [vmem:[%s7770_s13] sm:$0xff]   ;;  %v7009_v41 = vld [vmem:[%s7770_s13 + $0x48] sm:$0xff]  }
 0x513   :  { %4556 = vmatpush1.bf16.msra.mxu0 %v6875_v5  ;;  %4720 = vmatpush1.bf16.msra.mxu1 %v6878_v6  ;;  %v7010_v5 = vld [vmem:[%s7770_s13 + $0x8] sm:$0xff]   ;;  %v7011_v6 = vld [vmem:[%s7770_s13 + $0x50] sm:$0xff]  }
 0x514   :  { %4557 = vmatprep.subr.bf16.mxu0 %v6883_v7  ;;  %4721 = vmatprep.subr.bf16.mxu1 %v6886_v9  ;;  %v7012_v7 = vld [vmem:[%s7770_s13 + $0x10] sm:$0xff]   ;;  %v7013_v9 = vld [vmem:[%s7770_s13 + $0x58] sm:$0xff]  }
 0x517   :  { %4558 = vmatpush1.bf16.msra.mxu0 %v6881_v10  ;;  %4722 = vmatpush1.bf16.msra.mxu1 %v6884_v11  ;;  %v7014_v10 = vld [vmem:[%s7770_s13 + $0x18] sm:$0xff]   ;;  %v7015_v11 = vld [vmem:[%s7770_s13 + $0x60] sm:$0xff]  }
 0x518   :  { %4559 = vmatprep.subr.bf16.mxu0 %v6889_v14  ;;  %4723 = vmatprep.subr.bf16.mxu1 %v6892_v25  ;;  %v7016_v14 = vld [vmem:[%s7770_s13 + $0x20] sm:$0xff]   ;;  %v7017_v25 = vld [vmem:[%s7770_s13 + $0x68] sm:$0xff]  }
 0x51b   :  { %4560 = vmatpush1.bf16.msra.mxu0 %v6887_v15  ;;  %4724 = vmatpush1.bf16.msra.mxu1 %v6890_v16  ;;  %v7018_v15 = vld [vmem:[%s7770_s13 + $0x28] sm:$0xff]   ;;  %v7665_v16 = vld [vmem:[#allocation13] sm:$0xf] }
 0x51c   :  { %4561 = vmatprep.subr.bf16.mxu0 %v6895_v17  ;;  %4725 = vmatprep.subr.bf16.mxu1 %v6898_v22  ;;  %v3115_v17 = vrot.slane %v7665_v16, %v7545_v42  ;;  %v3119_v22 = vrot.slane %v7665_v16, %v7548_v44 }
 0x51f   :  { %4562 = vmatpush1.bf16.msra.mxu0 %v6893_v18  ;;  %4726 = vmatpush1.bf16.msra.mxu1 %v6896_v19  ;;  %v3127_v18 = vrot.slane %v7665_v16, %v7558_v3 }
 0x520   :  { %4563 = vmatprep.subr.bf16.mxu0 %v6901_v20  ;;  %4727 = vmatprep.subr.bf16.mxu1 %v6904_v21 }
 0x523   :  { %4564 = vmatpush1.bf16.msra.mxu0 %v6899_v23  ;;  %4728 = vmatpush1.bf16.msra.mxu1 %v6902_v24 }
 0x524   :  { %4565 = vmatprep.subr.bf16.mxu0 %v6907_v27  ;;  %4729 = vmatprep.subr.bf16.mxu1 %v6910_v28 }
 0x527   :  { %4566 = vmatpush1.bf16.msra.mxu0 %v6905_v26  ;;  %4730 = vmatpush1.bf16.msra.mxu1 %v6908_v29 }
 0x528   :  { %5144 = vmatprep.subr.bf16.mxu0 %v6913_v52  ;;  %6260 = vmatprep.subr.bf16.mxu1 %v7007_v30  ;;  %v3123_v30 = vrot.slane %v7665_v16, %v7581_v13  ;;  %v7020_v13 = vld [vmem:[%s7770_s13 + $0x30] sm:$0xff]  }
 0x52a   :  { %4568 = vmatmul.mubr.bf16.vlgmr.msra.gmra.mrb[12].mxu0 %v2824_v32  ;;  %4732 = vmatmul.mubr.bf16.vlgmr.msra.gmra.mrb[20].mxu1 %v2824_v32 }
 0x52b   :  { %5145 = vmatpush1.bf16.msra.mxu0 %v6911_v31  ;;  %6261 = vmatpush3.bf16.msra.mxu1 %v7008_v4  ;;  %v7003_v4 = vld [vmem:[#allocation14 + $0x1e4] ss:$8 sps:$4 sm:$0xff]  }
 0x52c   :  { %5146 = vmatprep.subr.bf16.mxu0 %v6916_v34  ;;  %6262 = vmatprep.subr.bf16.mxu1 %v7009_v41  ;;  %v7001_v41 = vld [vmem:[#allocation14 + $0x1e0] ss:$8 sps:$4 sm:$0xff]  }
 0x52f   :  { %5147 = vmatpush1.bf16.msra.mxu0 %v6914_v35  ;;  %6263 = vmatpush3.bf16.msra.mxu1 %v7010_v5 }
 0x530   :  { %5148 = vmatprep.subr.bf16.mxu0 %v6919_v33  ;;  %6264 = vmatprep.subr.bf16.mxu1 %v7011_v6  ;;  %v7006_v6 = vld [vmem:[#allocation14 + $0x1f4] ss:$8 sps:$4 sm:$0xff]  }
 0x533   :  { %5149 = vmatpush1.bf16.msra.mxu0 %v6917_v36  ;;  %6265 = vmatpush3.bf16.msra.mxu1 %v7012_v7  ;;  %v6959_v36 = vld [vmem:[#allocation14 + $0x100] ss:$8 sps:$4 sm:$0xff]   ;;  %v7004_v7 = vld [vmem:[#allocation14 + $0x1f0] ss:$8 sps:$4 sm:$0xff]  }
 0x534   :  { %5150 = vmatprep.subr.bf16.mxu0 %v6922_v37  ;;  %6266 = vmatprep.subr.bf16.mxu1 %v7013_v9 }
 0x537   :  { %5151 = vmatpush1.bf16.msra.mxu0 %v6920_v2  ;;  %6267 = vmatpush3.bf16.msra.mxu1 %v7014_v10  ;;  %v6964_v2 = vld [vmem:[#allocation14 + $0x114] ss:$8 sps:$4 sm:$0xff]  }
 0x538   :  { %5152 = vmatprep.subr.bf16.mxu0 %v6925_v38  ;;  %6268 = vmatprep.subr.bf16.mxu1 %v7015_v11  ;;  %v6962_v38 = vld [vmem:[#allocation14 + $0x110] ss:$8 sps:$4 sm:$0xff]  }
 0x539   :  { %v7019_v11 = vld [vmem:[%s7770_s13 + $0x70] sm:$0xff]  }
 0x53b   :  { %5153 = vmatpush1.bf16.msra.mxu0 %v6923_v39  ;;  %6269 = vmatpush3.bf16.msra.mxu1 %v7016_v14  ;;  %v6967_v39 = vld [vmem:[#allocation14 + $0x124] ss:$8 sps:$4 sm:$0xff]   ;;  %v7021_v14 = vld [vmem:[%s7770_s13 + $0x78] sm:$0xff]  }
 0x53c   :  { %5154 = vmatprep.subr.bf16.mxu0 %v6928_v12  ;;  %6270 = vmatprep.subr.bf16.mxu1 %v7017_v25  ;;  %v6965_v12 = vld [vmem:[#allocation14 + $0x120] ss:$8 sps:$4 sm:$0xff]   ;;  %v7022_v25 = vld [vmem:[%s7770_s13 + $0x38] sm:$0xff]  }
 0x53f   :  { %5155 = vmatpush1.bf16.msra.mxu0 %v6926_v40  ;;  %6271 = vmatpush3.bf16.msra.mxu1 %v7018_v15  ;;  %v6970_v40 = vld [vmem:[#allocation14 + $0x134] ss:$8 sps:$4 sm:$0xff]   ;;  %v4812_v15 = vld [vmem:[#allocation16] sm:$0x3] }
 0x540   :  { %5156 = vmatprep.subr.bf16.mxu0 %v6931_v43  ;;  %v6968_v43 = vld [vmem:[#allocation14 + $0x130] ss:$8 sps:$4 sm:$0xff]   ;;  %6272 = vmatprep.subr.bf16.mxu1 %v7019_v11  ;;  %v4817_v16 = vrot.slane %v4812_v15, %v7545_v42  ;;  %v7024_v42 = vld [vmem:[%s7772_s15 + $0x8] sm:$0xff]  }
 0x543   :  { %5157 = vmatpush1.bf16.msra.mxu0 %v6929_v45  ;;  %v6973_v45 = vld [vmem:[#allocation14 + $0x144] ss:$8 sps:$4 sm:$0xff]   ;;  %6273 = vmatpush3.bf16.msra.mxu1 %v7020_v13 }
 0x544   :  { %5158 = vmatprep.subr.bf16.mxu0 %v6934_v46  ;;  %v6971_v46 = vld [vmem:[#allocation14 + $0x140] ss:$8 sps:$4 sm:$0xff]   ;;  %6274 = vmatprep.subr.bf16.mxu1 %v7021_v14 }
 0x547   :  { %5159 = vmatpush1.bf16.msra.mxu0 %v6932_v47  ;;  %v6976_v47 = vld [vmem:[#allocation14 + $0x154] ss:$8 sps:$4 sm:$0xff]   ;;  %6275 = vmatpush3.bf16.msra.mxu1 %v7022_v25 }
 0x548   :  { %5160 = vmatprep.subr.bf16.mxu0 %v6937_v48  ;;  %v6974_v48 = vld [vmem:[#allocation14 + $0x150] ss:$8 sps:$4 sm:$0xff]   ;;  %6303 = vmatprep.subr.bf16.mxu1 %v7308_v0 }
 0x54b   :  { %5161 = vmatpush1.bf16.msra.mxu0 %v6935_v49  ;;  %v6979_v49 = vld [vmem:[#allocation14 + $0x164] ss:$8 sps:$4 sm:$0xff]  }
 0x54c   :  { %5162 = vmatprep.subr.bf16.mxu0 %v6940_v8  ;;  %v6977_v8 = vld [vmem:[#allocation14 + $0x160] ss:$8 sps:$4 sm:$0xff]  }
 0x54f   :  { %5163 = vmatpush1.bf16.msra.mxu0 %v6938_v50  ;;  %v6982_v50 = vld [vmem:[#allocation14 + $0x174] ss:$8 sps:$4 sm:$0xff]  }
 0x550   :  { %5164 = vmatprep.subr.bf16.mxu0 %v6943_v51  ;;  %v6980_v51 = vld [vmem:[#allocation14 + $0x170] ss:$8 sps:$4 sm:$0xff]  }
 0x553   :  { %5165 = vmatpush1.bf16.msra.mxu0 %v6941_v53  ;;  %v6985_v53 = vld [vmem:[#allocation14 + $0x184] ss:$8 sps:$4 sm:$0xff]  }
 0x554   :  { %5166 = vmatprep.subr.bf16.mxu0 %v6946_v54  ;;  %v6983_v54 = vld [vmem:[#allocation14 + $0x180] ss:$8 sps:$4 sm:$0xff]  }
 0x557   :  { %5167 = vmatpush1.bf16.msra.mxu0 %v6944_v55  ;;  %v6988_v55 = vld [vmem:[#allocation14 + $0x194] ss:$8 sps:$4 sm:$0xff]  }
 0x558   :  { %5168 = vmatprep.subr.bf16.mxu0 %v6949_v56  ;;  %v6986_v56 = vld [vmem:[#allocation14 + $0x190] ss:$8 sps:$4 sm:$0xff]  }
 0x55b   :  { %5169 = vmatpush1.bf16.msra.mxu0 %v6947_v57  ;;  %v6991_v57 = vld [vmem:[#allocation14 + $0x1a4] ss:$8 sps:$4 sm:$0xff]  }
 0x55c   :  { %5170 = vmatprep.subr.bf16.mxu0 %v6952_v58  ;;  %v6989_v58 = vld [vmem:[#allocation14 + $0x1a0] ss:$8 sps:$4 sm:$0xff]  }
 0x55f   :  { %5171 = vmatpush1.bf16.msra.mxu0 %v6950_v59  ;;  %v6994_v59 = vld [vmem:[#allocation14 + $0x1b4] ss:$8 sps:$4 sm:$0xff]  }
 0x560   :  { %5172 = vmatprep.subr.bf16.mxu0 %v6955_v60  ;;  %v6992_v60 = vld [vmem:[#allocation14 + $0x1b0] ss:$8 sps:$4 sm:$0xff]  }
 0x563   :  { %5173 = vmatpush1.bf16.msra.mxu0 %v6953_v61  ;;  %v6997_v61 = vld [vmem:[#allocation14 + $0x1c4] ss:$8 sps:$4 sm:$0xff]  }
 0x564   :  { %5174 = vmatprep.subr.bf16.mxu0 %v6958_v62  ;;  %v6995_v62 = vld [vmem:[#allocation14 + $0x1c0] ss:$8 sps:$4 sm:$0xff]  }
 0x567   :  { %5175 = vmatpush1.bf16.msra.mxu0 %v6956_v63  ;;  %v7000_v63 = vld [vmem:[#allocation14 + $0x1d4] ss:$8 sps:$4 sm:$0xff]  }
 0x568   :  { %5185 = vmatprep.subr.bf16.mxu0 %v6961_v1  ;;  %v6998_v1 = vld [vmem:[#allocation14 + $0x1d0] ss:$8 sps:$4 sm:$0xff]  }
 0x5fd   :  { %v4569_v19 = vpop.f32.mrb[12].mxu0  ;;  %v7673_v20 = vpop.f32.mrb[20].mxu1 }
 0x5fe   :  { %v6331_v21 = vadd.f32 %v4569_v19, %v3115_v17  ;;  %v4571_v23 = vpop.f32.mrb[13].mxu0  ;;  %v4735_v24 = vpop.f32.mrb[21].mxu1  ;;  %v6333_v5 = vadd.f32 %v7673_v20, %v3123_v30  ;;  %v4821_v17 = vrot.slane %v4812_v15, %v7548_v44  ;;  %v7025_v44 = vld [vmem:[%s7772_s15 + $0x10] sm:$0xff]  }
 0x5ff   :  { %v6332_v27 = vadd.f32 %v4571_v23, %v3119_v22  ;;  %v6334_v28 = vadd.f32 %v4735_v24, %v3127_v18  ;;  %v4573_v26 = vpop.f32.mrb[14].mxu0  ;;  %v4737_v29 = vpop.f32.mrb[22].mxu1 }
 0x600   :  { %v4740_v52 = vmax.f32 %v6331_v21, 0.0  ;;  %v4574_v31 = vpop.f32.mrb[15].mxu0  ;;  %v4738_v32 = vpop.f32.mrb[23].mxu1  ;;  %v4742_v9 = vmax.f32 %v6333_v5, 0.0  ;;  %v7023_v26 = vld [vmem:[%s7772_s15] sm:$0xff]  }
 0x601   :  { %v4741_v34 = vmax.f32 %v6332_v27, 0.0  ;;  %v4743_v35 = vmax.f32 %v6334_v28, 0.0  ;;  %v7027_v31 = vld [vmem:[%s7772_s15 + $0x20] sm:$0xff]   ;;  %v7028_v32 = vld [vmem:[%s7772_s15 + $0x28] sm:$0xff]  }
 0x602   :  { %v4744_v37 = vpack.c.bf16 %v4740_v52, %v4740_v52  ;;  %v4746_v10 = vpack.c.bf16 %v4742_v9, %v4742_v9  ;;  %v7026_v52 = vld [vmem:[%s7772_s15 + $0x18] sm:$0xff]  }
 0x603   :  { %v4745_v33 = vpack.c.bf16 %v4741_v34, %v4741_v34  ;;  %v4747_v3 = vpack.c.bf16 %v4743_v35, %v4743_v35  ;;  %v7029_v34 = vld [vmem:[%s7772_s15 + $0x30] sm:$0xff]   ;;  %v7030_v35 = vld [vmem:[%s7772_s15 + $0x38] sm:$0xff]  }
 0x605   :  { %5176 = vmatprep.mubr.bf16.mxu0 %v4745_v33 }
 0x606   :  { %5177 = vmatmul.mubr.bf16.vlgmr.msra.gmra.mrb[16].mxu0 %v4744_v37 }
 0x607   :  { %5186 = vmatpush1.bf16.msra.mxu0 %v6959_v36  ;;  %5217 = vmatprep.mubr.bf16.mxu0 %v4747_v3  ;;  %v6224_v36 = vld [vmem:[%s7771_s14] ss:$0 sm:$0xff] }
 0x608   :  { %5187 = vmatprep.subr.bf16.mxu0 %v6964_v2 }
 0x60b   :  { %5188 = vmatpush1.bf16.msra.mxu0 %v6962_v38 }
 0x60c   :  { %5189 = vmatprep.subr.bf16.mxu0 %v6967_v39 }
 0x60f   :  { %5190 = vmatpush1.bf16.msra.mxu0 %v6965_v12 }
 0x610   :  { %5191 = vmatprep.subr.bf16.mxu0 %v6970_v40 }
 0x613   :  { %5192 = vmatpush1.bf16.msra.mxu0 %v6968_v43 }
 0x614   :  { %5193 = vmatprep.subr.bf16.mxu0 %v6973_v45 }
 0x617   :  { %5194 = vmatpush1.bf16.msra.mxu0 %v6971_v46 }
 0x618   :  { %5195 = vmatprep.subr.bf16.mxu0 %v6976_v47 }
 0x61b   :  { %5196 = vmatpush1.bf16.msra.mxu0 %v6974_v48 }
 0x61c   :  { %5197 = vmatprep.subr.bf16.mxu0 %v6979_v49 }
 0x61f   :  { %5198 = vmatpush1.bf16.msra.mxu0 %v6977_v8 }
 0x620   :  { %5199 = vmatprep.subr.bf16.mxu0 %v6982_v50 }
 0x623   :  { %5200 = vmatpush1.bf16.msra.mxu0 %v6980_v51 }
 0x624   :  { %5201 = vmatprep.subr.bf16.mxu0 %v6985_v53 }
 0x627   :  { %5202 = vmatpush1.bf16.msra.mxu0 %v6983_v54 }
 0x628   :  { %5203 = vmatprep.subr.bf16.mxu0 %v6988_v55 }
 0x62b   :  { %5204 = vmatpush1.bf16.msra.mxu0 %v6986_v56 }
 0x62c   :  { %5205 = vmatprep.subr.bf16.mxu0 %v6991_v57 }
 0x62f   :  { %5206 = vmatpush1.bf16.msra.mxu0 %v6989_v58 }
 0x630   :  { %5207 = vmatprep.subr.bf16.mxu0 %v6994_v59 }
 0x633   :  { %5208 = vmatpush1.bf16.msra.mxu0 %v6992_v60 }
 0x634   :  { %5209 = vmatprep.subr.bf16.mxu0 %v6997_v61 }
 0x637   :  { %5210 = vmatpush1.bf16.msra.mxu0 %v6995_v62 }
 0x638   :  { %5211 = vmatprep.subr.bf16.mxu0 %v7000_v63 }
 0x63b   :  { %5212 = vmatpush1.bf16.msra.mxu0 %v6998_v1 }
 0x63c   :  { %5213 = vmatprep.subr.bf16.mxu0 %v7003_v4 }
 0x63f   :  { %5214 = vmatpush1.bf16.msra.mxu0 %v7001_v41 }
 0x640   :  { %5215 = vmatprep.subr.bf16.mxu0 %v7006_v6 }
 0x643   :  { %5216 = vmatpush1.bf16.msra.mxu0 %v7004_v7 }
 0x646   :  { %5218 = vmatmul.mubr.bf16.vlgmr.msra.gmra.mrb[16].mxu0 %v4746_v10 }
 0x719   :  { %v5219_v22 = vpop.f32.mrb[16].mxu0 }
 0x71a   :  { %v6335_v18 = vadd.f32 %v5219_v22, %v4817_v16  ;;  %v5221_v19 = vpop.f32.mrb[17].mxu0 }
 0x71b   :  { %v6336_v20 = vadd.f32 %v5221_v19, %v4821_v17  ;;  %v5223_v21 = vpop.f32.mrb[18].mxu0 }
 0x71c   :  { %v5226_v23 = vmax.f32 %v6335_v18, 0.0  ;;  %v5224_v24 = vpop.f32.mrb[19].mxu0 }
 0x71d   :  { %v5227_v27 = vmax.f32 %v6336_v20, 0.0 }
 0x71e   :  { %v5228_v29 = vpack.c.bf16 %v5226_v23, %v5226_v23 }
 0x71f   :  { %v5229_v28 = vpack.c.bf16 %v5227_v27, %v5227_v27 }
 0x721   :  { %5397 = vmatprep.mubr.bf16.mxu1 %v5229_v28 }
 0x722   :  { %5398 = vmatmul.mubr.bf16.vlgmr.msra.gmra.mrb[24].mxu1 %v5228_v29 }
 0x723   :  { %6304 = vmatpush3.bf16.msra.mxu1 %v7023_v26  ;;  %6319 = vmatprep.mubr.msk.bf16.mxu1 %vm7309_vm0, %v7308_v0 }
 0x724   :  { %6305 = vmatprep.subr.bf16.mxu1 %v7308_v0 }
 0x727   :  { %6306 = vmatpush3.bf16.msra.mxu1 %v7024_v42 }
 0x728   :  { %6307 = vmatprep.subr.bf16.mxu1 %v7308_v0 }
 0x72b   :  { %6308 = vmatpush3.bf16.msra.mxu1 %v7025_v44 }
 0x72c   :  { %6309 = vmatprep.subr.bf16.mxu1 %v7308_v0 }
 0x72f   :  { %6310 = vmatpush3.bf16.msra.mxu1 %v7026_v52 }
 0x730   :  { %6311 = vmatprep.subr.bf16.mxu1 %v7308_v0 }
 0x733   :  { %6312 = vmatpush3.bf16.msra.mxu1 %v7027_v31 }
 0x734   :  { %6313 = vmatprep.subr.bf16.mxu1 %v7308_v0 }
 0x737   :  { %6314 = vmatpush3.bf16.msra.mxu1 %v7028_v32 }
 0x738   :  { %6315 = vmatprep.subr.bf16.mxu1 %v7308_v0 }
 0x73b   :  { %6316 = vmatpush3.bf16.msra.mxu1 %v7029_v34 }
 0x73c   :  { %6317 = vmatprep.subr.bf16.mxu1 %v7308_v0 }
 0x73f   :  { %6318 = vmatpush3.bf16.msra.mxu1 %v7030_v35 }
 0x7f5   :  { %v6276_v33 = vpop.f32.mrb[24].mxu1 }
 0x7f6   :  { %v6277_v37 = vpop.f32.mrb[25].mxu1 }
 0x7f7   :  { %v6278_v2 = vadd.f32 %v6277_v37, %v6276_v33  ;;  %v6279_v3 = vpop.f32.mrb[26].mxu1 }
 0x7f8   :  { %v6280_v38 = vpop.f32.mrb[27].mxu1 }
 0x7f9   :  { %v5400_v39 = vadd.f32 %v6278_v2, %v6224_v36 }
 0x7fb   :  { %v5405_v12 = vmax.f32 %v5400_v39, 0.0 }
 0x7fd   :  { %v5406_v40 = vpack.c.bf16 %v5405_v12, %v5405_v12 }
 0x7ff   :  { %6320 = vmatmul.mubr.bf16.vlgmr.msra.gmra.mrb[28].mxu1 %v5406_v40 }
 0x800   :  { %7244 = shalt.err (!%p7241_p6)
}
 0x801   :  { %s7245_s7 = scalar_lea.hbm %s7774_s17, 512 }
 0x802   :  { %p7246_p7 = scmp.ne.s32.totalorder %s7774_s17, %s7245_s7  ;;  %p7249_p8 = scmp.lt.u32.totalorder %s7245_s7, %s7774_s17 }
 0x804   :  { %p7251_p9 = pnand %p7249_p8, %p7246_p7 }
 0x806   :  { %7254 = shalt.err (!%p7251_p9)
}
 0x807   :  { %5534 = dma.vmem_to_hbm [thread:$0]  %s5532_s8, 512, %s7774_s17, [#allocation4]   ;;  %v6241_v0 = vld [vmem:[%s7773_s16] ss:$0 sm:$0xff] }
 0x808   :  { %s7312_s5 = smov [#allocation18]  }
 0x809   :  { %s5541_s27 = sshll.u32 %s7312_s5, 4  ;;  %s5542_s27 = int_to_ptr.vmem [resolvable:$true] %s5541_s27 }
 0x80a   :  { %s7255_s17 = scalar_lea.vmem %s5542_s27, 128  ;;  %p7260_p11 = scmp.lt.s32.totalorder %s5542_s27, %s5542_s27 }
 0x80b   :  { %p7256_p10 = scmp.ne.s32.totalorder %s5542_s27, %s7255_s17  ;;  %p7261_p12 = scmp.lt.s32.totalorder %s7255_s17, %s7255_s17 }
 0x80d   :  { %p7262_p13 = por %p7261_p12, %p7260_p11 }
 0x80f   :  { %p7263_p0 = pnand %p7262_p13, %p7256_p10 }
 0x8d2   :  { %v5512_v43 = vpop.f32.mrb[28].mxu1 }
 0x8d3   :  { %v5513_v45 = vadd.f32 %v6241_v0, %v5512_v43  ;;  %v6321_v46 = vpop.f32.mrb[29].mxu1 }
 0x8d4   :  { %v5515_v47 = vpop.f32.mrb[30].mxu1 }
 0x8d5   :  { %v6250_v48 = vmul.f32 -1.442695, %v5513_v45  ;;  %v6322_v49 = vpop.f32.mrb[31].mxu1 }
 0x8d7   :  { %7031 = vpow2.f32 %v6250_v48 }
 0x8e1   :  { %v7032_v8 = vpop.eup %7031 }
 0x8e2   :  { %v5521_v50 = vadd.f32 1.0, %v7032_v8 }
 0x8e4   :  { %7033 = vrcp.f32 %v5521_v50 }
 0x8ee   :  { %v7034_v51 = vpop.eup %7033 }
 0x8ef   :  { %5524 = vst.msk [vmem:[#allocation18] sm:$0xff] %vm217_vm1, %v7034_v51 }
 0x8f0   :  { %7266 = shalt.err (!%p7263_p0)
}
 0x8f1   :  { %s7267_s10 = scalar_lea.hbm %s7775_s18, 128 }
 0x8f2   :  { %p7268_p1 = scmp.ne.s32.totalorder %s7775_s18, %s7267_s10  ;;  %p7271_p2 = scmp.lt.u32.totalorder %s7267_s10, %s7775_s18 }
 0x8f4   :  { %p7273_p3 = pnand %p7271_p2, %p7268_p1 }
 0x8f6   :  { %7276 = shalt.err (!%p7273_p3)
}
 0x8f7   :  { %5544 = dma.vmem_to_hbm [thread:$0]  %s5542_s27, 128, %s7775_s18, [#allocation19]  }
 0x8f8   :  { %7287 = dma.done.wait [#allocation4], 512  }
 0x8f9   :  { %7288 = vsyncadd [#allocation4], 4294966784 }
 0x8fa   :  { %7289 = dma.done.wait [#allocation19], 128  }
 0x8fb   :  { %7290 = vsyncadd [#allocation19], 4294967168 }
 0x8fc   :  { %5551 = vsyncpa [#allocation3], 1 }
 0x8fd   :  { %5552 = vsyncpa [#allocation6], 1 }
 0x8fe   :  { %5553 = vsyncpa [#allocation9], 1 }
 0x8ff   :  { %5554 = vsyncpa [#allocation12], 1 }
 0x900   :  { %5555 = vsyncpa [#allocation15], 1 }
 0x901   :  { %5556 = vsyncpa [#allocation4], 1 }
 0x902   :  { %5557 = vsyncpa [#allocation19], 1 }

</bundles_post_ra>
